<compile_context>
chip_gen: v5e
topology: v5e:2x2
jax: 0.10.0
libtpu: 0.0.40
codegen_flags: <defaults>
</compile_context>

<pallas_src>
import functools

import jax
import jax.numpy as jnp
from jax.experimental import pallas as pl
from jax.experimental.pallas import tpu as pltpu

# Lane-dense padded sizes (every Pallas output's last dim is a multiple of 128).
_OC_PAD = 128        # conv output channels 20 / 50 -> 128
_HID_PAD = 512       # fc hidden 500 -> 512
_CLS_PAD = 128       # classifier logits n_classes -> 128
_VMEM_LIMIT = 32 * 1024 * 1024   # right-sized for v7x (64 MiB physical VMEM)


def _round_up(n, m):
    return -(-n // m) * m


def _pick_batch_tile(batch, target=8):
    """Images per conv grid step; keeps grid >= 2 when batch allows (v7x)."""
    if batch <= 1:
        return 1
    if batch >= 2 * target:
        return target
    return max(1, batch // 2)


# ---------------------------------------------------------------------------
# Kernel 1: conv (matmul over pool-grouped im2col patches) + folded BN + bias
#           + ReLU + fused 2x2/stride-2 max pool.  Bt images per grid step.
# ---------------------------------------------------------------------------
def _conv_bn_relu_pool_kernel(p_ref, w_ref, s_ref, o_ref, y_scr, *, Bt, R, Rp):
    # p_ref: (Bt, 4*Rp, K) bf16 patches, 4 blocks of Rp rows = 2x2 pool offsets.
    # w_ref: (K, 128) bf16 folded conv*BN weight; s_ref: (1, 128) f32 shift.
    for b in range(Bt):
        acc = jnp.dot(p_ref[b], w_ref[...], preferred_element_type=jnp.float32)
        # BN shift + bias + ReLU, cast to bf16 (max/ReLU monotone -> exact).
        y_scr[...] = jnp.maximum(acc + s_ref[...], 0.0).astype(jnp.bfloat16)
        # 2x2 max pool = elementwise max of the 4 pool-offset blocks (all row
        # offsets are multiples of 8 -> aligned loads), ONE dense store/image.
        p00 = y_scr[0 * Rp:0 * Rp + R, :]
        p01 = y_scr[1 * Rp:1 * Rp + R, :]
        p10 = y_scr[2 * Rp:2 * Rp + R, :]
        p11 = y_scr[3 * Rp:3 * Rp + R, :]
        o_ref[b] = jnp.maximum(jnp.maximum(p00, p01),
                               jnp.maximum(p10, p11)).astype(o_ref.dtype)


def conv_bn_relu_pool(patches, w_folded, shift, R, Rp, batch_tile):
    """patches: (B, 4*Rp, K) bf16 pool-grouped im2col; returns (B, R, 128) bf16
    pooled activations, rows ordered (h_pooled * Wp + w_pooled)."""
    B, rows, K = patches.shape
    assert rows == 4 * Rp
    OC = w_folded.shape[1]
    Bt = batch_tile
    Bp = _round_up(B, Bt)
    if Bp != B:
        patches = jnp.pad(patches, ((0, Bp - B), (0, 0), (0, 0)))
    kernel = functools.partial(_conv_bn_relu_pool_kernel, Bt=Bt, R=R, Rp=Rp)
    out = pl.pallas_call(
        kernel,
        out_shape=jax.ShapeDtypeStruct((Bp, R, OC), jnp.bfloat16),
        grid=(Bp // Bt,),
        in_specs=[
            pl.BlockSpec((Bt, rows, K), lambda i: (i, 0, 0)),
            pl.BlockSpec((K, OC), lambda i: (0, 0)),
            pl.BlockSpec((1, OC), lambda i: (0, 0)),
        ],
        out_specs=pl.BlockSpec((Bt, R, OC), lambda i: (i, 0, 0)),
        scratch_shapes=[pltpu.VMEM((4 * Rp, OC), jnp.bfloat16)],
        compiler_params=pltpu.CompilerParams(
            dimension_semantics=("parallel",),
            vmem_limit_bytes=_VMEM_LIMIT,
        ),
    )(patches, w_folded, shift)
    return out[:B]


# ---------------------------------------------------------------------------
# Kernel 2: fused fc (1250->500) + classifier (500->n_classes), tiled over rows.
# ---------------------------------------------------------------------------
def _mlp_head_kernel(x_ref, w1_ref, b1_ref, w2_ref, b2_ref, o_ref, h_scr):
    h = jnp.dot(x_ref[...], w1_ref[...], preferred_element_type=jnp.float32)
    h_scr[...] = (h + b1_ref[...]).astype(jnp.bfloat16)   # fc out staged in VMEM
    o = jnp.dot(h_scr[...], w2_ref[...], preferred_element_type=jnp.float32)
    o_ref[...] = (o + b2_ref[...]).astype(o_ref.dtype)


def mlp_head(x, w1, b1, w2, b2, *, tm=128):
    """x: (B, 3200) bf16 -> (B, 128) f32 padded logits."""
    M, K = x.shape
    N1, N2 = w1.shape[1], w2.shape[1]
    Mp = _round_up(max(M, 8), 8)
    TM = min(tm, _round_up(max(Mp // 2, 8), 8))   # keep grid >= 2 when possible
    Mp = _round_up(Mp, TM)
    if Mp != M:
        x = jnp.pad(x, ((0, Mp - M), (0, 0)))
    out = pl.pallas_call(
        _mlp_head_kernel,
        out_shape=jax.ShapeDtypeStruct((Mp, N2), jnp.float32),
        grid=(Mp // TM,),
        in_specs=[
            pl.BlockSpec((TM, K), lambda i: (i, 0)),
            pl.BlockSpec((K, N1), lambda i: (0, 0)),
            pl.BlockSpec((1, N1), lambda i: (0, 0)),
            pl.BlockSpec((N1, N2), lambda i: (0, 0)),
            pl.BlockSpec((1, N2), lambda i: (0, 0)),
        ],
        out_specs=pl.BlockSpec((TM, N2), lambda i: (i, 0)),
        scratch_shapes=[pltpu.VMEM((TM, N1), jnp.bfloat16)],
        compiler_params=pltpu.CompilerParams(
            dimension_semantics=("parallel",),
            vmem_limit_bytes=_VMEM_LIMIT,
        ),
    )(x, w1, b1, w2, b2)
    return out[:M]


# ---------------------------------------------------------------------------
# Glue: im2col patches grouped by 2x2-pool offset, features lane-padded.
# ---------------------------------------------------------------------------
def _extract_pool_patches(x_nhwc, k, k_pad):
    """NHWC -> (B, 4*Rp, k_pad) patches.

    Block q = dy*2+dx (of Rp = round_up(Hp*Wp, 8) rows, zero row padding) holds
    the patch for conv output pixel (2*hp+dy, 2*wp+dx) at row hp*Wp+wp, with
    features ordered (kh, kw, c) and zero-padded along lanes to k_pad.
    """
    B, H, W, C = x_nhwc.shape
    Ho, Wo = H - k + 1, W - k + 1
    assert Ho % 2 == 0 and Wo % 2 == 0, "model requires even conv output sizes"
    Hp, Wp = Ho // 2, Wo // 2
    R = Hp * Wp
    Rp = _round_up(R, 8)
    K0 = k * k * C
    assert k_pad >= K0
    blocks = []
    for dy in range(2):
        for dx in range(2):
            slabs = [x_nhwc[:, dy + di:dy + di + Ho:2, dx + dj:dx + dj + Wo:2, :]
                     for di in range(k) for dj in range(k)]
            blk = jnp.concatenate(slabs, axis=-1).reshape(B, R, K0)
            if Rp != R:
                blk = jnp.pad(blk, ((0, 0), (0, Rp - R), (0, 0)))
            blocks.append(blk)
    p = jnp.concatenate(blocks, axis=1)                   # (B, 4*Rp, K0)
    if k_pad != K0:
        p = jnp.pad(p, ((0, 0), (0, 0), (0, k_pad - K0)))
    return p, Hp, Wp, R, Rp


# ---------------------------------------------------------------------------
# Parameter folding: BN -> conv weights, flatten-permutation + channel padding
# -> fc weight, zero-padding to lane-dense shapes, bf16 cast of matmul operands.
# ---------------------------------------------------------------------------
def prepare_params(p, eps=1e-5):
    f = {}
    cin = p["conv1_w"].shape[1]
    # conv1 + bn1 (eval): scale = gamma/sqrt(var+eps), shift = beta+(b-mean)*scale
    s1 = p["bn1_gamma"] / jnp.sqrt(p["bn1_var"] + eps)
    w1 = p["conv1_w"].transpose(2, 3, 1, 0).reshape(25 * cin, 20) * s1[None, :]
    K1 = _round_up(25 * cin, 128)                 # lane-dense contraction depth
    f["conv1_w"] = (jnp.zeros((K1, _OC_PAD), jnp.float32)
                    .at[:25 * cin, :20].set(w1).astype(jnp.bfloat16))
    sh1 = p["bn1_beta"] + (p["conv1_b"] - p["bn1_mean"]) * s1
    f["conv1_s"] = jnp.zeros((1, _OC_PAD), jnp.float32).at[0, :20].set(sh1)
    # conv2 + bn2; rows indexed (kh*5 + kw)*128 + c (all 128 padded channels).
    s2 = p["bn2_gamma"] / jnp.sqrt(p["bn2_var"] + eps)
    w2 = p["conv2_w"].transpose(2, 3, 1, 0) * s2[None, None, None, :]   # (5,5,20,50)
    w2p = (jnp.zeros((5, 5, _OC_PAD, _OC_PAD), jnp.float32)
           .at[:, :, :20, :50].set(w2))
    f["conv2_w"] = w2p.reshape(25 * _OC_PAD, _OC_PAD).astype(jnp.bfloat16)
    sh2 = p["bn2_beta"] + (p["conv2_b"] - p["bn2_mean"]) * s2
    f["conv2_s"] = jnp.zeros((1, _OC_PAD), jnp.float32).at[0, :50].set(sh2)
    # fc (1250 -> 500): fold PyTorch's NCHW flatten order (c*25 + h*5 + w) and
    # the channel padding into the weight -> rows indexed by (h*5 + w)*128 + c.
    wfc = p["fc_w"].T.reshape(50, 5, 5, 500).transpose(1, 2, 0, 3)   # (5,5,50,500)
    wfc_pad = (jnp.zeros((5, 5, _OC_PAD, _HID_PAD), jnp.float32)
               .at[:, :, :50, :500].set(wfc))
    f["fc_w"] = wfc_pad.reshape(25 * _OC_PAD, _HID_PAD).astype(jnp.bfloat16)
    f["fc_b"] = jnp.zeros((1, _HID_PAD), jnp.float32).at[0, :500].set(p["fc_b"])
    # classifier (500 -> n_classes), padded to (512, 128)
    ncls = p["l1_w"].shape[0]
    wcl = (jnp.zeros((_HID_PAD, _CLS_PAD), jnp.float32)
           .at[:500, :ncls].set(p["l1_w"].T))
    f["l1_w"] = wcl.astype(jnp.bfloat16)
    f["l1_b"] = jnp.zeros((1, _CLS_PAD), jnp.float32).at[0, :ncls].set(p["l1_b"])
    return f


# ---------------------------------------------------------------------------
# Parameter init (deterministic, Kaiming-normal weights like the PyTorch code)
# ---------------------------------------------------------------------------
def kaiming_normal(key, shape, fan_in):
    std = (2.0 / fan_in) ** 0.5
    return std * jax.random.normal(key, shape, dtype=jnp.float32)


def init_params(key, in_channels=1, n_classes=10):
    ks = jax.random.split(key, 8)
    p = {}
    p["conv1_w"] = kaiming_normal(ks[0], (20, in_channels, 5, 5), in_channels * 25)
    p["conv1_b"] = 0.01 * jax.random.normal(ks[1], (20,), dtype=jnp.float32)
    p["conv2_w"] = kaiming_normal(ks[2], (50, 20, 5, 5), 20 * 25)
    p["conv2_b"] = 0.01 * jax.random.normal(ks[3], (50,), dtype=jnp.float32)
    p["bn1_gamma"] = jnp.ones((20,), jnp.float32)
    p["bn1_beta"] = jnp.zeros((20,), jnp.float32)
    p["bn1_mean"] = jnp.zeros((20,), jnp.float32)
    p["bn1_var"] = jnp.ones((20,), jnp.float32)
    p["bn2_gamma"] = jnp.ones((50,), jnp.float32)
    p["bn2_beta"] = jnp.zeros((50,), jnp.float32)
    p["bn2_mean"] = jnp.zeros((50,), jnp.float32)
    p["bn2_var"] = jnp.ones((50,), jnp.float32)
    p["fc_w"] = kaiming_normal(ks[4], (500, 1250), 1250)     # PyTorch (out, in)
    p["fc_b"] = 0.01 * jax.random.normal(ks[5], (500,), dtype=jnp.float32)
    p["l1_w"] = kaiming_normal(ks[6], (n_classes, 500), 500)
    p["l1_b"] = 0.01 * jax.random.normal(ks[7], (n_classes,), dtype=jnp.float32)
    return p


# ---------------------------------------------------------------------------
# Forward pass (mirrors CNN.forward; requires 32x32 input so fc sees 1250 feats)
# ---------------------------------------------------------------------------
@functools.partial(jax.jit, static_argnames=("n_classes", "batch_tile"))
def cnn_forward(fp, x_nchw, *, n_classes=10, batch_tile=8):
    B = x_nchw.shape[0]
    Bt = _pick_batch_tile(B, batch_tile)
    x = jnp.transpose(x_nchw, (0, 2, 3, 1)).astype(jnp.bfloat16)          # NHWC
    # conv1 -> bn1 -> relu -> pool (single fused kernel)
    p1, Hp1, Wp1, R1, Rp1 = _extract_pool_patches(x, 5, fp["conv1_w"].shape[0])
    a1 = conv_bn_relu_pool(p1, fp["conv1_w"], fp["conv1_s"], R1, Rp1, Bt)
    a1 = a1.reshape(B, Hp1, Wp1, _OC_PAD)                                 # (B,14,14,128)
    # conv2 -> bn2 -> relu -> pool; im2col over all 128 padded channels (K=3200)
    p2, Hp2, Wp2, R2, Rp2 = _extract_pool_patches(a1, 5, fp["conv2_w"].shape[0])
    a2 = conv_bn_relu_pool(p2, fp["conv2_w"], fp["conv2_s"], R2, Rp2, Bt)  # (B,25,128)
    # flatten: layout already matches the folded fc weight (free reshape).
    feats = a2.reshape(B, R2 * _OC_PAD)                                    # (B, 3200)
    # TODO(synk): Dropout is identity (eval mode); training-mode masking not implemented.
    logits = mlp_head(feats, fp["fc_w"], fp["fc_b"], fp["l1_w"], fp["l1_b"])
    return logits[:, :n_classes]


# ---------------------------------------------------------------------------
# Pure-JAX f32 reference (eval-mode semantics) for a sanity check.
# ---------------------------------------------------------------------------
def cnn_reference(p, x, eps=1e-5):
    def conv(h, w, b):
        y = jax.lax.conv_general_dilated(
            h, w, (1, 1), "VALID", dimension_numbers=("NCHW", "OIHW", "NCHW"))
        return y + b[None, :, None, None]

    def bn(h, g, bt, m, v):
        return ((h - m[None, :, None, None])
                / jnp.sqrt(v[None, :, None, None] + eps)
                * g[None, :, None, None] + bt[None, :, None, None])

    def pool(h):
        return jax.lax.reduce_window(h, -jnp.inf, jax.lax.max,
                                     (1, 1, 2, 2), (1, 1, 2, 2), "VALID")

    h = pool(jax.nn.relu(bn(conv(x, p["conv1_w"], p["conv1_b"]),
                            p["bn1_gamma"], p["bn1_beta"], p["bn1_mean"], p["bn1_var"])))
    h = pool(jax.nn.relu(bn(conv(h, p["conv2_w"], p["conv2_b"]),
                            p["bn2_gamma"], p["bn2_beta"], p["bn2_mean"], p["bn2_var"])))
    h = h.reshape(x.shape[0], -1)
    h = h @ p["fc_w"].T + p["fc_b"]
    return h @ p["l1_w"].T + p["l1_b"]


if __name__ == "__main__":
    key = jax.random.PRNGKey(0)
    pkey, xkey = jax.random.split(key)
    raw_params = init_params(pkey, in_channels=1, n_classes=10)
    folded = prepare_params(raw_params)
    # Input: NCHW, 32x32 is required by the fc layer (50*5*5 = 1250).
    x = jax.random.normal(xkey, (2, 1, 32, 32), dtype=jnp.float32)
    out = jax.block_until_ready(cnn_forward(folded, x, n_classes=10))
    assert out.shape == (2, 10), out.shape
    assert bool(jnp.all(jnp.isfinite(out)))
    # Loose sanity check against a pure-JAX f32 reference (bf16 matmul operands).
    ref = jax.block_until_ready(cnn_reference(raw_params, x))
    err = float(jnp.max(jnp.abs(out - ref)))
    tol = 0.2 * float(jnp.max(jnp.abs(ref))) + 0.2
    assert err < tol, (err, tol)
    print("KERNEL_OK")
</pallas_src>

<mosaic_0001>
module attributes {stable_mosaic.version = 11 : i64} {
  func.func @_conv_bn_relu_pool_kernel(%arg0: i32, %arg1: memref<1x800x128xbf16, #tpu.memory_space<vmem>>, %arg2: memref<128x128xbf16, #tpu.memory_space<vmem>>, %arg3: memref<1x128xf32, #tpu.memory_space<vmem>>, %arg4: memref<1x196x128xbf16, #tpu.memory_space<vmem>>, %arg5: memref<800x128xbf16, #tpu.memory_space<vmem>>) attributes {dimension_semantics = [#tpu.dimension_semantics<parallel>], iteration_bounds = array<i64: 2>, scalar_prefetch = 0 : i64, scratch_operands = 1 : i64, tpu.core_type = #tpu.core_type<tc>, window_params = [{transform_indices = @transform_0, window_bounds = array<i64: 1, 800, 128>}, {pipeline_mode = #tpu.pipeline_mode<synchronous>, transform_indices = @transform_1, window_bounds = array<i64: 128, 128>}, {pipeline_mode = #tpu.pipeline_mode<synchronous>, transform_indices = @transform_2, window_bounds = array<i64: 1, 128>}, {transform_indices = @transform_3, window_bounds = array<i64: 1, 196, 128>}]} {
    %c0 = arith.constant 0 : index
    %c0_0 = arith.constant 0 : index
    %c0_1 = arith.constant 0 : index
    %0 = vector.load %arg1[%c0, %c0_0, %c0_1] : memref<1x800x128xbf16, #tpu.memory_space<vmem>>, vector<1x800x128xbf16>
    %1 = vector.shape_cast %0 : vector<1x800x128xbf16> to vector<800x128xbf16>
    %c0_2 = arith.constant 0 : index
    %c0_3 = arith.constant 0 : index
    %2 = vector.load %arg2[%c0_2, %c0_3] : memref<128x128xbf16, #tpu.memory_space<vmem>>, vector<128x128xbf16>
    %cst = arith.constant dense<0.000000e+00> : vector<800x128xf32>
    %3 = tpu.matmul %1, %2, %cst {dimension_numbers = #tpu.dot_dimension_numbers<[1], [0], [0], [1], [0, 0, 1, 1], [], []>} : vector<800x128xbf16>, vector<128x128xbf16>, vector<800x128xf32> -> vector<800x128xf32>
    %c0_4 = arith.constant 0 : index
    %c0_5 = arith.constant 0 : index
    %4 = vector.load %arg3[%c0_4, %c0_5] : memref<1x128xf32, #tpu.memory_space<vmem>>, vector<1x128xf32>
    %5 = vector.broadcast %4 : vector<1x128xf32> to vector<800x128xf32>
    %6 = arith.addf %3, %5 : vector<800x128xf32>
    %cst_6 = arith.constant 0.000000e+00 : f32
    %7 = vector.broadcast %cst_6 : f32 to vector<800x128xf32>
    %8 = arith.maximumf %6, %7 : vector<800x128xf32>
    %9 = arith.truncf %8 : vector<800x128xf32> to vector<800x128xbf16>
    %c0_7 = arith.constant 0 : index
    %c0_8 = arith.constant 0 : index
    %10 = vector.load %arg5[%c0_7, %c0_8] : memref<800x128xbf16, #tpu.memory_space<vmem>>, vector<800x128xbf16>
    tpu.vector_store %arg5[%c0_7, %c0_8], %9 {strides = array<i32>} : memref<800x128xbf16, #tpu.memory_space<vmem>>, vector<800x128xbf16>,
    %c0_9 = arith.constant 0 : index
    %c0_10 = arith.constant 0 : index
    %11 = vector.load %arg5[%c0_9, %c0_10] : memref<800x128xbf16, #tpu.memory_space<vmem>>, vector<196x128xbf16>
    %c200 = arith.constant 200 : index
    %c0_11 = arith.constant 0 : index
    %12 = vector.load %arg5[%c200, %c0_11] : memref<800x128xbf16, #tpu.memory_space<vmem>>, vector<196x128xbf16>
    %c400 = arith.constant 400 : index
    %c0_12 = arith.constant 0 : index
    %13 = vector.load %arg5[%c400, %c0_12] : memref<800x128xbf16, #tpu.memory_space<vmem>>, vector<196x128xbf16>
    %c600 = arith.constant 600 : index
    %c0_13 = arith.constant 0 : index
    %14 = vector.load %arg5[%c600, %c0_13] : memref<800x128xbf16, #tpu.memory_space<vmem>>, vector<196x128xbf16>
    %15 = arith.maximumf %11, %12 : vector<196x128xbf16>
    %16 = arith.maximumf %13, %14 : vector<196x128xbf16>
    %17 = arith.maximumf %15, %16 : vector<196x128xbf16>
    %c0_14 = arith.constant 0 : index
    %c0_15 = arith.constant 0 : index
    %c0_16 = arith.constant 0 : index
    %18 = vector.load %arg4[%c0_14, %c0_15, %c0_16] : memref<1x196x128xbf16, #tpu.memory_space<vmem>>, vector<1x196x128xbf16>
    %19 = vector.shape_cast %18 : vector<1x196x128xbf16> to vector<196x128xbf16>
    %20 = vector.shape_cast %17 : vector<196x128xbf16> to vector<1x196x128xbf16>
    tpu.vector_store %arg4[%c0_14, %c0_15, %c0_16], %20 {strides = array<i32>} : memref<1x196x128xbf16, #tpu.memory_space<vmem>>, vector<1x196x128xbf16>,
    return
  }
  func.func @transform_0(%arg0: i32) -> (i32, i32, i32) {
    %c0_i32 = arith.constant 0 : i32
    %c0_i32_0 = arith.constant 0 : i32
    %c0_i32_1 = arith.constant 0 : i32
    return %arg0, %c0_i32, %c0_i32_0 : i32, i32, i32
  }
  func.func @transform_1(%arg0: i32) -> (i32, i32) {
    %c0_i32 = arith.constant 0 : i32
    %c0_i32_0 = arith.constant 0 : i32
    %c0_i32_1 = arith.constant 0 : i32
    return %c0_i32, %c0_i32_0 : i32, i32
  }
  func.func @transform_2(%arg0: i32) -> (i32, i32) {
    %c0_i32 = arith.constant 0 : i32
    %c0_i32_0 = arith.constant 0 : i32
    %c0_i32_1 = arith.constant 0 : i32
    return %c0_i32, %c0_i32_0 : i32, i32
  }
  func.func @transform_3(%arg0: i32) -> (i32, i32, i32) {
    %c0_i32 = arith.constant 0 : i32
    %c0_i32_0 = arith.constant 0 : i32
    %c0_i32_1 = arith.constant 0 : i32
    return %arg0, %c0_i32, %c0_i32_0 : i32, i32, i32
  }
}

module attributes {stable_mosaic.version = 11 : i64} {
  func.func @_conv_bn_relu_pool_kernel(%arg0: i32, %arg1: memref<1x128x3200xbf16, #tpu.memory_space<vmem>>, %arg2: memref<3200x128xbf16, #tpu.memory_space<vmem>>, %arg3: memref<1x128xf32, #tpu.memory_space<vmem>>, %arg4: memref<1x25x128xbf16, #tpu.memory_space<vmem>>, %arg5: memref<128x128xbf16, #tpu.memory_space<vmem>>) attributes {dimension_semantics = [#tpu.dimension_semantics<parallel>], iteration_bounds = array<i64: 2>, scalar_prefetch = 0 : i64, scratch_operands = 1 : i64, tpu.core_type = #tpu.core_type<tc>, window_params = [{transform_indices = @transform_0, window_bounds = array<i64: 1, 128, 3200>}, {pipeline_mode = #tpu.pipeline_mode<synchronous>, transform_indices = @transform_1, window_bounds = array<i64: 3200, 128>}, {pipeline_mode = #tpu.pipeline_mode<synchronous>, transform_indices = @transform_2, window_bounds = array<i64: 1, 128>}, {transform_indices = @transform_3, window_bounds = array<i64: 1, 25, 128>}]} {
    %c0 = arith.constant 0 : index
    %c0_0 = arith.constant 0 : index
    %c0_1 = arith.constant 0 : index
    %0 = vector.load %arg1[%c0, %c0_0, %c0_1] : memref<1x128x3200xbf16, #tpu.memory_space<vmem>>, vector<1x128x3200xbf16>
    %1 = vector.shape_cast %0 : vector<1x128x3200xbf16> to vector<128x3200xbf16>
    %c0_2 = arith.constant 0 : index
    %c0_3 = arith.constant 0 : index
    %2 = vector.load %arg2[%c0_2, %c0_3] : memref<3200x128xbf16, #tpu.memory_space<vmem>>, vector<3200x128xbf16>
    %cst = arith.constant dense<0.000000e+00> : vector<128x128xf32>
    %3 = tpu.matmul %1, %2, %cst {dimension_numbers = #tpu.dot_dimension_numbers<[1], [0], [0], [1], [0, 0, 1, 1], [], []>} : vector<128x3200xbf16>, vector<3200x128xbf16>, vector<128x128xf32> -> vector<128x128xf32>
    %c0_4 = arith.constant 0 : index
    %c0_5 = arith.constant 0 : index
    %4 = vector.load %arg3[%c0_4, %c0_5] : memref<1x128xf32, #tpu.memory_space<vmem>>, vector<1x128xf32>
    %5 = vector.broadcast %4 : vector<1x128xf32> to vector<128x128xf32>
    %6 = arith.addf %3, %5 : vector<128x128xf32>
    %cst_6 = arith.constant 0.000000e+00 : f32
    %7 = vector.broadcast %cst_6 : f32 to vector<128x128xf32>
    %8 = arith.maximumf %6, %7 : vector<128x128xf32>
    %9 = arith.truncf %8 : vector<128x128xf32> to vector<128x128xbf16>
    %c0_7 = arith.constant 0 : index
    %c0_8 = arith.constant 0 : index
    %10 = vector.load %arg5[%c0_7, %c0_8] : memref<128x128xbf16, #tpu.memory_space<vmem>>, vector<128x128xbf16>
    tpu.vector_store %arg5[%c0_7, %c0_8], %9 {strides = array<i32>} : memref<128x128xbf16, #tpu.memory_space<vmem>>, vector<128x128xbf16>,
    %c0_9 = arith.constant 0 : index
    %c0_10 = arith.constant 0 : index
    %11 = vector.load %arg5[%c0_9, %c0_10] : memref<128x128xbf16, #tpu.memory_space<vmem>>, vector<25x128xbf16>
    %c32 = arith.constant 32 : index
    %c0_11 = arith.constant 0 : index
    %12 = vector.load %arg5[%c32, %c0_11] : memref<128x128xbf16, #tpu.memory_space<vmem>>, vector<25x128xbf16>
    %c64 = arith.constant 64 : index
    %c0_12 = arith.constant 0 : index
    %13 = vector.load %arg5[%c64, %c0_12] : memref<128x128xbf16, #tpu.memory_space<vmem>>, vector<25x128xbf16>
    %c96 = arith.constant 96 : index
    %c0_13 = arith.constant 0 : index
    %14 = vector.load %arg5[%c96, %c0_13] : memref<128x128xbf16, #tpu.memory_space<vmem>>, vector<25x128xbf16>
    %15 = arith.maximumf %11, %12 : vector<25x128xbf16>
    %16 = arith.maximumf %13, %14 : vector<25x128xbf16>
    %17 = arith.maximumf %15, %16 : vector<25x128xbf16>
    %c0_14 = arith.constant 0 : index
    %c0_15 = arith.constant 0 : index
    %c0_16 = arith.constant 0 : index
    %18 = vector.load %arg4[%c0_14, %c0_15, %c0_16] : memref<1x25x128xbf16, #tpu.memory_space<vmem>>, vector<1x25x128xbf16>
    %19 = vector.shape_cast %18 : vector<1x25x128xbf16> to vector<25x128xbf16>
    %20 = vector.shape_cast %17 : vector<25x128xbf16> to vector<1x25x128xbf16>
    tpu.vector_store %arg4[%c0_14, %c0_15, %c0_16], %20 {strides = array<i32>} : memref<1x25x128xbf16, #tpu.memory_space<vmem>>, vector<1x25x128xbf16>,
    return
  }
  func.func @transform_0(%arg0: i32) -> (i32, i32, i32) {
    %c0_i32 = arith.constant 0 : i32
    %c0_i32_0 = arith.constant 0 : i32
    %c0_i32_1 = arith.constant 0 : i32
    return %arg0, %c0_i32, %c0_i32_0 : i32, i32, i32
  }
  func.func @transform_1(%arg0: i32) -> (i32, i32) {
    %c0_i32 = arith.constant 0 : i32
    %c0_i32_0 = arith.constant 0 : i32
    %c0_i32_1 = arith.constant 0 : i32
    return %c0_i32, %c0_i32_0 : i32, i32
  }
  func.func @transform_2(%arg0: i32) -> (i32, i32) {
    %c0_i32 = arith.constant 0 : i32
    %c0_i32_0 = arith.constant 0 : i32
    %c0_i32_1 = arith.constant 0 : i32
    return %c0_i32, %c0_i32_0 : i32, i32
  }
  func.func @transform_3(%arg0: i32) -> (i32, i32, i32) {
    %c0_i32 = arith.constant 0 : i32
    %c0_i32_0 = arith.constant 0 : i32
    %c0_i32_1 = arith.constant 0 : i32
    return %arg0, %c0_i32, %c0_i32_0 : i32, i32, i32
  }
}

module attributes {stable_mosaic.version = 11 : i64} {
  func.func @_mlp_head_kernel(%arg0: i32, %arg1: memref<8x3200xbf16, #tpu.memory_space<vmem>>, %arg2: memref<3200x512xbf16, #tpu.memory_space<vmem>>, %arg3: memref<1x512xf32, #tpu.memory_space<vmem>>, %arg4: memref<512x128xbf16, #tpu.memory_space<vmem>>, %arg5: memref<1x128xf32, #tpu.memory_space<vmem>>, %arg6: memref<8x128xf32, #tpu.memory_space<vmem>>, %arg7: memref<8x512xbf16, #tpu.memory_space<vmem>>) attributes {dimension_semantics = [#tpu.dimension_semantics<parallel>], iteration_bounds = array<i64: 1>, scalar_prefetch = 0 : i64, scratch_operands = 1 : i64, tpu.core_type = #tpu.core_type<tc>, window_params = [{transform_indices = @transform_0, window_bounds = array<i64: 8, 3200>}, {pipeline_mode = #tpu.pipeline_mode<synchronous>, transform_indices = @transform_1, window_bounds = array<i64: 3200, 512>}, {pipeline_mode = #tpu.pipeline_mode<synchronous>, transform_indices = @transform_2, window_bounds = array<i64: 1, 512>}, {pipeline_mode = #tpu.pipeline_mode<synchronous>, transform_indices = @transform_3, window_bounds = array<i64: 512, 128>}, {pipeline_mode = #tpu.pipeline_mode<synchronous>, transform_indices = @transform_4, window_bounds = array<i64: 1, 128>}, {transform_indices = @transform_5, window_bounds = array<i64: 8, 128>}]} {
    %c0 = arith.constant 0 : index
    %c0_0 = arith.constant 0 : index
    %0 = vector.load %arg1[%c0, %c0_0] : memref<8x3200xbf16, #tpu.memory_space<vmem>>, vector<8x3200xbf16>
    %c0_1 = arith.constant 0 : index
    %c0_2 = arith.constant 0 : index
    %1 = vector.load %arg2[%c0_1, %c0_2] : memref<3200x512xbf16, #tpu.memory_space<vmem>>, vector<3200x512xbf16>
    %cst = arith.constant dense<0.000000e+00> : vector<8x512xf32>
    %2 = tpu.matmul %0, %1, %cst {dimension_numbers = #tpu.dot_dimension_numbers<[1], [0], [0], [1], [0, 0, 1, 1], [], []>} : vector<8x3200xbf16>, vector<3200x512xbf16>, vector<8x512xf32> -> vector<8x512xf32>
    %c0_3 = arith.constant 0 : index
    %c0_4 = arith.constant 0 : index
    %3 = vector.load %arg3[%c0_3, %c0_4] : memref<1x512xf32, #tpu.memory_space<vmem>>, vector<1x512xf32>
    %4 = vector.broadcast %3 : vector<1x512xf32> to vector<8x512xf32>
    %5 = arith.addf %2, %4 : vector<8x512xf32>
    %6 = arith.truncf %5 : vector<8x512xf32> to vector<8x512xbf16>
    %c0_5 = arith.constant 0 : index
    %c0_6 = arith.constant 0 : index
    %7 = vector.load %arg7[%c0_5, %c0_6] : memref<8x512xbf16, #tpu.memory_space<vmem>>, vector<8x512xbf16>
    tpu.vector_store %arg7[%c0_5, %c0_6], %6 {strides = array<i32>} : memref<8x512xbf16, #tpu.memory_space<vmem>>, vector<8x512xbf16>,
    %c0_7 = arith.constant 0 : index
    %c0_8 = arith.constant 0 : index
    %8 = vector.load %arg7[%c0_7, %c0_8] : memref<8x512xbf16, #tpu.memory_space<vmem>>, vector<8x512xbf16>
    %c0_9 = arith.constant 0 : index
    %c0_10 = arith.constant 0 : index
    %9 = vector.load %arg4[%c0_9, %c0_10] : memref<512x128xbf16, #tpu.memory_space<vmem>>, vector<512x128xbf16>
    %cst_11 = arith.constant dense<0.000000e+00> : vector<8x128xf32>
    %10 = tpu.matmul %8, %9, %cst_11 {dimension_numbers = #tpu.dot_dimension_numbers<[1], [0], [0], [1], [0, 0, 1, 1], [], []>} : vector<8x512xbf16>, vector<512x128xbf16>, vector<8x128xf32> -> vector<8x128xf32>
    %c0_12 = arith.constant 0 : index
    %c0_13 = arith.constant 0 : index
    %11 = vector.load %arg5[%c0_12, %c0_13] : memref<1x128xf32, #tpu.memory_space<vmem>>, vector<1x128xf32>
    %12 = vector.broadcast %11 : vector<1x128xf32> to vector<8x128xf32>
    %13 = arith.addf %10, %12 : vector<8x128xf32>
    %c0_14 = arith.constant 0 : index
    %c0_15 = arith.constant 0 : index
    %14 = vector.load %arg6[%c0_14, %c0_15] : memref<8x128xf32, #tpu.memory_space<vmem>>, vector<8x128xf32>
    tpu.vector_store %arg6[%c0_14, %c0_15], %13 {strides = array<i32>} : memref<8x128xf32, #tpu.memory_space<vmem>>, vector<8x128xf32>,
    return
  }
  func.func @transform_0(%arg0: i32) -> (i32, i32) {
    %c0_i32 = arith.constant 0 : i32
    %c0_i32_0 = arith.constant 0 : i32
    return %arg0, %c0_i32 : i32, i32
  }
  func.func @transform_1(%arg0: i32) -> (i32, i32) {
    %c0_i32 = arith.constant 0 : i32
    %c0_i32_0 = arith.constant 0 : i32
    %c0_i32_1 = arith.constant 0 : i32
    return %c0_i32, %c0_i32_0 : i32, i32
  }
  func.func @transform_2(%arg0: i32) -> (i32, i32) {
    %c0_i32 = arith.constant 0 : i32
    %c0_i32_0 = arith.constant 0 : i32
    %c0_i32_1 = arith.constant 0 : i32
    return %c0_i32, %c0_i32_0 : i32, i32
  }
  func.func @transform_3(%arg0: i32) -> (i32, i32) {
    %c0_i32 = arith.constant 0 : i32
    %c0_i32_0 = arith.constant 0 : i32
    %c0_i32_1 = arith.constant 0 : i32
    return %c0_i32, %c0_i32_0 : i32, i32
  }
  func.func @transform_4(%arg0: i32) -> (i32, i32) {
    %c0_i32 = arith.constant 0 : i32
    %c0_i32_0 = arith.constant 0 : i32
    %c0_i32_1 = arith.constant 0 : i32
    return %c0_i32, %c0_i32_0 : i32, i32
  }
  func.func @transform_5(%arg0: i32) -> (i32, i32) {
    %c0_i32 = arith.constant 0 : i32
    %c0_i32_0 = arith.constant 0 : i32
    return %arg0, %c0_i32 : i32, i32
  }
}

</mosaic_0001>

<bundles_post_ra>
// kernel: cnn_forward.3
= control target key start
LH: loop header
LB: loop body
LE: loop exit
PB: predicated region body
PF: predicated region fallthrough
CT: control target
= control target key end

     0   :  { %s2640_s12 = smov 0   ;;  %s2910_s0 = inlined_call_operand.vmem [shape: bf16[2,800,128], index: 0, kind: input, shape index: {}]   ;;  %s2911_s1 = inlined_call_operand.vmem [shape: bf16[128,128], index: 1, kind: input, shape index: {}]   ;;  %s2912_s2 = inlined_call_operand.vmem [shape: f32[1,128], index: 2, kind: input, shape index: {}]   ;;  %s2913_s3 = inlined_call_operand.vmem [shape: bf16[2,196,128], index: 3, kind: output, shape index: {}]  }
   0x1 LB: > { %s1678_s13 = sadd.s32 4294967295, %s2618_s12   ;;  %p1682_p0 = scmp.ge.s32.totalorder %s2618_s12, 1  ;;  %s2618_s12 = sphi %s2640_s12, %s13_s12  }
   0x2   : > { %p137_p1 = scmp.lt.s32.totalorder %s2618_s12, 3 }
   0x4   : > { %p138_p2 = pnand %p1682_p0, %p137_p1 }
   0x5   : > { %p161_p3 = scmp.lt.s32.totalorder (!%p138_p2), %s1678_s13, 1 }
   0x6   : > { %141 = sbr.rel (%p138_p2) target bundleno = 400 (0x190), region = 32 }
   0xb   : > { %v1976_v0 = vld [vmem:[%s2911_s1 + $0x38] sm:$0xff]  ;;  %v1975_v1 = vld [vmem:[%s2911_s1 + $0x30] sm:$0xff]  ;;  %v1974_v2 = vld [vmem:[%s2911_s1 + $0x28] sm:$0xff]  ;;  %s2915_s13 = smov (!%p161_p3, %s1678_s13), 1 }
   0xc   : > { %639 = vmatpush.bf16.msra.mxu0 %v1976_v0  ;;  %2576 = vmatpush.bf16.msra.mxu1 %v1976_v0  ;;  %v1973_v3 = vld [vmem:[%s2911_s1 + $0x20] sm:$0xff]  ;;  %v1972_v4 = vld [vmem:[%s2911_s1 + $0x18] sm:$0xff]  ;;  %v1971_v5 = vld [vmem:[%s2911_s1 + $0x10] sm:$0xff]  ;;  %s2600_s28 = smul.u32 400, %s2915_s13 }
   0xd   : > { %2577 = vmatpush.bf16.msra.mxu2 %v1976_v0  ;;  %2578 = vmatpush.bf16.msra.mxu3 %v1976_v0  ;;  %v1970_v6 = vld [vmem:[%s2911_s1 + $0x8] sm:$0xff]  ;;  %v1969_v7 = vld [vmem:[%s2911_s1] sm:$0xff]  ;;  %s2601_s9 = smul.u32 100, %s2915_s13 }
   0xe   : > { %s2682_s6 = scalar_lea.vmem %s2910_s0, %s2600_s28  ;;  %v2723_v46 = vld [vmem:[%s2912_s2] ss:$0 sm:$0xff] }
   0xf   : > { %v1919_v8 = vld [vmem:[%s2682_s6] sm:$0xff]  ;;  %v1956_v11 = vld [vmem:[%s2682_s6 + $0x128] sm:$0xff]  ;;  %v1957_v15 = vld [vmem:[%s2682_s6 + $0x130] sm:$0xff]  ;;  %s2785_s13 = scalar_lea.vmem %s2913_s3, %s2601_s9 }
  0x10   : > { %640 = vmatpush.bf16.msra.mxu0 %v1975_v1  ;;  %2579 = vmatpush.bf16.msra.mxu1 %v1975_v1  ;;  %v1931_v9 = vld [vmem:[%s2682_s6 + $0x60] sm:$0xff]  ;;  %v1920_v12 = vld [vmem:[%s2682_s6 + $0x8] sm:$0xff]  ;;  %v1921_v16 = vld [vmem:[%s2682_s6 + $0x10] sm:$0xff] }
  0x11   : > { %2580 = vmatpush.bf16.msra.mxu2 %v1975_v1  ;;  %2581 = vmatpush.bf16.msra.mxu3 %v1975_v1  ;;  %v1943_v10 = vld [vmem:[%s2682_s6 + $0xc0] sm:$0xff]  ;;  %v1932_v13 = vld [vmem:[%s2682_s6 + $0x68] sm:$0xff]  ;;  %v1933_v17 = vld [vmem:[%s2682_s6 + $0x70] sm:$0xff] }
  0x12   : > { %v1944_v14 = vld [vmem:[%s2682_s6 + $0xc8] sm:$0xff]  ;;  %v1945_v18 = vld [vmem:[%s2682_s6 + $0xd0] sm:$0xff]  ;;  %v1958_v19 = vld [vmem:[%s2682_s6 + $0x138] sm:$0xff] }
  0x13   : > { %v1922_v20 = vld [vmem:[%s2682_s6 + $0x18] sm:$0xff]  ;;  %v1959_v23 = vld [vmem:[%s2682_s6 + $0x140] sm:$0xff]  ;;  %v1960_v27 = vld [vmem:[%s2682_s6 + $0x148] sm:$0xff] }
  0x14   : > { %641 = vmatpush.bf16.msra.mxu0 %v1974_v2  ;;  %2582 = vmatpush.bf16.msra.mxu1 %v1974_v2  ;;  %v1934_v21 = vld [vmem:[%s2682_s6 + $0x78] sm:$0xff]  ;;  %v1923_v24 = vld [vmem:[%s2682_s6 + $0x20] sm:$0xff]  ;;  %v1924_v28 = vld [vmem:[%s2682_s6 + $0x28] sm:$0xff] }
  0x15   : > { %2583 = vmatpush.bf16.msra.mxu2 %v1974_v2  ;;  %2584 = vmatpush.bf16.msra.mxu3 %v1974_v2  ;;  %v1946_v22 = vld [vmem:[%s2682_s6 + $0xd8] sm:$0xff]  ;;  %v1935_v25 = vld [vmem:[%s2682_s6 + $0x80] sm:$0xff]  ;;  %v1936_v29 = vld [vmem:[%s2682_s6 + $0x88] sm:$0xff] }
  0x16   : > { %v1947_v26 = vld [vmem:[%s2682_s6 + $0xe0] sm:$0xff]  ;;  %v1948_v30 = vld [vmem:[%s2682_s6 + $0xe8] sm:$0xff]  ;;  %v1961_v31 = vld [vmem:[%s2682_s6 + $0x150] sm:$0xff] }
  0x17   : > { %v1925_v32 = vld [vmem:[%s2682_s6 + $0x30] sm:$0xff]  ;;  %v1962_v35 = vld [vmem:[%s2682_s6 + $0x158] sm:$0xff]  ;;  %v1963_v39 = vld [vmem:[%s2682_s6 + $0x160] sm:$0xff] }
  0x18   : > { %642 = vmatpush.bf16.msra.mxu0 %v1973_v3  ;;  %2585 = vmatpush.bf16.msra.mxu1 %v1973_v3  ;;  %v1937_v33 = vld [vmem:[%s2682_s6 + $0x90] sm:$0xff]  ;;  %v1926_v36 = vld [vmem:[%s2682_s6 + $0x38] sm:$0xff]  ;;  %v1927_v40 = vld [vmem:[%s2682_s6 + $0x40] sm:$0xff] }
  0x19   : > { %2586 = vmatpush.bf16.msra.mxu2 %v1973_v3  ;;  %2587 = vmatpush.bf16.msra.mxu3 %v1973_v3  ;;  %v1949_v34 = vld [vmem:[%s2682_s6 + $0xf0] sm:$0xff]  ;;  %v1938_v37 = vld [vmem:[%s2682_s6 + $0x98] sm:$0xff]  ;;  %v1939_v41 = vld [vmem:[%s2682_s6 + $0xa0] sm:$0xff] }
  0x1a   : > { %v1950_v38 = vld [vmem:[%s2682_s6 + $0xf8] sm:$0xff]  ;;  %v1951_v44 = vld [vmem:[%s2682_s6 + $0x100] sm:$0xff]  ;;  %v1964_v45 = vld [vmem:[%s2682_s6 + $0x168] sm:$0xff] }
  0x1b   : > { %v1928_v0 = vld [vmem:[%s2682_s6 + $0x48] sm:$0xff] }
  0x1c   : > { %643 = vmatpush.bf16.msra.mxu0 %v1972_v4  ;;  %2588 = vmatpush.bf16.msra.mxu1 %v1972_v4  ;;  %v1940_v1 = vld [vmem:[%s2682_s6 + $0xa8] sm:$0xff] }
  0x1d   : > { %2589 = vmatpush.bf16.msra.mxu2 %v1972_v4  ;;  %2590 = vmatpush.bf16.msra.mxu3 %v1972_v4 }
  0x20   : > { %644 = vmatpush.bf16.msra.mxu0 %v1971_v5  ;;  %2591 = vmatpush.bf16.msra.mxu1 %v1971_v5 }
  0x21   : > { %2592 = vmatpush.bf16.msra.mxu2 %v1971_v5  ;;  %2593 = vmatpush.bf16.msra.mxu3 %v1971_v5 }
  0x24   : > { %645 = vmatpush.bf16.msra.mxu0 %v1970_v6  ;;  %2594 = vmatpush.bf16.msra.mxu1 %v1970_v6 }
  0x25   : > { %2595 = vmatpush.bf16.msra.mxu2 %v1970_v6  ;;  %2596 = vmatpush.bf16.msra.mxu3 %v1970_v6 }
  0x28   : > { %646 = vmatpush.bf16.msra.mxu0 %v1969_v7  ;;  %2597 = vmatpush.bf16.msra.mxu1 %v1969_v7 }
  0x29   : > { %2598 = vmatpush.bf16.msra.mxu2 %v1969_v7  ;;  %2599 = vmatpush.bf16.msra.mxu3 %v1969_v7  ;;  %v1952_v7 = vld [vmem:[%s2682_s6 + $0x108] sm:$0xff] }
  0x2b   : > { %647 = vmatmul.bf16.vlgmr.msra.gmra.mxu0 %v1919_v8  ;;  %707 = vmatmul.bf16.vlgmr.msra.gmra.mxu1 %v1931_v9  ;;  %v1965_v8 = vld [vmem:[%s2682_s6 + $0x170] sm:$0xff] }
  0x2c   : > { %767 = vmatmul.bf16.vlgmr.msra.gmra.mxu2 %v1943_v10  ;;  %832 = vmatmul.bf16.vlgmr.msra.gmra.mxu3 %v1956_v11 }
  0x3b   : > { %652 = vmatmul.bf16.gmra.mxu0 %v1920_v12  ;;  %712 = vmatmul.bf16.gmra.mxu1 %v1932_v13 }
  0x3c   : > { %772 = vmatmul.bf16.gmra.mxu2 %v1944_v14  ;;  %837 = vmatmul.bf16.gmra.mxu3 %v1957_v15 }
  0x4b   : > { %657 = vmatmul.bf16.gmra.mxu0 %v1921_v16  ;;  %717 = vmatmul.bf16.gmra.mxu1 %v1933_v17 }
  0x4c   : > { %777 = vmatmul.bf16.gmra.mxu2 %v1945_v18  ;;  %842 = vmatmul.bf16.gmra.mxu3 %v1958_v19 }
  0x5b   : > { %662 = vmatmul.bf16.gmra.mxu0 %v1922_v20  ;;  %722 = vmatmul.bf16.gmra.mxu1 %v1934_v21 }
  0x5c   : > { %782 = vmatmul.bf16.gmra.mxu2 %v1946_v22  ;;  %847 = vmatmul.bf16.gmra.mxu3 %v1959_v23 }
  0x6b   : > { %667 = vmatmul.bf16.gmra.mxu0 %v1923_v24  ;;  %727 = vmatmul.bf16.gmra.mxu1 %v1935_v25 }
  0x6c   : > { %787 = vmatmul.bf16.gmra.mxu2 %v1947_v26  ;;  %852 = vmatmul.bf16.gmra.mxu3 %v1960_v27 }
  0x7b   : > { %672 = vmatmul.bf16.gmra.mxu0 %v1924_v28  ;;  %732 = vmatmul.bf16.gmra.mxu1 %v1936_v29 }
  0x7c   : > { %792 = vmatmul.bf16.gmra.mxu2 %v1948_v30  ;;  %857 = vmatmul.bf16.gmra.mxu3 %v1961_v31  ;;  %v1929_v31 = vld [vmem:[%s2682_s6 + $0x50] sm:$0xff] }
  0x8b   : > { %677 = vmatmul.bf16.gmra.mxu0 %v1925_v32  ;;  %737 = vmatmul.bf16.gmra.mxu1 %v1937_v33  ;;  %v1941_v32 = vld [vmem:[%s2682_s6 + $0xb0] sm:$0xff] }
  0x8c   : > { %797 = vmatmul.bf16.gmra.mxu2 %v1949_v34  ;;  %862 = vmatmul.bf16.gmra.mxu3 %v1962_v35 }
  0x9b   : > { %682 = vmatmul.bf16.gmra.mxu0 %v1926_v36  ;;  %742 = vmatmul.bf16.gmra.mxu1 %v1938_v37  ;;  %v1953_v37 = vld [vmem:[%s2682_s6 + $0x110] sm:$0xff] }
  0x9c   : > { %802 = vmatmul.bf16.gmra.mxu2 %v1950_v38  ;;  %867 = vmatmul.bf16.gmra.mxu3 %v1963_v39  ;;  %v1966_v38 = vld [vmem:[%s2682_s6 + $0x178] sm:$0xff] }
  0xa8   : > { %v648_v42 = vpop.f32.mrf.mxu0  ;;  %v708_v43 = vpop.f32.mrf.mxu1 }
  0xa9   : > { %v2726_v47 = vadd.f32 %v2723_v46, %v648_v42  ;;  %v709_v48 = vadd.f32 %v2723_v46, %v708_v43 }
  0xab   : > { %687 = vmatmul.bf16.gmra.mxu0 %v1927_v40  ;;  %747 = vmatmul.bf16.gmra.mxu1 %v1939_v41  ;;  %v898_v53 = vmax.f32 %v2726_v47, 0.0  ;;  %v922_v54 = vmax.f32 %v709_v48, 0.0 }
  0xac   : > { %807 = vmatmul.bf16.gmra.mxu2 %v1951_v44  ;;  %872 = vmatmul.bf16.gmra.mxu3 %v1964_v45 }
  0xaf   : > { %v768_v49 = vpop.f32.mrf.mxu2  ;;  %v833_v50 = vpop.f32.mrf.mxu3 }
  0xb0   : > { %v650_v51 = vpop.f32.mrf.mxu0  ;;  %v710_v52 = vpop.f32.mrf.mxu1  ;;  %v769_v59 = vadd.f32 %v2723_v46, %v768_v49  ;;  %v834_v61 = vadd.f32 %v2723_v46, %v833_v50 }
  0xb1   : > { %v2731_v55 = vadd.f32 %v2723_v46, %v650_v51  ;;  %v711_v56 = vadd.f32 %v2723_v46, %v710_v52 }
  0xb2   : > { %v946_v2 = vmax.f32 %v769_v59, 0.0  ;;  %v972_v9 = vmax.f32 %v834_v61, 0.0 }
  0xb3   : > { %v899_v57 = vmax.f32 %v2731_v55, 0.0  ;;  %v923_v58 = vmax.f32 %v711_v56, 0.0 }
  0xb5   : > { %v2040_v60 = vpack.c.bf16 %v923_v58, %v922_v54 }
  0xb7   : > { %v770_v62 = vpop.f32.mrf.mxu2  ;;  %v835_v63 = vpop.f32.mrf.mxu3  ;;  %2482 = vst [vmem:[#allocation2 + $0x60] sm:$0xff] %v2040_v60  }
  0xb8   : > { %v771_v3 = vadd.f32 %v2723_v46, %v770_v62  ;;  %v836_v4 = vadd.f32 %v2723_v46, %v835_v63  ;;  %v653_v5 = vpop.f32.mrf.mxu0  ;;  %v713_v6 = vpop.f32.mrf.mxu1 }
  0xb9   : > { %v2744_v14 = vadd.f32 %v2723_v46, %v653_v5  ;;  %v714_v15 = vadd.f32 %v2723_v46, %v713_v6  ;;  %v1930_v6 = vld [vmem:[%s2682_s6 + $0x58] sm:$0xff] }
  0xba   : > { %v947_v10 = vmax.f32 %v771_v3, 0.0  ;;  %v973_v11 = vmax.f32 %v836_v4, 0.0 }
  0xbb   : > { %692 = vmatmul.bf16.gmra.mxu0 %v1928_v0  ;;  %752 = vmatmul.bf16.gmra.mxu1 %v1940_v1  ;;  %v900_v20 = vmax.f32 %v2744_v14, 0.0  ;;  %v924_v23 = vmax.f32 %v714_v15, 0.0  ;;  %v1967_v15 = vld [vmem:[%s2682_s6 + $0x180] sm:$0xff] }
  0xbc   : > { %v2100_v12 = vpack.c.bf16 %v947_v10, %v946_v2  ;;  %v2165_v13 = vpack.c.bf16 %v973_v11, %v972_v9  ;;  %812 = vmatmul.bf16.gmra.mxu2 %v1952_v7  ;;  %877 = vmatmul.bf16.gmra.mxu3 %v1965_v8  ;;  %v1942_v7 = vld [vmem:[%s2682_s6 + $0xb8] sm:$0xff] }
  0xbd   : > { %v1349_v51 = vmax.f32 %v899_v57, %v924_v23 }
  0xbe   : > { %2494 = vst [vmem:[#allocation2 + $0xc0] sm:$0xff] %v2100_v12   ;;  %v1223_v27 = vld [vmem:[#allocation2 + $0x64] sm:$0xf] }
  0xbf   : > { %2507 = vst [vmem:[#allocation2 + $0x128] sm:$0xff] %v2165_v13   ;;  %v773_v16 = vpop.f32.mrf.mxu2  ;;  %v838_v17 = vpop.f32.mrf.mxu3  ;;  %v1323_v40 = vunpack.c.l.bf16 %v1223_v27  ;;  %v1954_v13 = vld [vmem:[%s2682_s6 + $0x118] sm:$0xff] }
  0xc0   : > { %v655_v18 = vpop.f32.mrf.mxu0  ;;  %v715_v19 = vpop.f32.mrf.mxu1  ;;  %v774_v26 = vadd.f32 %v2723_v46, %v773_v16  ;;  %v839_v28 = vadd.f32 %v2723_v46, %v838_v17 }
  0xc1   : > { %v2749_v21 = vadd.f32 %v2723_v46, %v655_v18  ;;  %v2752_v22 = vadd.f32 %v2723_v46, %v715_v19  ;;  %v1348_v49 = vmax.f32 %v898_v53, %v1323_v40 }
  0xc2   : > { %v948_v33 = vmax.f32 %v774_v26, 0.0  ;;  %v974_v43 = vmax.f32 %v839_v28, 0.0 }
  0xc3   : > { %v901_v24 = vmax.f32 %v2749_v21, 0.0  ;;  %v925_v25 = vmax.f32 %v2752_v22, 0.0 }
  0xc5   : > { %v1350_v19 = vmax.f32 %v900_v20, %v925_v25 }
  0xc6   : > { %v1273_v42 = vld [vmem:[#allocation2 + $0x12c] sm:$0xf] }
  0xc7   : > { %v775_v29 = vpop.f32.mrf.mxu2  ;;  %v840_v30 = vpop.f32.mrf.mxu3  ;;  %v1423_v50 = vunpack.c.l.bf16 %v1273_v42 }
  0xc8   : > { %v776_v34 = vadd.f32 %v2723_v46, %v775_v29  ;;  %v658_v35 = vpop.f32.mrf.mxu0  ;;  %v718_v36 = vpop.f32.mrf.mxu1  ;;  %v841_v39 = vadd.f32 %v2723_v46, %v840_v30 }
  0xc9   : > { %v2765_v45 = vadd.f32 %v2723_v46, %v658_v35  ;;  %v719_v48 = vadd.f32 %v2723_v46, %v718_v36  ;;  %v1448_v56 = vmax.f32 %v948_v33, %v1423_v50  ;;  %v1968_v50 = vld [vmem:[%s2682_s6 + $0x188] sm:$0xff] }
  0xca   : > { %v949_v41 = vmax.f32 %v776_v34, 0.0  ;;  %v975_v44 = vmax.f32 %v841_v39, 0.0 }
  0xcb   : > { %697 = vmatmul.bf16.gmra.mxu0 %v1929_v31  ;;  %757 = vmatmul.bf16.gmra.mxu1 %v1941_v32  ;;  %v902_v58 = vmax.f32 %v2765_v45, 0.0  ;;  %v926_v62 = vmax.f32 %v719_v48, 0.0  ;;  %v1548_v53 = vmax.f32 %v1348_v49, %v1448_v56  ;;  %v1955_v49 = vld [vmem:[%s2682_s6 + $0x120] sm:$0xff] }
  0xcc   : > { %817 = vmatmul.bf16.gmra.mxu2 %v1953_v37  ;;  %882 = vmatmul.bf16.gmra.mxu3 %v1966_v38  ;;  %v1449_v61 = vmax.f32 %v949_v41, %v974_v43 }
  0xcd   : > { %v1351_v23 = vmax.f32 %v901_v24, %v926_v62 }
  0xce   : > { %v1549_v55 = vmax.f32 %v1349_v51, %v1449_v61 }
  0xcf   : > { %v778_v52 = vpop.f32.mrf.mxu2  ;;  %v843_v54 = vpop.f32.mrf.mxu3 }
  0xd0   : > { %v660_v59 = vpop.f32.mrf.mxu0  ;;  %v720_v60 = vpop.f32.mrf.mxu1  ;;  %v779_v1 = vadd.f32 %v2723_v46, %v778_v52  ;;  %v2414_v2 = vpack.c.bf16 %v1549_v55, %v1548_v53  ;;  %v844_v3 = vadd.f32 %v2723_v46, %v843_v54 }
  0xd1   : > { %v2775_v63 = vadd.f32 %v2723_v46, %v660_v59  ;;  %v2778_v47 = vadd.f32 %v2723_v46, %v720_v60 }
  0xd2   : > { %2415 = vst [vmem:[%s2785_s13] sm:$0xff] %v2414_v2   ;;  %v950_v8 = vmax.f32 %v779_v1, 0.0  ;;  %v976_v16 = vmax.f32 %v844_v3, 0.0 }
  0xd3   : > { %v903_v57 = vmax.f32 %v2775_v63, 0.0  ;;  %v927_v0 = vmax.f32 %v2778_v47, 0.0 }
  0xd4   : > { %v1450_v30 = vmax.f32 %v950_v8, %v975_v44 }
  0xd5   : > { %v1352_v56 = vmax.f32 %v902_v58, %v927_v0 }
  0xd6   : > { %v1550_v21 = vmax.f32 %v1350_v19, %v1450_v30 }
  0xd7   : > { %v780_v4 = vpop.f32.mrf.mxu2  ;;  %v845_v5 = vpop.f32.mrf.mxu3 }
  0xd8   : > { %v781_v9 = vadd.f32 %v2723_v46, %v780_v4  ;;  %v846_v10 = vadd.f32 %v2723_v46, %v845_v5  ;;  %v663_v11 = vpop.f32.mrf.mxu0  ;;  %v723_v12 = vpop.f32.mrf.mxu1 }
  0xd9   : > { %v2803_v26 = vadd.f32 %v2723_v46, %v663_v11  ;;  %v724_v27 = vadd.f32 %v2723_v46, %v723_v12 }
  0xda   : > { %v951_v17 = vmax.f32 %v781_v9, 0.0  ;;  %v977_v18 = vmax.f32 %v846_v10, 0.0 }
  0xdb   : > { %702 = vmatmul.bf16.gmra.mxu0 %v1930_v6  ;;  %762 = vmatmul.bf16.gmra.mxu1 %v1942_v7  ;;  %v904_v22 = vmax.f32 %v2803_v26, 0.0  ;;  %v928_v25 = vmax.f32 %v724_v27, 0.0 }
  0xdc   : > { %822 = vmatmul.bf16.gmra.mxu2 %v1954_v13  ;;  %887 = vmatmul.bf16.gmra.mxu3 %v1967_v15  ;;  %v1451_v31 = vmax.f32 %v951_v17, %v976_v16 }
  0xdd   : > { %v1353_v61 = vmax.f32 %v903_v57, %v928_v25 }
  0xde   : > { %v1551_v24 = vmax.f32 %v1351_v23, %v1451_v31 }
  0xdf   : > { %v783_v28 = vpop.f32.mrf.mxu2  ;;  %v848_v29 = vpop.f32.mrf.mxu3 }
  0xe0   : > { %v665_v32 = vpop.f32.mrf.mxu0  ;;  %v725_v33 = vpop.f32.mrf.mxu1  ;;  %v2419_v36 = vpack.c.bf16 %v1551_v24, %v1550_v21  ;;  %v784_v37 = vadd.f32 %v2723_v46, %v783_v28  ;;  %v849_v38 = vadd.f32 %v2723_v46, %v848_v29 }
  0xe1   : > { %v666_v14 = vadd.f32 %v2723_v46, %v665_v32  ;;  %v726_v20 = vadd.f32 %v2723_v46, %v725_v33 }
  0xe2   : > { %2565 = vst [vmem:[%s2785_s13 + $0x8] sm:$0xff] %v2419_v36   ;;  %v952_v41 = vmax.f32 %v784_v37, 0.0  ;;  %v978_v51 = vmax.f32 %v849_v38, 0.0 }
  0xe3   : > { %v905_v34 = vmax.f32 %v666_v14, 0.0  ;;  %v929_v35 = vmax.f32 %v726_v20, 0.0 }
  0xe4   : > { %v1452_v53 = vmax.f32 %v952_v41, %v977_v18 }
  0xe5   : > { %v1354_v23 = vmax.f32 %v904_v22, %v929_v35 }
  0xe6   : > { %v1552_v0 = vmax.f32 %v1352_v56, %v1452_v53 }
  0xe7   : > { %v785_v39 = vpop.f32.mrf.mxu2  ;;  %v850_v40 = vpop.f32.mrf.mxu3 }
  0xe8   : > { %v786_v42 = vadd.f32 %v2723_v46, %v785_v39  ;;  %v851_v43 = vadd.f32 %v2723_v46, %v850_v40  ;;  %v668_v44 = vpop.f32.mrf.mxu0  ;;  %v728_v48 = vpop.f32.mrf.mxu1 }
  0xe9   : > { %v2819_v59 = vadd.f32 %v2723_v46, %v668_v44  ;;  %v729_v60 = vadd.f32 %v2723_v46, %v728_v48 }
  0xea   : > { %v953_v52 = vmax.f32 %v786_v42, 0.0  ;;  %v979_v54 = vmax.f32 %v851_v43, 0.0 }
  0xeb   : > { %v906_v3 = vmax.f32 %v2819_v59, 0.0  ;;  %v930_v4 = vmax.f32 %v729_v60, 0.0 }
  0xec   : > { %827 = vmatmul.bf16.gmra.mxu2 %v1955_v49  ;;  %892 = vmatmul.bf16.gmra.mxu3 %v1968_v50  ;;  %v1453_v55 = vmax.f32 %v953_v52, %v978_v51 }
  0xed   : > { %v1355_v26 = vmax.f32 %v905_v34, %v930_v4 }
  0xee   : > { %v1553_v5 = vmax.f32 %v1353_v61, %v1453_v55 }
  0xef   : > { %v788_v62 = vpop.f32.mrf.mxu2  ;;  %v853_v47 = vpop.f32.mrf.mxu3 }
  0xf0   : > { %v670_v1 = vpop.f32.mrf.mxu0  ;;  %v730_v2 = vpop.f32.mrf.mxu1  ;;  %v2424_v63 = vpack.c.bf16 %v1553_v5, %v1552_v0  ;;  %v789_v57 = vadd.f32 %v2723_v46, %v788_v62  ;;  %v854_v8 = vadd.f32 %v2723_v46, %v853_v47 }
  0xf1   : > { %v671_v45 = vadd.f32 %v2723_v46, %v670_v1  ;;  %v731_v58 = vadd.f32 %v2723_v46, %v730_v2 }
  0xf2   : > { %2566 = vst [vmem:[%s2785_s13 + $0x10] sm:$0xff] %v2424_v63   ;;  %v954_v11 = vmax.f32 %v789_v57, 0.0  ;;  %v980_v17 = vmax.f32 %v854_v8, 0.0 }
  0xf3   : > { %v907_v6 = vmax.f32 %v671_v45, 0.0  ;;  %v931_v7 = vmax.f32 %v731_v58, 0.0 }
  0xf4   : > { %v1454_v31 = vmax.f32 %v954_v11, %v979_v54 }
  0xf5   : > { %v1356_v54 = vmax.f32 %v906_v3, %v931_v7 }
  0xf6   : > { %v1554_v22 = vmax.f32 %v1354_v23, %v1454_v31 }
  0xf7   : > { %v790_v9 = vpop.f32.mrf.mxu2  ;;  %v855_v10 = vpop.f32.mrf.mxu3 }
  0xf8   : > { %v791_v12 = vadd.f32 %v2723_v46, %v790_v9  ;;  %v856_v13 = vadd.f32 %v2723_v46, %v855_v10  ;;  %v673_v15 = vpop.f32.mrf.mxu0  ;;  %v733_v16 = vpop.f32.mrf.mxu1 }
  0xf9   : > { %v2833_v27 = vadd.f32 %v2723_v46, %v673_v15  ;;  %v734_v28 = vadd.f32 %v2723_v46, %v733_v16 }
  0xfa   : > { %v955_v18 = vmax.f32 %v791_v12, 0.0  ;;  %v981_v19 = vmax.f32 %v856_v13, 0.0 }
  0xfb   : > { %v908_v20 = vmax.f32 %v2833_v27, 0.0  ;;  %v932_v34 = vmax.f32 %v734_v28, 0.0 }
  0xfc   : > { %v1455_v32 = vmax.f32 %v955_v18, %v980_v17 }
  0xfd   : > { %v1357_v60 = vmax.f32 %v907_v6, %v932_v34 }
  0xfe   : > { %v1555_v25 = vmax.f32 %v1355_v26, %v1455_v32 }
  0xff   : > { %v793_v29 = vpop.f32.mrf.mxu2  ;;  %v858_v30 = vpop.f32.mrf.mxu3 }
 0x100   : > { %v675_v33 = vpop.f32.mrf.mxu0  ;;  %v735_v14 = vpop.f32.mrf.mxu1  ;;  %v2429_v37 = vpack.c.bf16 %v1555_v25, %v1554_v22  ;;  %v794_v38 = vadd.f32 %v2723_v46, %v793_v29  ;;  %v859_v39 = vadd.f32 %v2723_v46, %v858_v30 }
 0x101   : > { %v676_v21 = vadd.f32 %v2723_v46, %v675_v33  ;;  %v736_v24 = vadd.f32 %v2723_v46, %v735_v14 }
 0x102   : > { %2567 = vst [vmem:[%s2785_s13 + $0x18] sm:$0xff] %v2429_v37   ;;  %v956_v42 = vmax.f32 %v794_v38, 0.0  ;;  %v982_v50 = vmax.f32 %v859_v39, 0.0 }
 0x103   : > { %v909_v35 = vmax.f32 %v676_v21, 0.0  ;;  %v933_v36 = vmax.f32 %v736_v24, 0.0 }
 0x104   : > { %v1456_v47 = vmax.f32 %v956_v42, %v981_v19 }
 0x105   : > { %v1358_v19 = vmax.f32 %v908_v20, %v933_v36 }
 0x106   : > { %v1556_v58 = vmax.f32 %v1356_v54, %v1456_v47 }
 0x107   : > { %v795_v40 = vpop.f32.mrf.mxu2  ;;  %v860_v41 = vpop.f32.mrf.mxu3 }
 0x108   : > { %v796_v43 = vadd.f32 %v2723_v46, %v795_v40  ;;  %v861_v44 = vadd.f32 %v2723_v46, %v860_v41  ;;  %v678_v48 = vpop.f32.mrf.mxu0  ;;  %v738_v49 = vpop.f32.mrf.mxu1 }
 0x109   : > { %v2845_v56 = vadd.f32 %v2723_v46, %v678_v48  ;;  %v739_v59 = vadd.f32 %v2723_v46, %v738_v49 }
 0x10a   : > { %v957_v51 = vmax.f32 %v796_v43, 0.0  ;;  %v983_v52 = vmax.f32 %v861_v44, 0.0 }
 0x10b   : > { %v910_v2 = vmax.f32 %v2845_v56, 0.0  ;;  %v934_v4 = vmax.f32 %v739_v59, 0.0 }
 0x10c   : > { %v1457_v53 = vmax.f32 %v957_v51, %v982_v50 }
 0x10d   : > { %v1359_v23 = vmax.f32 %v909_v35, %v934_v4 }
 0x10e   : > { %v1557_v0 = vmax.f32 %v1357_v60, %v1457_v53 }
 0x10f   : > { %v798_v61 = vpop.f32.mrf.mxu2  ;;  %v863_v62 = vpop.f32.mrf.mxu3 }
 0x110   : > { %v680_v55 = vpop.f32.mrf.mxu0  ;;  %v740_v1 = vpop.f32.mrf.mxu1  ;;  %v2434_v63 = vpack.c.bf16 %v1557_v0, %v1556_v58  ;;  %v799_v6 = vadd.f32 %v2723_v46, %v798_v61  ;;  %v864_v57 = vadd.f32 %v2723_v46, %v863_v62 }
 0x111   : > { %v681_v45 = vadd.f32 %v2723_v46, %v680_v55  ;;  %v741_v3 = vadd.f32 %v2723_v46, %v740_v1 }
 0x112   : > { %2568 = vst [vmem:[%s2785_s13 + $0x20] sm:$0xff] %v2434_v63   ;;  %v958_v10 = vmax.f32 %v799_v6, 0.0  ;;  %v984_v16 = vmax.f32 %v864_v57, 0.0 }
 0x113   : > { %v911_v5 = vmax.f32 %v681_v45, 0.0  ;;  %v935_v7 = vmax.f32 %v741_v3, 0.0 }
 0x114   : > { %v1458_v30 = vmax.f32 %v958_v10, %v983_v52 }
 0x115   : > { %v1360_v52 = vmax.f32 %v910_v2, %v935_v7 }
 0x116   : > { %v1558_v20 = vmax.f32 %v1358_v19, %v1458_v30 }
 0x117   : > { %v800_v8 = vpop.f32.mrf.mxu2  ;;  %v865_v9 = vpop.f32.mrf.mxu3 }
 0x118   : > { %v801_v11 = vadd.f32 %v2723_v46, %v800_v8  ;;  %v866_v12 = vadd.f32 %v2723_v46, %v865_v9  ;;  %v683_v13 = vpop.f32.mrf.mxu0  ;;  %v743_v15 = vpop.f32.mrf.mxu1 }
 0x119   : > { %v2857_v26 = vadd.f32 %v2723_v46, %v683_v13  ;;  %v744_v27 = vadd.f32 %v2723_v46, %v743_v15 }
 0x11a   : > { %v959_v17 = vmax.f32 %v801_v11, 0.0  ;;  %v985_v18 = vmax.f32 %v866_v12, 0.0 }
 0x11b   : > { %v912_v14 = vmax.f32 %v2857_v26, 0.0  ;;  %v936_v25 = vmax.f32 %v744_v27, 0.0 }
 0x11c   : > { %v1459_v31 = vmax.f32 %v959_v17, %v984_v16 }
 0x11d   : > { %v1361_v59 = vmax.f32 %v911_v5, %v936_v25 }
 0x11e   : > { %v1559_v22 = vmax.f32 %v1359_v23, %v1459_v31 }
 0x11f   : > { %v803_v28 = vpop.f32.mrf.mxu2  ;;  %v868_v29 = vpop.f32.mrf.mxu3 }
 0x120   : > { %v685_v32 = vpop.f32.mrf.mxu0  ;;  %v745_v33 = vpop.f32.mrf.mxu1  ;;  %v2439_v36 = vpack.c.bf16 %v1559_v22, %v1558_v20  ;;  %v804_v37 = vadd.f32 %v2723_v46, %v803_v28  ;;  %v869_v38 = vadd.f32 %v2723_v46, %v868_v29 }
 0x121   : > { %v686_v21 = vadd.f32 %v2723_v46, %v685_v32  ;;  %v746_v24 = vadd.f32 %v2723_v46, %v745_v33 }
 0x122   : > { %2569 = vst [vmem:[%s2785_s13 + $0x28] sm:$0xff] %v2439_v36   ;;  %v960_v41 = vmax.f32 %v804_v37, 0.0  ;;  %v986_v49 = vmax.f32 %v869_v38, 0.0 }
 0x123   : > { %v913_v34 = vmax.f32 %v686_v21, 0.0  ;;  %v937_v35 = vmax.f32 %v746_v24, 0.0 }
 0x124   : > { %v1460_v62 = vmax.f32 %v960_v41, %v985_v18 }
 0x125   : > { %v1362_v18 = vmax.f32 %v912_v14, %v937_v35 }
 0x126   : > { %v1560_v3 = vmax.f32 %v1360_v52, %v1460_v62 }
 0x127   : > { %v805_v39 = vpop.f32.mrf.mxu2  ;;  %v870_v40 = vpop.f32.mrf.mxu3 }
 0x128   : > { %v806_v42 = vadd.f32 %v2723_v46, %v805_v39  ;;  %v871_v43 = vadd.f32 %v2723_v46, %v870_v40  ;;  %v688_v44 = vpop.f32.mrf.mxu0  ;;  %v748_v48 = vpop.f32.mrf.mxu1 }
 0x129   : > { %v2869_v54 = vadd.f32 %v2723_v46, %v688_v44  ;;  %v749_v56 = vadd.f32 %v2723_v46, %v748_v48 }
 0x12a   : > { %v961_v50 = vmax.f32 %v806_v42, 0.0  ;;  %v987_v51 = vmax.f32 %v871_v43, 0.0 }
 0x12b   : > { %v914_v1 = vmax.f32 %v2869_v54, 0.0  ;;  %v938_v4 = vmax.f32 %v749_v56, 0.0 }
 0x12c   : > { %v1461_v47 = vmax.f32 %v961_v50, %v986_v49 }
 0x12d   : > { %v1363_v19 = vmax.f32 %v913_v34, %v938_v4 }
 0x12e   : > { %v1561_v58 = vmax.f32 %v1361_v59, %v1461_v47 }
 0x12f   : > { %v808_v60 = vpop.f32.mrf.mxu2  ;;  %v873_v61 = vpop.f32.mrf.mxu3 }
 0x130   : > { %v690_v53 = vpop.f32.mrf.mxu0  ;;  %v750_v55 = vpop.f32.mrf.mxu1  ;;  %v2444_v63 = vpack.c.bf16 %v1561_v58, %v1560_v3  ;;  %v809_v5 = vadd.f32 %v2723_v46, %v808_v60  ;;  %v874_v6 = vadd.f32 %v2723_v46, %v873_v61 }
 0x131   : > { %v691_v45 = vadd.f32 %v2723_v46, %v690_v53  ;;  %v751_v2 = vadd.f32 %v2723_v46, %v750_v55 }
 0x132   : > { %2570 = vst [vmem:[%s2785_s13 + $0x30] sm:$0xff] %v2444_v63   ;;  %v962_v9 = vmax.f32 %v809_v5, 0.0  ;;  %v988_v15 = vmax.f32 %v874_v6, 0.0 }
 0x133   : > { %v915_v0 = vmax.f32 %v691_v45, 0.0  ;;  %v939_v7 = vmax.f32 %v751_v2, 0.0 }
 0x134   : > { %v1462_v29 = vmax.f32 %v962_v9, %v987_v51 }
 0x135   : > { %v1364_v51 = vmax.f32 %v914_v1, %v939_v7 }
 0x136   : > { %v1562_v14 = vmax.f32 %v1362_v18, %v1462_v29 }
 0x137   : > { %v810_v57 = vpop.f32.mrf.mxu2  ;;  %v875_v8 = vpop.f32.mrf.mxu3 }
 0x138   : > { %v811_v10 = vadd.f32 %v2723_v46, %v810_v57  ;;  %v876_v11 = vadd.f32 %v2723_v46, %v875_v8  ;;  %v693_v12 = vpop.f32.mrf.mxu0  ;;  %v753_v13 = vpop.f32.mrf.mxu1 }
 0x139   : > { %v2881_v23 = vadd.f32 %v2723_v46, %v693_v12  ;;  %v754_v26 = vadd.f32 %v2723_v46, %v753_v13 }
 0x13a   : > { %v963_v16 = vmax.f32 %v811_v10, 0.0  ;;  %v989_v17 = vmax.f32 %v876_v11, 0.0 }
 0x13b   : > { %v916_v33 = vmax.f32 %v2881_v23, 0.0  ;;  %v940_v22 = vmax.f32 %v754_v26, 0.0 }
 0x13c   : > { %v1463_v30 = vmax.f32 %v963_v16, %v988_v15 }
 0x13d   : > { %v1365_v56 = vmax.f32 %v915_v0, %v940_v22  ;;  %v2611_v0 = vld [vmem:[%s2912_s2] ss:$0 sm:$0xff] }
 0x13e   : > { %v1563_v20 = vmax.f32 %v1363_v19, %v1463_v30 }
 0x13f   : > { %v813_v27 = vpop.f32.mrf.mxu2  ;;  %v878_v28 = vpop.f32.mrf.mxu3 }
 0x140   : > { %v695_v31 = vpop.f32.mrf.mxu0  ;;  %v755_v32 = vpop.f32.mrf.mxu1  ;;  %v2449_v35 = vpack.c.bf16 %v1563_v20, %v1562_v14  ;;  %v814_v36 = vadd.f32 %v2723_v46, %v813_v27  ;;  %v879_v37 = vadd.f32 %v2723_v46, %v878_v28 }
 0x141   : > { %v696_v21 = vadd.f32 %v2723_v46, %v695_v31  ;;  %v756_v24 = vadd.f32 %v2723_v46, %v755_v32 }
 0x142   : > { %2571 = vst [vmem:[%s2785_s13 + $0x38] sm:$0xff] %v2449_v35   ;;  %v964_v40 = vmax.f32 %v814_v36, 0.0  ;;  %v990_v48 = vmax.f32 %v879_v37, 0.0 }
 0x143   : > { %v917_v25 = vmax.f32 %v696_v21, 0.0  ;;  %v941_v34 = vmax.f32 %v756_v24, 0.0 }
 0x144   : > { %v1464_v61 = vmax.f32 %v964_v40, %v989_v17 }
 0x145   : > { %v1366_v17 = vmax.f32 %v916_v33, %v941_v34 }
 0x146   : > { %v1564_v2 = vmax.f32 %v1364_v51, %v1464_v61 }
 0x147   : > { %v815_v38 = vpop.f32.mrf.mxu2  ;;  %v880_v39 = vpop.f32.mrf.mxu3 }
 0x148   : > { %v816_v41 = vadd.f32 %v2723_v46, %v815_v38  ;;  %v881_v42 = vadd.f32 %v2723_v46, %v880_v39  ;;  %v698_v43 = vpop.f32.mrf.mxu0  ;;  %v758_v44 = vpop.f32.mrf.mxu1 }
 0x149   : > { %v2893_v52 = vadd.f32 %v2723_v46, %v698_v43  ;;  %v759_v54 = vadd.f32 %v2723_v46, %v758_v44 }
 0x14a   : > { %v965_v49 = vmax.f32 %v816_v41, 0.0  ;;  %v991_v50 = vmax.f32 %v881_v42, 0.0 }
 0x14b   : > { %v918_v55 = vmax.f32 %v2893_v52, 0.0  ;;  %v942_v4 = vmax.f32 %v759_v54, 0.0 }
 0x14c   : > { %v1465_v62 = vmax.f32 %v965_v49, %v990_v48 }
 0x14d   : > { %v1367_v18 = vmax.f32 %v917_v25, %v942_v4 }
 0x14e   : > { %v1565_v3 = vmax.f32 %v1365_v56, %v1465_v62 }
 0x14f   : > { %v818_v59 = vpop.f32.mrf.mxu2  ;;  %v883_v60 = vpop.f32.mrf.mxu3 }
 0x150   : > { %v700_v47 = vpop.f32.mrf.mxu0  ;;  %v760_v53 = vpop.f32.mrf.mxu1  ;;  %v2454_v63 = vpack.c.bf16 %v1565_v3, %v1564_v2  ;;  %v819_v5 = vadd.f32 %v2611_v0, %v818_v59  ;;  %v884_v6 = vadd.f32 %v2611_v0, %v883_v60 }
 0x151   : > { %v701_v45 = vadd.f32 %v2723_v46, %v700_v47  ;;  %v761_v1 = vadd.f32 %v2723_v46, %v760_v53 }
 0x152   : > { %2572 = vst [vmem:[%s2785_s13 + $0x40] sm:$0xff] %v2454_v63   ;;  %v966_v9 = vmax.f32 %v819_v5, 0.0  ;;  %v992_v46 = vmax.f32 %v884_v6, 0.0  ;;  %v1246_v5 = vld [vmem:[#allocation2 + $0xc0] sm:$0xf] }
 0x153   : > { %v919_v58 = vmax.f32 %v701_v45, 0.0  ;;  %v943_v7 = vmax.f32 %v761_v1, 0.0  ;;  %v1272_v6 = vld [vmem:[#allocation2 + $0x128] sm:$0x3] }
 0x154   : > { %v1466_v28 = vmax.f32 %v966_v9, %v991_v50  ;;  %v1346_v9 = vunpack.c.l.bf16 %v1246_v5 }
 0x155   : > { %v1368_v48 = vmax.f32 %v918_v55, %v943_v7  ;;  %v1247_v7 = vld [vmem:[#allocation2 + $0xc4] sm:$0x3] }
 0x156   : > { %v1566_v14 = vmax.f32 %v1366_v17, %v1466_v28 }
 0x157   : > { %v820_v57 = vpop.f32.mrf.mxu2  ;;  %v885_v8 = vpop.f32.mrf.mxu3 }
 0x158   : > { %v821_v10 = vadd.f32 %v2611_v0, %v820_v57  ;;  %v886_v11 = vadd.f32 %v2611_v0, %v885_v8  ;;  %v703_v12 = vpop.f32.mrf.mxu0  ;;  %v763_v13 = vpop.f32.mrf.mxu1  ;;  %v1347_v8 = vunpack.c.l.bf16 %v1247_v7 }
 0x159   : > { %v704_v19 = vadd.f32 %v2611_v0, %v703_v12  ;;  %v764_v23 = vadd.f32 %v2611_v0, %v763_v13 }
 0x15a   : > { %v967_v15 = vmax.f32 %v821_v10, 0.0  ;;  %v993_v16 = vmax.f32 %v886_v11, 0.0  ;;  %v1422_v10 = vunpack.c.l.bf16 %v1272_v6 }
 0x15b   : > { %v920_v32 = vmax.f32 %v704_v19, 0.0  ;;  %v944_v22 = vmax.f32 %v764_v23, 0.0 }
 0x15c   : > { %v1467_v29 = vmax.f32 %v967_v15, %v992_v46 }
 0x15d   : > { %v1369_v49 = vmax.f32 %v919_v58, %v944_v22  ;;  %v1222_v58 = vld [vmem:[#allocation2 + $0x60] sm:$0x3] }
 0x15e   : > { %v1567_v20 = vmax.f32 %v1367_v18, %v1467_v29  ;;  %v1322_v57 = vunpack.c.l.bf16 %v1222_v58 }
 0x15f   : > { %v823_v26 = vpop.f32.mrf.mxu2  ;;  %v888_v27 = vpop.f32.mrf.mxu3 }
 0x160   : > { %v705_v30 = vpop.f32.mrf.mxu0  ;;  %v765_v31 = vpop.f32.mrf.mxu1  ;;  %v2459_v37 = vpack.c.bf16 %v1567_v20, %v1566_v14  ;;  %v824_v33 = vadd.f32 %v2611_v0, %v823_v26  ;;  %v889_v25 = vadd.f32 %v2611_v0, %v888_v27 }
 0x161   : > { %v706_v21 = vadd.f32 %v2611_v0, %v705_v30  ;;  %v766_v24 = vadd.f32 %v2611_v0, %v765_v31 }
 0x162   : > { %2573 = vst [vmem:[%s2785_s13 + $0x48] sm:$0xff] %v2459_v37   ;;  %v968_v39 = vmax.f32 %v824_v33, 0.0  ;;  %v994_v42 = vmax.f32 %v889_v25, 0.0 }
 0x163   : > { %v921_v35 = vmax.f32 %v706_v21, 0.0  ;;  %v945_v36 = vmax.f32 %v766_v24, 0.0 }
 0x164   : > { %v1468_v52 = vmax.f32 %v968_v39, %v993_v16  ;;  %v1372_v16 = vmax.f32 %v1322_v57, %v1347_v8 }
 0x165   : > { %v1370_v11 = vmax.f32 %v920_v32, %v945_v36  ;;  %v1371_v17 = vmax.f32 %v921_v35, %v1346_v9 }
 0x166   : > { %v1568_v56 = vmax.f32 %v1368_v48, %v1468_v52 }
 0x167   : > { %v825_v34 = vpop.f32.mrf.mxu2  ;;  %v890_v38 = vpop.f32.mrf.mxu3 }
 0x168   : > { %v826_v40 = vadd.f32 %v2611_v0, %v825_v34  ;;  %v891_v41 = vadd.f32 %v2611_v0, %v890_v38 }
 0x16a   : > { %v969_v43 = vmax.f32 %v826_v40, 0.0  ;;  %v995_v44 = vmax.f32 %v891_v41, 0.0 }
 0x16c   : > { %v1469_v54 = vmax.f32 %v969_v43, %v994_v42 }
 0x16e   : > { %v1569_v59 = vmax.f32 %v1369_v49, %v1469_v54 }
 0x16f   : > { %v828_v50 = vpop.f32.mrf.mxu2  ;;  %v893_v51 = vpop.f32.mrf.mxu3 }
 0x170   : > { %v2464_v60 = vpack.c.bf16 %v1569_v59, %v1568_v56  ;;  %v829_v61 = vadd.f32 %v2611_v0, %v828_v50  ;;  %v894_v62 = vadd.f32 %v2611_v0, %v893_v51 }
 0x172   : > { %2574 = vst [vmem:[%s2785_s13 + $0x50] sm:$0xff] %v2464_v60   ;;  %v970_v4 = vmax.f32 %v829_v61, 0.0  ;;  %v996_v2 = vmax.f32 %v894_v62, 0.0 }
 0x174   : > { %v1470_v46 = vmax.f32 %v970_v4, %v995_v44 }
 0x176   : > { %v1570_v23 = vmax.f32 %v1370_v11, %v1470_v46 }
 0x177   : > { %v830_v47 = vpop.f32.mrf.mxu2  ;;  %v895_v53 = vpop.f32.mrf.mxu3 }
 0x178   : > { %v831_v45 = vadd.f32 %v2611_v0, %v830_v47  ;;  %v896_v1 = vadd.f32 %v2611_v0, %v895_v53 }
 0x17a   : > { %v971_v3 = vmax.f32 %v831_v45, 0.0  ;;  %v997_v63 = vmax.f32 %v896_v1, 0.0 }
 0x17c   : > { %v2225_v55 = vpack.c.bf16 %v997_v63, %v996_v2 }
 0x17e   : > { %2519 = vst [vmem:[#allocation2 + $0x188] sm:$0xff] %v2225_v55  }
 0x185   : > { %v1296_v12 = vld [vmem:[#allocation2 + $0x188] sm:$0xf]  ;;  %v1297_v13 = vld [vmem:[#allocation2 + $0x18c] sm:$0x3] }
 0x186   : > { %v1446_v0 = vunpack.c.l.bf16 %v1296_v12  ;;  %v1447_v15 = vunpack.c.l.bf16 %v1297_v13 }
 0x188   : > { %v1471_v18 = vmax.f32 %v971_v3, %v1446_v0  ;;  %v1472_v19 = vmax.f32 %v1422_v10, %v1447_v15 }
 0x18a   : > { %v1571_v26 = vmax.f32 %v1371_v17, %v1471_v18  ;;  %v1572_v27 = vmax.f32 %v1372_v16, %v1472_v19 }
 0x18c   : > { %v1597_v28 = vpack.c.bf16 %v1572_v27, %v1572_v27  ;;  %v2469_v29 = vpack.c.bf16 %v1571_v26, %v1570_v23 }
 0x18e   : > { %2575 = vst [vmem:[%s2785_s13 + $0x58] sm:$0xff] %v2469_v29  }
 0x18f   : > { %1622 = vst [vmem:[%s2785_s13 + $0x60] sm:$0x3] %v1597_v28 }
 0x190 PF: > { %s13_s12 = sadd.s32 1, %s2618_s12  }
 0x191   : > { %p10_p4 = scmp.ge.s32.totalorder %s13_s12, 4  }
 0x193   :  { %12 = sbr.rel (!%p10_p4) target bundleno = 1 (0x1), region = 62 }

// kernel: cnn_forward.4
= control target key start
LH: loop header
LB: loop body
LE: loop exit
PB: predicated region body
PF: predicated region fallthrough
CT: control target
= control target key end

     0   :  { %s6536_s12 = smov 0   ;;  %s7880_s0 = inlined_call_operand.vmem [shape: bf16[2,128,3200], index: 0, kind: input, shape index: {}]   ;;  %s7881_s1 = inlined_call_operand.vmem [shape: bf16[3200,128], index: 1, kind: input, shape index: {}]   ;;  %s7882_s2 = inlined_call_operand.vmem [shape: f32[1,128], index: 2, kind: input, shape index: {}]   ;;  %s7883_s3 = inlined_call_operand.vmem [shape: bf16[2,25,128], index: 3, kind: output, shape index: {}]  }
   0x1 LB: > { %s4392_s13 = sadd.s32 4294967295, %s6514_s12   ;;  %p4396_p0 = scmp.ge.s32.totalorder %s6514_s12, 1  ;;  %s6514_s12 = sphi %s6536_s12, %s13_s12  }
   0x2   : > { %p137_p1 = scmp.lt.s32.totalorder %s6514_s12, 3 }
   0x4   : > { %p138_p2 = pnand %p4396_p0, %p137_p1 }
   0x5   : > { %p161_p3 = scmp.lt.s32.totalorder (!%p138_p2), %s4392_s13, 1 }
   0x6   : > { %141 = sbr.rel (%p138_p2) target bundleno = 995 (0x3e3), region = 32 }
   0xb   : > { %v6210_v0 = vld [vmem:[%s7881_s1 + $0x38] sm:$0xff]  ;;  %v6209_v1 = vld [vmem:[%s7881_s1 + $0x30] sm:$0xff]  ;;  %v6208_v2 = vld [vmem:[%s7881_s1 + $0x28] sm:$0xff]  ;;  %s7885_s13 = smov (!%p161_p3, %s4392_s13), 1  ;;  %vm4331_vm0 = vcmask 1040384  }
   0xc   : > { %6474 = vmatpush.bf16.msra.mxu1 %v6210_v0  ;;  %6475 = vmatpush.bf16.msra.mxu2 %v6210_v0  ;;  %v6207_v3 = vld [vmem:[%s7881_s1 + $0x20] sm:$0xff]  ;;  %v6206_v4 = vld [vmem:[%s7881_s1 + $0x18] sm:$0xff]  ;;  %v6205_v5 = vld [vmem:[%s7881_s1 + $0x10] sm:$0xff]  ;;  %s6498_s26 = smul.u32 1600, %s7885_s13  ;;  %vm4332_vm1 = vsmask.f32 256 }
   0xd   : > { %6476 = vmatpush.bf16.msra.mxu3 %v6210_v0  ;;  %2991 = vmatpush.bf16.msra.mxu0 %v6210_v0  ;;  %v6204_v6 = vld [vmem:[%s7881_s1 + $0x8] sm:$0xff]  ;;  %v6203_v7 = vld [vmem:[%s7881_s1] sm:$0xff]  ;;  %v6226_v16 = vld [vmem:[%s7881_s1 + $0xb8] sm:$0xff] }
   0xe   : > { %s6571_s4 = scalar_lea.vmem %s7880_s0, %s6498_s26  ;;  %v6218_v17 = vld [vmem:[%s7881_s1 + $0x78] sm:$0xff]  ;;  %v6225_v24 = vld [vmem:[%s7881_s1 + $0xb0] sm:$0xff]  ;;  %v6224_v28 = vld [vmem:[%s7881_s1 + $0xa8] sm:$0xff] }
   0xf   : > { %v4602_v8 = vld [vmem:[%s6571_s4 + $0x190] sm:$0xf]  ;;  %v6065_v9 = vld [vmem:[%s6571_s4 + $0x1f0] sm:$0xf0]  ;;  %v4802_v10 = vld [vmem:[%s6571_s4 + $0x320] sm:$0xf] }
  0x10   : > { %6477 = vmatpush.bf16.msra.mxu1 %v6209_v1  ;;  %6478 = vmatpush.bf16.msra.mxu2 %v6209_v1  ;;  %v6115_v11 = vld [vmem:[%s6571_s4 + $0x380] sm:$0xf0]  ;;  %v5002_v12 = vld [vmem:[%s6571_s4 + $0x4b0] sm:$0xf]  ;;  %v6165_v13 = vld [vmem:[%s6571_s4 + $0x510] sm:$0xf0]  ;;  %v4603_v18 = vor.u32 %v6065_v9, %v4602_v8 }
  0x11   : > { %6479 = vmatpush.bf16.msra.mxu3 %v6209_v1  ;;  %2992 = vmatpush.bf16.msra.mxu0 %v6209_v1  ;;  %v4402_v14 = vld [vmem:[%s6571_s4] sm:$0xf]  ;;  %v6015_v15 = vld [vmem:[%s6571_s4 + $0x60] sm:$0xf0]  ;;  %v4803_v19 = vor.u32 %v6115_v11, %v4802_v10  ;;  %v5003_v20 = vor.u32 %v6165_v13, %v5002_v12  ;;  %v6234_v22 = vld [vmem:[%s7881_s1 + $0xf8] sm:$0xff] }
  0x12   : > { %v4403_v21 = vor.u32 %v6015_v15, %v4402_v14  ;;  %v6242_v23 = vld [vmem:[%s7881_s1 + $0x138] sm:$0xff]  ;;  %v6217_v25 = vld [vmem:[%s7881_s1 + $0x70] sm:$0xff]  ;;  %v6216_v29 = vld [vmem:[%s7881_s1 + $0x68] sm:$0xff] }
  0x13   : > { %v6233_v26 = vld [vmem:[%s7881_s1 + $0xf0] sm:$0xff]  ;;  %v6232_v30 = vld [vmem:[%s7881_s1 + $0xe8] sm:$0xff]  ;;  %v6223_v32 = vld [vmem:[%s7881_s1 + $0xa0] sm:$0xff] }
  0x14   : > { %6480 = vmatpush.bf16.msra.mxu1 %v6208_v2  ;;  %6481 = vmatpush.bf16.msra.mxu2 %v6208_v2  ;;  %v6241_v27 = vld [vmem:[%s7881_s1 + $0x130] sm:$0xff]  ;;  %v6240_v31 = vld [vmem:[%s7881_s1 + $0x128] sm:$0xff]  ;;  %v6215_v33 = vld [vmem:[%s7881_s1 + $0x60] sm:$0xff] }
  0x15   : > { %6482 = vmatpush.bf16.msra.mxu3 %v6208_v2  ;;  %2993 = vmatpush.bf16.msra.mxu0 %v6208_v2  ;;  %v6231_v34 = vld [vmem:[%s7881_s1 + $0xe0] sm:$0xff]  ;;  %v4702_v36 = vld [vmem:[%s6571_s4 + $0x258] sm:$0xf]  ;;  %v6090_v37 = vld [vmem:[%s6571_s4 + $0x2b8] sm:$0xf0] }
  0x16   : > { %v6239_v35 = vld [vmem:[%s7881_s1 + $0x120] sm:$0xff]  ;;  %v4902_v38 = vld [vmem:[%s6571_s4 + $0x3e8] sm:$0xf]  ;;  %v6140_v39 = vld [vmem:[%s6571_s4 + $0x448] sm:$0xf0]  ;;  %v4703_v46 = vor.u32 %v6090_v37, %v4702_v36 }
  0x17   : > { %v5102_v40 = vld [vmem:[%s6571_s4 + $0x578] sm:$0xf]  ;;  %v6190_v41 = vld [vmem:[%s6571_s4 + $0x5d8] sm:$0xf0]  ;;  %v4502_v42 = vld [vmem:[%s6571_s4 + $0xc8] sm:$0xf]  ;;  %v4903_v47 = vor.u32 %v6140_v39, %v4902_v38 }
  0x18   : > { %6483 = vmatpush.bf16.msra.mxu1 %v6207_v3  ;;  %6484 = vmatpush.bf16.msra.mxu2 %v6207_v3  ;;  %v6040_v43 = vld [vmem:[%s6571_s4 + $0x128] sm:$0xf0]  ;;  %v6222_v44 = vld [vmem:[%s7881_s1 + $0x98] sm:$0xff]  ;;  %v5103_v48 = vor.u32 %v6190_v41, %v5102_v40  ;;  %v6221_v52 = vld [vmem:[%s7881_s1 + $0x90] sm:$0xff] }
  0x19   : > { %6485 = vmatpush.bf16.msra.mxu3 %v6207_v3  ;;  %2994 = vmatpush.bf16.msra.mxu0 %v6207_v3  ;;  %v6214_v45 = vld [vmem:[%s7881_s1 + $0x58] sm:$0xff]  ;;  %v4503_v49 = vor.u32 %v6040_v43, %v4502_v42  ;;  %v6213_v53 = vld [vmem:[%s7881_s1 + $0x50] sm:$0xff]  ;;  %v6220_v56 = vld [vmem:[%s7881_s1 + $0x88] sm:$0xff] }
  0x1a   : > { %v6230_v50 = vld [vmem:[%s7881_s1 + $0xd8] sm:$0xff]  ;;  %v6229_v54 = vld [vmem:[%s7881_s1 + $0xd0] sm:$0xff]  ;;  %v6212_v57 = vld [vmem:[%s7881_s1 + $0x48] sm:$0xff] }
  0x1b   : > { %v6238_v51 = vld [vmem:[%s7881_s1 + $0x118] sm:$0xff]  ;;  %v6237_v55 = vld [vmem:[%s7881_s1 + $0x110] sm:$0xff]  ;;  %v6228_v58 = vld [vmem:[%s7881_s1 + $0xc8] sm:$0xff] }
  0x1c   : > { %6486 = vmatpush.bf16.msra.mxu1 %v6206_v4  ;;  %6487 = vmatpush.bf16.msra.mxu2 %v6206_v4  ;;  %v6236_v59 = vld [vmem:[%s7881_s1 + $0x108] sm:$0xff]  ;;  %v6219_v60 = vld [vmem:[%s7881_s1 + $0x80] sm:$0xff]  ;;  %v6258_v2 = vld [vmem:[%s7881_s1 + $0x1b8] sm:$0xff] }
  0x1d   : > { %6488 = vmatpush.bf16.msra.mxu3 %v6206_v4  ;;  %2995 = vmatpush.bf16.msra.mxu0 %v6206_v4  ;;  %v6211_v61 = vld [vmem:[%s7881_s1 + $0x40] sm:$0xff]  ;;  %v4404_v1 = vld [vmem:[%s6571_s4 + $0x64] sm:$0xf0]  ;;  %v6250_v3 = vld [vmem:[%s7881_s1 + $0x178] sm:$0xff] }
  0x1e   : > { %v6003_v62 = vld [vmem:[%s6571_s4 + $0x4] sm:$0xf]  ;;  %v4410_v4 = vld [vmem:[%s6571_s4 + $0x8] sm:$0xf]  ;;  %v4418_v8 = vld [vmem:[%s6571_s4 + $0x10] sm:$0xf] }
  0x1f   : > { %v6227_v63 = vld [vmem:[%s7881_s1 + $0xc0] sm:$0xff]  ;;  %v6017_v9 = vld [vmem:[%s6571_s4 + $0x70] sm:$0xf0]  ;;  %v6266_v10 = vld [vmem:[%s7881_s1 + $0x1f8] sm:$0xff]  ;;  %v4407_v12 = vor.u32 %v6003_v62, %v4404_v1 }
  0x20   : > { %6489 = vmatpush.bf16.msra.mxu1 %v6205_v5  ;;  %6490 = vmatpush.bf16.msra.mxu2 %v6205_v5  ;;  %v6235_v0 = vld [vmem:[%s7881_s1 + $0x100] sm:$0xff]  ;;  %v6274_v11 = vld [vmem:[%s7881_s1 + $0x238] sm:$0xff]  ;;  %v4419_v15 = vor.u32 %v6017_v9, %v4418_v8  ;;  %v6053_v40 = vld [vmem:[%s6571_s4 + $0x194] sm:$0xf] }
  0x21   : > { %6491 = vmatpush.bf16.msra.mxu3 %v6205_v5  ;;  %2996 = vmatpush.bf16.msra.mxu0 %v6205_v5  ;;  %v6016_v5 = vld [vmem:[%s6571_s4 + $0x68] sm:$0xf0]  ;;  %v6255_v36 = vld [vmem:[%s7881_s1 + $0x1a0] sm:$0xff]  ;;  %v4604_v41 = vld [vmem:[%s6571_s4 + $0x1f4] sm:$0xf0] }
  0x22   : > { %v4411_v13 = vor.u32 %v6016_v5, %v4410_v4  ;;  %v6263_v37 = vld [vmem:[%s7881_s1 + $0x1e0] sm:$0xff]  ;;  %v4610_v42 = vld [vmem:[%s6571_s4 + $0x198] sm:$0xf]  ;;  %v6066_v43 = vld [vmem:[%s6571_s4 + $0x1f8] sm:$0xf0] }
  0x23   : > { %v6247_v38 = vld [vmem:[%s7881_s1 + $0x160] sm:$0xff]  ;;  %v4718_v62 = vld [vmem:[%s6571_s4 + $0x268] sm:$0xf]  ;;  %v6253_v4 = vld [vmem:[%s7881_s1 + $0x190] sm:$0xff] }
  0x24   : > { %6492 = vmatpush.bf16.msra.mxu1 %v6204_v6  ;;  %6493 = vmatpush.bf16.msra.mxu2 %v6204_v6  ;;  %v6271_v39 = vld [vmem:[%s7881_s1 + $0x220] sm:$0xff]  ;;  %v6261_v5 = vld [vmem:[%s7881_s1 + $0x1d0] sm:$0xff]  ;;  %v4804_v9 = vld [vmem:[%s6571_s4 + $0x384] sm:$0xf0] }
  0x25   : > { %6494 = vmatpush.bf16.msra.mxu3 %v6204_v6  ;;  %2997 = vmatpush.bf16.msra.mxu0 %v6204_v6  ;;  %v6004_v6 = vld [vmem:[%s6571_s4 + $0xc] sm:$0xf]  ;;  %v6103_v8 = vld [vmem:[%s6571_s4 + $0x324] sm:$0xf]  ;;  %vm4333_vm2 = vmand %vm4331_vm0, %vm4332_vm1 }
  0x28   : > { %6495 = vmatpush.bf16.msra.mxu1 %v6203_v7  ;;  %6496 = vmatpush.bf16.msra.mxu2 %v6203_v7 }
  0x29   : > { %6497 = vmatpush.bf16.msra.mxu3 %v6203_v7  ;;  %2998 = vmatpush.bf16.msra.mxu0 %v6203_v7  ;;  %v4412_v7 = vld [vmem:[%s6571_s4 + $0x6c] sm:$0xf0] }
  0x2a   : > { %v4415_v14 = vor.u32 %v6004_v6, %v4412_v7  ;;  %v6245_v6 = vld [vmem:[%s7881_s1 + $0x150] sm:$0xff] }
  0x2b   : > { %3009 = vmatmul.bf16.vlgmr.msra.gmra.mxu1 %v4603_v18  ;;  %3019 = vmatmul.bf16.vlgmr.msra.gmra.mxu2 %v4803_v19  ;;  %v6265_v18 = vld [vmem:[%s7881_s1 + $0x1f0] sm:$0xff] }
  0x2c   : > { %3089 = vmatpush.bf16.msrb.mxu2 %v6226_v16  ;;  %3040 = vmatpush.bf16.msrb.mxu1 %v6218_v17  ;;  %v6257_v16 = vld [vmem:[%s7881_s1 + $0x1b0] sm:$0xff] }
  0x2d   : > { %3029 = vmatmul.bf16.vlgmr.msra.gmra.mxu3 %v5003_v20  ;;  %2999 = vmatmul.bf16.vlgmr.msra.gmra.mxu0 %v4403_v21  ;;  %v6249_v17 = vld [vmem:[%s7881_s1 + $0x170] sm:$0xff]  ;;  %v6256_v20 = vld [vmem:[%s7881_s1 + $0x1a8] sm:$0xff] }
  0x2e   : > { %3138 = vmatpush.bf16.msrb.mxu3 %v6234_v22  ;;  %3187 = vmatpush.bf16.msrb.mxu0 %v6242_v23  ;;  %v6273_v19 = vld [vmem:[%s7881_s1 + $0x230] sm:$0xff]  ;;  %v6248_v21 = vld [vmem:[%s7881_s1 + $0x168] sm:$0xff] }
  0x2f   : > { %v6264_v22 = vld [vmem:[%s7881_s1 + $0x1e8] sm:$0xff]  ;;  %v6269_v7 = vld [vmem:[%s7881_s1 + $0x210] sm:$0xff] }
  0x30   : > { %3090 = vmatpush.bf16.msrb.mxu2 %v6225_v24  ;;  %3041 = vmatpush.bf16.msrb.mxu1 %v6217_v25  ;;  %v6272_v23 = vld [vmem:[%s7881_s1 + $0x228] sm:$0xff]  ;;  %v4504_v25 = vld [vmem:[%s6571_s4 + $0x12c] sm:$0xf0] }
  0x31   : > { %v6028_v24 = vld [vmem:[%s6571_s4 + $0xcc] sm:$0xf] }
  0x32   : > { %3139 = vmatpush.bf16.msrb.mxu3 %v6233_v26  ;;  %3188 = vmatpush.bf16.msrb.mxu0 %v6241_v27  ;;  %v4510_v26 = vld [vmem:[%s6571_s4 + $0xd0] sm:$0xf]  ;;  %v6041_v27 = vld [vmem:[%s6571_s4 + $0x130] sm:$0xf0] }
  0x34   : > { %3091 = vmatpush.bf16.msrb.mxu2 %v6224_v28  ;;  %3042 = vmatpush.bf16.msrb.mxu1 %v6216_v29  ;;  %v6029_v28 = vld [vmem:[%s6571_s4 + $0xd4] sm:$0xf]  ;;  %v4512_v29 = vld [vmem:[%s6571_s4 + $0x134] sm:$0xf0] }
  0x36   : > { %3140 = vmatpush.bf16.msrb.mxu3 %v6232_v30  ;;  %3189 = vmatpush.bf16.msrb.mxu0 %v6240_v31  ;;  %v4518_v30 = vld [vmem:[%s6571_s4 + $0xd8] sm:$0xf]  ;;  %v6042_v31 = vld [vmem:[%s6571_s4 + $0x138] sm:$0xf0] }
  0x38   : > { %3092 = vmatpush.bf16.msrb.mxu2 %v6223_v32  ;;  %3043 = vmatpush.bf16.msrb.mxu1 %v6215_v33  ;;  %v4507_v32 = vor.u32 %v6028_v24, %v4504_v25  ;;  %v4511_v33 = vor.u32 %v6041_v27, %v4510_v26  ;;  %v6128_v24 = vld [vmem:[%s6571_s4 + $0x3ec] sm:$0xf]  ;;  %v4904_v25 = vld [vmem:[%s6571_s4 + $0x44c] sm:$0xf0]  ;;  %v6141_v27 = vld [vmem:[%s6571_s4 + $0x450] sm:$0xf0] }
  0x39   : > { %v4910_v26 = vld [vmem:[%s6571_s4 + $0x3f0] sm:$0xf] }
  0x3a   : > { %3141 = vmatpush.bf16.msrb.mxu3 %v6231_v34  ;;  %3190 = vmatpush.bf16.msrb.mxu0 %v6239_v35  ;;  %v4515_v34 = vor.u32 %v6029_v28, %v4512_v29  ;;  %v4519_v35 = vor.u32 %v6042_v31, %v4518_v30  ;;  %v6129_v28 = vld [vmem:[%s6571_s4 + $0x3f4] sm:$0xf]  ;;  %v4912_v29 = vld [vmem:[%s6571_s4 + $0x454] sm:$0xf0]  ;;  %v6142_v31 = vld [vmem:[%s6571_s4 + $0x458] sm:$0xf0] }
  0x3b   : > { %3014 = vmatmul.bf16.gmra.mxu1 %v4703_v46  ;;  %3024 = vmatmul.bf16.gmra.mxu2 %v4903_v47  ;;  %v4618_v46 = vld [vmem:[%s6571_s4 + $0x1a0] sm:$0xf]  ;;  %v6067_v47 = vld [vmem:[%s6571_s4 + $0x200] sm:$0xf0]  ;;  %v4918_v30 = vld [vmem:[%s6571_s4 + $0x3f8] sm:$0xf] }
  0x3c   : > { %3093 = vmatpush.bf16.msrb.mxu2 %v6222_v44  ;;  %3044 = vmatpush.bf16.msrb.mxu1 %v6214_v45  ;;  %v6054_v44 = vld [vmem:[%s6571_s4 + $0x19c] sm:$0xf]  ;;  %v4612_v45 = vld [vmem:[%s6571_s4 + $0x1fc] sm:$0xf0] }
  0x3d   : > { %3034 = vmatmul.bf16.gmra.mxu3 %v5103_v48  ;;  %3004 = vmatmul.bf16.gmra.mxu0 %v4503_v49  ;;  %v4607_v48 = vor.u32 %v6053_v40, %v4604_v41  ;;  %v4611_v49 = vor.u32 %v6066_v43, %v4610_v42  ;;  %v6153_v40 = vld [vmem:[%s6571_s4 + $0x4b4] sm:$0xf]  ;;  %v5004_v41 = vld [vmem:[%s6571_s4 + $0x514] sm:$0xf0]  ;;  %v6166_v43 = vld [vmem:[%s6571_s4 + $0x518] sm:$0xf0] }
  0x3e   : > { %3142 = vmatpush.bf16.msrb.mxu3 %v6230_v50  ;;  %3191 = vmatpush.bf16.msrb.mxu0 %v6238_v51  ;;  %v4615_v50 = vor.u32 %v6054_v44, %v4612_v45  ;;  %v4619_v51 = vor.u32 %v6067_v47, %v4618_v46  ;;  %v5010_v42 = vld [vmem:[%s6571_s4 + $0x4b8] sm:$0xf]  ;;  %v6154_v44 = vld [vmem:[%s6571_s4 + $0x4bc] sm:$0xf]  ;;  %v5012_v45 = vld [vmem:[%s6571_s4 + $0x51c] sm:$0xf0] }
  0x3f   : > { %v5018_v46 = vld [vmem:[%s6571_s4 + $0x4c0] sm:$0xf]  ;;  %v6167_v47 = vld [vmem:[%s6571_s4 + $0x520] sm:$0xf0] }
  0x40   : > { %3094 = vmatpush.bf16.msrb.mxu2 %v6221_v52  ;;  %3045 = vmatpush.bf16.msrb.mxu1 %v6213_v53  ;;  %v6254_v52 = vld [vmem:[%s7881_s1 + $0x198] sm:$0xff] }
  0x41   : > { %v6262_v53 = vld [vmem:[%s7881_s1 + $0x1d8] sm:$0xff] }
  0x42   : > { %3143 = vmatpush.bf16.msrb.mxu3 %v6229_v54  ;;  %3192 = vmatpush.bf16.msrb.mxu0 %v6237_v55  ;;  %v6246_v54 = vld [vmem:[%s7881_s1 + $0x158] sm:$0xff] }
  0x43   : > { %v6270_v55 = vld [vmem:[%s7881_s1 + $0x218] sm:$0xff] }
  0x44   : > { %3095 = vmatpush.bf16.msrb.mxu2 %v6220_v56  ;;  %3046 = vmatpush.bf16.msrb.mxu1 %v6212_v57  ;;  %v6078_v56 = vld [vmem:[%s6571_s4 + $0x25c] sm:$0xf]  ;;  %v4704_v57 = vld [vmem:[%s6571_s4 + $0x2bc] sm:$0xf0] }
  0x46   : > { %3144 = vmatpush.bf16.msrb.mxu3 %v6228_v58  ;;  %3193 = vmatpush.bf16.msrb.mxu0 %v6236_v59  ;;  %v4710_v58 = vld [vmem:[%s6571_s4 + $0x260] sm:$0xf]  ;;  %v6091_v59 = vld [vmem:[%s6571_s4 + $0x2c0] sm:$0xf0] }
  0x47   : > { %v4711_v1 = vor.u32 %v6091_v59, %v4710_v58 }
  0x48   : > { %3096 = vmatpush.bf16.msrb.mxu2 %v6219_v60  ;;  %3047 = vmatpush.bf16.msrb.mxu1 %v6211_v61  ;;  %v6079_v60 = vld [vmem:[%s6571_s4 + $0x264] sm:$0xf]  ;;  %v4712_v61 = vld [vmem:[%s6571_s4 + $0x2c4] sm:$0xf0] }
  0x4a   : > { %3145 = vmatpush.bf16.msrb.mxu3 %v6227_v63  ;;  %3194 = vmatpush.bf16.msrb.mxu0 %v6235_v0  ;;  %v6092_v63 = vld [vmem:[%s6571_s4 + $0x2c8] sm:$0xf0]  ;;  %v4707_v0 = vor.u32 %v6078_v56, %v4704_v57  ;;  %v6853_v56 = vld [vmem:[%s7882_s2] ss:$0 sm:$0xff] }
  0x4b   : > { %3048 = vmatmul.bf16.vlgmr.msrb.gmra.mxu1 %v4407_v12  ;;  %3097 = vmatmul.bf16.vlgmr.msrb.gmra.mxu2 %v4411_v13  ;;  %v6104_v12 = vld [vmem:[%s6571_s4 + $0x32c] sm:$0xf]  ;;  %v4812_v13 = vld [vmem:[%s6571_s4 + $0x38c] sm:$0xf0] }
  0x4c   : > { %3285 = vmatpush.bf16.msra.mxu2 %v6258_v2  ;;  %3236 = vmatpush.bf16.msra.mxu1 %v6250_v3  ;;  %v4715_v2 = vor.u32 %v6079_v60, %v4712_v61  ;;  %v4719_v3 = vor.u32 %v6092_v63, %v4718_v62  ;;  %v6282_v63 = vld [vmem:[%s7881_s1 + $0x278] sm:$0xff] }
  0x4d   : > { %3146 = vmatmul.bf16.vlgmr.msrb.gmra.mxu3 %v4415_v14  ;;  %3195 = vmatmul.bf16.vlgmr.msrb.gmra.mxu0 %v4419_v15  ;;  %v4818_v14 = vld [vmem:[%s6571_s4 + $0x330] sm:$0xf]  ;;  %v6117_v15 = vld [vmem:[%s6571_s4 + $0x390] sm:$0xf0] }
  0x4e   : > { %3334 = vmatpush.bf16.msra.mxu3 %v6266_v10  ;;  %3383 = vmatpush.bf16.msra.mxu0 %v6274_v11  ;;  %v4810_v10 = vld [vmem:[%s6571_s4 + $0x328] sm:$0xf]  ;;  %v6116_v11 = vld [vmem:[%s6571_s4 + $0x388] sm:$0xf0] }
  0x50   : > { %3286 = vmatpush.bf16.msra.mxu2 %v6257_v16  ;;  %3237 = vmatpush.bf16.msra.mxu1 %v6249_v17  ;;  %v4807_v16 = vor.u32 %v6103_v8, %v4804_v9  ;;  %v4811_v17 = vor.u32 %v6116_v11, %v4810_v10  ;;  %v6192_v8 = vld [vmem:[%s6571_s4 + $0x5e8] sm:$0xf0] }
  0x52   : > { %3335 = vmatpush.bf16.msra.mxu3 %v6265_v18  ;;  %3384 = vmatpush.bf16.msra.mxu0 %v6273_v19  ;;  %v4815_v18 = vor.u32 %v6104_v12, %v4812_v13  ;;  %v4819_v19 = vor.u32 %v6117_v15, %v4818_v14 }
  0x54   : > { %3287 = vmatpush.bf16.msra.mxu2 %v6256_v20  ;;  %3238 = vmatpush.bf16.msra.mxu1 %v6248_v21  ;;  %v6252_v20 = vld [vmem:[%s7881_s1 + $0x188] sm:$0xff] }
  0x55   : > { %v6260_v21 = vld [vmem:[%s7881_s1 + $0x1c8] sm:$0xff] }
  0x56   : > { %3336 = vmatpush.bf16.msra.mxu3 %v6264_v22  ;;  %3385 = vmatpush.bf16.msra.mxu0 %v6272_v23  ;;  %v6244_v22 = vld [vmem:[%s7881_s1 + $0x148] sm:$0xff] }
  0x57   : > { %v6268_v23 = vld [vmem:[%s7881_s1 + $0x208] sm:$0xff] }
  0x58   : > { %3288 = vmatpush.bf16.msra.mxu2 %v6255_v36  ;;  %3239 = vmatpush.bf16.msra.mxu1 %v6247_v38  ;;  %v6251_v36 = vld [vmem:[%s7881_s1 + $0x180] sm:$0xff] }
  0x59   : > { %v6243_v38 = vld [vmem:[%s7881_s1 + $0x140] sm:$0xff] }
  0x5a   : > { %3337 = vmatpush.bf16.msra.mxu3 %v6263_v37  ;;  %3386 = vmatpush.bf16.msra.mxu0 %v6271_v39  ;;  %v6259_v37 = vld [vmem:[%s7881_s1 + $0x1c0] sm:$0xff] }
  0x5b   : > { %3053 = vmatmul.bf16.gmra.mxu1 %v4507_v32  ;;  %3102 = vmatmul.bf16.gmra.mxu2 %v4511_v33  ;;  %v4907_v32 = vor.u32 %v6128_v24, %v4904_v25  ;;  %v4911_v33 = vor.u32 %v6141_v27, %v4910_v26  ;;  %v6267_v39 = vld [vmem:[%s7881_s1 + $0x200] sm:$0xff]  ;;  %v6281_v27 = vld [vmem:[%s7881_s1 + $0x270] sm:$0xff] }
  0x5c   : > { %3289 = vmatpush.bf16.msra.mxu2 %v6254_v52  ;;  %3240 = vmatpush.bf16.msra.mxu1 %v6246_v54  ;;  %v5019_v52 = vor.u32 %v6167_v47, %v5018_v46  ;;  %v6290_v54 = vld [vmem:[%s7881_s1 + $0x2b8] sm:$0xff] }
  0x5d   : > { %3151 = vmatmul.bf16.gmra.mxu3 %v4515_v34  ;;  %3200 = vmatmul.bf16.gmra.mxu0 %v4519_v35  ;;  %v4915_v34 = vor.u32 %v6129_v28, %v4912_v29  ;;  %v4919_v35 = vor.u32 %v6142_v31, %v4918_v30  ;;  %v6305_v28 = vld [vmem:[%s7881_s1 + $0x330] sm:$0xff]  ;;  %v4420_v30 = vld [vmem:[%s6571_s4 + $0x74] sm:$0xf0] }
  0x5e   : > { %3338 = vmatpush.bf16.msra.mxu3 %v6262_v53  ;;  %3387 = vmatpush.bf16.msra.mxu0 %v6270_v55  ;;  %v6298_v55 = vld [vmem:[%s7881_s1 + $0x2f8] sm:$0xff]  ;;  %v6005_v29 = vld [vmem:[%s6571_s4 + $0x14] sm:$0xf] }
  0x5f   : > { %v4426_v31 = vld [vmem:[%s6571_s4 + $0x18] sm:$0xf] }
  0x60   : > { %3290 = vmatpush.bf16.msra.mxu2 %v6253_v4  ;;  %3241 = vmatpush.bf16.msra.mxu1 %v6245_v6  ;;  %v6191_v4 = vld [vmem:[%s6571_s4 + $0x5e0] sm:$0xf0]  ;;  %v5112_v6 = vld [vmem:[%s6571_s4 + $0x5e4] sm:$0xf0] }
  0x62   : > { %3339 = vmatpush.bf16.msra.mxu3 %v6261_v5  ;;  %3388 = vmatpush.bf16.msra.mxu0 %v6269_v7  ;;  %v6179_v5 = vld [vmem:[%s6571_s4 + $0x584] sm:$0xf]  ;;  %v5118_v7 = vld [vmem:[%s6571_s4 + $0x588] sm:$0xf] }
  0x64   : > { %3291 = vmatpush.bf16.msra.mxu2 %v6252_v20  ;;  %3242 = vmatpush.bf16.msra.mxu1 %v6244_v22  ;;  %v6297_v20 = vld [vmem:[%s7881_s1 + $0x2f0] sm:$0xff] }
  0x66   : > { %3340 = vmatpush.bf16.msra.mxu3 %v6260_v21  ;;  %3389 = vmatpush.bf16.msra.mxu0 %v6268_v23 }
  0x68   : > { %3292 = vmatpush.bf16.msra.mxu2 %v6251_v36  ;;  %3243 = vmatpush.bf16.msra.mxu1 %v6243_v38  ;;  %v6019_v36 = vld [vmem:[%s6571_s4 + $0x80] sm:$0xf0] }
  0x6a   : > { %3341 = vmatpush.bf16.msra.mxu3 %v6259_v37  ;;  %3390 = vmatpush.bf16.msra.mxu0 %v6267_v39 }
  0x6b   : > { %3058 = vmatmul.bf16.gmra.mxu1 %v4607_v48  ;;  %3107 = vmatmul.bf16.gmra.mxu2 %v4611_v49  ;;  %v5007_v48 = vor.u32 %v6153_v40, %v5004_v41  ;;  %v5011_v49 = vor.u32 %v6166_v43, %v5010_v42  ;;  %v4423_v41 = vor.u32 %v6005_v29, %v4420_v30 }
  0x6c   : > { %3481 = vmatpush.bf16.msrb.mxu2 %v6290_v54  ;;  %3432 = vmatpush.bf16.msrb.mxu1 %v6282_v63 }
  0x6d   : > { %3156 = vmatmul.bf16.gmra.mxu3 %v4615_v50  ;;  %3205 = vmatmul.bf16.gmra.mxu0 %v4619_v51  ;;  %v5015_v51 = vor.u32 %v6154_v44, %v5012_v45 }
  0x6e   : > { %3530 = vmatpush.bf16.msrb.mxu3 %v6298_v55 }
  0x70   : > { %3433 = vmatpush.bf16.msrb.mxu1 %v6281_v27 }
  0x72   : > { %3531 = vmatpush.bf16.msrb.mxu3 %v6297_v20 }
  0x7b   : > { %3063 = vmatmul.bf16.gmra.mxu1 %v4707_v0  ;;  %3112 = vmatmul.bf16.gmra.mxu2 %v4711_v1  ;;  %v6306_v0 = vld [vmem:[%s7881_s1 + $0x338] sm:$0xff] }
  0x7c   : > { %v6178_v1 = vld [vmem:[%s6571_s4 + $0x57c] sm:$0xf]  ;;  %3579 = vmatpush.bf16.msrb.mxu0 %v6306_v0 }
  0x7d   : > { %3161 = vmatmul.bf16.gmra.mxu3 %v4715_v2  ;;  %3210 = vmatmul.bf16.gmra.mxu0 %v4719_v3  ;;  %v5104_v2 = vld [vmem:[%s6571_s4 + $0x5dc] sm:$0xf0] }
  0x7e   : > { %v5110_v3 = vld [vmem:[%s6571_s4 + $0x580] sm:$0xf]  ;;  %v5107_v12 = vor.u32 %v6178_v1, %v5104_v2  ;;  %v6280_v1 = vld [vmem:[%s7881_s1 + $0x268] sm:$0xff] }
  0x7f   : > { %v5111_v13 = vor.u32 %v6191_v4, %v5110_v3  ;;  %v6304_v2 = vld [vmem:[%s7881_s1 + $0x328] sm:$0xff]  ;;  %v6030_v3 = vld [vmem:[%s6571_s4 + $0xdc] sm:$0xf]  ;;  %3434 = vmatpush.bf16.msrb.mxu1 %v6280_v1 }
  0x80   : > { %3580 = vmatpush.bf16.msrb.mxu0 %v6305_v28 }
  0x84   : > { %3581 = vmatpush.bf16.msrb.mxu0 %v6304_v2 }
  0x8b   : > { %3068 = vmatmul.bf16.gmra.mxu1 %v4807_v16  ;;  %3117 = vmatmul.bf16.gmra.mxu2 %v4811_v17  ;;  %v5115_v16 = vor.u32 %v6179_v5, %v5112_v6  ;;  %v5119_v17 = vor.u32 %v6192_v8, %v5118_v7  ;;  %v4526_v5 = vld [vmem:[%s6571_s4 + $0xe0] sm:$0xf]  ;;  %v6043_v6 = vld [vmem:[%s6571_s4 + $0x140] sm:$0xf0]  ;;  %v4528_v8 = vld [vmem:[%s6571_s4 + $0x144] sm:$0xf0] }
  0x8c   : > { %v6031_v7 = vld [vmem:[%s6571_s4 + $0xe4] sm:$0xf]  ;;  %v4527_v20 = vor.u32 %v6043_v6, %v4526_v5 }
  0x8d   : > { %3166 = vmatmul.bf16.gmra.mxu3 %v4815_v18  ;;  %3215 = vmatmul.bf16.gmra.mxu0 %v4819_v19  ;;  %v6289_v19 = vld [vmem:[%s7881_s1 + $0x2b0] sm:$0xff] }
  0x8e   : > { %3482 = vmatpush.bf16.msrb.mxu2 %v6289_v19 }
  0x9b   : > { %3073 = vmatmul.bf16.gmra.mxu1 %v4907_v32  ;;  %3122 = vmatmul.bf16.gmra.mxu2 %v4911_v33  ;;  %v6018_v32 = vld [vmem:[%s6571_s4 + $0x78] sm:$0xf0] }
  0x9c   : > { %v6006_v33 = vld [vmem:[%s6571_s4 + $0x1c] sm:$0xf]  ;;  %v4427_v42 = vor.u32 %v6018_v32, %v4426_v31  ;;  %v6295_v32 = vld [vmem:[%s7881_s1 + $0x2e0] sm:$0xff] }
  0x9d   : > { %3171 = vmatmul.bf16.gmra.mxu3 %v4915_v34  ;;  %3220 = vmatmul.bf16.gmra.mxu0 %v4919_v35  ;;  %v4428_v34 = vld [vmem:[%s6571_s4 + $0x7c] sm:$0xf0] }
  0x9e   : > { %v4434_v35 = vld [vmem:[%s6571_s4 + $0x20] sm:$0xf]  ;;  %v4431_v45 = vor.u32 %v6006_v33, %v4428_v34 }
  0x9f   : > { %v4435_v46 = vor.u32 %v6019_v36, %v4434_v35 }
  0xa8   : > { %v6840_v50 = vpop.f32.mrf.mxu1 }
  0xaa   : > { %v6842_v53 = vpop.f32.mrf.mxu0 }
  0xab   : > { %3078 = vmatmul.bf16.gmra.mxu1 %v5007_v48  ;;  %3127 = vmatmul.bf16.gmra.mxu2 %v5011_v49  ;;  %v3001_v38 = vadd.f32 %v6853_v56, %v6842_v53  ;;  %v6288_v49 = vld [vmem:[%s7881_s1 + $0x2a8] sm:$0xff] }
  0xac   : > { %3483 = vmatpush.bf16.msrb.mxu2 %v6288_v49  ;;  %v6056_v49 = vld [vmem:[%s6571_s4 + $0x1ac] sm:$0xf] }
  0xad   : > { %3176 = vmatmul.bf16.gmra.mxu3 %v5015_v51  ;;  %3225 = vmatmul.bf16.gmra.mxu0 %v5019_v52  ;;  %v6296_v51 = vld [vmem:[%s7881_s1 + $0x2e8] sm:$0xff] }
  0xae   : > { %v3020_v57 = vpop.f32.mrf.mxu2  ;;  %3532 = vmatpush.bf16.msrb.mxu3 %v6296_v51  ;;  %v4628_v51 = vld [vmem:[%s6571_s4 + $0x20c] sm:$0xf0] }
  0xaf   : > { %v6856_v58 = vadd.f32 %v6853_v56, %v3020_v57  ;;  %v4631_v2 = vor.u32 %v6056_v49, %v4628_v51  ;;  %v6293_v51 = vld [vmem:[%s7881_s1 + $0x2d0] sm:$0xff] }
  0xb0   : > { %v3030_v59 = vpop.f32.mrf.mxu3  ;;  %v6861_v61 = vpop.f32.mrf.mxu1 }
  0xb1   : > { %v6859_v60 = vadd.f32 %v6853_v56, %v3030_v59 }
  0xb2   : > { %v6863_v62 = vpop.f32.mrf.mxu0  ;;  %3533 = vmatpush.bf16.msrb.mxu3 %v6295_v32  ;;  %v4728_v32 = vld [vmem:[%s6571_s4 + $0x2d4] sm:$0xf0] }
  0xb3   : > { %v3003_v53 = vadd.f32 %v6853_v56, %v6863_v62  ;;  %v4520_v62 = vld [vmem:[%s6571_s4 + $0x13c] sm:$0xf0] }
  0xb4   : > { %v4523_v19 = vor.u32 %v6030_v3, %v4520_v62 }
  0xb6   : > { %v3022_v9 = vpop.f32.mrf.mxu2 }
  0xb7   : > { %v6880_v10 = vadd.f32 %v6853_v56, %v3022_v9  ;;  %v4534_v9 = vld [vmem:[%s6571_s4 + $0xe8] sm:$0xf] }
  0xb8   : > { %v3032_v11 = vpop.f32.mrf.mxu3  ;;  %v6885_v15 = vpop.f32.mrf.mxu1 }
  0xb9   : > { %v6883_v14 = vadd.f32 %v6853_v56, %v3032_v11  ;;  %v6044_v11 = vld [vmem:[%s6571_s4 + $0x148] sm:$0xf0] }
  0xba   : > { %v6887_v18 = vpop.f32.mrf.mxu0  ;;  %v4535_v27 = vor.u32 %v6044_v11, %v4534_v9  ;;  %v3013_v11 = vadd.f32 %v6853_v56, %v6861_v61  ;;  %v4720_v61 = vld [vmem:[%s6571_s4 + $0x2cc] sm:$0xf0] }
  0xbb   : > { %3083 = vmatmul.bf16.gmra.mxu1 %v5107_v12  ;;  %3132 = vmatmul.bf16.gmra.mxu2 %v5111_v13  ;;  %v3006_v13 = vadd.f32 %v6853_v56, %v6887_v18  ;;  %v6287_v18 = vld [vmem:[%s7881_s1 + $0x2a0] sm:$0xff] }
  0xbc   : > { %3484 = vmatpush.bf16.msrb.mxu2 %v6287_v18  ;;  %v6081_v18 = vld [vmem:[%s6571_s4 + $0x274] sm:$0xf] }
  0xbd   : > { %3181 = vmatmul.bf16.gmra.mxu3 %v5115_v16  ;;  %3230 = vmatmul.bf16.gmra.mxu0 %v5119_v17 }
  0xbe   : > { %v3025_v21 = vpop.f32.mrf.mxu2 }
  0xbf   : > { %v6896_v22 = vadd.f32 %v6853_v56, %v3025_v21 }
  0xc0   : > { %v3035_v23 = vpop.f32.mrf.mxu3  ;;  %v6901_v25 = vpop.f32.mrf.mxu1 }
  0xc1   : > { %v6899_v24 = vadd.f32 %v6853_v56, %v3035_v23  ;;  %v4531_v23 = vor.u32 %v6031_v7, %v4528_v8  ;;  %v6294_v8 = vld [vmem:[%s7881_s1 + $0x2d8] sm:$0xff] }
  0xc2   : > { %v6903_v26 = vpop.f32.mrf.mxu0  ;;  %3534 = vmatpush.bf16.msrb.mxu3 %v6294_v8  ;;  %v4834_v8 = vld [vmem:[%s6571_s4 + $0x340] sm:$0xf] }
  0xc3   : > { %v3008_v34 = vadd.f32 %v6853_v56, %v6903_v26  ;;  %v4620_v26 = vld [vmem:[%s6571_s4 + $0x204] sm:$0xf0] }
  0xc6   : > { %v3027_v37 = vpop.f32.mrf.mxu2  ;;  %3535 = vmatpush.bf16.msrb.mxu3 %v6293_v51 }
  0xc7   : > { %v6922_v39 = vadd.f32 %v6853_v56, %v3027_v37 }
  0xc8   : > { %v3037_v40 = vpop.f32.mrf.mxu3  ;;  %v3049_v44 = vpop.f32.mrf.mxu1 }
  0xc9   : > { %v6925_v43 = vadd.f32 %v6853_v56, %v3037_v40  ;;  %v3050_v47 = vadd.f32 %v3049_v44, %v3001_v38  ;;  %v6303_v44 = vld [vmem:[%s7881_s1 + $0x320] sm:$0xff] }
  0xca   : > { %v3196_v48 = vpop.f32.mrf.mxu0  ;;  %3582 = vmatpush.bf16.msrb.mxu0 %v6303_v44  ;;  %v4731_v44 = vor.u32 %v6081_v18, %v4728_v32  ;;  %v6292_v18 = vld [vmem:[%s7881_s1 + $0x2c8] sm:$0xff] }
  0xcb   : > { %3244 = vmatmul.bf16.vlgmr.msra.gmra.mxu1 %v4423_v41  ;;  %3293 = vmatmul.bf16.vlgmr.msra.gmra.mxu2 %v4427_v42  ;;  %v6279_v42 = vld [vmem:[%s7881_s1 + $0x260] sm:$0xff] }
  0xcc   : > { %3435 = vmatpush.bf16.msrb.mxu1 %v6279_v42  ;;  %3536 = vmatpush.bf16.msrb.mxu3 %v6292_v18 }
  0xcd   : > { %3342 = vmatmul.bf16.vlgmr.msra.gmra.mxu3 %v4431_v45  ;;  %3391 = vmatmul.bf16.vlgmr.msra.gmra.mxu0 %v4435_v46  ;;  %v6055_v45 = vld [vmem:[%s6571_s4 + $0x1a4] sm:$0xf] }
  0xce   : > { %v3098_v52 = vpop.f32.mrf.mxu2 }
  0xcf   : > { %v3099_v54 = vadd.f32 %v3098_v52, %v3050_v47  ;;  %v4626_v47 = vld [vmem:[%s6571_s4 + $0x1a8] sm:$0xf]  ;;  %v4634_v52 = vld [vmem:[%s6571_s4 + $0x1b0] sm:$0xf] }
  0xd0   : > { %v3147_v55 = vpop.f32.mrf.mxu3  ;;  %v3051_v57 = vpop.f32.mrf.mxu1 }
  0xd1   : > { %v3148_v59 = vadd.f32 %v3147_v55, %v3099_v54  ;;  %v3052_v63 = vadd.f32 %v3051_v57, %v3003_v53  ;;  %v6069_v53 = vld [vmem:[%s6571_s4 + $0x210] sm:$0xf0]  ;;  %v3011_v55 = vadd.f32 %v6853_v56, %v6840_v50  ;;  %v6286_v50 = vld [vmem:[%s7881_s1 + $0x298] sm:$0xff] }
  0xd2   : > { %v3198_v0 = vpop.f32.mrf.mxu0  ;;  %v4635_v3 = vor.u32 %v6069_v53, %v4634_v52  ;;  %3485 = vmatpush.bf16.msrb.mxu2 %v6286_v50  ;;  %v3018_v53 = vadd.f32 %v6853_v56, %v6901_v25  ;;  %v4828_v50 = vld [vmem:[%s6571_s4 + $0x39c] sm:$0xf0] }
  0xd3   : > { %v6943_v4 = vadd.f32 %v3196_v48, %v3148_v59  ;;  %v6068_v48 = vld [vmem:[%s6571_s4 + $0x208] sm:$0xf0] }
  0xd6   : > { %v3100_v12 = vpop.f32.mrf.mxu2 }
  0xd7   : > { %v3101_v16 = vadd.f32 %v3100_v12, %v3052_v63  ;;  %v4623_v63 = vor.u32 %v6055_v45, %v4620_v26 }
  0xd8   : > { %v3149_v17 = vpop.f32.mrf.mxu3  ;;  %v3054_v21 = vpop.f32.mrf.mxu1 }
  0xd9   : > { %v3150_v28 = vadd.f32 %v3149_v17, %v3101_v16  ;;  %v3055_v29 = vadd.f32 %v3054_v21, %v3006_v13  ;;  %v6278_v21 = vld [vmem:[%s7881_s1 + $0x258] sm:$0xff] }
  0xda   : > { %v3201_v30 = vpop.f32.mrf.mxu0  ;;  %3436 = vmatpush.bf16.msrb.mxu1 %v6278_v21 }
  0xdb   : > { %3249 = vmatmul.bf16.gmra.mxu1 %v4523_v19  ;;  %3298 = vmatmul.bf16.gmra.mxu2 %v4527_v20  ;;  %v6953_v31 = vadd.f32 %v3198_v0, %v3150_v28  ;;  %v4627_v0 = vor.u32 %v6068_v48, %v4626_v47 }
  0xdd   : > { %3347 = vmatmul.bf16.gmra.mxu3 %v4531_v23  ;;  %3396 = vmatmul.bf16.gmra.mxu0 %v4535_v27  ;;  %v6302_v23 = vld [vmem:[%s7881_s1 + $0x318] sm:$0xff]  ;;  %v6080_v27 = vld [vmem:[%s6571_s4 + $0x26c] sm:$0xf] }
  0xde   : > { %v3103_v33 = vpop.f32.mrf.mxu2  ;;  %3583 = vmatpush.bf16.msrb.mxu0 %v6302_v23 }
  0xdf   : > { %v3104_v35 = vadd.f32 %v3103_v33, %v3055_v29  ;;  %v4726_v29 = vld [vmem:[%s6571_s4 + $0x270] sm:$0xf]  ;;  %v4734_v33 = vld [vmem:[%s6571_s4 + $0x278] sm:$0xf] }
  0xe0   : > { %v3152_v36 = vpop.f32.mrf.mxu3  ;;  %v3056_v37 = vpop.f32.mrf.mxu1 }
  0xe1   : > { %v3153_v38 = vadd.f32 %v3152_v36, %v3104_v35  ;;  %v3057_v40 = vadd.f32 %v3056_v37, %v3008_v34  ;;  %v6094_v34 = vld [vmem:[%s6571_s4 + $0x2d8] sm:$0xf0]  ;;  %v3016_v36 = vadd.f32 %v6853_v56, %v6885_v15  ;;  %v6285_v15 = vld [vmem:[%s7881_s1 + $0x290] sm:$0xff]  ;;  %v4820_v56 = vld [vmem:[%s6571_s4 + $0x394] sm:$0xf0] }
  0xe2   : > { %v3203_v41 = vpop.f32.mrf.mxu0  ;;  %v4735_v45 = vor.u32 %v6094_v34, %v4734_v33  ;;  %3486 = vmatpush.bf16.msrb.mxu2 %v6285_v15  ;;  %v6144_v15 = vld [vmem:[%s6571_s4 + $0x468] sm:$0xf0] }
  0xe3   : > { %v6971_v46 = vadd.f32 %v3201_v30, %v3153_v38  ;;  %v6093_v30 = vld [vmem:[%s6571_s4 + $0x2d0] sm:$0xf0] }
  0xe6   : > { %v3105_v54 = vpop.f32.mrf.mxu2 }
  0xe7   : > { %v3106_v57 = vadd.f32 %v3105_v54, %v3057_v40  ;;  %v4723_v40 = vor.u32 %v6080_v27, %v4720_v61 }
  0xe8   : > { %v3154_v59 = vpop.f32.mrf.mxu3  ;;  %v3059_v1 = vpop.f32.mrf.mxu1 }
  0xe9   : > { %v3155_v62 = vadd.f32 %v3154_v59, %v3106_v57  ;;  %v3060_v5 = vadd.f32 %v3059_v1, %v3011_v55  ;;  %v6277_v1 = vld [vmem:[%s7881_s1 + $0x250] sm:$0xff] }
  0xea   : > { %v3206_v6 = vpop.f32.mrf.mxu0  ;;  %3437 = vmatpush.bf16.msrb.mxu1 %v6277_v1 }
  0xeb   : > { %3254 = vmatmul.bf16.gmra.mxu1 %v4623_v63  ;;  %3303 = vmatmul.bf16.gmra.mxu2 %v4627_v0  ;;  %v6981_v7 = vadd.f32 %v3203_v41, %v3155_v62  ;;  %v4727_v41 = vor.u32 %v6093_v30, %v4726_v29  ;;  %v4826_v62 = vld [vmem:[%s6571_s4 + $0x338] sm:$0xf]  ;;  %v6284_v30 = vld [vmem:[%s7881_s1 + $0x288] sm:$0xff] }
  0xec   : > { %3487 = vmatpush.bf16.msrb.mxu2 %v6284_v30 }
  0xed   : > { %3352 = vmatmul.bf16.gmra.mxu3 %v4631_v2  ;;  %3401 = vmatmul.bf16.gmra.mxu0 %v4635_v3  ;;  %v6301_v2 = vld [vmem:[%s7881_s1 + $0x310] sm:$0xff] }
  0xee   : > { %v3108_v9 = vpop.f32.mrf.mxu2  ;;  %v6105_v3 = vld [vmem:[%s6571_s4 + $0x334] sm:$0xf]  ;;  %3584 = vmatpush.bf16.msrb.mxu0 %v6301_v2 }
  0xef   : > { %v3109_v12 = vadd.f32 %v3108_v9, %v3060_v5  ;;  %v6118_v5 = vld [vmem:[%s6571_s4 + $0x398] sm:$0xf0]  ;;  %v6119_v9 = vld [vmem:[%s6571_s4 + $0x3a0] sm:$0xf0] }
  0xf0   : > { %v3157_v13 = vpop.f32.mrf.mxu3  ;;  %v3061_v16 = vpop.f32.mrf.mxu1  ;;  %v4835_v21 = vor.u32 %v6119_v9, %v4834_v8 }
  0xf1   : > { %v3158_v17 = vadd.f32 %v3157_v13, %v3109_v12  ;;  %v3062_v19 = vadd.f32 %v3061_v16, %v3013_v11  ;;  %v4823_v16 = vor.u32 %v6105_v3, %v4820_v56  ;;  %v6283_v56 = vld [vmem:[%s7881_s1 + $0x280] sm:$0xff] }
  0xf2   : > { %v3208_v20 = vpop.f32.mrf.mxu0  ;;  %3488 = vmatpush.bf16.msrb.mxu2 %v6283_v56 }
  0xf3   : > { %v6999_v28 = vadd.f32 %v3206_v6, %v3158_v17  ;;  %v6106_v6 = vld [vmem:[%s6571_s4 + $0x33c] sm:$0xf]  ;;  %v4827_v17 = vor.u32 %v6118_v5, %v4826_v62  ;;  %v6291_v62 = vld [vmem:[%s7881_s1 + $0x2c0] sm:$0xff] }
  0xf4   : > { %3537 = vmatpush.bf16.msrb.mxu3 %v6291_v62 }
  0xf6   : > { %v3110_v35 = vpop.f32.mrf.mxu2 }
  0xf7   : > { %v3111_v37 = vadd.f32 %v3110_v35, %v3062_v19 }
  0xf8   : > { %v3159_v38 = vpop.f32.mrf.mxu3  ;;  %v3064_v42 = vpop.f32.mrf.mxu1 }
  0xf9   : > { %v3160_v26 = vadd.f32 %v3159_v38, %v3111_v37  ;;  %v3065_v47 = vadd.f32 %v3064_v42, %v3016_v36  ;;  %v6276_v38 = vld [vmem:[%s7881_s1 + $0x248] sm:$0xff]  ;;  %v4920_v42 = vld [vmem:[%s6571_s4 + $0x45c] sm:$0xf0] }
  0xfa   : > { %v3211_v48 = vpop.f32.mrf.mxu0  ;;  %3438 = vmatpush.bf16.msrb.mxu1 %v6276_v38 }
  0xfb   : > { %3259 = vmatmul.bf16.gmra.mxu1 %v4723_v40  ;;  %3308 = vmatmul.bf16.gmra.mxu2 %v4727_v41  ;;  %v7009_v49 = vadd.f32 %v3208_v20, %v3160_v26  ;;  %v4831_v20 = vor.u32 %v6106_v6, %v4828_v50  ;;  %v6300_v40 = vld [vmem:[%s7881_s1 + $0x308] sm:$0xff]  ;;  %v6130_v41 = vld [vmem:[%s6571_s4 + $0x3fc] sm:$0xf]  ;;  %v6143_v26 = vld [vmem:[%s6571_s4 + $0x460] sm:$0xf0] }
  0xfc   : > { %3585 = vmatpush.bf16.msrb.mxu0 %v6300_v40 }
  0xfd   : > { %3357 = vmatmul.bf16.gmra.mxu3 %v4731_v44  ;;  %3406 = vmatmul.bf16.gmra.mxu0 %v4735_v45  ;;  %v4926_v45 = vld [vmem:[%s6571_s4 + $0x400] sm:$0xf] }
  0xfe   : > { %v3113_v52 = vpop.f32.mrf.mxu2 }
  0xff   : > { %v3114_v54 = vadd.f32 %v3113_v52, %v3065_v47  ;;  %v6131_v47 = vld [vmem:[%s6571_s4 + $0x404] sm:$0xf] }
 0x100   : > { %v3162_v55 = vpop.f32.mrf.mxu3  ;;  %v3066_v57 = vpop.f32.mrf.mxu1 }
 0x101   : > { %v3163_v59 = vadd.f32 %v3162_v55, %v3114_v54  ;;  %v3067_v63 = vadd.f32 %v3066_v57, %v3018_v53  ;;  %v4923_v54 = vor.u32 %v6130_v41, %v4920_v42  ;;  %v4927_v55 = vor.u32 %v6143_v26, %v4926_v45  ;;  %v6322_v42 = vld [vmem:[%s7881_s1 + $0x3b8] sm:$0xff] }
 0x102   : > { %v3213_v0 = vpop.f32.mrf.mxu0  ;;  %v6330_v45 = vld [vmem:[%s7881_s1 + $0x3f8] sm:$0xff]  ;;  %3677 = vmatpush.bf16.msra.mxu2 %v6322_v42 }
 0x103   : > { %v7027_v25 = vadd.f32 %v3211_v48, %v3163_v59  ;;  %v4928_v48 = vld [vmem:[%s6571_s4 + $0x464] sm:$0xf0]  ;;  %3726 = vmatpush.bf16.msra.mxu3 %v6330_v45 }
 0x104   : > { %v4931_v59 = vor.u32 %v6131_v47, %v4928_v48 }
 0x106   : > { %v3115_v11 = vpop.f32.mrf.mxu2 }
 0x107   : > { %v3116_v12 = vadd.f32 %v3115_v11, %v3067_v63 }
 0x108   : > { %v3164_v13 = vpop.f32.mrf.mxu3  ;;  %v3069_v19 = vpop.f32.mrf.mxu1 }
 0x109   : > { %v3165_v23 = vadd.f32 %v3164_v13, %v3116_v12  ;;  %v3070_v27 = vadd.f32 %v3069_v19, %v6856_v58  ;;  %v6275_v12 = vld [vmem:[%s7881_s1 + $0x240] sm:$0xff] }
 0x10a   : > { %v3216_v61 = vpop.f32.mrf.mxu0  ;;  %v6299_v13 = vld [vmem:[%s7881_s1 + $0x300] sm:$0xff]  ;;  %3439 = vmatpush.bf16.msrb.mxu1 %v6275_v12 }
 0x10b   : > { %3264 = vmatmul.bf16.gmra.mxu1 %v4823_v16  ;;  %3313 = vmatmul.bf16.gmra.mxu2 %v4827_v17  ;;  %v7036_v29 = vadd.f32 %v3213_v0, %v3165_v23  ;;  %v6155_v16 = vld [vmem:[%s6571_s4 + $0x4c4] sm:$0xf]  ;;  %v5020_v17 = vld [vmem:[%s6571_s4 + $0x524] sm:$0xf0]  ;;  %v6156_v23 = vld [vmem:[%s6571_s4 + $0x4cc] sm:$0xf] }
 0x10c   : > { %3586 = vmatpush.bf16.msrb.mxu0 %v6299_v13 }
 0x10d   : > { %3362 = vmatmul.bf16.gmra.mxu3 %v4831_v20  ;;  %3411 = vmatmul.bf16.gmra.mxu0 %v4835_v21  ;;  %v5026_v20 = vld [vmem:[%s6571_s4 + $0x4c8] sm:$0xf]  ;;  %v6168_v21 = vld [vmem:[%s6571_s4 + $0x528] sm:$0xf0] }
 0x10e   : > { %v3118_v32 = vpop.f32.mrf.mxu2 }
 0x10f   : > { %v3119_v58 = vadd.f32 %v3118_v32, %v3070_v27  ;;  %v5028_v27 = vld [vmem:[%s6571_s4 + $0x52c] sm:$0xf0] }
 0x110   : > { %v3167_v33 = vpop.f32.mrf.mxu3  ;;  %v3071_v34 = vpop.f32.mrf.mxu1 }
 0x111   : > { %v3168_v35 = vadd.f32 %v3167_v33, %v3119_v58  ;;  %v3072_v36 = vadd.f32 %v3071_v34, %v6880_v10  ;;  %v4934_v10 = vld [vmem:[%s6571_s4 + $0x408] sm:$0xf]  ;;  %v5023_v58 = vor.u32 %v6155_v16, %v5020_v17  ;;  %v5027_v33 = vor.u32 %v6168_v21, %v5026_v20  ;;  %v6321_v17 = vld [vmem:[%s7881_s1 + $0x3b0] sm:$0xff] }
 0x112   : > { %v3218_v37 = vpop.f32.mrf.mxu0  ;;  %v4935_v63 = vor.u32 %v6144_v15, %v4934_v10  ;;  %v6329_v20 = vld [vmem:[%s7881_s1 + $0x3f0] sm:$0xff]  ;;  %3678 = vmatpush.bf16.msra.mxu2 %v6321_v17 }
 0x113   : > { %v7053_v44 = vadd.f32 %v3216_v61, %v3168_v35  ;;  %v6169_v61 = vld [vmem:[%s6571_s4 + $0x530] sm:$0xf0]  ;;  %v5031_v35 = vor.u32 %v6156_v23, %v5028_v27  ;;  %3727 = vmatpush.bf16.msra.mxu3 %v6329_v20 }
 0x116   : > { %v3120_v51 = vpop.f32.mrf.mxu2 }
 0x117   : > { %v3121_v52 = vadd.f32 %v3120_v51, %v3072_v36 }
 0x118   : > { %v3169_v53 = vpop.f32.mrf.mxu3  ;;  %v3074_v57 = vpop.f32.mrf.mxu1 }
 0x119   : > { %v3170_v0 = vadd.f32 %v3169_v53, %v3121_v52  ;;  %v3075_v1 = vadd.f32 %v3074_v57, %v6896_v22  ;;  %v6314_v52 = vld [vmem:[%s7881_s1 + $0x378] sm:$0xff] }
 0x11a   : > { %v3221_v2 = vpop.f32.mrf.mxu0  ;;  %v6338_v53 = vld [vmem:[%s7881_s1 + $0x438] sm:$0xff]  ;;  %3628 = vmatpush.bf16.msra.mxu1 %v6314_v52 }
 0x11b   : > { %3269 = vmatmul.bf16.gmra.mxu1 %v4923_v54  ;;  %3318 = vmatmul.bf16.gmra.mxu2 %v4927_v55  ;;  %v7062_v3 = vadd.f32 %v3218_v37, %v3170_v0  ;;  %v6180_v54 = vld [vmem:[%s6571_s4 + $0x58c] sm:$0xf]  ;;  %v5120_v55 = vld [vmem:[%s6571_s4 + $0x5ec] sm:$0xf0]  ;;  %v6181_v0 = vld [vmem:[%s6571_s4 + $0x594] sm:$0xf] }
 0x11c   : > { %3775 = vmatpush.bf16.msra.mxu0 %v6338_v53 }
 0x11d   : > { %3367 = vmatmul.bf16.gmra.mxu3 %v4931_v59  ;;  %3416 = vmatmul.bf16.gmra.mxu0 %v4935_v63  ;;  %v5126_v59 = vld [vmem:[%s6571_s4 + $0x590] sm:$0xf]  ;;  %v6193_v63 = vld [vmem:[%s6571_s4 + $0x5f0] sm:$0xf0] }
 0x11e   : > { %v3123_v5 = vpop.f32.mrf.mxu2 }
 0x11f   : > { %v3124_v22 = vadd.f32 %v3123_v5, %v3075_v1  ;;  %v5128_v1 = vld [vmem:[%s6571_s4 + $0x5f4] sm:$0xf0] }
 0x120   : > { %v3172_v6 = vpop.f32.mrf.mxu3  ;;  %v3076_v50 = vpop.f32.mrf.mxu1 }
 0x121   : > { %v3173_v8 = vadd.f32 %v3172_v6, %v3124_v22  ;;  %v3077_v9 = vadd.f32 %v3076_v50, %v6922_v39  ;;  %v5034_v39 = vld [vmem:[%s6571_s4 + $0x4d0] sm:$0xf]  ;;  %v5123_v22 = vor.u32 %v6180_v54, %v5120_v55  ;;  %v5127_v6 = vor.u32 %v6193_v63, %v5126_v59  ;;  %v6320_v55 = vld [vmem:[%s7881_s1 + $0x3a8] sm:$0xff] }
 0x122   : > { %v3223_v11 = vpop.f32.mrf.mxu0  ;;  %v5035_v36 = vor.u32 %v6169_v61, %v5034_v39  ;;  %v6328_v59 = vld [vmem:[%s7881_s1 + $0x3e8] sm:$0xff]  ;;  %3679 = vmatpush.bf16.msra.mxu2 %v6320_v55 }
 0x123   : > { %v7079_v19 = vadd.f32 %v3221_v2, %v3173_v8  ;;  %v6194_v2 = vld [vmem:[%s6571_s4 + $0x5f8] sm:$0xf0]  ;;  %v5131_v8 = vor.u32 %v6181_v0, %v5128_v1  ;;  %3728 = vmatpush.bf16.msra.mxu3 %v6328_v59 }
 0x126   : > { %v3125_v30 = vpop.f32.mrf.mxu2 }
 0x127   : > { %v3126_v18 = vadd.f32 %v3125_v30, %v3077_v9 }
 0x128   : > { %v3174_v32 = vpop.f32.mrf.mxu3  ;;  %v3079_v34 = vpop.f32.mrf.mxu1 }
 0x129   : > { %v3175_v37 = vadd.f32 %v3174_v32, %v3126_v18  ;;  %v3080_v38 = vadd.f32 %v3079_v34, %v6859_v60  ;;  %v6313_v18 = vld [vmem:[%s7881_s1 + $0x370] sm:$0xff] }
 0x12a   : > { %v3226_v40 = vpop.f32.mrf.mxu0  ;;  %v6337_v32 = vld [vmem:[%s7881_s1 + $0x430] sm:$0xff]  ;;  %3629 = vmatpush.bf16.msra.mxu1 %v6313_v18 }
 0x12b   : > { %3274 = vmatmul.bf16.gmra.mxu1 %v5023_v58  ;;  %3323 = vmatmul.bf16.gmra.mxu2 %v5027_v33  ;;  %v7088_v41 = vadd.f32 %v3223_v11, %v3175_v37  ;;  %v6007_v58 = vld [vmem:[%s6571_s4 + $0x24] sm:$0xf]  ;;  %v4436_v33 = vld [vmem:[%s6571_s4 + $0x84] sm:$0xf0]  ;;  %v6008_v37 = vld [vmem:[%s6571_s4 + $0x2c] sm:$0xf] }
 0x12c   : > { %3776 = vmatpush.bf16.msra.mxu0 %v6337_v32 }
 0x12d   : > { %3372 = vmatmul.bf16.gmra.mxu3 %v5031_v35  ;;  %3421 = vmatmul.bf16.gmra.mxu0 %v5035_v36  ;;  %v4442_v35 = vld [vmem:[%s6571_s4 + $0x28] sm:$0xf]  ;;  %v6020_v36 = vld [vmem:[%s6571_s4 + $0x88] sm:$0xf0] }
 0x12e   : > { %v3128_v26 = vpop.f32.mrf.mxu2 }
 0x12f   : > { %v3129_v60 = vadd.f32 %v3128_v26, %v3080_v38  ;;  %v4444_v38 = vld [vmem:[%s6571_s4 + $0x8c] sm:$0xf0] }
 0x130   : > { %v3177_v47 = vpop.f32.mrf.mxu3  ;;  %v3081_v48 = vpop.f32.mrf.mxu1 }
 0x131   : > { %v3178_v10 = vadd.f32 %v3177_v47, %v3129_v60  ;;  %v3082_v15 = vadd.f32 %v3081_v48, %v6883_v14  ;;  %v5134_v14 = vld [vmem:[%s6571_s4 + $0x598] sm:$0xf]  ;;  %v4439_v60 = vor.u32 %v6007_v58, %v4436_v33  ;;  %v4443_v47 = vor.u32 %v6020_v36, %v4442_v35  ;;  %v6319_v33 = vld [vmem:[%s7881_s1 + $0x3a0] sm:$0xff] }
 0x132   : > { %v3228_v51 = vpop.f32.mrf.mxu0  ;;  %v5135_v9 = vor.u32 %v6194_v2, %v5134_v14  ;;  %v6327_v35 = vld [vmem:[%s7881_s1 + $0x3e0] sm:$0xff]  ;;  %3680 = vmatpush.bf16.msra.mxu2 %v6319_v33 }
 0x133   : > { %v7105_v57 = vadd.f32 %v3226_v40, %v3178_v10  ;;  %v6021_v40 = vld [vmem:[%s6571_s4 + $0x90] sm:$0xf0]  ;;  %v4447_v10 = vor.u32 %v6008_v37, %v4444_v38  ;;  %3729 = vmatpush.bf16.msra.mxu3 %v6327_v35 }
 0x136   : > { %v3130_v56 = vpop.f32.mrf.mxu2 }
 0x137   : > { %v3131_v62 = vadd.f32 %v3130_v56, %v3082_v15 }
 0x138   : > { %v3179_v5 = vpop.f32.mrf.mxu3  ;;  %v3084_v50 = vpop.f32.mrf.mxu1 }
 0x139   : > { %v3180_v11 = vadd.f32 %v3179_v5, %v3131_v62  ;;  %v3085_v12 = vadd.f32 %v3084_v50, %v6899_v24  ;;  %v6312_v62 = vld [vmem:[%s7881_s1 + $0x368] sm:$0xff] }
 0x13a   : > { %v3231_v13 = vpop.f32.mrf.mxu0  ;;  %v6336_v5 = vld [vmem:[%s7881_s1 + $0x428] sm:$0xff]  ;;  %3630 = vmatpush.bf16.msra.mxu1 %v6312_v62 }
 0x13b   : > { %3279 = vmatmul.bf16.gmra.mxu1 %v5123_v22  ;;  %3328 = vmatmul.bf16.gmra.mxu2 %v5127_v6  ;;  %v7114_v16 = vadd.f32 %v3228_v51, %v3180_v11  ;;  %v6032_v22 = vld [vmem:[%s6571_s4 + $0xec] sm:$0xf]  ;;  %v4536_v6 = vld [vmem:[%s6571_s4 + $0x14c] sm:$0xf0]  ;;  %v6033_v11 = vld [vmem:[%s6571_s4 + $0xf4] sm:$0xf] }
 0x13c   : > { %3777 = vmatpush.bf16.msra.mxu0 %v6336_v5 }
 0x13d   : > { %3377 = vmatmul.bf16.gmra.mxu3 %v5131_v8  ;;  %3426 = vmatmul.bf16.gmra.mxu0 %v5135_v9  ;;  %v4542_v8 = vld [vmem:[%s6571_s4 + $0xf0] sm:$0xf]  ;;  %v6045_v9 = vld [vmem:[%s6571_s4 + $0x150] sm:$0xf0] }
 0x13e   : > { %v3133_v21 = vpop.f32.mrf.mxu2 }
 0x13f   : > { %v3134_v24 = vadd.f32 %v3133_v21, %v3085_v12  ;;  %v4544_v12 = vld [vmem:[%s6571_s4 + $0x154] sm:$0xf0] }
 0x140   : > { %v3182_v23 = vpop.f32.mrf.mxu3  ;;  %v3086_v27 = vpop.f32.mrf.mxu1 }
 0x141   : > { %v3183_v39 = vadd.f32 %v3182_v23, %v3134_v24  ;;  %v3087_v61 = vadd.f32 %v3086_v27, %v6925_v43  ;;  %v4450_v43 = vld [vmem:[%s6571_s4 + $0x30] sm:$0xf]  ;;  %v4539_v24 = vor.u32 %v6032_v22, %v4536_v6  ;;  %v4543_v23 = vor.u32 %v6045_v9, %v4542_v8  ;;  %v6318_v6 = vld [vmem:[%s7881_s1 + $0x398] sm:$0xff] }
 0x142   : > { %v3233_v30 = vpop.f32.mrf.mxu0  ;;  %v4451_v15 = vor.u32 %v6021_v40, %v4450_v43  ;;  %v6326_v8 = vld [vmem:[%s7881_s1 + $0x3d8] sm:$0xff]  ;;  %3681 = vmatpush.bf16.msra.mxu2 %v6318_v6 }
 0x143   : > { %v7131_v34 = vadd.f32 %v3231_v13, %v3183_v39  ;;  %v6046_v13 = vld [vmem:[%s6571_s4 + $0x158] sm:$0xf0]  ;;  %v4547_v39 = vor.u32 %v6033_v11, %v4544_v12  ;;  %3730 = vmatpush.bf16.msra.mxu3 %v6326_v8 }
 0x146   : > { %v3135_v42 = vpop.f32.mrf.mxu2 }
 0x147   : > { %v3136_v45 = vadd.f32 %v3135_v42, %v3087_v61 }
 0x148   : > { %v3184_v26 = vpop.f32.mrf.mxu3  ;;  %v3245_v48 = vpop.f32.mrf.mxu1 }
 0x149   : > { %v3185_v51 = vadd.f32 %v3184_v26, %v3136_v45  ;;  %v3246_v52 = vadd.f32 %v3245_v48, %v6943_v4  ;;  %v6311_v45 = vld [vmem:[%s7881_s1 + $0x360] sm:$0xff] }
 0x14a   : > { %v3392_v53 = vpop.f32.mrf.mxu0  ;;  %v6335_v26 = vld [vmem:[%s7881_s1 + $0x420] sm:$0xff]  ;;  %3631 = vmatpush.bf16.msra.mxu1 %v6311_v45 }
 0x14b   : > { %3440 = vmatmul.bf16.vlgmr.msrb.gmra.mxu1 %v4439_v60  ;;  %3489 = vmatmul.bf16.vlgmr.msrb.gmra.mxu2 %v4443_v47  ;;  %v7140_v54 = vadd.f32 %v3233_v30, %v3185_v51  ;;  %v6057_v60 = vld [vmem:[%s6571_s4 + $0x1b4] sm:$0xf]  ;;  %v4636_v47 = vld [vmem:[%s6571_s4 + $0x214] sm:$0xf0]  ;;  %v6058_v51 = vld [vmem:[%s6571_s4 + $0x1bc] sm:$0xf] }
 0x14c   : > { %3778 = vmatpush.bf16.msra.mxu0 %v6335_v26 }
 0x14d   : > { %3538 = vmatmul.bf16.vlgmr.msrb.gmra.mxu3 %v4447_v10  ;;  %3587 = vmatmul.bf16.vlgmr.msrb.gmra.mxu0 %v4451_v15  ;;  %v4642_v10 = vld [vmem:[%s6571_s4 + $0x1b8] sm:$0xf]  ;;  %v6070_v15 = vld [vmem:[%s6571_s4 + $0x218] sm:$0xf0] }
 0x14e   : > { %v3294_v63 = vpop.f32.mrf.mxu2 }
 0x14f   : > { %v3295_v4 = vadd.f32 %v3294_v63, %v3246_v52  ;;  %v4644_v52 = vld [vmem:[%s6571_s4 + $0x21c] sm:$0xf0] }
 0x150   : > { %v3343_v0 = vpop.f32.mrf.mxu3  ;;  %v3247_v1 = vpop.f32.mrf.mxu1 }
 0x151   : > { %v3344_v14 = vadd.f32 %v3343_v0, %v3295_v4  ;;  %v3248_v2 = vadd.f32 %v3247_v1, %v6953_v31  ;;  %v4550_v31 = vld [vmem:[%s6571_s4 + $0xf8] sm:$0xf]  ;;  %v4639_v4 = vor.u32 %v6057_v60, %v4636_v47  ;;  %v4643_v0 = vor.u32 %v6070_v15, %v4642_v10  ;;  %v6317_v47 = vld [vmem:[%s7881_s1 + $0x390] sm:$0xff] }
 0x152   : > { %v3394_v56 = vpop.f32.mrf.mxu0  ;;  %v4551_v61 = vor.u32 %v6046_v13, %v4550_v31  ;;  %v6325_v10 = vld [vmem:[%s7881_s1 + $0x3d0] sm:$0xff]  ;;  %3682 = vmatpush.bf16.msra.mxu2 %v6317_v47 }
 0x153   : > { %v7157_v50 = vadd.f32 %v3392_v53, %v3344_v14  ;;  %v6071_v53 = vld [vmem:[%s6571_s4 + $0x220] sm:$0xf0]  ;;  %v4647_v14 = vor.u32 %v6058_v51, %v4644_v52  ;;  %3731 = vmatpush.bf16.msra.mxu3 %v6325_v10 }
 0x156   : > { %v3296_v17 = vpop.f32.mrf.mxu2 }
 0x157   : > { %v3297_v20 = vadd.f32 %v3296_v17, %v3248_v2 }
 0x158   : > { %v3345_v21 = vpop.f32.mrf.mxu3  ;;  %v3250_v27 = vpop.f32.mrf.mxu1 }
 0x159   : > { %v3346_v30 = vadd.f32 %v3345_v21, %v3297_v20  ;;  %v3251_v18 = vadd.f32 %v3250_v27, %v6971_v46  ;;  %v6310_v20 = vld [vmem:[%s7881_s1 + $0x358] sm:$0xff] }
 0x15a   : > { %v3397_v32 = vpop.f32.mrf.mxu0  ;;  %v6334_v21 = vld [vmem:[%s7881_s1 + $0x418] sm:$0xff]  ;;  %3632 = vmatpush.bf16.msra.mxu1 %v6310_v20 }
 0x15b   : > { %3445 = vmatmul.bf16.gmra.mxu1 %v4539_v24  ;;  %3494 = vmatmul.bf16.gmra.mxu2 %v4543_v23  ;;  %v7166_v58 = vadd.f32 %v3394_v56, %v3346_v30  ;;  %v6082_v24 = vld [vmem:[%s6571_s4 + $0x27c] sm:$0xf]  ;;  %v4736_v23 = vld [vmem:[%s6571_s4 + $0x2dc] sm:$0xf0]  ;;  %v6083_v30 = vld [vmem:[%s6571_s4 + $0x284] sm:$0xf] }
 0x15c   : > { %3779 = vmatpush.bf16.msra.mxu0 %v6334_v21 }
 0x15d   : > { %3543 = vmatmul.bf16.gmra.mxu3 %v4547_v39  ;;  %3592 = vmatmul.bf16.gmra.mxu0 %v4551_v61  ;;  %v4742_v39 = vld [vmem:[%s6571_s4 + $0x280] sm:$0xf]  ;;  %v6095_v61 = vld [vmem:[%s6571_s4 + $0x2e0] sm:$0xf0] }
 0x15e   : > { %v3299_v36 = vpop.f32.mrf.mxu2 }
 0x15f   : > { %v3300_v46 = vadd.f32 %v3299_v36, %v3251_v18  ;;  %v4744_v18 = vld [vmem:[%s6571_s4 + $0x2e4] sm:$0xf0] }
 0x160   : > { %v3348_v37 = vpop.f32.mrf.mxu3  ;;  %v3252_v38 = vpop.f32.mrf.mxu1 }
 0x161   : > { %v3349_v43 = vadd.f32 %v3348_v37, %v3300_v46  ;;  %v3253_v40 = vadd.f32 %v3252_v38, %v6981_v7  ;;  %v4650_v7 = vld [vmem:[%s6571_s4 + $0x1c0] sm:$0xf]  ;;  %v4739_v46 = vor.u32 %v6082_v24, %v4736_v23  ;;  %v4743_v37 = vor.u32 %v6095_v61, %v4742_v39  ;;  %v6316_v23 = vld [vmem:[%s7881_s1 + $0x388] sm:$0xff] }
 0x162   : > { %v3399_v42 = vpop.f32.mrf.mxu0  ;;  %v4651_v2 = vor.u32 %v6071_v53, %v4650_v7  ;;  %v6324_v39 = vld [vmem:[%s7881_s1 + $0x3c8] sm:$0xff]  ;;  %3683 = vmatpush.bf16.msra.mxu2 %v6316_v23 }
 0x163   : > { %v7183_v48 = vadd.f32 %v3397_v32, %v3349_v43  ;;  %v6096_v32 = vld [vmem:[%s6571_s4 + $0x2e8] sm:$0xf0]  ;;  %v4747_v43 = vor.u32 %v6083_v30, %v4744_v18  ;;  %3732 = vmatpush.bf16.msra.mxu3 %v6324_v39 }
 0x166   : > { %v3301_v55 = vpop.f32.mrf.mxu2 }
 0x167   : > { %v3302_v59 = vadd.f32 %v3301_v55, %v3253_v40 }
 0x168   : > { %v3350_v63 = vpop.f32.mrf.mxu3  ;;  %v3255_v1 = vpop.f32.mrf.mxu1 }
 0x169   : > { %v3351_v56 = vadd.f32 %v3350_v63, %v3302_v59  ;;  %v3256_v62 = vadd.f32 %v3255_v1, %v6999_v28  ;;  %v6309_v59 = vld [vmem:[%s7881_s1 + $0x350] sm:$0xff] }
 0x16a   : > { %v3402_v5 = vpop.f32.mrf.mxu0  ;;  %v6333_v63 = vld [vmem:[%s7881_s1 + $0x410] sm:$0xff]  ;;  %3633 = vmatpush.bf16.msra.mxu1 %v6309_v59 }
 0x16b   : > { %3450 = vmatmul.bf16.gmra.mxu1 %v4639_v4  ;;  %3499 = vmatmul.bf16.gmra.mxu2 %v4643_v0  ;;  %v7192_v22 = vadd.f32 %v3399_v42, %v3351_v56  ;;  %v6107_v4 = vld [vmem:[%s6571_s4 + $0x344] sm:$0xf]  ;;  %v4836_v0 = vld [vmem:[%s6571_s4 + $0x3a4] sm:$0xf0]  ;;  %v6108_v56 = vld [vmem:[%s6571_s4 + $0x34c] sm:$0xf] }
 0x16c   : > { %3780 = vmatpush.bf16.msra.mxu0 %v6333_v63 }
 0x16d   : > { %3548 = vmatmul.bf16.gmra.mxu3 %v4647_v14  ;;  %3597 = vmatmul.bf16.gmra.mxu0 %v4651_v2  ;;  %v4842_v14 = vld [vmem:[%s6571_s4 + $0x348] sm:$0xf]  ;;  %v6120_v2 = vld [vmem:[%s6571_s4 + $0x3a8] sm:$0xf0] }
 0x16e   : > { %v3304_v9 = vpop.f32.mrf.mxu2 }
 0x16f   : > { %v3305_v28 = vadd.f32 %v3304_v9, %v3256_v62  ;;  %v4844_v62 = vld [vmem:[%s6571_s4 + $0x3ac] sm:$0xf0] }
 0x170   : > { %v3353_v11 = vpop.f32.mrf.mxu3  ;;  %v3257_v12 = vpop.f32.mrf.mxu1 }
 0x171   : > { %v3354_v31 = vadd.f32 %v3353_v11, %v3305_v28  ;;  %v3258_v13 = vadd.f32 %v3257_v12, %v7009_v49  ;;  %v4750_v49 = vld [vmem:[%s6571_s4 + $0x288] sm:$0xf]  ;;  %v4839_v28 = vor.u32 %v6107_v4, %v4836_v0  ;;  %v4843_v11 = vor.u32 %v6120_v2, %v4842_v14  ;;  %v6315_v0 = vld [vmem:[%s7881_s1 + $0x380] sm:$0xff] }
 0x172   : > { %v3404_v17 = vpop.f32.mrf.mxu0  ;;  %v4751_v40 = vor.u32 %v6096_v32, %v4750_v49  ;;  %v6323_v14 = vld [vmem:[%s7881_s1 + $0x3c0] sm:$0xff]  ;;  %3684 = vmatpush.bf16.msra.mxu2 %v6315_v0 }
 0x173   : > { %v7209_v27 = vadd.f32 %v3402_v5, %v3354_v31  ;;  %v6121_v5 = vld [vmem:[%s6571_s4 + $0x3b0] sm:$0xf0]  ;;  %v4847_v31 = vor.u32 %v6108_v56, %v4844_v62  ;;  %3733 = vmatpush.bf16.msra.mxu3 %v6323_v14 }
 0x176   : > { %v3306_v33 = vpop.f32.mrf.mxu2 }
 0x177   : > { %v3307_v35 = vadd.f32 %v3306_v33, %v3258_v13 }
 0x178   : > { %v3355_v36 = vpop.f32.mrf.mxu3  ;;  %v3260_v38 = vpop.f32.mrf.mxu1 }
 0x179   : > { %v3356_v42 = vadd.f32 %v3355_v36, %v3307_v35  ;;  %v3261_v45 = vadd.f32 %v3260_v38, %v7027_v25  ;;  %v6308_v35 = vld [vmem:[%s7881_s1 + $0x348] sm:$0xff] }
 0x17a   : > { %v3407_v26 = vpop.f32.mrf.mxu0  ;;  %v6332_v36 = vld [vmem:[%s7881_s1 + $0x408] sm:$0xff]  ;;  %3634 = vmatpush.bf16.msra.mxu1 %v6308_v35 }
 0x17b   : > { %3455 = vmatmul.bf16.gmra.mxu1 %v4739_v46  ;;  %3504 = vmatmul.bf16.gmra.mxu2 %v4743_v37  ;;  %v7218_v60 = vadd.f32 %v3404_v17, %v3356_v42  ;;  %v6132_v46 = vld [vmem:[%s6571_s4 + $0x40c] sm:$0xf]  ;;  %v4936_v37 = vld [vmem:[%s6571_s4 + $0x46c] sm:$0xf0]  ;;  %v6133_v42 = vld [vmem:[%s6571_s4 + $0x414] sm:$0xf] }
 0x17c   : > { %3781 = vmatpush.bf16.msra.mxu0 %v6332_v36 }
 0x17d   : > { %3553 = vmatmul.bf16.gmra.mxu3 %v4747_v43  ;;  %3602 = vmatmul.bf16.gmra.mxu0 %v4751_v40  ;;  %v4942_v43 = vld [vmem:[%s6571_s4 + $0x410] sm:$0xf]  ;;  %v6145_v40 = vld [vmem:[%s6571_s4 + $0x470] sm:$0xf0] }
 0x17e   : > { %v3309_v15 = vpop.f32.mrf.mxu2 }
 0x17f   : > { %v3310_v25 = vadd.f32 %v3309_v15, %v3261_v45  ;;  %v4944_v45 = vld [vmem:[%s6571_s4 + $0x474] sm:$0xf0] }
 0x180   : > { %v3358_v51 = vpop.f32.mrf.mxu3  ;;  %v3262_v52 = vpop.f32.mrf.mxu1 }
 0x181   : > { %v3359_v7 = vadd.f32 %v3358_v51, %v3310_v25  ;;  %v3263_v53 = vadd.f32 %v3262_v52, %v7036_v29  ;;  %v4850_v29 = vld [vmem:[%s6571_s4 + $0x350] sm:$0xf]  ;;  %v4939_v25 = vor.u32 %v6132_v46, %v4936_v37  ;;  %v4943_v51 = vor.u32 %v6145_v40, %v4942_v43  ;;  %v6354_v37 = vld [vmem:[%s7881_s1 + $0x4b8] sm:$0xff] }
 0x182   : > { %v3409_v55 = vpop.f32.mrf.mxu0  ;;  %v4851_v13 = vor.u32 %v6121_v5, %v4850_v29  ;;  %v6362_v43 = vld [vmem:[%s7881_s1 + $0x4f8] sm:$0xff]  ;;  %3873 = vmatpush.bf16.msrb.mxu2 %v6354_v37 }
 0x183   : > { %v7235_v1 = vadd.f32 %v3407_v26, %v3359_v7  ;;  %v6146_v26 = vld [vmem:[%s6571_s4 + $0x478] sm:$0xf0]  ;;  %v4947_v7 = vor.u32 %v6133_v42, %v4944_v45  ;;  %3922 = vmatpush.bf16.msrb.mxu3 %v6362_v43 }
 0x186   : > { %v3311_v6 = vpop.f32.mrf.mxu2 }
 0x187   : > { %v3312_v8 = vadd.f32 %v3311_v6, %v3263_v53 }
 0x188   : > { %v3360_v9 = vpop.f32.mrf.mxu3  ;;  %v3265_v12 = vpop.f32.mrf.mxu1 }
 0x189   : > { %v3361_v17 = vadd.f32 %v3360_v9, %v3312_v8  ;;  %v3266_v20 = vadd.f32 %v3265_v12, %v7053_v44  ;;  %v6307_v8 = vld [vmem:[%s7881_s1 + $0x340] sm:$0xff] }
 0x18a   : > { %v3412_v21 = vpop.f32.mrf.mxu0  ;;  %v6331_v9 = vld [vmem:[%s7881_s1 + $0x400] sm:$0xff]  ;;  %3635 = vmatpush.bf16.msra.mxu1 %v6307_v8 }
 0x18b   : > { %3460 = vmatmul.bf16.gmra.mxu1 %v4839_v28  ;;  %3509 = vmatmul.bf16.gmra.mxu2 %v4843_v11  ;;  %v7244_v24 = vadd.f32 %v3409_v55, %v3361_v17  ;;  %v6157_v28 = vld [vmem:[%s6571_s4 + $0x4d4] sm:$0xf]  ;;  %v5036_v11 = vld [vmem:[%s6571_s4 + $0x534] sm:$0xf0]  ;;  %v6158_v17 = vld [vmem:[%s6571_s4 + $0x4dc] sm:$0xf] }
 0x18c   : > { %3782 = vmatpush.bf16.msra.mxu0 %v6331_v9 }
 0x18d   : > { %3558 = vmatmul.bf16.gmra.mxu3 %v4847_v31  ;;  %3607 = vmatmul.bf16.gmra.mxu0 %v4851_v13  ;;  %v5042_v31 = vld [vmem:[%s6571_s4 + $0x4d8] sm:$0xf]  ;;  %v6170_v13 = vld [vmem:[%s6571_s4 + $0x538] sm:$0xf0] }
 0x18e   : > { %v3314_v61 = vpop.f32.mrf.mxu2 }
 0x18f   : > { %v3315_v44 = vadd.f32 %v3314_v61, %v3266_v20  ;;  %v5044_v20 = vld [vmem:[%s6571_s4 + $0x53c] sm:$0xf0] }
 0x190   : > { %v3363_v30 = vpop.f32.mrf.mxu3  ;;  %v3267_v18 = vpop.f32.mrf.mxu1 }
 0x191   : > { %v3364_v49 = vadd.f32 %v3363_v30, %v3315_v44  ;;  %v3268_v32 = vadd.f32 %v3267_v18, %v7062_v3  ;;  %v4950_v3 = vld [vmem:[%s6571_s4 + $0x418] sm:$0xf]  ;;  %v5039_v44 = vor.u32 %v6157_v28, %v5036_v11  ;;  %v5043_v30 = vor.u32 %v6170_v13, %v5042_v31  ;;  %v6353_v11 = vld [vmem:[%s7881_s1 + $0x4b0] sm:$0xff] }
 0x192   : > { %v3414_v33 = vpop.f32.mrf.mxu0  ;;  %v4951_v53 = vor.u32 %v6146_v26, %v4950_v3  ;;  %v6361_v31 = vld [vmem:[%s7881_s1 + $0x4f0] sm:$0xff]  ;;  %3874 = vmatpush.bf16.msrb.mxu2 %v6353_v11 }
 0x193   : > { %v7261_v38 = vadd.f32 %v3412_v21, %v3364_v49  ;;  %v6171_v21 = vld [vmem:[%s6571_s4 + $0x540] sm:$0xf0]  ;;  %v5047_v49 = vor.u32 %v6158_v17, %v5044_v20  ;;  %3923 = vmatpush.bf16.msrb.mxu3 %v6361_v31 }
 0x196   : > { %v3316_v47 = vpop.f32.mrf.mxu2 }
 0x197   : > { %v3317_v10 = vadd.f32 %v3316_v47, %v3268_v32 }
 0x198   : > { %v3365_v15 = vpop.f32.mrf.mxu3  ;;  %v3270_v52 = vpop.f32.mrf.mxu1 }
 0x199   : > { %v3366_v55 = vadd.f32 %v3365_v15, %v3317_v10  ;;  %v3271_v59 = vadd.f32 %v3270_v52, %v7079_v19  ;;  %v6346_v10 = vld [vmem:[%s7881_s1 + $0x478] sm:$0xff] }
 0x19a   : > { %v3417_v63 = vpop.f32.mrf.mxu0  ;;  %v6370_v15 = vld [vmem:[%s7881_s1 + $0x538] sm:$0xff]  ;;  %3824 = vmatpush.bf16.msrb.mxu1 %v6346_v10 }
 0x19b   : > { %3465 = vmatmul.bf16.gmra.mxu1 %v4939_v25  ;;  %3514 = vmatmul.bf16.gmra.mxu2 %v4943_v51  ;;  %v7270_v4 = vadd.f32 %v3414_v33, %v3366_v55  ;;  %v6182_v25 = vld [vmem:[%s6571_s4 + $0x59c] sm:$0xf]  ;;  %v5136_v51 = vld [vmem:[%s6571_s4 + $0x5fc] sm:$0xf0]  ;;  %v6183_v55 = vld [vmem:[%s6571_s4 + $0x5a4] sm:$0xf] }
 0x19c   : > { %3971 = vmatpush.bf16.msrb.mxu0 %v6370_v15 }
 0x19d   : > { %3563 = vmatmul.bf16.gmra.mxu3 %v4947_v7  ;;  %3612 = vmatmul.bf16.gmra.mxu0 %v4951_v53  ;;  %v5142_v7 = vld [vmem:[%s6571_s4 + $0x5a0] sm:$0xf]  ;;  %v6195_v53 = vld [vmem:[%s6571_s4 + $0x600] sm:$0xf0] }
 0x19e   : > { %v3319_v2 = vpop.f32.mrf.mxu2 }
 0x19f   : > { %v3320_v19 = vadd.f32 %v3319_v2, %v3271_v59  ;;  %v5144_v59 = vld [vmem:[%s6571_s4 + $0x604] sm:$0xf0] }
 0x1a0   : > { %v3368_v56 = vpop.f32.mrf.mxu3  ;;  %v3272_v62 = vpop.f32.mrf.mxu1 }
 0x1a1   : > { %v3369_v29 = vadd.f32 %v3368_v56, %v3320_v19  ;;  %v3273_v5 = vadd.f32 %v3272_v62, %v7088_v41  ;;  %v5050_v41 = vld [vmem:[%s6571_s4 + $0x4e0] sm:$0xf]  ;;  %v5139_v19 = vor.u32 %v6182_v25, %v5136_v51  ;;  %v5143_v56 = vor.u32 %v6195_v53, %v5142_v7  ;;  %v6352_v51 = vld [vmem:[%s7881_s1 + $0x4a8] sm:$0xff] }
 0x1a2   : > { %v3419_v6 = vpop.f32.mrf.mxu0  ;;  %v5051_v32 = vor.u32 %v6171_v21, %v5050_v41  ;;  %v6360_v7 = vld [vmem:[%s7881_s1 + $0x4e8] sm:$0xff]  ;;  %3875 = vmatpush.bf16.msrb.mxu2 %v6352_v51 }
 0x1a3   : > { %v7287_v12 = vadd.f32 %v3417_v63, %v3369_v29  ;;  %v6196_v63 = vld [vmem:[%s6571_s4 + $0x608] sm:$0xf0]  ;;  %v5147_v29 = vor.u32 %v6183_v55, %v5144_v59  ;;  %3924 = vmatpush.bf16.msrb.mxu3 %v6360_v7 }
 0x1a6   : > { %v3321_v23 = vpop.f32.mrf.mxu2 }
 0x1a7   : > { %v3322_v39 = vadd.f32 %v3321_v23, %v3273_v5 }
 0x1a8   : > { %v3370_v61 = vpop.f32.mrf.mxu3  ;;  %v3275_v18 = vpop.f32.mrf.mxu1 }
 0x1a9   : > { %v3371_v33 = vadd.f32 %v3370_v61, %v3322_v39  ;;  %v3276_v35 = vadd.f32 %v3275_v18, %v7105_v57  ;;  %v6345_v39 = vld [vmem:[%s7881_s1 + $0x470] sm:$0xff] }
 0x1aa   : > { %v3422_v36 = vpop.f32.mrf.mxu0  ;;  %v6369_v61 = vld [vmem:[%s7881_s1 + $0x530] sm:$0xff]  ;;  %3825 = vmatpush.bf16.msrb.mxu1 %v6345_v39 }
 0x1ab   : > { %3470 = vmatmul.bf16.gmra.mxu1 %v5039_v44  ;;  %3519 = vmatmul.bf16.gmra.mxu2 %v5043_v30  ;;  %v7296_v46 = vadd.f32 %v3419_v6, %v3371_v33  ;;  %v6009_v44 = vld [vmem:[%s6571_s4 + $0x34] sm:$0xf]  ;;  %v4452_v30 = vld [vmem:[%s6571_s4 + $0x94] sm:$0xf0]  ;;  %v6010_v33 = vld [vmem:[%s6571_s4 + $0x3c] sm:$0xf] }
 0x1ac   : > { %3972 = vmatpush.bf16.msrb.mxu0 %v6369_v61 }
 0x1ad   : > { %3568 = vmatmul.bf16.gmra.mxu3 %v5047_v49  ;;  %3617 = vmatmul.bf16.gmra.mxu0 %v5051_v32  ;;  %v4458_v49 = vld [vmem:[%s6571_s4 + $0x38] sm:$0xf]  ;;  %v6022_v32 = vld [vmem:[%s6571_s4 + $0x98] sm:$0xf0] }
 0x1ae   : > { %v3324_v40 = vpop.f32.mrf.mxu2 }
 0x1af   : > { %v3325_v57 = vadd.f32 %v3324_v40, %v3276_v35  ;;  %v4460_v35 = vld [vmem:[%s6571_s4 + $0x9c] sm:$0xf0] }
 0x1b0   : > { %v3373_v42 = vpop.f32.mrf.mxu3  ;;  %v3277_v45 = vpop.f32.mrf.mxu1 }
 0x1b1   : > { %v3374_v3 = vadd.f32 %v3373_v42, %v3325_v57  ;;  %v3278_v26 = vadd.f32 %v3277_v45, %v7114_v16  ;;  %v5150_v16 = vld [vmem:[%s6571_s4 + $0x5a8] sm:$0xf]  ;;  %v4455_v57 = vor.u32 %v6009_v44, %v4452_v30  ;;  %v4459_v42 = vor.u32 %v6022_v32, %v4458_v49  ;;  %v6351_v30 = vld [vmem:[%s7881_s1 + $0x4a0] sm:$0xff] }
 0x1b2   : > { %v3424_v47 = vpop.f32.mrf.mxu0  ;;  %v5151_v5 = vor.u32 %v6196_v63, %v5150_v16  ;;  %v6359_v49 = vld [vmem:[%s7881_s1 + $0x4e0] sm:$0xff]  ;;  %3876 = vmatpush.bf16.msrb.mxu2 %v6351_v30 }
 0x1b3   : > { %v7313_v52 = vadd.f32 %v3422_v36, %v3374_v3  ;;  %v6023_v36 = vld [vmem:[%s6571_s4 + $0xa0] sm:$0xf0]  ;;  %v4463_v3 = vor.u32 %v6010_v33, %v4460_v35  ;;  %3925 = vmatpush.bf16.msrb.mxu3 %v6359_v49 }
 0x1b6   : > { %v3326_v0 = vpop.f32.mrf.mxu2 }
 0x1b7   : > { %v3327_v14 = vadd.f32 %v3326_v0, %v3278_v26 }
 0x1b8   : > { %v3375_v2 = vpop.f32.mrf.mxu3  ;;  %v3280_v62 = vpop.f32.mrf.mxu1 }
 0x1b9   : > { %v3376_v6 = vadd.f32 %v3375_v2, %v3327_v14  ;;  %v3281_v8 = vadd.f32 %v3280_v62, %v7131_v34  ;;  %v6344_v14 = vld [vmem:[%s7881_s1 + $0x468] sm:$0xff] }
 0x1ba   : > { %v3427_v9 = vpop.f32.mrf.mxu0  ;;  %v6368_v2 = vld [vmem:[%s7881_s1 + $0x528] sm:$0xff]  ;;  %3826 = vmatpush.bf16.msrb.mxu1 %v6344_v14 }
 0x1bb   : > { %3475 = vmatmul.bf16.gmra.mxu1 %v5139_v19  ;;  %3524 = vmatmul.bf16.gmra.mxu2 %v5143_v56  ;;  %v7322_v28 = vadd.f32 %v3424_v47, %v3376_v6  ;;  %v6034_v19 = vld [vmem:[%s6571_s4 + $0xfc] sm:$0xf]  ;;  %v4552_v56 = vld [vmem:[%s6571_s4 + $0x15c] sm:$0xf0]  ;;  %v6035_v6 = vld [vmem:[%s6571_s4 + $0x104] sm:$0xf] }
 0x1bc   : > { %3973 = vmatpush.bf16.msrb.mxu0 %v6368_v2 }
 0x1bd   : > { %3573 = vmatmul.bf16.gmra.mxu3 %v5147_v29  ;;  %3622 = vmatmul.bf16.gmra.mxu0 %v5151_v5  ;;  %v4558_v29 = vld [vmem:[%s6571_s4 + $0x100] sm:$0xf]  ;;  %v6047_v5 = vld [vmem:[%s6571_s4 + $0x160] sm:$0xf0] }
 0x1be   : > { %v3329_v13 = vpop.f32.mrf.mxu2 }
 0x1bf   : > { %v3330_v34 = vadd.f32 %v3329_v13, %v3281_v8  ;;  %v4560_v8 = vld [vmem:[%s6571_s4 + $0x164] sm:$0xf0] }
 0x1c0   : > { %v3378_v17 = vpop.f32.mrf.mxu3  ;;  %v3282_v20 = vpop.f32.mrf.mxu1 }
 0x1c1   : > { %v3379_v41 = vadd.f32 %v3378_v17, %v3330_v34  ;;  %v3283_v21 = vadd.f32 %v3282_v20, %v7140_v54  ;;  %v4466_v54 = vld [vmem:[%s6571_s4 + $0x40] sm:$0xf]  ;;  %v4555_v34 = vor.u32 %v6034_v19, %v4552_v56  ;;  %v4559_v17 = vor.u32 %v6047_v5, %v4558_v29  ;;  %v6350_v56 = vld [vmem:[%s7881_s1 + $0x498] sm:$0xff] }
 0x1c2   : > { %v3429_v23 = vpop.f32.mrf.mxu0  ;;  %v4467_v26 = vor.u32 %v6023_v36, %v4466_v54  ;;  %v6358_v29 = vld [vmem:[%s7881_s1 + $0x4d8] sm:$0xff]  ;;  %3877 = vmatpush.bf16.msrb.mxu2 %v6350_v56 }
 0x1c3   : > { %v7339_v18 = vadd.f32 %v3427_v9, %v3379_v41  ;;  %v6048_v9 = vld [vmem:[%s6571_s4 + $0x168] sm:$0xf0]  ;;  %v4563_v41 = vor.u32 %v6035_v6, %v4560_v8  ;;  %3926 = vmatpush.bf16.msrb.mxu3 %v6358_v29 }
 0x1c6   : > { %v3331_v37 = vpop.f32.mrf.mxu2 }
 0x1c7   : > { %v3332_v43 = vadd.f32 %v3331_v37, %v3283_v21 }
 0x1c8   : > { %v3380_v40 = vpop.f32.mrf.mxu3  ;;  %v3441_v45 = vpop.f32.mrf.mxu1 }
 0x1c9   : > { %v3381_v47 = vadd.f32 %v3380_v40, %v3332_v43  ;;  %v3442_v10 = vadd.f32 %v3441_v45, %v7157_v50  ;;  %v6343_v43 = vld [vmem:[%s7881_s1 + $0x460] sm:$0xff] }
 0x1ca   : > { %v3588_v15 = vpop.f32.mrf.mxu0  ;;  %v6367_v40 = vld [vmem:[%s7881_s1 + $0x520] sm:$0xff]  ;;  %3827 = vmatpush.bf16.msrb.mxu1 %v6343_v43 }
 0x1cb   : > { %3636 = vmatmul.bf16.vlgmr.msra.gmra.mxu1 %v4455_v57  ;;  %3685 = vmatmul.bf16.vlgmr.msra.gmra.mxu2 %v4459_v42  ;;  %v7348_v25 = vadd.f32 %v3429_v23, %v3381_v47  ;;  %v6059_v57 = vld [vmem:[%s6571_s4 + $0x1c4] sm:$0xf]  ;;  %v4652_v42 = vld [vmem:[%s6571_s4 + $0x224] sm:$0xf0]  ;;  %v6060_v47 = vld [vmem:[%s6571_s4 + $0x1cc] sm:$0xf] }
 0x1cc   : > { %3974 = vmatpush.bf16.msrb.mxu0 %v6367_v40 }
 0x1cd   : > { %3734 = vmatmul.bf16.vlgmr.msra.gmra.mxu3 %v4463_v3  ;;  %3783 = vmatmul.bf16.vlgmr.msra.gmra.mxu0 %v4467_v26  ;;  %v4658_v3 = vld [vmem:[%s6571_s4 + $0x1c8] sm:$0xf]  ;;  %v6072_v26 = vld [vmem:[%s6571_s4 + $0x228] sm:$0xf0] }
 0x1ce   : > { %v3490_v53 = vpop.f32.mrf.mxu2 }
 0x1cf   : > { %v3491_v50 = vadd.f32 %v3490_v53, %v3442_v10  ;;  %v4660_v10 = vld [vmem:[%s6571_s4 + $0x22c] sm:$0xf0] }
 0x1d0   : > { %v3539_v55 = vpop.f32.mrf.mxu3  ;;  %v3443_v59 = vpop.f32.mrf.mxu1 }
 0x1d1   : > { %v3540_v16 = vadd.f32 %v3539_v55, %v3491_v50  ;;  %v3444_v63 = vadd.f32 %v3443_v59, %v7166_v58  ;;  %v4566_v58 = vld [vmem:[%s6571_s4 + $0x108] sm:$0xf]  ;;  %v4655_v50 = vor.u32 %v6059_v57, %v4652_v42  ;;  %v4659_v55 = vor.u32 %v6072_v26, %v4658_v3  ;;  %v6349_v42 = vld [vmem:[%s7881_s1 + $0x490] sm:$0xff] }
 0x1d2   : > { %v3590_v0 = vpop.f32.mrf.mxu0  ;;  %v4567_v21 = vor.u32 %v6048_v9, %v4566_v58  ;;  %v6357_v3 = vld [vmem:[%s7881_s1 + $0x4d0] sm:$0xff]  ;;  %3878 = vmatpush.bf16.msrb.mxu2 %v6349_v42 }
 0x1d3   : > { %v7365_v62 = vadd.f32 %v3588_v15, %v3540_v16  ;;  %v6073_v15 = vld [vmem:[%s6571_s4 + $0x230] sm:$0xf0]  ;;  %v4663_v16 = vor.u32 %v6060_v47, %v4660_v10  ;;  %3927 = vmatpush.bf16.msrb.mxu3 %v6357_v3 }
 0x1d6   : > { %v3492_v11 = vpop.f32.mrf.mxu2 }
 0x1d7   : > { %v3493_v31 = vadd.f32 %v3492_v11, %v3444_v63 }
 0x1d8   : > { %v3541_v13 = vpop.f32.mrf.mxu3  ;;  %v3446_v20 = vpop.f32.mrf.mxu1 }
 0x1d9   : > { %v3542_v23 = vadd.f32 %v3541_v13, %v3493_v31  ;;  %v3447_v39 = vadd.f32 %v3446_v20, %v7183_v48  ;;  %v6342_v31 = vld [vmem:[%s7881_s1 + $0x458] sm:$0xff] }
 0x1da   : > { %v3593_v61 = vpop.f32.mrf.mxu0  ;;  %v6366_v13 = vld [vmem:[%s7881_s1 + $0x518] sm:$0xff]  ;;  %3828 = vmatpush.bf16.msrb.mxu1 %v6342_v31 }
 0x1db   : > { %3641 = vmatmul.bf16.gmra.mxu1 %v4555_v34  ;;  %3690 = vmatmul.bf16.gmra.mxu2 %v4559_v17  ;;  %v7374_v44 = vadd.f32 %v3590_v0, %v3542_v23  ;;  %v6084_v34 = vld [vmem:[%s6571_s4 + $0x28c] sm:$0xf]  ;;  %v4752_v17 = vld [vmem:[%s6571_s4 + $0x2ec] sm:$0xf0]  ;;  %v6085_v23 = vld [vmem:[%s6571_s4 + $0x294] sm:$0xf] }
 0x1dc   : > { %3975 = vmatpush.bf16.msrb.mxu0 %v6366_v13 }
 0x1dd   : > { %3739 = vmatmul.bf16.gmra.mxu3 %v4563_v41  ;;  %3788 = vmatmul.bf16.gmra.mxu0 %v4567_v21  ;;  %v4758_v41 = vld [vmem:[%s6571_s4 + $0x290] sm:$0xf]  ;;  %v6097_v21 = vld [vmem:[%s6571_s4 + $0x2f0] sm:$0xf0] }
 0x1de   : > { %v3495_v32 = vpop.f32.mrf.mxu2 }
 0x1df   : > { %v3496_v48 = vadd.f32 %v3495_v32, %v3447_v39  ;;  %v4760_v39 = vld [vmem:[%s6571_s4 + $0x2f4] sm:$0xf0] }
 0x1e0   : > { %v3544_v33 = vpop.f32.mrf.mxu3  ;;  %v3448_v35 = vpop.f32.mrf.mxu1 }
 0x1e1   : > { %v3545_v54 = vadd.f32 %v3544_v33, %v3496_v48  ;;  %v3449_v36 = vadd.f32 %v3448_v35, %v7192_v22  ;;  %v4666_v22 = vld [vmem:[%s6571_s4 + $0x1d0] sm:$0xf]  ;;  %v4755_v48 = vor.u32 %v6084_v34, %v4752_v17  ;;  %v4759_v33 = vor.u32 %v6097_v21, %v4758_v41  ;;  %v6348_v17 = vld [vmem:[%s7881_s1 + $0x488] sm:$0xff] }
 0x1e2   : > { %v3595_v37 = vpop.f32.mrf.mxu0  ;;  %v4667_v63 = vor.u32 %v6073_v15, %v4666_v22  ;;  %v6356_v41 = vld [vmem:[%s7881_s1 + $0x4c8] sm:$0xff]  ;;  %3879 = vmatpush.bf16.msrb.mxu2 %v6348_v17 }
 0x1e3   : > { %v7391_v45 = vadd.f32 %v3593_v61, %v3545_v54  ;;  %v6098_v61 = vld [vmem:[%s6571_s4 + $0x2f8] sm:$0xf0]  ;;  %v4763_v54 = vor.u32 %v6085_v23, %v4760_v39  ;;  %3928 = vmatpush.bf16.msrb.mxu3 %v6356_v41 }
 0x1e6   : > { %v3497_v51 = vpop.f32.mrf.mxu2 }
 0x1e7   : > { %v3498_v7 = vadd.f32 %v3497_v51, %v3449_v36 }
 0x1e8   : > { %v3546_v53 = vpop.f32.mrf.mxu3  ;;  %v3451_v59 = vpop.f32.mrf.mxu1 }
 0x1e9   : > { %v3547_v0 = vadd.f32 %v3546_v53, %v3498_v7  ;;  %v3452_v14 = vadd.f32 %v3451_v59, %v7209_v27  ;;  %v6341_v7 = vld [vmem:[%s7881_s1 + $0x450] sm:$0xff] }
 0x1ea   : > { %v3598_v2 = vpop.f32.mrf.mxu0  ;;  %v6365_v53 = vld [vmem:[%s7881_s1 + $0x510] sm:$0xff]  ;;  %3829 = vmatpush.bf16.msrb.mxu1 %v6341_v7 }
 0x1eb   : > { %3646 = vmatmul.bf16.gmra.mxu1 %v4655_v50  ;;  %3695 = vmatmul.bf16.gmra.mxu2 %v4659_v55  ;;  %v7400_v19 = vadd.f32 %v3595_v37, %v3547_v0  ;;  %v6109_v50 = vld [vmem:[%s6571_s4 + $0x354] sm:$0xf]  ;;  %v4852_v55 = vld [vmem:[%s6571_s4 + $0x3b4] sm:$0xf0]  ;;  %v6110_v0 = vld [vmem:[%s6571_s4 + $0x35c] sm:$0xf] }
 0x1ec   : > { %3976 = vmatpush.bf16.msrb.mxu0 %v6365_v53 }
 0x1ed   : > { %3744 = vmatmul.bf16.gmra.mxu3 %v4663_v16  ;;  %3793 = vmatmul.bf16.gmra.mxu0 %v4667_v63  ;;  %v4858_v16 = vld [vmem:[%s6571_s4 + $0x358] sm:$0xf]  ;;  %v6122_v63 = vld [vmem:[%s6571_s4 + $0x3b8] sm:$0xf0] }
 0x1ee   : > { %v3500_v5 = vpop.f32.mrf.mxu2 }
 0x1ef   : > { %v3501_v27 = vadd.f32 %v3500_v5, %v3452_v14  ;;  %v4860_v14 = vld [vmem:[%s6571_s4 + $0x3bc] sm:$0xf0] }
 0x1f0   : > { %v3549_v6 = vpop.f32.mrf.mxu3  ;;  %v3453_v8 = vpop.f32.mrf.mxu1 }
 0x1f1   : > { %v3550_v58 = vadd.f32 %v3549_v6, %v3501_v27  ;;  %v3454_v9 = vadd.f32 %v3453_v8, %v7218_v60  ;;  %v4766_v60 = vld [vmem:[%s6571_s4 + $0x298] sm:$0xf]  ;;  %v4855_v27 = vor.u32 %v6109_v50, %v4852_v55  ;;  %v4859_v6 = vor.u32 %v6122_v63, %v4858_v16  ;;  %v6347_v55 = vld [vmem:[%s7881_s1 + $0x480] sm:$0xff] }
 0x1f2   : > { %v3600_v11 = vpop.f32.mrf.mxu0  ;;  %v4767_v36 = vor.u32 %v6098_v61, %v4766_v60  ;;  %v6355_v16 = vld [vmem:[%s7881_s1 + $0x4c0] sm:$0xff]  ;;  %3880 = vmatpush.bf16.msrb.mxu2 %v6347_v55 }
 0x1f3   : > { %v7417_v20 = vadd.f32 %v3598_v2, %v3550_v58  ;;  %v6123_v2 = vld [vmem:[%s6571_s4 + $0x3c0] sm:$0xf0]  ;;  %v4863_v58 = vor.u32 %v6110_v0, %v4860_v14  ;;  %3929 = vmatpush.bf16.msrb.mxu3 %v6355_v16 }
 0x1f6   : > { %v3502_v30 = vpop.f32.mrf.mxu2 }
 0x1f7   : > { %v3503_v49 = vadd.f32 %v3502_v30, %v3454_v9 }
 0x1f8   : > { %v3551_v32 = vpop.f32.mrf.mxu3  ;;  %v3456_v35 = vpop.f32.mrf.mxu1 }
 0x1f9   : > { %v3552_v37 = vadd.f32 %v3551_v32, %v3503_v49  ;;  %v3457_v43 = vadd.f32 %v3456_v35, %v7235_v1  ;;  %v6340_v49 = vld [vmem:[%s7881_s1 + $0x448] sm:$0xff] }
 0x1fa   : > { %v3603_v40 = vpop.f32.mrf.mxu0  ;;  %v6364_v32 = vld [vmem:[%s7881_s1 + $0x508] sm:$0xff]  ;;  %3830 = vmatpush.bf16.msrb.mxu1 %v6340_v49 }
 0x1fb   : > { %3651 = vmatmul.bf16.gmra.mxu1 %v4755_v48  ;;  %3700 = vmatmul.bf16.gmra.mxu2 %v4759_v33  ;;  %v7426_v57 = vadd.f32 %v3600_v11, %v3552_v37  ;;  %v6134_v48 = vld [vmem:[%s6571_s4 + $0x41c] sm:$0xf]  ;;  %v4952_v33 = vld [vmem:[%s6571_s4 + $0x47c] sm:$0xf0]  ;;  %v6135_v37 = vld [vmem:[%s6571_s4 + $0x424] sm:$0xf] }
 0x1fc   : > { %3977 = vmatpush.bf16.msrb.mxu0 %v6364_v32 }
 0x1fd   : > { %3749 = vmatmul.bf16.gmra.mxu3 %v4763_v54  ;;  %3798 = vmatmul.bf16.gmra.mxu0 %v4767_v36  ;;  %v4958_v54 = vld [vmem:[%s6571_s4 + $0x420] sm:$0xf]  ;;  %v6147_v36 = vld [vmem:[%s6571_s4 + $0x480] sm:$0xf0] }
 0x1fe   : > { %v3505_v26 = vpop.f32.mrf.mxu2 }
 0x1ff   : > { %v3506_v1 = vadd.f32 %v3505_v26, %v3457_v43  ;;  %v4960_v43 = vld [vmem:[%s6571_s4 + $0x484] sm:$0xf0] }
 0x200   : > { %v3554_v47 = vpop.f32.mrf.mxu3  ;;  %v3458_v10 = vpop.f32.mrf.mxu1 }
 0x201   : > { %v3555_v22 = vadd.f32 %v3554_v47, %v3506_v1  ;;  %v3459_v15 = vadd.f32 %v3458_v10, %v7244_v24  ;;  %v4866_v24 = vld [vmem:[%s6571_s4 + $0x360] sm:$0xf]  ;;  %v4955_v1 = vor.u32 %v6134_v48, %v4952_v33  ;;  %v4959_v47 = vor.u32 %v6147_v36, %v4958_v54  ;;  %v6386_v33 = vld [vmem:[%s7881_s1 + $0x5b8] sm:$0xff] }
 0x202   : > { %v3605_v51 = vpop.f32.mrf.mxu0  ;;  %v4867_v9 = vor.u32 %v6123_v2, %v4866_v24  ;;  %v6394_v54 = vld [vmem:[%s7881_s1 + $0x5f8] sm:$0xff]  ;;  %4069 = vmatpush.bf16.msra.mxu2 %v6386_v33 }
 0x203   : > { %v7443_v59 = vadd.f32 %v3603_v40, %v3555_v22  ;;  %v6148_v40 = vld [vmem:[%s6571_s4 + $0x488] sm:$0xf0]  ;;  %v4963_v22 = vor.u32 %v6135_v37, %v4960_v43  ;;  %4118 = vmatpush.bf16.msra.mxu3 %v6394_v54 }
 0x206   : > { %v3507_v56 = vpop.f32.mrf.mxu2 }
 0x207   : > { %v3508_v29 = vadd.f32 %v3507_v56, %v3459_v15 }
 0x208   : > { %v3556_v5 = vpop.f32.mrf.mxu3  ;;  %v3461_v8 = vpop.f32.mrf.mxu1 }
 0x209   : > { %v3557_v11 = vadd.f32 %v3556_v5, %v3508_v29  ;;  %v3462_v31 = vadd.f32 %v3461_v8, %v7261_v38  ;;  %v6339_v29 = vld [vmem:[%s7881_s1 + $0x440] sm:$0xff] }
 0x20a   : > { %v3608_v13 = vpop.f32.mrf.mxu0  ;;  %v6363_v5 = vld [vmem:[%s7881_s1 + $0x500] sm:$0xff]  ;;  %3831 = vmatpush.bf16.msrb.mxu1 %v6339_v29 }
 0x20b   : > { %3656 = vmatmul.bf16.gmra.mxu1 %v4855_v27  ;;  %3705 = vmatmul.bf16.gmra.mxu2 %v4859_v6  ;;  %v7452_v34 = vadd.f32 %v3605_v51, %v3557_v11  ;;  %v6159_v27 = vld [vmem:[%s6571_s4 + $0x4e4] sm:$0xf]  ;;  %v5052_v6 = vld [vmem:[%s6571_s4 + $0x544] sm:$0xf0]  ;;  %v6160_v11 = vld [vmem:[%s6571_s4 + $0x4ec] sm:$0xf] }
 0x20c   : > { %3978 = vmatpush.bf16.msrb.mxu0 %v6363_v5 }
 0x20d   : > { %3754 = vmatmul.bf16.gmra.mxu3 %v4863_v58  ;;  %3803 = vmatmul.bf16.gmra.mxu0 %v4867_v9  ;;  %v5058_v58 = vld [vmem:[%s6571_s4 + $0x4e8] sm:$0xf]  ;;  %v6172_v9 = vld [vmem:[%s6571_s4 + $0x548] sm:$0xf0] }
 0x20e   : > { %v3510_v21 = vpop.f32.mrf.mxu2 }
 0x20f   : > { %v3511_v38 = vadd.f32 %v3510_v21, %v3462_v31  ;;  %v5060_v31 = vld [vmem:[%s6571_s4 + $0x54c] sm:$0xf0] }
 0x210   : > { %v3559_v23 = vpop.f32.mrf.mxu3  ;;  %v3463_v39 = vpop.f32.mrf.mxu1 }
 0x211   : > { %v3560_v60 = vadd.f32 %v3559_v23, %v3511_v38  ;;  %v3464_v61 = vadd.f32 %v3463_v39, %v7270_v4  ;;  %v4966_v4 = vld [vmem:[%s6571_s4 + $0x428] sm:$0xf]  ;;  %v5055_v38 = vor.u32 %v6159_v27, %v5052_v6  ;;  %v5059_v23 = vor.u32 %v6172_v9, %v5058_v58  ;;  %v6385_v6 = vld [vmem:[%s7881_s1 + $0x5b0] sm:$0xff] }
 0x212   : > { %v3610_v30 = vpop.f32.mrf.mxu0  ;;  %v4967_v15 = vor.u32 %v6148_v40, %v4966_v4  ;;  %v6393_v58 = vld [vmem:[%s7881_s1 + $0x5f0] sm:$0xff]  ;;  %4070 = vmatpush.bf16.msra.mxu2 %v6385_v6 }
 0x213   : > { %v7469_v35 = vadd.f32 %v3608_v13, %v3560_v60  ;;  %v6173_v13 = vld [vmem:[%s6571_s4 + $0x550] sm:$0xf0]  ;;  %v5063_v60 = vor.u32 %v6160_v11, %v5060_v31  ;;  %4119 = vmatpush.bf16.msra.mxu3 %v6393_v58 }
 0x216   : > { %v3512_v42 = vpop.f32.mrf.mxu2 }
 0x217   : > { %v3513_v3 = vadd.f32 %v3512_v42, %v3464_v61 }
 0x218   : > { %v3561_v26 = vpop.f32.mrf.mxu3  ;;  %v3466_v10 = vpop.f32.mrf.mxu1 }
 0x219   : > { %v3562_v51 = vadd.f32 %v3561_v26, %v3513_v3  ;;  %v3467_v7 = vadd.f32 %v3466_v10, %v7287_v12  ;;  %v6378_v3 = vld [vmem:[%s7881_s1 + $0x578] sm:$0xff] }
 0x21a   : > { %v3613_v53 = vpop.f32.mrf.mxu0  ;;  %v6402_v26 = vld [vmem:[%s7881_s1 + $0x638] sm:$0xff]  ;;  %4020 = vmatpush.bf16.msra.mxu1 %v6378_v3 }
 0x21b   : > { %3661 = vmatmul.bf16.gmra.mxu1 %v4955_v1  ;;  %3710 = vmatmul.bf16.gmra.mxu2 %v4959_v47  ;;  %v7478_v50 = vadd.f32 %v3610_v30, %v3562_v51  ;;  %v6184_v1 = vld [vmem:[%s6571_s4 + $0x5ac] sm:$0xf]  ;;  %v5152_v47 = vld [vmem:[%s6571_s4 + $0x60c] sm:$0xf0]  ;;  %v6185_v51 = vld [vmem:[%s6571_s4 + $0x5b4] sm:$0xf] }
 0x21c   : > { %4167 = vmatpush.bf16.msra.mxu0 %v6402_v26 }
 0x21d   : > { %3759 = vmatmul.bf16.gmra.mxu3 %v4963_v22  ;;  %3808 = vmatmul.bf16.gmra.mxu0 %v4967_v15  ;;  %v5158_v22 = vld [vmem:[%s6571_s4 + $0x5b0] sm:$0xf]  ;;  %v6197_v15 = vld [vmem:[%s6571_s4 + $0x610] sm:$0xf0] }
 0x21e   : > { %v3515_v63 = vpop.f32.mrf.mxu2 }
 0x21f   : > { %v3516_v12 = vadd.f32 %v3515_v63, %v3467_v7  ;;  %v5160_v7 = vld [vmem:[%s6571_s4 + $0x614] sm:$0xf0] }
 0x220   : > { %v3564_v0 = vpop.f32.mrf.mxu3  ;;  %v3468_v14 = vpop.f32.mrf.mxu1 }
 0x221   : > { %v3565_v24 = vadd.f32 %v3564_v0, %v3516_v12  ;;  %v3469_v2 = vadd.f32 %v3468_v14, %v7296_v46  ;;  %v5066_v46 = vld [vmem:[%s6571_s4 + $0x4f0] sm:$0xf]  ;;  %v5155_v12 = vor.u32 %v6184_v1, %v5152_v47  ;;  %v5159_v0 = vor.u32 %v6197_v15, %v5158_v22  ;;  %v6384_v47 = vld [vmem:[%s7881_s1 + $0x5a8] sm:$0xff] }
 0x222   : > { %v3615_v56 = vpop.f32.mrf.mxu0  ;;  %v5067_v61 = vor.u32 %v6173_v13, %v5066_v46  ;;  %v6392_v22 = vld [vmem:[%s7881_s1 + $0x5e8] sm:$0xff]  ;;  %4071 = vmatpush.bf16.msra.mxu2 %v6384_v47 }
 0x223   : > { %v7495_v8 = vadd.f32 %v3613_v53, %v3565_v24  ;;  %v6198_v53 = vld [vmem:[%s6571_s4 + $0x618] sm:$0xf0]  ;;  %v5163_v24 = vor.u32 %v6185_v51, %v5160_v7  ;;  %4120 = vmatpush.bf16.msra.mxu3 %v6392_v22 }
 0x226   : > { %v3517_v17 = vpop.f32.mrf.mxu2 }
 0x227   : > { %v3518_v41 = vadd.f32 %v3517_v17, %v3469_v2 }
 0x228   : > { %v3566_v21 = vpop.f32.mrf.mxu3  ;;  %v3471_v39 = vpop.f32.mrf.mxu1 }
 0x229   : > { %v3567_v30 = vadd.f32 %v3566_v21, %v3518_v41  ;;  %v3472_v49 = vadd.f32 %v3471_v39, %v7313_v52  ;;  %v6377_v41 = vld [vmem:[%s7881_s1 + $0x570] sm:$0xff] }
 0x22a   : > { %v3618_v32 = vpop.f32.mrf.mxu0  ;;  %v6401_v21 = vld [vmem:[%s7881_s1 + $0x630] sm:$0xff]  ;;  %4021 = vmatpush.bf16.msra.mxu1 %v6377_v41 }
 0x22b   : > { %3666 = vmatmul.bf16.gmra.mxu1 %v5055_v38  ;;  %3715 = vmatmul.bf16.gmra.mxu2 %v5059_v23  ;;  %v7504_v48 = vadd.f32 %v3615_v56, %v3567_v30  ;;  %v6011_v38 = vld [vmem:[%s6571_s4 + $0x44] sm:$0xf]  ;;  %v4468_v23 = vld [vmem:[%s6571_s4 + $0xa4] sm:$0xf0]  ;;  %v6012_v30 = vld [vmem:[%s6571_s4 + $0x4c] sm:$0xf] }
 0x22c   : > { %4168 = vmatpush.bf16.msra.mxu0 %v6401_v21 }
 0x22d   : > { %3764 = vmatmul.bf16.gmra.mxu3 %v5063_v60  ;;  %3813 = vmatmul.bf16.gmra.mxu0 %v5067_v61  ;;  %v4474_v60 = vld [vmem:[%s6571_s4 + $0x48] sm:$0xf]  ;;  %v6024_v61 = vld [vmem:[%s6571_s4 + $0xa8] sm:$0xf0] }
 0x22e   : > { %v3520_v36 = vpop.f32.mrf.mxu2 }
 0x22f   : > { %v3521_v52 = vadd.f32 %v3520_v36, %v3472_v49  ;;  %v4476_v49 = vld [vmem:[%s6571_s4 + $0xac] sm:$0xf0] }
 0x230   : > { %v3569_v37 = vpop.f32.mrf.mxu3  ;;  %v3473_v43 = vpop.f32.mrf.mxu1 }
 0x231   : > { %v3570_v4 = vadd.f32 %v3569_v37, %v3521_v52  ;;  %v3474_v40 = vadd.f32 %v3473_v43, %v7322_v28  ;;  %v5166_v28 = vld [vmem:[%s6571_s4 + $0x5b8] sm:$0xf]  ;;  %v4471_v52 = vor.u32 %v6011_v38, %v4468_v23  ;;  %v4475_v37 = vor.u32 %v6024_v61, %v4474_v60  ;;  %v6383_v23 = vld [vmem:[%s7881_s1 + $0x5a0] sm:$0xff] }
 0x232   : > { %v3620_v42 = vpop.f32.mrf.mxu0  ;;  %v5167_v2 = vor.u32 %v6198_v53, %v5166_v28  ;;  %v6391_v60 = vld [vmem:[%s7881_s1 + $0x5e0] sm:$0xff]  ;;  %4072 = vmatpush.bf16.msra.mxu2 %v6383_v23 }
 0x233   : > { %v7521_v10 = vadd.f32 %v3618_v32, %v3570_v4  ;;  %v6025_v32 = vld [vmem:[%s6571_s4 + $0xb0] sm:$0xf0]  ;;  %v4479_v4 = vor.u32 %v6012_v30, %v4476_v49  ;;  %4121 = vmatpush.bf16.msra.mxu3 %v6391_v60 }
 0x236   : > { %v3522_v55 = vpop.f32.mrf.mxu2 }
 0x237   : > { %v3523_v16 = vadd.f32 %v3522_v55, %v3474_v40 }
 0x238   : > { %v3571_v63 = vpop.f32.mrf.mxu3  ;;  %v3476_v14 = vpop.f32.mrf.mxu1 }
 0x239   : > { %v3572_v56 = vadd.f32 %v3571_v63, %v3523_v16  ;;  %v3477_v29 = vadd.f32 %v3476_v14, %v7339_v18  ;;  %v6376_v16 = vld [vmem:[%s7881_s1 + $0x568] sm:$0xff] }
 0x23a   : > { %v3623_v5 = vpop.f32.mrf.mxu0  ;;  %v6400_v63 = vld [vmem:[%s7881_s1 + $0x628] sm:$0xff]  ;;  %4022 = vmatpush.bf16.msra.mxu1 %v6376_v16 }
 0x23b   : > { %3671 = vmatmul.bf16.gmra.mxu1 %v5155_v12  ;;  %3720 = vmatmul.bf16.gmra.mxu2 %v5159_v0  ;;  %v7530_v27 = vadd.f32 %v3620_v42, %v3572_v56  ;;  %v6036_v12 = vld [vmem:[%s6571_s4 + $0x10c] sm:$0xf]  ;;  %v4568_v0 = vld [vmem:[%s6571_s4 + $0x16c] sm:$0xf0]  ;;  %v6037_v56 = vld [vmem:[%s6571_s4 + $0x114] sm:$0xf] }
 0x23c   : > { %4169 = vmatpush.bf16.msra.mxu0 %v6400_v63 }
 0x23d   : > { %3769 = vmatmul.bf16.gmra.mxu3 %v5163_v24  ;;  %3818 = vmatmul.bf16.gmra.mxu0 %v5167_v2  ;;  %v4574_v24 = vld [vmem:[%s6571_s4 + $0x110] sm:$0xf]  ;;  %v6049_v2 = vld [vmem:[%s6571_s4 + $0x170] sm:$0xf0] }
 0x23e   : > { %v3525_v9 = vpop.f32.mrf.mxu2 }
 0x23f   : > { %v3526_v18 = vadd.f32 %v3525_v9, %v3477_v29  ;;  %v4576_v29 = vld [vmem:[%s6571_s4 + $0x174] sm:$0xf0] }
 0x240   : > { %v3574_v11 = vpop.f32.mrf.mxu3  ;;  %v3478_v31 = vpop.f32.mrf.mxu1 }
 0x241   : > { %v3575_v46 = vadd.f32 %v3574_v11, %v3526_v18  ;;  %v3479_v13 = vadd.f32 %v3478_v31, %v7348_v25  ;;  %v4482_v25 = vld [vmem:[%s6571_s4 + $0x50] sm:$0xf]  ;;  %v4571_v18 = vor.u32 %v6036_v12, %v4568_v0  ;;  %v4575_v11 = vor.u32 %v6049_v2, %v4574_v24  ;;  %v6382_v0 = vld [vmem:[%s7881_s1 + $0x598] sm:$0xff] }
 0x242   : > { %v3625_v17 = vpop.f32.mrf.mxu0  ;;  %v4483_v40 = vor.u32 %v6025_v32, %v4482_v25  ;;  %v6390_v24 = vld [vmem:[%s7881_s1 + $0x5d8] sm:$0xff]  ;;  %4073 = vmatpush.bf16.msra.mxu2 %v6382_v0 }
 0x243   : > { %v7547_v39 = vadd.f32 %v3623_v5, %v3575_v46  ;;  %v6050_v5 = vld [vmem:[%s6571_s4 + $0x178] sm:$0xf0]  ;;  %v4579_v46 = vor.u32 %v6037_v56, %v4576_v29  ;;  %4122 = vmatpush.bf16.msra.mxu3 %v6390_v24 }
 0x246   : > { %v3527_v33 = vpop.f32.mrf.mxu2 }
 0x247   : > { %v3528_v54 = vadd.f32 %v3527_v33, %v3479_v13 }
 0x248   : > { %v3576_v36 = vpop.f32.mrf.mxu3  ;;  %v3637_v43 = vpop.f32.mrf.mxu1 }
 0x249   : > { %v3577_v42 = vadd.f32 %v3576_v36, %v3528_v54  ;;  %v3638_v3 = vadd.f32 %v3637_v43, %v7365_v62  ;;  %v6375_v54 = vld [vmem:[%s7881_s1 + $0x560] sm:$0xff] }
 0x24a   : > { %v3784_v26 = vpop.f32.mrf.mxu0  ;;  %v6399_v36 = vld [vmem:[%s7881_s1 + $0x620] sm:$0xff]  ;;  %4023 = vmatpush.bf16.msra.mxu1 %v6375_v54 }
 0x24b   : > { %3832 = vmatmul.bf16.vlgmr.msrb.gmra.mxu1 %v4471_v52  ;;  %3881 = vmatmul.bf16.vlgmr.msrb.gmra.mxu2 %v4475_v37  ;;  %v7556_v1 = vadd.f32 %v3625_v17, %v3577_v42  ;;  %v6061_v52 = vld [vmem:[%s6571_s4 + $0x1d4] sm:$0xf]  ;;  %v4668_v37 = vld [vmem:[%s6571_s4 + $0x234] sm:$0xf0]  ;;  %v6062_v42 = vld [vmem:[%s6571_s4 + $0x1dc] sm:$0xf] }
 0x24c   : > { %4170 = vmatpush.bf16.msra.mxu0 %v6399_v36 }
 0x24d   : > { %3930 = vmatmul.bf16.vlgmr.msrb.gmra.mxu3 %v4479_v4  ;;  %3979 = vmatmul.bf16.vlgmr.msrb.gmra.mxu0 %v4483_v40  ;;  %v4674_v4 = vld [vmem:[%s6571_s4 + $0x1d8] sm:$0xf]  ;;  %v6074_v40 = vld [vmem:[%s6571_s4 + $0x238] sm:$0xf0] }
 0x24e   : > { %v3686_v15 = vpop.f32.mrf.mxu2 }
 0x24f   : > { %v3687_v62 = vadd.f32 %v3686_v15, %v3638_v3  ;;  %v4676_v3 = vld [vmem:[%s6571_s4 + $0x23c] sm:$0xf0] }
 0x250   : > { %v3735_v51 = vpop.f32.mrf.mxu3  ;;  %v3639_v7 = vpop.f32.mrf.mxu1 }
 0x251   : > { %v3736_v28 = vadd.f32 %v3735_v51, %v3687_v62  ;;  %v3640_v53 = vadd.f32 %v3639_v7, %v7374_v44  ;;  %v4582_v44 = vld [vmem:[%s6571_s4 + $0x118] sm:$0xf]  ;;  %v4671_v62 = vor.u32 %v6061_v52, %v4668_v37  ;;  %v4675_v51 = vor.u32 %v6074_v40, %v4674_v4  ;;  %v6381_v37 = vld [vmem:[%s7881_s1 + $0x590] sm:$0xff] }
 0x252   : > { %v3786_v55 = vpop.f32.mrf.mxu0  ;;  %v4583_v13 = vor.u32 %v6050_v5, %v4582_v44  ;;  %v6389_v4 = vld [vmem:[%s7881_s1 + $0x5d0] sm:$0xff]  ;;  %4074 = vmatpush.bf16.msra.mxu2 %v6381_v37 }
 0x253   : > { %v7573_v14 = vadd.f32 %v3784_v26, %v3736_v28  ;;  %v6075_v26 = vld [vmem:[%s6571_s4 + $0x240] sm:$0xf0]  ;;  %v4679_v28 = vor.u32 %v6062_v42, %v4676_v3  ;;  %4123 = vmatpush.bf16.msra.mxu3 %v6389_v4 }
 0x256   : > { %v3688_v6 = vpop.f32.mrf.mxu2 }
 0x257   : > { %v3689_v58 = vadd.f32 %v3688_v6, %v3640_v53 }
 0x258   : > { %v3737_v9 = vpop.f32.mrf.mxu3  ;;  %v3642_v31 = vpop.f32.mrf.mxu1 }
 0x259   : > { %v3738_v17 = vadd.f32 %v3737_v9, %v3689_v58  ;;  %v3643_v41 = vadd.f32 %v3642_v31, %v7391_v45  ;;  %v6374_v58 = vld [vmem:[%s7881_s1 + $0x558] sm:$0xff] }
 0x25a   : > { %v3789_v21 = vpop.f32.mrf.mxu0  ;;  %v6398_v9 = vld [vmem:[%s7881_s1 + $0x618] sm:$0xff]  ;;  %4024 = vmatpush.bf16.msra.mxu1 %v6374_v58 }
 0x25b   : > { %3837 = vmatmul.bf16.gmra.mxu1 %v4571_v18  ;;  %3886 = vmatmul.bf16.gmra.mxu2 %v4575_v11  ;;  %v7582_v38 = vadd.f32 %v3786_v55, %v3738_v17  ;;  %v6086_v18 = vld [vmem:[%s6571_s4 + $0x29c] sm:$0xf]  ;;  %v4768_v11 = vld [vmem:[%s6571_s4 + $0x2fc] sm:$0xf0]  ;;  %v6087_v17 = vld [vmem:[%s6571_s4 + $0x2a4] sm:$0xf] }
 0x25c   : > { %4171 = vmatpush.bf16.msra.mxu0 %v6398_v9 }
 0x25d   : > { %3935 = vmatmul.bf16.gmra.mxu3 %v4579_v46  ;;  %3984 = vmatmul.bf16.gmra.mxu0 %v4583_v13  ;;  %v4774_v46 = vld [vmem:[%s6571_s4 + $0x2a0] sm:$0xf]  ;;  %v6099_v13 = vld [vmem:[%s6571_s4 + $0x300] sm:$0xf0] }
 0x25e   : > { %v3691_v61 = vpop.f32.mrf.mxu2 }
 0x25f   : > { %v3692_v45 = vadd.f32 %v3691_v61, %v3643_v41  ;;  %v4776_v41 = vld [vmem:[%s6571_s4 + $0x304] sm:$0xf0] }
 0x260   : > { %v3740_v30 = vpop.f32.mrf.mxu3  ;;  %v3644_v49 = vpop.f32.mrf.mxu1 }
 0x261   : > { %v3741_v25 = vadd.f32 %v3740_v30, %v3692_v45  ;;  %v3645_v32 = vadd.f32 %v3644_v49, %v7400_v19  ;;  %v4682_v19 = vld [vmem:[%s6571_s4 + $0x1e0] sm:$0xf]  ;;  %v4771_v45 = vor.u32 %v6086_v18, %v4768_v11  ;;  %v4775_v30 = vor.u32 %v6099_v13, %v4774_v46  ;;  %v6380_v11 = vld [vmem:[%s7881_s1 + $0x588] sm:$0xff] }
 0x262   : > { %v3791_v33 = vpop.f32.mrf.mxu0  ;;  %v4683_v53 = vor.u32 %v6075_v26, %v4682_v19  ;;  %v6388_v46 = vld [vmem:[%s7881_s1 + $0x5c8] sm:$0xff]  ;;  %4075 = vmatpush.bf16.msra.mxu2 %v6380_v11 }
 0x263   : > { %v7599_v43 = vadd.f32 %v3789_v21, %v3741_v25  ;;  %v6100_v21 = vld [vmem:[%s6571_s4 + $0x308] sm:$0xf0]  ;;  %v4779_v25 = vor.u32 %v6087_v17, %v4776_v41  ;;  %4124 = vmatpush.bf16.msra.mxu3 %v6388_v46 }
 0x266   : > { %v3693_v47 = vpop.f32.mrf.mxu2 }
 0x267   : > { %v3694_v22 = vadd.f32 %v3693_v47, %v3645_v32 }
 0x268   : > { %v3742_v15 = vpop.f32.mrf.mxu3  ;;  %v3647_v7 = vpop.f32.mrf.mxu1 }
 0x269   : > { %v3743_v55 = vadd.f32 %v3742_v15, %v3694_v22  ;;  %v3648_v16 = vadd.f32 %v3647_v7, %v7417_v20  ;;  %v6373_v22 = vld [vmem:[%s7881_s1 + $0x550] sm:$0xff] }
 0x26a   : > { %v3794_v63 = vpop.f32.mrf.mxu0  ;;  %v6397_v15 = vld [vmem:[%s7881_s1 + $0x610] sm:$0xff]  ;;  %4025 = vmatpush.bf16.msra.mxu1 %v6373_v22 }
 0x26b   : > { %3842 = vmatmul.bf16.gmra.mxu1 %v4671_v62  ;;  %3891 = vmatmul.bf16.gmra.mxu2 %v4675_v51  ;;  %v7608_v12 = vadd.f32 %v3791_v33, %v3743_v55  ;;  %v6111_v62 = vld [vmem:[%s6571_s4 + $0x364] sm:$0xf]  ;;  %v4868_v51 = vld [vmem:[%s6571_s4 + $0x3c4] sm:$0xf0]  ;;  %v6112_v55 = vld [vmem:[%s6571_s4 + $0x36c] sm:$0xf] }
 0x26c   : > { %4172 = vmatpush.bf16.msra.mxu0 %v6397_v15 }
 0x26d   : > { %3940 = vmatmul.bf16.gmra.mxu3 %v4679_v28  ;;  %3989 = vmatmul.bf16.gmra.mxu0 %v4683_v53  ;;  %v4874_v28 = vld [vmem:[%s6571_s4 + $0x368] sm:$0xf]  ;;  %v6124_v53 = vld [vmem:[%s6571_s4 + $0x3c8] sm:$0xf0] }
 0x26e   : > { %v3696_v2 = vpop.f32.mrf.mxu2 }
 0x26f   : > { %v3697_v20 = vadd.f32 %v3696_v2, %v3648_v16  ;;  %v4876_v16 = vld [vmem:[%s6571_s4 + $0x3cc] sm:$0xf0] }
 0x270   : > { %v3745_v56 = vpop.f32.mrf.mxu3  ;;  %v3649_v29 = vpop.f32.mrf.mxu1 }
 0x271   : > { %v3746_v44 = vadd.f32 %v3745_v56, %v3697_v20  ;;  %v3650_v5 = vadd.f32 %v3649_v29, %v7426_v57  ;;  %v4782_v57 = vld [vmem:[%s6571_s4 + $0x2a8] sm:$0xf]  ;;  %v4871_v20 = vor.u32 %v6111_v62, %v4868_v51  ;;  %v4875_v56 = vor.u32 %v6124_v53, %v4874_v28  ;;  %v6379_v51 = vld [vmem:[%s7881_s1 + $0x580] sm:$0xff] }
 0x272   : > { %v3796_v6 = vpop.f32.mrf.mxu0  ;;  %v4783_v32 = vor.u32 %v6100_v21, %v4782_v57  ;;  %v6387_v28 = vld [vmem:[%s7881_s1 + $0x5c0] sm:$0xff]  ;;  %4076 = vmatpush.bf16.msra.mxu2 %v6379_v51 }
 0x273   : > { %v7625_v31 = vadd.f32 %v3794_v63, %v3746_v44  ;;  %v6125_v63 = vld [vmem:[%s6571_s4 + $0x3d0] sm:$0xf0]  ;;  %v4879_v44 = vor.u32 %v6112_v55, %v4876_v16  ;;  %4125 = vmatpush.bf16.msra.mxu3 %v6387_v28 }
 0x276   : > { %v3698_v23 = vpop.f32.mrf.mxu2 }
 0x277   : > { %v3699_v60 = vadd.f32 %v3698_v23, %v3650_v5 }
 0x278   : > { %v3747_v61 = vpop.f32.mrf.mxu3  ;;  %v3652_v49 = vpop.f32.mrf.mxu1 }
 0x279   : > { %v3748_v33 = vadd.f32 %v3747_v61, %v3699_v60  ;;  %v3653_v54 = vadd.f32 %v3652_v49, %v7443_v59  ;;  %v6372_v60 = vld [vmem:[%s7881_s1 + $0x548] sm:$0xff] }
 0x27a   : > { %v3799_v36 = vpop.f32.mrf.mxu0  ;;  %v6396_v61 = vld [vmem:[%s7881_s1 + $0x608] sm:$0xff]  ;;  %4026 = vmatpush.bf16.msra.mxu1 %v6372_v60 }
 0x27b   : > { %3847 = vmatmul.bf16.gmra.mxu1 %v4771_v45  ;;  %3896 = vmatmul.bf16.gmra.mxu2 %v4775_v30  ;;  %v7634_v52 = vadd.f32 %v3796_v6, %v3748_v33  ;;  %v6136_v45 = vld [vmem:[%s6571_s4 + $0x42c] sm:$0xf]  ;;  %v4968_v30 = vld [vmem:[%s6571_s4 + $0x48c] sm:$0xf0]  ;;  %v6137_v33 = vld [vmem:[%s6571_s4 + $0x434] sm:$0xf] }
 0x27c   : > { %4173 = vmatpush.bf16.msra.mxu0 %v6396_v61 }
 0x27d   : > { %3945 = vmatmul.bf16.gmra.mxu3 %v4779_v25  ;;  %3994 = vmatmul.bf16.gmra.mxu0 %v4783_v32  ;;  %v4974_v25 = vld [vmem:[%s6571_s4 + $0x430] sm:$0xf]  ;;  %v6149_v32 = vld [vmem:[%s6571_s4 + $0x490] sm:$0xf0] }
 0x27e   : > { %v3701_v40 = vpop.f32.mrf.mxu2 }
 0x27f   : > { %v3702_v59 = vadd.f32 %v3701_v40, %v3653_v54  ;;  %v4976_v54 = vld [vmem:[%s6571_s4 + $0x494] sm:$0xf0] }
 0x280   : > { %v3750_v42 = vpop.f32.mrf.mxu3  ;;  %v3654_v3 = vpop.f32.mrf.mxu1 }
 0x281   : > { %v3751_v19 = vadd.f32 %v3750_v42, %v3702_v59  ;;  %v3655_v26 = vadd.f32 %v3654_v3, %v7452_v34  ;;  %v4882_v34 = vld [vmem:[%s6571_s4 + $0x370] sm:$0xf]  ;;  %v4971_v59 = vor.u32 %v6136_v45, %v4968_v30  ;;  %v4975_v42 = vor.u32 %v6149_v32, %v4974_v25 }
 0x282   : > { %v3801_v47 = vpop.f32.mrf.mxu0  ;;  %v4883_v5 = vor.u32 %v6125_v63, %v4882_v34 }
 0x283   : > { %v7651_v7 = vadd.f32 %v3799_v36, %v3751_v19  ;;  %v6150_v36 = vld [vmem:[%s6571_s4 + $0x498] sm:$0xf0]  ;;  %v4979_v19 = vor.u32 %v6137_v33, %v4976_v54 }
 0x286   : > { %v3703_v0 = vpop.f32.mrf.mxu2 }
 0x287   : > { %v3704_v24 = vadd.f32 %v3703_v0, %v3655_v26 }
 0x288   : > { %v3752_v2 = vpop.f32.mrf.mxu3  ;;  %v3657_v29 = vpop.f32.mrf.mxu1 }
 0x289   : > { %v3753_v6 = vadd.f32 %v3752_v2, %v3704_v24  ;;  %v3658_v58 = vadd.f32 %v3657_v29, %v7469_v35  ;;  %v6371_v24 = vld [vmem:[%s7881_s1 + $0x540] sm:$0xff] }
 0x28a   : > { %v3804_v9 = vpop.f32.mrf.mxu0  ;;  %v6395_v2 = vld [vmem:[%s7881_s1 + $0x600] sm:$0xff]  ;;  %4027 = vmatpush.bf16.msra.mxu1 %v6371_v24 }
 0x28b   : > { %3852 = vmatmul.bf16.gmra.mxu1 %v4871_v20  ;;  %3901 = vmatmul.bf16.gmra.mxu2 %v4875_v56  ;;  %v7660_v18 = vadd.f32 %v3801_v47, %v3753_v6  ;;  %v6161_v20 = vld [vmem:[%s6571_s4 + $0x4f4] sm:$0xf]  ;;  %v5068_v56 = vld [vmem:[%s6571_s4 + $0x554] sm:$0xf0]  ;;  %v6162_v6 = vld [vmem:[%s6571_s4 + $0x4fc] sm:$0xf] }
 0x28c   : > { %4174 = vmatpush.bf16.msra.mxu0 %v6395_v2 }
 0x28d   : > { %3950 = vmatmul.bf16.gmra.mxu3 %v4879_v44  ;;  %3999 = vmatmul.bf16.gmra.mxu0 %v4883_v5  ;;  %v5074_v44 = vld [vmem:[%s6571_s4 + $0x4f8] sm:$0xf]  ;;  %v6174_v5 = vld [vmem:[%s6571_s4 + $0x558] sm:$0xf0] }
 0x28e   : > { %v3706_v13 = vpop.f32.mrf.mxu2 }
 0x28f   : > { %v3707_v35 = vadd.f32 %v3706_v13, %v3658_v58  ;;  %v5076_v58 = vld [vmem:[%s6571_s4 + $0x55c] sm:$0xf0] }
 0x290   : > { %v3755_v17 = vpop.f32.mrf.mxu3  ;;  %v3659_v41 = vpop.f32.mrf.mxu1 }
 0x291   : > { %v3756_v57 = vadd.f32 %v3755_v17, %v3707_v35  ;;  %v3660_v21 = vadd.f32 %v3659_v41, %v7478_v50  ;;  %v4982_v50 = vld [vmem:[%s6571_s4 + $0x438] sm:$0xf]  ;;  %v5071_v35 = vor.u32 %v6161_v20, %v5068_v56  ;;  %v5075_v17 = vor.u32 %v6174_v5, %v5074_v44  ;;  %v6013_v5 = vld [vmem:[%s6571_s4 + $0x54] sm:$0xf] }
 0x292   : > { %v3806_v23 = vpop.f32.mrf.mxu0  ;;  %v4983_v26 = vor.u32 %v6150_v36, %v4982_v50  ;;  %v6186_v36 = vld [vmem:[%s6571_s4 + $0x5bc] sm:$0xf] }
 0x293   : > { %v7677_v49 = vadd.f32 %v3804_v9, %v3756_v57  ;;  %v6175_v9 = vld [vmem:[%s6571_s4 + $0x560] sm:$0xf0]  ;;  %v5079_v57 = vor.u32 %v6162_v6, %v5076_v58  ;;  %v4484_v6 = vld [vmem:[%s6571_s4 + $0xb4] sm:$0xf0] }
 0x296   : > { %v3708_v37 = vpop.f32.mrf.mxu2 }
 0x297   : > { %v3709_v4 = vadd.f32 %v3708_v37, %v3660_v21  ;;  %v5168_v37 = vld [vmem:[%s6571_s4 + $0x61c] sm:$0xf0] }
 0x298   : > { %v3757_v40 = vpop.f32.mrf.mxu3  ;;  %v3662_v3 = vpop.f32.mrf.mxu1  ;;  %v5171_v51 = vor.u32 %v6186_v36, %v5168_v37 }
 0x299   : > { %v3758_v47 = vadd.f32 %v3757_v40, %v3709_v4  ;;  %v3663_v22 = vadd.f32 %v3662_v3, %v7495_v8  ;;  %v5174_v40 = vld [vmem:[%s6571_s4 + $0x5c0] sm:$0xf]  ;;  %v5176_v3 = vld [vmem:[%s6571_s4 + $0x624] sm:$0xf0] }
 0x29a   : > { %v3809_v15 = vpop.f32.mrf.mxu0 }
 0x29b   : > { %3857 = vmatmul.bf16.gmra.mxu1 %v4971_v59  ;;  %3906 = vmatmul.bf16.gmra.mxu2 %v4975_v42  ;;  %v7686_v62 = vadd.f32 %v3806_v23, %v3758_v47  ;;  %v6199_v59 = vld [vmem:[%s6571_s4 + $0x620] sm:$0xf0] }
 0x29c   : > { %v6187_v42 = vld [vmem:[%s6571_s4 + $0x5c4] sm:$0xf]  ;;  %v5175_v28 = vor.u32 %v6199_v59, %v5174_v40  ;;  %v6038_v59 = vld [vmem:[%s6571_s4 + $0x11c] sm:$0xf] }
 0x29d   : > { %3955 = vmatmul.bf16.gmra.mxu3 %v4979_v19  ;;  %4004 = vmatmul.bf16.gmra.mxu0 %v4983_v26  ;;  %v5182_v19 = vld [vmem:[%s6571_s4 + $0x5c8] sm:$0xf]  ;;  %v6200_v26 = vld [vmem:[%s6571_s4 + $0x628] sm:$0xf0] }
 0x29e   : > { %v3711_v53 = vpop.f32.mrf.mxu2 }
 0x29f   : > { %v3712_v8 = vadd.f32 %v3711_v53, %v3663_v22 }
 0x2a0   : > { %v3760_v55 = vpop.f32.mrf.mxu3  ;;  %v3664_v16 = vpop.f32.mrf.mxu1 }
 0x2a1   : > { %v3761_v34 = vadd.f32 %v3760_v55, %v3712_v8  ;;  %v3665_v63 = vadd.f32 %v3664_v16, %v7504_v48  ;;  %v5082_v48 = vld [vmem:[%s6571_s4 + $0x500] sm:$0xf]  ;;  %v5179_v8 = vor.u32 %v6187_v42, %v5176_v3  ;;  %v5183_v55 = vor.u32 %v6200_v26, %v5182_v19  ;;  %v6051_v26 = vld [vmem:[%s6571_s4 + $0x180] sm:$0xf0] }
 0x2a2   : > { %v3811_v0 = vpop.f32.mrf.mxu0  ;;  %v5083_v21 = vor.u32 %v6175_v9, %v5082_v48  ;;  %v4490_v48 = vld [vmem:[%s6571_s4 + $0x58] sm:$0xf]  ;;  %v6026_v9 = vld [vmem:[%s6571_s4 + $0xb8] sm:$0xf0]  ;;  %v4584_v42 = vld [vmem:[%s6571_s4 + $0x17c] sm:$0xf0] }
 0x2a3   : > { %v7703_v29 = vadd.f32 %v3809_v15, %v3761_v34  ;;  %v4590_v19 = vld [vmem:[%s6571_s4 + $0x120] sm:$0xf] }
 0x2a6   : > { %v3713_v11 = vpop.f32.mrf.mxu2 }
 0x2a7   : > { %v3714_v46 = vadd.f32 %v3713_v11, %v3665_v63  ;;  %v6014_v11 = vld [vmem:[%s6571_s4 + $0x5c] sm:$0xf] }
 0x2a8   : > { %v3762_v13 = vpop.f32.mrf.mxu3  ;;  %v3667_v41 = vpop.f32.mrf.mxu1 }
 0x2a9   : > { %v3763_v23 = vadd.f32 %v3762_v13, %v3714_v46  ;;  %v3668_v60 = vadd.f32 %v3667_v41, %v7521_v10  ;;  %v4492_v46 = vld [vmem:[%s6571_s4 + $0xbc] sm:$0xf0] }
 0x2aa   : > { %v3814_v61 = vpop.f32.mrf.mxu0  ;;  %v4498_v13 = vld [vmem:[%s6571_s4 + $0x60] sm:$0xf] }
 0x2ab   : > { %3862 = vmatmul.bf16.gmra.mxu1 %v5071_v35  ;;  %3911 = vmatmul.bf16.gmra.mxu2 %v5075_v17  ;;  %v7712_v45 = vadd.f32 %v3811_v0, %v3763_v23  ;;  %v6027_v35 = vld [vmem:[%s6571_s4 + $0xc0] sm:$0xf0]  ;;  %v4491_v23 = vor.u32 %v6026_v9, %v4490_v48 }
 0x2ac   : > { %v6063_v9 = vld [vmem:[%s6571_s4 + $0x1e4] sm:$0xf] }
 0x2ad   : > { %3960 = vmatmul.bf16.gmra.mxu3 %v5079_v57  ;;  %4009 = vmatmul.bf16.gmra.mxu0 %v5083_v21  ;;  %v4487_v21 = vor.u32 %v6013_v5, %v4484_v6 }
 0x2ae   : > { %v3716_v30 = vpop.f32.mrf.mxu2 }
 0x2af   : > { %v3717_v25 = vadd.f32 %v3716_v30, %v3668_v60  ;;  %v4499_v30 = vor.u32 %v6027_v35, %v4498_v13  ;;  %v4690_v13 = vld [vmem:[%s6571_s4 + $0x1e8] sm:$0xf]  ;;  %v6076_v35 = vld [vmem:[%s6571_s4 + $0x248] sm:$0xf0] }
 0x2b0   : > { %v3765_v32 = vpop.f32.mrf.mxu3  ;;  %v3669_v33 = vpop.f32.mrf.mxu1 }
 0x2b1   : > { %v3766_v54 = vadd.f32 %v3765_v32, %v3717_v25  ;;  %v3670_v10 = vadd.f32 %v3669_v33, %v7530_v27 }
 0x2b2   : > { %v3816_v50 = vpop.f32.mrf.mxu0 }
 0x2b3   : > { %v7717_v4 = vadd.f32 %v3814_v61, %v3766_v54  ;;  %v4495_v61 = vor.u32 %v6014_v11, %v4492_v46  ;;  %v4684_v11 = vld [vmem:[%s6571_s4 + $0x244] sm:$0xf0] }
 0x2b6   : > { %v3718_v47 = vpop.f32.mrf.mxu2 }
 0x2b7   : > { %v3719_v22 = vadd.f32 %v3718_v47, %v3670_v10  ;;  %v6039_v47 = vld [vmem:[%s6571_s4 + $0x124] sm:$0xf] }
 0x2b8   : > { %v3767_v15 = vpop.f32.mrf.mxu3  ;;  %v3672_v53 = vpop.f32.mrf.mxu1 }
 0x2b9   : > { %v3768_v27 = vadd.f32 %v3767_v15, %v3719_v22  ;;  %v3673_v16 = vadd.f32 %v3672_v53, %v7547_v39  ;;  %v4592_v22 = vld [vmem:[%s6571_s4 + $0x184] sm:$0xf0] }
 0x2ba   : > { %v3819_v34 = vpop.f32.mrf.mxu0  ;;  %v4598_v15 = vld [vmem:[%s6571_s4 + $0x128] sm:$0xf] }
 0x2bb   : > { %3867 = vmatmul.bf16.gmra.mxu1 %v5171_v51  ;;  %3916 = vmatmul.bf16.gmra.mxu2 %v5175_v28  ;;  %v7726_v63 = vadd.f32 %v3816_v50, %v3768_v27  ;;  %v6052_v51 = vld [vmem:[%s6571_s4 + $0x188] sm:$0xf0]  ;;  %v4591_v27 = vor.u32 %v6051_v26, %v4590_v19 }
 0x2bc   : > { %v6088_v26 = vld [vmem:[%s6571_s4 + $0x2ac] sm:$0xf] }
 0x2bd   : > { %3965 = vmatmul.bf16.gmra.mxu3 %v5179_v8  ;;  %4014 = vmatmul.bf16.gmra.mxu0 %v5183_v55  ;;  %v4587_v55 = vor.u32 %v6038_v59, %v4584_v42 }
 0x2be   : > { %v3721_v0 = vpop.f32.mrf.mxu2 }
 0x2bf   : > { %v3722_v24 = vadd.f32 %v3721_v0, %v3673_v16  ;;  %v4599_v0 = vor.u32 %v6052_v51, %v4598_v15  ;;  %v4790_v15 = vld [vmem:[%s6571_s4 + $0x2b0] sm:$0xf]  ;;  %v6101_v51 = vld [vmem:[%s6571_s4 + $0x310] sm:$0xf0] }
 0x2c0   : > { %v3770_v2 = vpop.f32.mrf.mxu3  ;;  %v3674_v20 = vpop.f32.mrf.mxu1 }
 0x2c1   : > { %v3771_v56 = vadd.f32 %v3770_v2, %v3722_v24  ;;  %v3675_v39 = vadd.f32 %v3674_v20, %v7556_v1 }
 0x2c2   : > { %v3821_v44 = vpop.f32.mrf.mxu0 }
 0x2c3   : > { %v7731_v58 = vadd.f32 %v3819_v34, %v3771_v56  ;;  %v4595_v34 = vor.u32 %v6039_v47, %v4592_v22  ;;  %v4784_v47 = vld [vmem:[%s6571_s4 + $0x30c] sm:$0xf0] }
 0x2c6   : > { %v3723_v17 = vpop.f32.mrf.mxu2 }
 0x2c7   : > { %v3724_v41 = vadd.f32 %v3723_v17, %v3675_v39  ;;  %v6064_v17 = vld [vmem:[%s6571_s4 + $0x1ec] sm:$0xf] }
 0x2c8   : > { %v3772_v57 = vpop.f32.mrf.mxu3  ;;  %v3833_v60 = vpop.f32.mrf.mxu1 }
 0x2c9   : > { %v3773_v1 = vadd.f32 %v3772_v57, %v3724_v41  ;;  %v3834_v25 = vadd.f32 %v3833_v60, %v7573_v14  ;;  %v4692_v41 = vld [vmem:[%s6571_s4 + $0x24c] sm:$0xf0] }
 0x2ca   : > { %v3980_v32 = vpop.f32.mrf.mxu0  ;;  %v4698_v57 = vld [vmem:[%s6571_s4 + $0x1f0] sm:$0xf] }
 0x2cb   : > { %4028 = vmatmul.bf16.vlgmr.msra.gmra.mxu1 %v4487_v21  ;;  %4077 = vmatmul.bf16.vlgmr.msra.gmra.mxu2 %v4491_v23  ;;  %v7740_v33 = vadd.f32 %v3821_v44, %v3773_v1  ;;  %v6077_v21 = vld [vmem:[%s6571_s4 + $0x250] sm:$0xf0]  ;;  %v4691_v1 = vor.u32 %v6076_v35, %v4690_v13 }
 0x2cc   : > { %v6113_v35 = vld [vmem:[%s6571_s4 + $0x374] sm:$0xf] }
 0x2cd   : > { %4126 = vmatmul.bf16.vlgmr.msra.gmra.mxu3 %v4495_v61  ;;  %4175 = vmatmul.bf16.vlgmr.msra.gmra.mxu0 %v4499_v30  ;;  %v4687_v30 = vor.u32 %v6063_v9, %v4684_v11 }
 0x2ce   : > { %v3882_v54 = vpop.f32.mrf.mxu2 }
 0x2cf   : > { %v3883_v10 = vadd.f32 %v3882_v54, %v3834_v25  ;;  %v4699_v54 = vor.u32 %v6077_v21, %v4698_v57  ;;  %v4890_v57 = vld [vmem:[%s6571_s4 + $0x378] sm:$0xf]  ;;  %v6126_v21 = vld [vmem:[%s6571_s4 + $0x3d8] sm:$0xf0] }
 0x2d0   : > { %v3931_v50 = vpop.f32.mrf.mxu3  ;;  %v3835_v36 = vpop.f32.mrf.mxu1 }
 0x2d1   : > { %v3932_v37 = vadd.f32 %v3931_v50, %v3883_v10  ;;  %v3836_v14 = vadd.f32 %v3835_v36, %v7582_v38 }
 0x2d2   : > { %v3982_v40 = vpop.f32.mrf.mxu0 }
 0x2d3   : > { %v7745_v3 = vadd.f32 %v3980_v32, %v3932_v37  ;;  %v4695_v32 = vor.u32 %v6064_v17, %v4692_v41  ;;  %v4884_v17 = vld [vmem:[%s6571_s4 + $0x3d4] sm:$0xf0] }
 0x2d6   : > { %v3884_v28 = vpop.f32.mrf.mxu2 }
 0x2d7   : > { %v3885_v53 = vadd.f32 %v3884_v28, %v3836_v14  ;;  %v6089_v28 = vld [vmem:[%s6571_s4 + $0x2b4] sm:$0xf] }
 0x2d8   : > { %v3933_v8 = vpop.f32.mrf.mxu3  ;;  %v3838_v16 = vpop.f32.mrf.mxu1 }
 0x2d9   : > { %v3934_v38 = vadd.f32 %v3933_v8, %v3885_v53  ;;  %v3839_v24 = vadd.f32 %v3838_v16, %v7599_v43  ;;  %v4792_v53 = vld [vmem:[%s6571_s4 + $0x314] sm:$0xf0] }
 0x2da   : > { %v3985_v2 = vpop.f32.mrf.mxu0  ;;  %v4798_v8 = vld [vmem:[%s6571_s4 + $0x2b8] sm:$0xf] }
 0x2db   : > { %4033 = vmatmul.bf16.gmra.mxu1 %v4587_v55  ;;  %4082 = vmatmul.bf16.gmra.mxu2 %v4591_v27  ;;  %v7754_v20 = vadd.f32 %v3982_v40, %v3934_v38  ;;  %v6102_v55 = vld [vmem:[%s6571_s4 + $0x318] sm:$0xf0]  ;;  %v4791_v38 = vor.u32 %v6101_v51, %v4790_v15 }
 0x2dc   : > { %v6138_v51 = vld [vmem:[%s6571_s4 + $0x43c] sm:$0xf] }
 0x2dd   : > { %4131 = vmatmul.bf16.gmra.mxu3 %v4595_v34  ;;  %4180 = vmatmul.bf16.gmra.mxu0 %v4599_v0  ;;  %v4787_v0 = vor.u32 %v6088_v26, %v4784_v47 }
 0x2de   : > { %v3887_v56 = vpop.f32.mrf.mxu2 }
 0x2df   : > { %v3888_v39 = vadd.f32 %v3887_v56, %v3839_v24  ;;  %v4799_v56 = vor.u32 %v6102_v55, %v4798_v8  ;;  %v4990_v8 = vld [vmem:[%s6571_s4 + $0x440] sm:$0xf]  ;;  %v6151_v55 = vld [vmem:[%s6571_s4 + $0x4a0] sm:$0xf0] }
 0x2e0   : > { %v3936_v44 = vpop.f32.mrf.mxu3  ;;  %v3840_v5 = vpop.f32.mrf.mxu1 }
 0x2e1   : > { %v3937_v6 = vadd.f32 %v3936_v44, %v3888_v39  ;;  %v3841_v43 = vadd.f32 %v3840_v5, %v7608_v12 }
 0x2e2   : > { %v3987_v48 = vpop.f32.mrf.mxu0 }
 0x2e3   : > { %v7759_v46 = vadd.f32 %v3985_v2, %v3937_v6  ;;  %v4795_v2 = vor.u32 %v6089_v28, %v4792_v53  ;;  %v4984_v28 = vld [vmem:[%s6571_s4 + $0x49c] sm:$0xf0] }
 0x2e6   : > { %v3889_v23 = vpop.f32.mrf.mxu2 }
 0x2e7   : > { %v3890_v60 = vadd.f32 %v3889_v23, %v3841_v43  ;;  %v6114_v23 = vld [vmem:[%s6571_s4 + $0x37c] sm:$0xf] }
 0x2e8   : > { %v3938_v61 = vpop.f32.mrf.mxu3  ;;  %v3843_v25 = vpop.f32.mrf.mxu1 }
 0x2e9   : > { %v3939_v12 = vadd.f32 %v3938_v61, %v3890_v60  ;;  %v3844_v10 = vadd.f32 %v3843_v25, %v7625_v31  ;;  %v4892_v60 = vld [vmem:[%s6571_s4 + $0x3dc] sm:$0xf0] }
 0x2ea   : > { %v3990_v50 = vpop.f32.mrf.mxu0  ;;  %v4898_v61 = vld [vmem:[%s6571_s4 + $0x380] sm:$0xf] }
 0x2eb   : > { %4038 = vmatmul.bf16.gmra.mxu1 %v4687_v30  ;;  %4087 = vmatmul.bf16.gmra.mxu2 %v4691_v1  ;;  %v7768_v36 = vadd.f32 %v3987_v48, %v3939_v12  ;;  %v6127_v30 = vld [vmem:[%s6571_s4 + $0x3e0] sm:$0xf0]  ;;  %v4891_v12 = vor.u32 %v6126_v21, %v4890_v57 }
 0x2ec   : > { %v6163_v21 = vld [vmem:[%s6571_s4 + $0x504] sm:$0xf] }
 0x2ed   : > { %4136 = vmatmul.bf16.gmra.mxu3 %v4695_v32  ;;  %4185 = vmatmul.bf16.gmra.mxu0 %v4699_v54  ;;  %v4887_v54 = vor.u32 %v6113_v35, %v4884_v17 }
 0x2ee   : > { %v3892_v37 = vpop.f32.mrf.mxu2 }
 0x2ef   : > { %v3893_v14 = vadd.f32 %v3892_v37, %v3844_v10  ;;  %v4899_v37 = vor.u32 %v6127_v30, %v4898_v61  ;;  %v5090_v61 = vld [vmem:[%s6571_s4 + $0x508] sm:$0xf]  ;;  %v6176_v30 = vld [vmem:[%s6571_s4 + $0x568] sm:$0xf0] }
 0x2f0   : > { %v3941_v40 = vpop.f32.mrf.mxu3  ;;  %v3845_v59 = vpop.f32.mrf.mxu1 }
 0x2f1   : > { %v3942_v42 = vadd.f32 %v3941_v40, %v3893_v14  ;;  %v3846_v31 = vadd.f32 %v3845_v59, %v7634_v52 }
 0x2f2   : > { %v3992_v19 = vpop.f32.mrf.mxu0 }
 0x2f3   : > { %v7773_v22 = vadd.f32 %v3990_v50, %v3942_v42  ;;  %v4895_v50 = vor.u32 %v6114_v23, %v4892_v60  ;;  %v5084_v23 = vld [vmem:[%s6571_s4 + $0x564] sm:$0xf0] }
 0x2f6   : > { %v3894_v27 = vpop.f32.mrf.mxu2 }
 0x2f7   : > { %v3895_v16 = vadd.f32 %v3894_v27, %v3846_v31  ;;  %v6139_v27 = vld [vmem:[%s6571_s4 + $0x444] sm:$0xf] }
 0x2f8   : > { %v3943_v34 = vpop.f32.mrf.mxu3  ;;  %v3848_v24 = vpop.f32.mrf.mxu1 }
 0x2f9   : > { %v3944_v52 = vadd.f32 %v3943_v34, %v3895_v16  ;;  %v3849_v39 = vadd.f32 %v3848_v24, %v7651_v7  ;;  %v4992_v16 = vld [vmem:[%s6571_s4 + $0x4a4] sm:$0xf0] }
 0x2fa   : > { %v3995_v44 = vpop.f32.mrf.mxu0  ;;  %v4998_v34 = vld [vmem:[%s6571_s4 + $0x448] sm:$0xf] }
 0x2fb   : > { %4043 = vmatmul.bf16.gmra.mxu1 %v4787_v0  ;;  %4092 = vmatmul.bf16.gmra.mxu2 %v4791_v38  ;;  %v7782_v5 = vadd.f32 %v3992_v19, %v3944_v52  ;;  %v6152_v0 = vld [vmem:[%s6571_s4 + $0x4a8] sm:$0xf0]  ;;  %v4991_v52 = vor.u32 %v6151_v55, %v4990_v8 }
 0x2fc   : > { %v6188_v55 = vld [vmem:[%s6571_s4 + $0x5cc] sm:$0xf] }
 0x2fd   : > { %4141 = vmatmul.bf16.gmra.mxu3 %v4795_v2  ;;  %4190 = vmatmul.bf16.gmra.mxu0 %v4799_v56  ;;  %v4987_v56 = vor.u32 %v6138_v51, %v4984_v28 }
 0x2fe   : > { %v3897_v6 = vpop.f32.mrf.mxu2 }
 0x2ff   : > { %v3898_v43 = vadd.f32 %v3897_v6, %v3849_v39  ;;  %v4999_v6 = vor.u32 %v6152_v0, %v4998_v34  ;;  %v5190_v34 = vld [vmem:[%s6571_s4 + $0x5d0] sm:$0xf]  ;;  %v6201_v0 = vld [vmem:[%s6571_s4 + $0x630] sm:$0xf0] }
 0x300   : > { %v3946_v48 = vpop.f32.mrf.mxu3  ;;  %v3850_v9 = vpop.f32.mrf.mxu1 }
 0x301   : > { %v3947_v11 = vadd.f32 %v3946_v48, %v3898_v43  ;;  %v3851_v7 = vadd.f32 %v3850_v9, %v7660_v18 }
 0x302   : > { %v3997_v13 = vpop.f32.mrf.mxu0 }
 0x303   : > { %v7787_v41 = vadd.f32 %v3995_v44, %v3947_v11  ;;  %v4995_v44 = vor.u32 %v6139_v27, %v4992_v16  ;;  %v5184_v27 = vld [vmem:[%s6571_s4 + $0x62c] sm:$0xf0] }
 0x306   : > { %v3899_v1 = vpop.f32.mrf.mxu2 }
 0x307   : > { %v3900_v25 = vadd.f32 %v3899_v1, %v3851_v7  ;;  %v6164_v1 = vld [vmem:[%s6571_s4 + $0x50c] sm:$0xf] }
 0x308   : > { %v3948_v32 = vpop.f32.mrf.mxu3  ;;  %v3853_v10 = vpop.f32.mrf.mxu1 }
 0x309   : > { %v3949_v18 = vadd.f32 %v3948_v32, %v3900_v25  ;;  %v3854_v14 = vadd.f32 %v3853_v10, %v7677_v49  ;;  %v5092_v25 = vld [vmem:[%s6571_s4 + $0x56c] sm:$0xf0] }
 0x30a   : > { %v4000_v40 = vpop.f32.mrf.mxu0  ;;  %v5098_v32 = vld [vmem:[%s6571_s4 + $0x510] sm:$0xf] }
 0x30b   : > { %4048 = vmatmul.bf16.gmra.mxu1 %v4887_v54  ;;  %4097 = vmatmul.bf16.gmra.mxu2 %v4891_v12  ;;  %v7796_v59 = vadd.f32 %v3997_v13, %v3949_v18  ;;  %v6177_v54 = vld [vmem:[%s6571_s4 + $0x570] sm:$0xf0]  ;;  %v5091_v18 = vor.u32 %v6176_v30, %v5090_v61 }
 0x30d   : > { %4146 = vmatmul.bf16.gmra.mxu3 %v4895_v50  ;;  %4195 = vmatmul.bf16.gmra.mxu0 %v4899_v37  ;;  %v5087_v37 = vor.u32 %v6163_v21, %v5084_v23 }
 0x30e   : > { %v3902_v42 = vpop.f32.mrf.mxu2 }
 0x30f   : > { %v3903_v31 = vadd.f32 %v3902_v42, %v3854_v14  ;;  %v5099_v42 = vor.u32 %v6177_v54, %v5098_v32 }
 0x310   : > { %v3951_v19 = vpop.f32.mrf.mxu3  ;;  %v3855_v26 = vpop.f32.mrf.mxu1 }
 0x311   : > { %v3952_v47 = vadd.f32 %v3951_v19, %v3903_v31  ;;  %v3856_v49 = vadd.f32 %v3855_v26, %v7686_v62 }
 0x312   : > { %v4002_v15 = vpop.f32.mrf.mxu0 }
 0x313   : > { %v7801_v53 = vadd.f32 %v4000_v40, %v3952_v47  ;;  %v5095_v40 = vor.u32 %v6164_v1, %v5092_v25 }
 0x316   : > { %v3904_v38 = vpop.f32.mrf.mxu2 }
 0x317   : > { %v3905_v24 = vadd.f32 %v3904_v38, %v3856_v49  ;;  %v6189_v38 = vld [vmem:[%s6571_s4 + $0x5d4] sm:$0xf] }
 0x318   : > { %v3953_v2 = vpop.f32.mrf.mxu3  ;;  %v3858_v39 = vpop.f32.mrf.mxu1 }
 0x319   : > { %v3954_v62 = vadd.f32 %v3953_v2, %v3905_v24  ;;  %v3859_v43 = vadd.f32 %v3858_v39, %v7703_v29  ;;  %v5192_v24 = vld [vmem:[%s6571_s4 + $0x634] sm:$0xf0] }
 0x31a   : > { %v4005_v48 = vpop.f32.mrf.mxu0  ;;  %v5198_v2 = vld [vmem:[%s6571_s4 + $0x5d8] sm:$0xf] }
 0x31b   : > { %4053 = vmatmul.bf16.gmra.mxu1 %v4987_v56  ;;  %4102 = vmatmul.bf16.gmra.mxu2 %v4991_v52  ;;  %v7810_v9 = vadd.f32 %v4002_v15, %v3954_v62  ;;  %v6202_v56 = vld [vmem:[%s6571_s4 + $0x638] sm:$0xf0]  ;;  %v5191_v62 = vor.u32 %v6201_v0, %v5190_v34  ;;  %s6002_s4 = sshll.u32 %s7885_s13, 4 }
 0x31c   : > { %s7871_s11 = scalar_lea.vmem %s7883_s3, %s6002_s4 }
 0x31d   : > { %4151 = vmatmul.bf16.gmra.mxu3 %v4995_v44  ;;  %4200 = vmatmul.bf16.gmra.mxu0 %v4999_v6  ;;  %v5187_v6 = vor.u32 %v6188_v55, %v5184_v27 }
 0x31e   : > { %v3907_v11 = vpop.f32.mrf.mxu2 }
 0x31f   : > { %v3908_v7 = vadd.f32 %v3907_v11, %v3859_v43  ;;  %v5199_v11 = vor.u32 %v6202_v56, %v5198_v2 }
 0x320   : > { %v3956_v13 = vpop.f32.mrf.mxu3  ;;  %v3860_v35 = vpop.f32.mrf.mxu1 }
 0x321   : > { %v3957_v17 = vadd.f32 %v3956_v13, %v3908_v7  ;;  %v3861_v29 = vadd.f32 %v3860_v35, %v7712_v45 }
 0x322   : > { %v4007_v57 = vpop.f32.mrf.mxu0 }
 0x323   : > { %v7815_v60 = vadd.f32 %v4005_v48, %v3957_v17  ;;  %v5195_v48 = vor.u32 %v6189_v38, %v5192_v24 }
 0x326   : > { %v3909_v12 = vpop.f32.mrf.mxu2 }
 0x327   : > { %v3910_v10 = vadd.f32 %v3909_v12, %v3861_v29 }
 0x328   : > { %v3958_v50 = vpop.f32.mrf.mxu3  ;;  %v3863_v14 = vpop.f32.mrf.mxu1 }
 0x329   : > { %v3959_v45 = vadd.f32 %v3958_v50, %v3910_v10  ;;  %v3864_v31 = vadd.f32 %v3863_v14, %v7717_v4 }
 0x32a   : > { %v4010_v19 = vpop.f32.mrf.mxu0 }
 0x32b   : > { %4058 = vmatmul.bf16.gmra.mxu1 %v5087_v37  ;;  %4107 = vmatmul.bf16.gmra.mxu2 %v5091_v18  ;;  %v7824_v26 = vadd.f32 %v4007_v57, %v3959_v45 }
 0x32d   : > { %4156 = vmatmul.bf16.gmra.mxu3 %v5095_v40  ;;  %4205 = vmatmul.bf16.gmra.mxu0 %v5099_v42 }
 0x32e   : > { %v3912_v47 = vpop.f32.mrf.mxu2 }
 0x32f   : > { %v3913_v49 = vadd.f32 %v3912_v47, %v3864_v31 }
 0x330   : > { %v3961_v15 = vpop.f32.mrf.mxu3  ;;  %v3865_v51 = vpop.f32.mrf.mxu1 }
 0x331   : > { %v3962_v28 = vadd.f32 %v3961_v15, %v3913_v49  ;;  %v3866_v4 = vadd.f32 %v3865_v51, %v7726_v63 }
 0x332   : > { %v4012_v8 = vpop.f32.mrf.mxu0 }
 0x333   : > { %v7829_v16 = vadd.f32 %v4010_v19, %v3962_v28 }
 0x336   : > { %v3914_v52 = vpop.f32.mrf.mxu2 }
 0x337   : > { %v3915_v39 = vadd.f32 %v3914_v52, %v3866_v4 }
 0x338   : > { %v3963_v44 = vpop.f32.mrf.mxu3  ;;  %v3868_v43 = vpop.f32.mrf.mxu1 }
 0x339   : > { %v3964_v63 = vadd.f32 %v3963_v44, %v3915_v39  ;;  %v3869_v7 = vadd.f32 %v3868_v43, %v7731_v58 }
 0x33a   : > { %v4015_v13 = vpop.f32.mrf.mxu0 }
 0x33b   : > { %4063 = vmatmul.bf16.gmra.mxu1 %v5187_v6  ;;  %4112 = vmatmul.bf16.gmra.mxu2 %v5191_v62  ;;  %v7838_v35 = vadd.f32 %v4012_v8, %v3964_v63 }
 0x33d   : > { %4161 = vmatmul.bf16.gmra.mxu3 %v5195_v48  ;;  %4210 = vmatmul.bf16.gmra.mxu0 %v5199_v11 }
 0x33e   : > { %v3917_v17 = vpop.f32.mrf.mxu2 }
 0x33f   : > { %v3918_v29 = vadd.f32 %v3917_v17, %v3869_v7 }
 0x340   : > { %v3966_v57 = vpop.f32.mrf.mxu3  ;;  %v3870_v21 = vpop.f32.mrf.mxu1 }
 0x341   : > { %v3967_v23 = vadd.f32 %v3966_v57, %v3918_v29  ;;  %v3871_v61 = vadd.f32 %v3870_v21, %v7740_v33 }
 0x342   : > { %v4017_v30 = vpop.f32.mrf.mxu0 }
 0x343   : > { %v7841_v1 = vadd.f32 %v4015_v13, %v3967_v23 }
 0x346   : > { %v3919_v25 = vpop.f32.mrf.mxu2 }
 0x347   : > { %v3920_v32 = vadd.f32 %v3919_v25, %v3871_v61 }
 0x348   : > { %v3968_v58 = vpop.f32.mrf.mxu3  ;;  %v4029_v54 = vpop.f32.mrf.mxu1 }
 0x349   : > { %v3969_v12 = vadd.f32 %v3968_v58, %v3920_v32  ;;  %v4030_v18 = vadd.f32 %v4029_v54, %v7745_v3 }
 0x34a   : > { %v4176_v10 = vpop.f32.mrf.mxu0 }
 0x34b   : > { %v7843_v50 = vadd.f32 %v4017_v30, %v3969_v12 }
 0x34e   : > { %v4078_v37 = vpop.f32.mrf.mxu2 }
 0x34f   : > { %v4079_v42 = vadd.f32 %v4078_v37, %v4030_v18 }
 0x350   : > { %v4127_v14 = vpop.f32.mrf.mxu3  ;;  %v4031_v40 = vpop.f32.mrf.mxu1 }
 0x351   : > { %v4128_v31 = vadd.f32 %v4127_v14, %v4079_v42  ;;  %v4032_v33 = vadd.f32 %v4031_v40, %v7754_v20 }
 0x352   : > { %v4178_v45 = vpop.f32.mrf.mxu0 }
 0x353   : > { %v4177_v51 = vadd.f32 %v4176_v10, %v4128_v31 }
 0x355   : > { %v4216_v55 = vmax.f32 %v4177_v51, 0.0 }
 0x356   : > { %v4080_v19 = vpop.f32.mrf.mxu2 }
 0x357   : > { %v4081_v47 = vadd.f32 %v4080_v19, %v4032_v33 }
 0x358   : > { %v4129_v49 = vpop.f32.mrf.mxu3  ;;  %v4034_v15 = vpop.f32.mrf.mxu1 }
 0x359   : > { %v4130_v28 = vadd.f32 %v4129_v49, %v4081_v47  ;;  %v4035_v3 = vadd.f32 %v4034_v15, %v7759_v46 }
 0x35a   : > { %v4181_v4 = vpop.f32.mrf.mxu0 }
 0x35b   : > { %v4179_v8 = vadd.f32 %v4178_v45, %v4130_v28 }
 0x35d   : > { %v4217_v27 = vmax.f32 %v4179_v8, 0.0 }
 0x35e   : > { %v4083_v34 = vpop.f32.mrf.mxu2 }
 0x35f   : > { %v4084_v24 = vadd.f32 %v4083_v34, %v4035_v3 }
 0x360   : > { %v4132_v0 = vpop.f32.mrf.mxu3  ;;  %v4036_v38 = vpop.f32.mrf.mxu1 }
 0x361   : > { %v4133_v56 = vadd.f32 %v4132_v0, %v4084_v24  ;;  %v4037_v20 = vadd.f32 %v4036_v38, %v7768_v36 }
 0x362   : > { %v4183_v2 = vpop.f32.mrf.mxu0 }
 0x363   : > { %v4182_v62 = vadd.f32 %v4181_v4, %v4133_v56 }
 0x365   : > { %v4218_v63 = vmax.f32 %v4182_v62, 0.0 }
 0x366   : > { %v4085_v52 = vpop.f32.mrf.mxu2 }
 0x367   : > { %v4086_v39 = vadd.f32 %v4085_v52, %v4037_v20 }
 0x368   : > { %v4134_v44 = vpop.f32.mrf.mxu3  ;;  %v4039_v6 = vpop.f32.mrf.mxu1 }
 0x369   : > { %v4135_v43 = vadd.f32 %v4134_v44, %v4086_v39  ;;  %v4040_v46 = vadd.f32 %v4039_v6, %v7773_v22 }
 0x36a   : > { %v4186_v48 = vpop.f32.mrf.mxu0 }
 0x36b   : > { %v4184_v11 = vadd.f32 %v4183_v2, %v4135_v43 }
 0x36d   : > { %v4219_v7 = vmax.f32 %v4184_v11, 0.0 }
 0x36e   : > { %v4088_v13 = vpop.f32.mrf.mxu2 }
 0x36f   : > { %v6411_v17 = vpack.c.bf16 %v4219_v7, %v4218_v63  ;;  %v4089_v21 = vadd.f32 %v4088_v13, %v4040_v46 }
 0x370   : > { %v4137_v29 = vpop.f32.mrf.mxu3  ;;  %v4041_v57 = vpop.f32.mrf.mxu1 }
 0x371   : > { %6464 = vst [vmem:[#allocation2 + $0x8] sm:$0xff] %v6411_v17   ;;  %v4138_v36 = vadd.f32 %v4137_v29, %v4089_v21  ;;  %v4042_v61 = vadd.f32 %v4041_v57, %v7782_v5 }
 0x372   : > { %v4188_v23 = vpop.f32.mrf.mxu0 }
 0x373   : > { %v4187_v54 = vadd.f32 %v4186_v48, %v4138_v36 }
 0x375   : > { %v4220_v18 = vmax.f32 %v4187_v54, 0.0 }
 0x376   : > { %v4090_v30 = vpop.f32.mrf.mxu2 }
 0x377   : > { %v4091_v25 = vadd.f32 %v4090_v30, %v4042_v61  ;;  %v7852_v19 = vmax.f32 %v4216_v55, %v4220_v18 }
 0x378   : > { %v4139_v32 = vpop.f32.mrf.mxu3  ;;  %v4044_v58 = vpop.f32.mrf.mxu1 }
 0x379   : > { %v4140_v12 = vadd.f32 %v4139_v32, %v4091_v25  ;;  %v4045_v22 = vadd.f32 %v4044_v58, %v7787_v41 }
 0x37a   : > { %v4191_v10 = vpop.f32.mrf.mxu0 }
 0x37b   : > { %v4189_v37 = vadd.f32 %v4188_v23, %v4140_v12 }
 0x37d   : > { %v4221_v14 = vmax.f32 %v4189_v37, 0.0 }
 0x37e   : > { %v4093_v40 = vpop.f32.mrf.mxu2 }
 0x37f   : > { %v4094_v31 = vadd.f32 %v4093_v40, %v4045_v22  ;;  %v7854_v5 = vmax.f32 %v4217_v27, %v4221_v14 }
 0x380   : > { %v4142_v42 = vpop.f32.mrf.mxu3  ;;  %v4046_v45 = vpop.f32.mrf.mxu1 }
 0x381   : > { %v4143_v47 = vadd.f32 %v4142_v42, %v4094_v31  ;;  %v4047_v49 = vadd.f32 %v4046_v45, %v7796_v59 }
 0x382   : > { %v4193_v33 = vpop.f32.mrf.mxu0 }
 0x383   : > { %v4192_v8 = vadd.f32 %v4191_v10, %v4143_v47 }
 0x385   : > { %v4222_v41 = vmax.f32 %v4192_v8, 0.0 }
 0x386   : > { %v4095_v15 = vpop.f32.mrf.mxu2 }
 0x387   : > { %v4096_v51 = vadd.f32 %v4095_v15, %v4047_v49 }
 0x388   : > { %v4144_v28 = vpop.f32.mrf.mxu3  ;;  %v4049_v4 = vpop.f32.mrf.mxu1 }
 0x389   : > { %v4145_v34 = vadd.f32 %v4144_v28, %v4096_v51  ;;  %v4050_v55 = vadd.f32 %v4049_v4, %v7801_v53 }
 0x38a   : > { %v4196_v3 = vpop.f32.mrf.mxu0 }
 0x38b   : > { %v4194_v0 = vadd.f32 %v4193_v33, %v4145_v34 }
 0x38d   : > { %v4223_v38 = vmax.f32 %v4194_v0, 0.0 }
 0x38e   : > { %v4098_v24 = vpop.f32.mrf.mxu2 }
 0x38f   : > { %v6421_v2 = vpack.c.bf16 %v4223_v38, %v4222_v41  ;;  %v4099_v20 = vadd.f32 %v4098_v24, %v4050_v55 }
 0x390   : > { %v4147_v56 = vpop.f32.mrf.mxu3  ;;  %v4051_v27 = vpop.f32.mrf.mxu1 }
 0x391   : > { %6466 = vst [vmem:[#allocation2 + $0x18] sm:$0xff] %v6421_v2   ;;  %v4148_v59 = vadd.f32 %v4147_v56, %v4099_v20  ;;  %v4052_v39 = vadd.f32 %v4051_v27, %v7810_v9 }
 0x392   : > { %v4198_v52 = vpop.f32.mrf.mxu0 }
 0x393   : > { %v4197_v48 = vadd.f32 %v4196_v3, %v4148_v59 }
 0x395   : > { %v4224_v13 = vmax.f32 %v4197_v48, 0.0 }
 0x396   : > { %v4100_v44 = vpop.f32.mrf.mxu2 }
 0x397   : > { %v4101_v6 = vadd.f32 %v4100_v44, %v4052_v39 }
 0x398   : > { %v4149_v62 = vpop.f32.mrf.mxu3  ;;  %v4054_v43 = vpop.f32.mrf.mxu1 }
 0x399   : > { %v4150_v11 = vadd.f32 %v4149_v62, %v4101_v6  ;;  %v4055_v53 = vadd.f32 %v4054_v43, %v7815_v60 }
 0x39a   : > { %v4201_v63 = vpop.f32.mrf.mxu0 }
 0x39b   : > { %v4199_v7 = vadd.f32 %v4198_v52, %v4150_v11 }
 0x39d   : > { %v4225_v17 = vmax.f32 %v4199_v7, 0.0  ;;  %v4266_v7 = vld [vmem:[#allocation2 + $0x8] sm:$0xf] }
 0x39e   : > { %v4103_v46 = vpop.f32.mrf.mxu2 }
 0x39f   : > { %v4104_v21 = vadd.f32 %v4103_v46, %v4055_v53 }
 0x3a0   : > { %v4152_v29 = vpop.f32.mrf.mxu3  ;;  %v4056_v57 = vpop.f32.mrf.mxu1 }
 0x3a1   : > { %v4153_v36 = vadd.f32 %v4152_v29, %v4104_v21  ;;  %v4057_v9 = vadd.f32 %v4056_v57, %v7824_v26  ;;  %v4282_v57 = vunpack.c.l.bf16 %v4266_v7 }
 0x3a2   : > { %v4203_v23 = vpop.f32.mrf.mxu0 }
 0x3a3   : > { %v4202_v58 = vadd.f32 %v4201_v63, %v4153_v36  ;;  %v4271_v63 = vld [vmem:[#allocation2 + $0x1c] sm:$0x1] }
 0x3a4   : > { %v4287_v46 = vunpack.c.l.bf16 %v4271_v63 }
 0x3a5   : > { %v4226_v37 = vmax.f32 %v4202_v58, 0.0 }
 0x3a6   : > { %v4105_v61 = vpop.f32.mrf.mxu2 }
 0x3a7   : > { %v4106_v30 = vadd.f32 %v4105_v61, %v4057_v9 }
 0x3a8   : > { %v4154_v25 = vpop.f32.mrf.mxu3  ;;  %v4059_v32 = vpop.f32.mrf.mxu1 }
 0x3a9   : > { %v4155_v54 = vadd.f32 %v4154_v25, %v4106_v30  ;;  %v4060_v60 = vadd.f32 %v4059_v32, %v7829_v16 }
 0x3aa   : > { %v4206_v10 = vpop.f32.mrf.mxu0 }
 0x3ab   : > { %v4204_v12 = vadd.f32 %v4203_v23, %v4155_v54 }
 0x3ad   : > { %v4227_v18 = vmax.f32 %v4204_v12, 0.0 }
 0x3ae   : > { %v4108_v14 = vpop.f32.mrf.mxu2 }
 0x3af   : > { %v6431_v40 = vpack.c.bf16 %v4227_v18, %v4226_v37  ;;  %v4109_v45 = vadd.f32 %v4108_v14, %v4060_v60  ;;  %v4334_v18 = vld [vmem:[%s7871_s11 + $0xc] sm:$0x1] }
 0x3b0   : > { %v4157_v22 = vpop.f32.mrf.mxu3  ;;  %v4061_v42 = vpop.f32.mrf.mxu1 }
 0x3b1   : > { %6468 = vst [vmem:[#allocation2 + $0x28] sm:$0xff] %v6431_v40   ;;  %v4158_v31 = vadd.f32 %v4157_v22, %v4109_v45  ;;  %v4062_v26 = vadd.f32 %v4061_v42, %v7838_v35 }
 0x3b2   : > { %v4208_v33 = vpop.f32.mrf.mxu0 }
 0x3b3   : > { %v4207_v28 = vadd.f32 %v4206_v10, %v4158_v31 }
 0x3b5   : > { %v4228_v34 = vmax.f32 %v4207_v28, 0.0 }
 0x3b6   : > { %v4110_v47 = vpop.f32.mrf.mxu2 }
 0x3b7   : > { %v4111_v49 = vadd.f32 %v4110_v47, %v4062_v26  ;;  %v4304_v35 = vmax.f32 %v4224_v13, %v4228_v34  ;;  %v4267_v13 = vld [vmem:[#allocation2 + $0xc] sm:$0x1] }
 0x3b8   : > { %v4159_v15 = vpop.f32.mrf.mxu3  ;;  %v4064_v51 = vpop.f32.mrf.mxu1  ;;  %v4274_v53 = vld [vmem:[#allocation2 + $0x28] sm:$0xf]  ;;  %v4275_v29 = vld [vmem:[#allocation2 + $0x2c] sm:$0x1]  ;;  %v4283_v21 = vunpack.c.l.bf16 %v4267_v13 }
 0x3b9   : > { %v4160_v4 = vadd.f32 %v4159_v15, %v4111_v49  ;;  %v4065_v16 = vadd.f32 %v4064_v51, %v7841_v1  ;;  %v4320_v56 = vmax.f32 %v7852_v19, %v4304_v35  ;;  %v4298_v9 = vunpack.c.l.bf16 %v4274_v53 }
 0x3ba   : > { %v4211_v38 = vpop.f32.mrf.mxu0  ;;  %v4299_v61 = vunpack.c.l.bf16 %v4275_v29  ;;  %v4291_v58 = vmax.f32 %v4283_v21, %v4287_v46 }
 0x3bb   : > { %v4209_v8 = vadd.f32 %v4208_v33, %v4160_v4 }
 0x3bd   : > { %v4229_v3 = vmax.f32 %v4209_v8, 0.0 }
 0x3be   : > { %v4113_v0 = vpop.f32.mrf.mxu2 }
 0x3bf   : > { %v4114_v24 = vadd.f32 %v4113_v0, %v4065_v16  ;;  %v4305_v55 = vmax.f32 %v4225_v17, %v4229_v3 }
 0x3c0   : > { %v4162_v41 = vpop.f32.mrf.mxu3  ;;  %v4066_v2 = vpop.f32.mrf.mxu1 }
 0x3c1   : > { %v4321_v27 = vmax.f32 %v7854_v5, %v4305_v55  ;;  %v4163_v20 = vadd.f32 %v4162_v41, %v4114_v24  ;;  %v4067_v52 = vadd.f32 %v4066_v2, %v7843_v50  ;;  %v4270_v50 = vld [vmem:[#allocation2 + $0x18] sm:$0xf] }
 0x3c2   : > { %v4213_v43 = vpop.f32.mrf.mxu0  ;;  %v4286_v17 = vunpack.c.l.bf16 %v4270_v50 }
 0x3c3   : > { %v6462_v59 = vpack.c.bf16 %v4321_v27, %v4320_v56  ;;  %v4212_v6 = vadd.f32 %v4211_v38, %v4163_v20 }
 0x3c4   : > { %v4290_v32 = vmax.f32 %v4282_v57, %v4286_v17 }
 0x3c5   : > { %6463 = vst [vmem:[%s7871_s11] sm:$0xff] %v6462_v59   ;;  %v4230_v48 = vmax.f32 %v4212_v6, 0.0 }
 0x3c6   : > { %v4115_v1 = vpop.f32.mrf.mxu2 }
 0x3c7   : > { %v4116_v39 = vadd.f32 %v4115_v1, %v4067_v52 }
 0x3c8   : > { %v4164_v44 = vpop.f32.mrf.mxu3 }
 0x3c9   : > { %v4165_v62 = vadd.f32 %v4164_v44, %v4116_v39 }
 0x3cb   : > { %v4214_v19 = vadd.f32 %v4213_v43, %v4165_v62 }
 0x3cd   : > { %v4231_v5 = vmax.f32 %v4214_v19, 0.0 }
 0x3cf   : > { %v6441_v11 = vpack.c.bf16 %v4231_v5, %v4230_v48 }
 0x3d1   : > { %6470 = vst [vmem:[#allocation2 + $0x38] sm:$0xff] %v6441_v11  }
 0x3d8   : > { %v4278_v23 = vld [vmem:[#allocation2 + $0x38] sm:$0xf]  ;;  %v4279_v36 = vld [vmem:[#allocation2 + $0x3c] sm:$0x1] }
 0x3d9   : > { %v4302_v30 = vunpack.c.l.bf16 %v4278_v23  ;;  %v4303_v25 = vunpack.c.l.bf16 %v4279_v36 }
 0x3db   : > { %v4306_v54 = vmax.f32 %v4298_v9, %v4302_v30  ;;  %v4307_v12 = vmax.f32 %v4299_v61, %v4303_v25 }
 0x3dd   : > { %v4322_v10 = vmax.f32 %v4290_v32, %v4306_v54  ;;  %v4323_v37 = vmax.f32 %v4291_v58, %v4307_v12 }
 0x3df   : > { %v4326_v14 = vpack.c.bf16 %v4322_v10, %v4322_v10  ;;  %v4327_v40 = vpack.c.bf16 %v4323_v37, %v4323_v37 }
 0x3e1   : > { %4330 = vst [vmem:[%s7871_s11 + $0x8] sm:$0xf] %v4326_v14  ;;  %v4335_v60 = vsel %vm4333_vm2, %v4327_v40, %v4334_v18 }
 0x3e2   : > { %4336 = vst [vmem:[%s7871_s11 + $0xc] sm:$0x1] %v4335_v60 }
 0x3e3 PF: > { %s13_s12 = sadd.s32 1, %s6514_s12  }
 0x3e4   : > { %p10_p4 = scmp.ge.s32.totalorder %s13_s12, 4  }
 0x3e6   :  { %12 = sbr.rel (!%p10_p4) target bundleno = 1 (0x1), region = 62 }

// kernel: cnn_forward.5
= control target key start
LH: loop header
LB: loop body
LE: loop exit
PB: predicated region body
PF: predicated region fallthrough
CT: control target
= control target key end

     0   :  { %s15935_s1 = inlined_call_operand.vmem [shape: bf16[3200,512], index: 1, kind: input, shape index: {}]   ;;  %s15936_s0 = inlined_call_operand.vmem [shape: bf16[8,3200], index: 0, kind: input, shape index: {}]   ;;  %s15937_s2 = inlined_call_operand.vmem [shape: f32[1,512], index: 2, kind: input, shape index: {}]   ;;  %s15938_s3 = inlined_call_operand.vmem [shape: bf16[512,128], index: 3, kind: input, shape index: {}]   ;;  %s15939_s4 = inlined_call_operand.vmem [shape: f32[1,128], index: 4, kind: input, shape index: {}]   ;;  %s15940_s5 = inlined_call_operand.vmem [shape: f32[8,128], index: 5, kind: output, shape index: {}]  }
   0x1   :  { %v6682_v0 = vld [vmem:[%s15935_s1 + $0xe0] sm:$0xf]  ;;  %v9926_v1 = vld [vmem:[%s15935_s1 + $0xec] sm:$0xf0] }
   0x2   :  { %v6810_v2 = vld [vmem:[%s15935_s1 + $0x1e0] sm:$0xf]  ;;  %v6683_v3 = vor.u32 %v9926_v1, %v6682_v0  ;;  %v9958_v4 = vld [vmem:[%s15935_s1 + $0x1ec] sm:$0xf0] }
   0x3   :  { %v6938_v5 = vld [vmem:[%s15935_s1 + $0x2e0] sm:$0xf]  ;;  %v9990_v6 = vld [vmem:[%s15935_s1 + $0x2ec] sm:$0xf0]  ;;  %v6811_v7 = vor.u32 %v9958_v4, %v6810_v2 }
   0x4   :  { %v6939_v8 = vor.u32 %v9990_v6, %v6938_v5  ;;  %v7066_v9 = vld [vmem:[%s15935_s1 + $0x3e0] sm:$0xf]  ;;  %v10022_v10 = vld [vmem:[%s15935_s1 + $0x3ec] sm:$0xf0]  ;;  %4931 = vmatpush.bf16.msra.mxu0 %v6683_v3 }
   0x5   :  { %v6666_v11 = vld [vmem:[%s15935_s1 + $0xc0] sm:$0xf]  ;;  %v7067_v12 = vor.u32 %v10022_v10, %v7066_v9  ;;  %v9922_v13 = vld [vmem:[%s15935_s1 + $0xcc] sm:$0xf0]  ;;  %4944 = vmatpush.bf16.msra.mxu1 %v6811_v7 }
   0x6   :  { %v6794_v14 = vld [vmem:[%s15935_s1 + $0x1c0] sm:$0xf]  ;;  %v9954_v15 = vld [vmem:[%s15935_s1 + $0x1cc] sm:$0xf0]  ;;  %4957 = vmatpush.bf16.msra.mxu2 %v6939_v8  ;;  %v6667_v16 = vor.u32 %v9922_v13, %v6666_v11 }
   0x7   :  { %v6795_v17 = vor.u32 %v9954_v15, %v6794_v14  ;;  %v6922_v18 = vld [vmem:[%s15935_s1 + $0x2c0] sm:$0xf]  ;;  %v9986_v19 = vld [vmem:[%s15935_s1 + $0x2cc] sm:$0xf0]  ;;  %4970 = vmatpush.bf16.msra.mxu3 %v7067_v12 }
   0x8   :  { %v7050_v20 = vld [vmem:[%s15935_s1 + $0x3c0] sm:$0xf]  ;;  %v6923_v21 = vor.u32 %v9986_v19, %v6922_v18  ;;  %v10018_v22 = vld [vmem:[%s15935_s1 + $0x3cc] sm:$0xf0]  ;;  %4932 = vmatpush.bf16.msra.mxu0 %v6667_v16 }
   0x9   :  { %v6650_v23 = vld [vmem:[%s15935_s1 + $0xa0] sm:$0xf]  ;;  %v9918_v24 = vld [vmem:[%s15935_s1 + $0xac] sm:$0xf0]  ;;  %v7051_v25 = vor.u32 %v10018_v22, %v7050_v20  ;;  %4945 = vmatpush.bf16.msra.mxu1 %v6795_v17 }
   0xa   :  { %v6778_v26 = vld [vmem:[%s15935_s1 + $0x1a0] sm:$0xf]  ;;  %v9950_v27 = vld [vmem:[%s15935_s1 + $0x1ac] sm:$0xf0]  ;;  %v6651_v29 = vor.u32 %v9918_v24, %v6650_v23  ;;  %4958 = vmatpush.bf16.msra.mxu2 %v6923_v21 }
   0xb   :  { %v6906_v28 = vld [vmem:[%s15935_s1 + $0x2a0] sm:$0xf]  ;;  %v9982_v30 = vld [vmem:[%s15935_s1 + $0x2ac] sm:$0xf0]  ;;  %v6779_v33 = vor.u32 %v9950_v27, %v6778_v26  ;;  %4971 = vmatpush.bf16.msra.mxu3 %v7051_v25 }
   0xc   :  { %v7034_v31 = vld [vmem:[%s15935_s1 + $0x3a0] sm:$0xf]  ;;  %v10014_v32 = vld [vmem:[%s15935_s1 + $0x3ac] sm:$0xf0]  ;;  %v6907_v34 = vor.u32 %v9982_v30, %v6906_v28  ;;  %4933 = vmatpush.bf16.msra.mxu0 %v6651_v29 }
   0xd   :  { %v6634_v35 = vld [vmem:[%s15935_s1 + $0x80] sm:$0xf]  ;;  %v9914_v36 = vld [vmem:[%s15935_s1 + $0x8c] sm:$0xf0]  ;;  %v7035_v38 = vor.u32 %v10014_v32, %v7034_v31  ;;  %4946 = vmatpush.bf16.msra.mxu1 %v6779_v33 }
   0xe   :  { %v6762_v37 = vld [vmem:[%s15935_s1 + $0x180] sm:$0xf]  ;;  %v9946_v39 = vld [vmem:[%s15935_s1 + $0x18c] sm:$0xf0]  ;;  %v6635_v44 = vor.u32 %v9914_v36, %v6634_v35  ;;  %4959 = vmatpush.bf16.msra.mxu2 %v6907_v34 }
   0xf   :  { %v6890_v40 = vld [vmem:[%s15935_s1 + $0x280] sm:$0xf]  ;;  %v9978_v41 = vld [vmem:[%s15935_s1 + $0x28c] sm:$0xf0]  ;;  %v6763_v45 = vor.u32 %v9946_v39, %v6762_v37  ;;  %4972 = vmatpush.bf16.msra.mxu3 %v7035_v38 }
  0x10   :  { %v7018_v42 = vld [vmem:[%s15935_s1 + $0x380] sm:$0xf]  ;;  %v10010_v43 = vld [vmem:[%s15935_s1 + $0x38c] sm:$0xf0]  ;;  %v6891_v46 = vor.u32 %v9978_v41, %v6890_v40  ;;  %4934 = vmatpush.bf16.msra.mxu0 %v6635_v44 }
  0x11   :  { %v6618_v47 = vld [vmem:[%s15935_s1 + $0x60] sm:$0xf]  ;;  %v9910_v48 = vld [vmem:[%s15935_s1 + $0x6c] sm:$0xf0]  ;;  %v7019_v50 = vor.u32 %v10010_v43, %v7018_v42  ;;  %4947 = vmatpush.bf16.msra.mxu1 %v6763_v45 }
  0x12   :  { %v6746_v49 = vld [vmem:[%s15935_s1 + $0x160] sm:$0xf]  ;;  %v9942_v51 = vld [vmem:[%s15935_s1 + $0x16c] sm:$0xf0]  ;;  %v6619_v56 = vor.u32 %v9910_v48, %v6618_v47  ;;  %4960 = vmatpush.bf16.msra.mxu2 %v6891_v46 }
  0x13   :  { %v6874_v52 = vld [vmem:[%s15935_s1 + $0x260] sm:$0xf]  ;;  %v9974_v53 = vld [vmem:[%s15935_s1 + $0x26c] sm:$0xf0]  ;;  %v6747_v57 = vor.u32 %v9942_v51, %v6746_v49  ;;  %4973 = vmatpush.bf16.msra.mxu3 %v7019_v50 }
  0x14   :  { %v7002_v54 = vld [vmem:[%s15935_s1 + $0x360] sm:$0xf]  ;;  %v10006_v55 = vld [vmem:[%s15935_s1 + $0x36c] sm:$0xf0]  ;;  %v6875_v58 = vor.u32 %v9974_v53, %v6874_v52  ;;  %4935 = vmatpush.bf16.msra.mxu0 %v6619_v56 }
  0x15   :  { %v6602_v59 = vld [vmem:[%s15935_s1 + $0x40] sm:$0xf]  ;;  %v9906_v60 = vld [vmem:[%s15935_s1 + $0x4c] sm:$0xf0]  ;;  %v7003_v62 = vor.u32 %v10006_v55, %v7002_v54  ;;  %4948 = vmatpush.bf16.msra.mxu1 %v6747_v57 }
  0x16   :  { %v6730_v61 = vld [vmem:[%s15935_s1 + $0x140] sm:$0xf]  ;;  %v9938_v63 = vld [vmem:[%s15935_s1 + $0x14c] sm:$0xf0]  ;;  %v6603_v4 = vor.u32 %v9906_v60, %v6602_v59  ;;  %4961 = vmatpush.bf16.msra.mxu2 %v6875_v58 }
  0x17   :  { %v6858_v0 = vld [vmem:[%s15935_s1 + $0x240] sm:$0xf]  ;;  %v9970_v1 = vld [vmem:[%s15935_s1 + $0x24c] sm:$0xf0]  ;;  %v6731_v5 = vor.u32 %v9938_v63, %v6730_v61  ;;  %4974 = vmatpush.bf16.msra.mxu3 %v7003_v62 }
  0x18   :  { %v6986_v2 = vld [vmem:[%s15935_s1 + $0x340] sm:$0xf]  ;;  %v10002_v3 = vld [vmem:[%s15935_s1 + $0x34c] sm:$0xf0]  ;;  %v6859_v6 = vor.u32 %v9970_v1, %v6858_v0  ;;  %4936 = vmatpush.bf16.msra.mxu0 %v6603_v4 }
  0x19   :  { %v6586_v7 = vld [vmem:[%s15935_s1 + $0x20] sm:$0xf]  ;;  %v9902_v8 = vld [vmem:[%s15935_s1 + $0x2c] sm:$0xf0]  ;;  %v6987_v10 = vor.u32 %v10002_v3, %v6986_v2  ;;  %4949 = vmatpush.bf16.msra.mxu1 %v6731_v5  ;;  %v21_v2 = vld [vmem:[%s15936_s0 + $0x8] sm:$0xff] }
  0x1a   :  { %v6714_v9 = vld [vmem:[%s15935_s1 + $0x120] sm:$0xf]  ;;  %v9934_v11 = vld [vmem:[%s15935_s1 + $0x12c] sm:$0xf0]  ;;  %v6587_v16 = vor.u32 %v9902_v8, %v6586_v7  ;;  %4962 = vmatpush.bf16.msra.mxu2 %v6859_v6  ;;  %v858_v8 = vunpack.c.l.b16 %v21_v2 }
  0x1b   :  { %v6842_v12 = vld [vmem:[%s15935_s1 + $0x220] sm:$0xf]  ;;  %v9966_v13 = vld [vmem:[%s15935_s1 + $0x22c] sm:$0xf0]  ;;  %v6715_v19 = vor.u32 %v9934_v11, %v6714_v9  ;;  %4975 = vmatpush.bf16.msra.mxu3 %v6987_v10  ;;  %v859_v10 = vunpack.c.h.b16 %v21_v2 }
  0x1c   :  { %v6970_v14 = vld [vmem:[%s15935_s1 + $0x320] sm:$0xf]  ;;  %v9998_v15 = vld [vmem:[%s15935_s1 + $0x32c] sm:$0xf0]  ;;  %v6843_v20 = vor.u32 %v9966_v13, %v6842_v12  ;;  %4937 = vmatpush.bf16.msra.mxu0 %v6587_v16 }
  0x1d   :  { %v6570_v17 = vld [vmem:[%s15935_s1] sm:$0xf]  ;;  %v9898_v18 = vld [vmem:[%s15935_s1 + $0xc] sm:$0xf0]  ;;  %v6971_v24 = vor.u32 %v9998_v15, %v6970_v14  ;;  %4950 = vmatpush.bf16.msra.mxu1 %v6715_v19 }
  0x1e   :  { %v6698_v21 = vld [vmem:[%s15935_s1 + $0x100] sm:$0xf]  ;;  %v9930_v22 = vld [vmem:[%s15935_s1 + $0x10c] sm:$0xf0]  ;;  %v6571_v31 = vor.u32 %v9898_v18, %v6570_v17  ;;  %4963 = vmatpush.bf16.msra.mxu2 %v6843_v20  ;;  %v11056_v18 = vpack.c.b16 %v858_v8, %v858_v8  ;;  %v11060_v20 = vpack.c.b16 %v859_v10, %v859_v10 }
  0x1f   :  { %v6826_v23 = vld [vmem:[%s15935_s1 + $0x200] sm:$0xf]  ;;  %v9962_v25 = vld [vmem:[%s15935_s1 + $0x20c] sm:$0xf0]  ;;  %v6699_v35 = vor.u32 %v9930_v22, %v6698_v21  ;;  %4976 = vmatpush.bf16.msra.mxu3 %v6971_v24 }
  0x20   :  { %v6954_v26 = vld [vmem:[%s15935_s1 + $0x300] sm:$0xf]  ;;  %v9994_v27 = vld [vmem:[%s15935_s1 + $0x30c] sm:$0xf0]  ;;  %v6827_v36 = vor.u32 %v9962_v25, %v6826_v23  ;;  %4938 = vmatpush.bf16.msra.mxu0 %v6571_v31 }
  0x21   :  { %v7194_v28 = vld [vmem:[%s15935_s1 + $0x4e0] sm:$0xf]  ;;  %v10054_v29 = vld [vmem:[%s15935_s1 + $0x4ec] sm:$0xf0]  ;;  %v6955_v39 = vor.u32 %v9994_v27, %v6954_v26  ;;  %4951 = vmatpush.bf16.msra.mxu1 %v6699_v35 }
  0x22   :  { %v7322_v30 = vld [vmem:[%s15935_s1 + $0x5e0] sm:$0xf]  ;;  %v10086_v32 = vld [vmem:[%s15935_s1 + $0x5ec] sm:$0xf0]  ;;  %v7195_v40 = vor.u32 %v10054_v29, %v7194_v28  ;;  %4964 = vmatpush.bf16.msra.mxu2 %v6827_v36 }
  0x23   :  { %v7450_v33 = vld [vmem:[%s15935_s1 + $0x6e0] sm:$0xf]  ;;  %v10118_v34 = vld [vmem:[%s15935_s1 + $0x6ec] sm:$0xf0]  ;;  %v7323_v41 = vor.u32 %v10086_v32, %v7322_v30  ;;  %4977 = vmatpush.bf16.msra.mxu3 %v6955_v39 }
  0x24   :  { %v7578_v37 = vld [vmem:[%s15935_s1 + $0x7e0] sm:$0xf]  ;;  %v10150_v38 = vld [vmem:[%s15935_s1 + $0x7ec] sm:$0xf0]  ;;  %v7451_v42 = vor.u32 %v10118_v34, %v7450_v33  ;;  %4983 = vmatpush.bf16.msrb.mxu0 %v7195_v40 }
  0x25   :  { %v7178_v43 = vld [vmem:[%s15935_s1 + $0x4c0] sm:$0xf]  ;;  %v10050_v44 = vld [vmem:[%s15935_s1 + $0x4cc] sm:$0xf0]  ;;  %v7579_v46 = vor.u32 %v10150_v38, %v7578_v37  ;;  %4996 = vmatpush.bf16.msrb.mxu1 %v7323_v41  ;;  %4965 = vmatmul.bf16.vlgmr.msra.gmra.mxu2 %v11056_v18 }
  0x26   :  { %v7306_v45 = vld [vmem:[%s15935_s1 + $0x5c0] sm:$0xf]  ;;  %v10082_v47 = vld [vmem:[%s15935_s1 + $0x5cc] sm:$0xf0]  ;;  %v7179_v52 = vor.u32 %v10050_v44, %v7178_v43  ;;  %5009 = vmatpush.bf16.msrb.mxu2 %v7451_v42  ;;  %4978 = vmatmul.bf16.vlgmr.msra.gmra.mxu3 %v11060_v20 }
  0x27   :  { %v7434_v48 = vld [vmem:[%s15935_s1 + $0x6c0] sm:$0xf]  ;;  %v10114_v49 = vld [vmem:[%s15935_s1 + $0x6cc] sm:$0xf0]  ;;  %v7307_v54 = vor.u32 %v10082_v47, %v7306_v45  ;;  %5022 = vmatpush.bf16.msrb.mxu3 %v7579_v46 }
  0x28   :  { %v7562_v50 = vld [vmem:[%s15935_s1 + $0x7c0] sm:$0xf]  ;;  %v10146_v51 = vld [vmem:[%s15935_s1 + $0x7cc] sm:$0xf0]  ;;  %v7435_v55 = vor.u32 %v10114_v49, %v7434_v48  ;;  %4984 = vmatpush.bf16.msrb.mxu0 %v7179_v52 }
  0x29   :  { %v7162_v53 = vld [vmem:[%s15935_s1 + $0x4a0] sm:$0xf]  ;;  %v10046_v56 = vld [vmem:[%s15935_s1 + $0x4ac] sm:$0xf0]  ;;  %v7563_v59 = vor.u32 %v10146_v51, %v7562_v50  ;;  %4997 = vmatpush.bf16.msrb.mxu1 %v7307_v54 }
  0x2a   :  { %v7290_v57 = vld [vmem:[%s15935_s1 + $0x5a0] sm:$0xf]  ;;  %v10078_v58 = vld [vmem:[%s15935_s1 + $0x5ac] sm:$0xf0]  ;;  %v7163_v0 = vor.u32 %v10046_v56, %v7162_v53  ;;  %5010 = vmatpush.bf16.msrb.mxu2 %v7435_v55 }
  0x2b   :  { %v7418_v60 = vld [vmem:[%s15935_s1 + $0x6a0] sm:$0xf]  ;;  %v10110_v61 = vld [vmem:[%s15935_s1 + $0x6ac] sm:$0xf0]  ;;  %v7291_v1 = vor.u32 %v10078_v58, %v7290_v57  ;;  %5023 = vmatpush.bf16.msrb.mxu3 %v7563_v59 }
  0x2c   :  { %v7546_v62 = vld [vmem:[%s15935_s1 + $0x7a0] sm:$0xf]  ;;  %v10142_v63 = vld [vmem:[%s15935_s1 + $0x7ac] sm:$0xf0]  ;;  %v7419_v4 = vor.u32 %v10110_v61, %v7418_v60  ;;  %4985 = vmatpush.bf16.msrb.mxu0 %v7163_v0 }
  0x2d   :  { %v20_v3 = vld [vmem:[%s15936_s0] sm:$0xff]  ;;  %v10042_v6 = vld [vmem:[%s15935_s1 + $0x48c] sm:$0xf0]  ;;  %v7547_v11 = vor.u32 %v10142_v63, %v7546_v62  ;;  %4998 = vmatpush.bf16.msrb.mxu1 %v7291_v1 }
  0x2e   :  { %v7146_v5 = vld [vmem:[%s15935_s1 + $0x480] sm:$0xf]  ;;  %v856_v9 = vunpack.c.l.b16 %v20_v3  ;;  %v10074_v12 = vld [vmem:[%s15935_s1 + $0x58c] sm:$0xf0]  ;;  %v857_v15 = vunpack.c.h.b16 %v20_v3  ;;  %5011 = vmatpush.bf16.msrb.mxu2 %v7419_v4  ;;  %v23_v3 = vld [vmem:[%s15936_s0 + $0x18] sm:$0xff] }
  0x2f   :  { %v7274_v7 = vld [vmem:[%s15935_s1 + $0x580] sm:$0xf]  ;;  %v10106_v14 = vld [vmem:[%s15935_s1 + $0x68c] sm:$0xf0]  ;;  %v7147_v21 = vor.u32 %v10042_v6, %v7146_v5  ;;  %5024 = vmatpush.bf16.msrb.mxu3 %v7547_v11 }
  0x30   :  { %v7402_v13 = vld [vmem:[%s15935_s1 + $0x680] sm:$0xf]  ;;  %v10138_v17 = vld [vmem:[%s15935_s1 + $0x78c] sm:$0xf0]  ;;  %v11058_v19 = vpack.c.b16 %v856_v9, %v856_v9  ;;  %v11062_v22 = vpack.c.b16 %v857_v15, %v857_v15  ;;  %v7275_v23 = vor.u32 %v10074_v12, %v7274_v7  ;;  %v862_v15 = vunpack.c.l.b16 %v23_v3 }
  0x31   :  { %v7530_v16 = vld [vmem:[%s15935_s1 + $0x780] sm:$0xf]  ;;  %v7403_v24 = vor.u32 %v10106_v14, %v7402_v13  ;;  %v10038_v26 = vld [vmem:[%s15935_s1 + $0x46c] sm:$0xf0]  ;;  %4986 = vmatpush.bf16.msrb.mxu0 %v7147_v21 }
  0x32   :  { %v7130_v25 = vld [vmem:[%s15935_s1 + $0x460] sm:$0xf]  ;;  %v7531_v28 = vor.u32 %v10138_v17, %v7530_v16  ;;  %v10070_v29 = vld [vmem:[%s15935_s1 + $0x56c] sm:$0xf0]  ;;  %4939 = vmatmul.bf16.vlgmr.msra.gmra.mxu0 %v11058_v19  ;;  %4952 = vmatmul.bf16.vlgmr.msra.gmra.mxu1 %v11062_v22 }
  0x33   :  { %v7258_v27 = vld [vmem:[%s15935_s1 + $0x560] sm:$0xf]  ;;  %v10102_v31 = vld [vmem:[%s15935_s1 + $0x66c] sm:$0xf0]  ;;  %v7131_v34 = vor.u32 %v10038_v26, %v7130_v25  ;;  %4999 = vmatpush.bf16.msrb.mxu1 %v7275_v23  ;;  %5012 = vmatpush.bf16.msrb.mxu2 %v7403_v24  ;;  %v863_v25 = vunpack.c.h.b16 %v23_v3 }
  0x34   :  { %v7386_v30 = vld [vmem:[%s15935_s1 + $0x660] sm:$0xf]  ;;  %v10134_v33 = vld [vmem:[%s15935_s1 + $0x76c] sm:$0xf0]  ;;  %v7259_v35 = vor.u32 %v10070_v29, %v7258_v27  ;;  %5025 = vmatpush.bf16.msrb.mxu3 %v7531_v28 }
  0x35   :  { %v7514_v32 = vld [vmem:[%s15935_s1 + $0x760] sm:$0xf]  ;;  %v7387_v36 = vor.u32 %v10102_v31, %v7386_v30  ;;  %v10034_v38 = vld [vmem:[%s15935_s1 + $0x44c] sm:$0xf0]  ;;  %4987 = vmatpush.bf16.msrb.mxu0 %v7131_v34 }
  0x36   :  { %v7114_v37 = vld [vmem:[%s15935_s1 + $0x440] sm:$0xf]  ;;  %v7515_v40 = vor.u32 %v10134_v33, %v7514_v32  ;;  %v10066_v41 = vld [vmem:[%s15935_s1 + $0x54c] sm:$0xf0] }
  0x37   :  { %v7242_v39 = vld [vmem:[%s15935_s1 + $0x540] sm:$0xf]  ;;  %v10098_v43 = vld [vmem:[%s15935_s1 + $0x64c] sm:$0xf0]  ;;  %v7115_v46 = vor.u32 %v10034_v38, %v7114_v37  ;;  %5000 = vmatpush.bf16.msrb.mxu1 %v7259_v35  ;;  %5013 = vmatpush.bf16.msrb.mxu2 %v7387_v36  ;;  %v11212_v38 = vpack.c.b16 %v862_v15, %v862_v15 }
  0x38   :  { %v7370_v42 = vld [vmem:[%s15935_s1 + $0x640] sm:$0xf]  ;;  %v10130_v45 = vld [vmem:[%s15935_s1 + $0x74c] sm:$0xf0]  ;;  %v7243_v47 = vor.u32 %v10066_v41, %v7242_v39  ;;  %5026 = vmatpush.bf16.msrb.mxu3 %v7515_v40 }
  0x39   :  { %v7498_v44 = vld [vmem:[%s15935_s1 + $0x740] sm:$0xf]  ;;  %v7371_v48 = vor.u32 %v10098_v43, %v7370_v42  ;;  %v10030_v50 = vld [vmem:[%s15935_s1 + $0x42c] sm:$0xf0]  ;;  %4988 = vmatpush.bf16.msrb.mxu0 %v7115_v46  ;;  %v11222_v42 = vpack.c.b16 %v863_v25, %v863_v25 }
  0x3a   :  { %v7098_v49 = vld [vmem:[%s15935_s1 + $0x420] sm:$0xf]  ;;  %v7499_v52 = vor.u32 %v10130_v45, %v7498_v44  ;;  %v10062_v53 = vld [vmem:[%s15935_s1 + $0x52c] sm:$0xf0] }
  0x3b   :  { %v7226_v51 = vld [vmem:[%s15935_s1 + $0x520] sm:$0xf]  ;;  %v10094_v55 = vld [vmem:[%s15935_s1 + $0x62c] sm:$0xf0]  ;;  %v7099_v59 = vor.u32 %v10030_v50, %v7098_v49  ;;  %5001 = vmatpush.bf16.msrb.mxu1 %v7243_v47  ;;  %5014 = vmatpush.bf16.msrb.mxu2 %v7371_v48 }
  0x3c   :  { %v7354_v54 = vld [vmem:[%s15935_s1 + $0x620] sm:$0xf]  ;;  %v10126_v57 = vld [vmem:[%s15935_s1 + $0x72c] sm:$0xf0]  ;;  %v7227_v63 = vor.u32 %v10062_v53, %v7226_v51  ;;  %5027 = vmatpush.bf16.msrb.mxu3 %v7499_v52 }
  0x3d   :  { %v7482_v56 = vld [vmem:[%s15935_s1 + $0x720] sm:$0xf]  ;;  %v10026_v60 = vld [vmem:[%s15935_s1 + $0x40c] sm:$0xf0]  ;;  %v7355_v0 = vor.u32 %v10094_v55, %v7354_v54  ;;  %4989 = vmatpush.bf16.msrb.mxu0 %v7099_v59 }
  0x3e   :  { %v7082_v58 = vld [vmem:[%s15935_s1 + $0x400] sm:$0xf]  ;;  %v10058_v62 = vld [vmem:[%s15935_s1 + $0x50c] sm:$0xf0]  ;;  %v7483_v4 = vor.u32 %v10126_v57, %v7482_v56 }
  0x3f   :  { %v7210_v61 = vld [vmem:[%s15935_s1 + $0x500] sm:$0xf]  ;;  %v10090_v2 = vld [vmem:[%s15935_s1 + $0x60c] sm:$0xf0]  ;;  %v7083_v11 = vor.u32 %v10026_v60, %v7082_v58  ;;  %5002 = vmatpush.bf16.msrb.mxu1 %v7227_v63  ;;  %5015 = vmatpush.bf16.msrb.mxu2 %v7355_v0 }
  0x40   :  { %v7338_v1 = vld [vmem:[%s15935_s1 + $0x600] sm:$0xf]  ;;  %v10122_v6 = vld [vmem:[%s15935_s1 + $0x70c] sm:$0xf0]  ;;  %v7211_v16 = vor.u32 %v10058_v62, %v7210_v61  ;;  %5028 = vmatpush.bf16.msrb.mxu3 %v7483_v4 }
  0x41   :  { %v7466_v5 = vld [vmem:[%s15935_s1 + $0x700] sm:$0xf]  ;;  %v22_v7 = vld [vmem:[%s15936_s0 + $0x10] sm:$0xff]  ;;  %v7339_v17 = vor.u32 %v10090_v2, %v7338_v1  ;;  %4990 = vmatpush.bf16.msrb.mxu0 %v7083_v11 }
  0x42   :  { %v7706_v8 = vld [vmem:[%s15935_s1 + $0x8e0] sm:$0xf]  ;;  %v10182_v9 = vld [vmem:[%s15935_s1 + $0x8ec] sm:$0xf0]  ;;  %v860_v24 = vunpack.c.l.b16 %v22_v7  ;;  %v7467_v26 = vor.u32 %v10122_v6, %v7466_v5  ;;  %v861_v28 = vunpack.c.h.b16 %v22_v7 }
  0x43   :  { %v7834_v10 = vld [vmem:[%s15935_s1 + $0x9e0] sm:$0xf]  ;;  %v10214_v12 = vld [vmem:[%s15935_s1 + $0x9ec] sm:$0xf0]  ;;  %v7707_v27 = vor.u32 %v10182_v9, %v7706_v8  ;;  %5003 = vmatpush.bf16.msrb.mxu1 %v7211_v16  ;;  %5016 = vmatpush.bf16.msrb.mxu2 %v7339_v17 }
  0x44   :  { %v7962_v13 = vld [vmem:[%s15935_s1 + $0xae0] sm:$0xf]  ;;  %v10246_v14 = vld [vmem:[%s15935_s1 + $0xaec] sm:$0xf0]  ;;  %v7835_v29 = vor.u32 %v10214_v12, %v7834_v10  ;;  %v11220_v41 = vpack.c.b16 %v860_v24, %v860_v24  ;;  %5029 = vmatpush.bf16.msrb.mxu3 %v7467_v26  ;;  %v11224_v44 = vpack.c.b16 %v861_v28, %v861_v28 }
  0x45   :  { %v8090_v21 = vld [vmem:[%s15935_s1 + $0xbe0] sm:$0xf]  ;;  %v10278_v23 = vld [vmem:[%s15935_s1 + $0xbec] sm:$0xf0]  ;;  %v7963_v30 = vor.u32 %v10246_v14, %v7962_v13  ;;  %5035 = vmatpush.bf16.msra.mxu0 %v7707_v27 }
  0x46   :  { %v7690_v31 = vld [vmem:[%s15935_s1 + $0x8c0] sm:$0xf]  ;;  %v10178_v32 = vld [vmem:[%s15935_s1 + $0x8cc] sm:$0xf0]  ;;  %v8091_v34 = vor.u32 %v10278_v23, %v8090_v21  ;;  %5017 = vmatmul.bf16.vlgmr.msrb.gmra.mxu2 %v11212_v38  ;;  %4991 = vmatmul.bf16.vlgmr.msrb.gmra.mxu0 %v11220_v41 }
  0x47   :  { %v7818_v33 = vld [vmem:[%s15935_s1 + $0x9c0] sm:$0xf]  ;;  %v10210_v35 = vld [vmem:[%s15935_s1 + $0x9cc] sm:$0xf0]  ;;  %v7691_v43 = vor.u32 %v10178_v32, %v7690_v31  ;;  %5048 = vmatpush.bf16.msra.mxu1 %v7835_v29  ;;  %5061 = vmatpush.bf16.msra.mxu2 %v7963_v30 }
  0x48   :  { %v7946_v36 = vld [vmem:[%s15935_s1 + $0xac0] sm:$0xf]  ;;  %v10242_v37 = vld [vmem:[%s15935_s1 + $0xacc] sm:$0xf0]  ;;  %v7819_v45 = vor.u32 %v10210_v35, %v7818_v33  ;;  %5074 = vmatpush.bf16.msra.mxu3 %v8091_v34  ;;  %5004 = vmatmul.bf16.vlgmr.msrb.gmra.mxu1 %v11224_v44 }
  0x49   :  { %v8074_v39 = vld [vmem:[%s15935_s1 + $0xbc0] sm:$0xf]  ;;  %v10274_v40 = vld [vmem:[%s15935_s1 + $0xbcc] sm:$0xf0]  ;;  %v7947_v46 = vor.u32 %v10242_v37, %v7946_v36  ;;  %5030 = vmatmul.bf16.vlgmr.msrb.gmra.mxu3 %v11222_v42  ;;  %5036 = vmatpush.bf16.msra.mxu0 %v7691_v43 }
  0x4a   :  { %v7674_v47 = vld [vmem:[%s15935_s1 + $0x8a0] sm:$0xf]  ;;  %v10174_v48 = vld [vmem:[%s15935_s1 + $0x8ac] sm:$0xf0]  ;;  %v8075_v50 = vor.u32 %v10274_v40, %v8074_v39 }
  0x4b   :  { %v7802_v49 = vld [vmem:[%s15935_s1 + $0x9a0] sm:$0xf]  ;;  %v10206_v51 = vld [vmem:[%s15935_s1 + $0x9ac] sm:$0xf0]  ;;  %v7675_v56 = vor.u32 %v10174_v48, %v7674_v47  ;;  %5049 = vmatpush.bf16.msra.mxu1 %v7819_v45  ;;  %5062 = vmatpush.bf16.msra.mxu2 %v7947_v46 }
  0x4c   :  { %v7930_v52 = vld [vmem:[%s15935_s1 + $0xaa0] sm:$0xf]  ;;  %v10238_v53 = vld [vmem:[%s15935_s1 + $0xaac] sm:$0xf0]  ;;  %v7803_v57 = vor.u32 %v10206_v51, %v7802_v49  ;;  %5075 = vmatpush.bf16.msra.mxu3 %v8075_v50 }
  0x4d   :  { %v8058_v54 = vld [vmem:[%s15935_s1 + $0xba0] sm:$0xf]  ;;  %v10270_v55 = vld [vmem:[%s15935_s1 + $0xbac] sm:$0xf0]  ;;  %v7931_v58 = vor.u32 %v10238_v53, %v7930_v52  ;;  %5037 = vmatpush.bf16.msra.mxu0 %v7675_v56 }
  0x4e   :  { %v7658_v59 = vld [vmem:[%s15935_s1 + $0x880] sm:$0xf]  ;;  %v10170_v60 = vld [vmem:[%s15935_s1 + $0x88c] sm:$0xf0]  ;;  %v8059_v62 = vor.u32 %v10270_v55, %v8058_v54 }
  0x4f   :  { %v7786_v61 = vld [vmem:[%s15935_s1 + $0x980] sm:$0xf]  ;;  %v10202_v63 = vld [vmem:[%s15935_s1 + $0x98c] sm:$0xf0]  ;;  %v7659_v4 = vor.u32 %v10170_v60, %v7658_v59  ;;  %5050 = vmatpush.bf16.msra.mxu1 %v7803_v57  ;;  %5063 = vmatpush.bf16.msra.mxu2 %v7931_v58 }
  0x50   :  { %v7914_v0 = vld [vmem:[%s15935_s1 + $0xa80] sm:$0xf]  ;;  %v10234_v1 = vld [vmem:[%s15935_s1 + $0xa8c] sm:$0xf0]  ;;  %v7787_v5 = vor.u32 %v10202_v63, %v7786_v61  ;;  %5076 = vmatpush.bf16.msra.mxu3 %v8059_v62  ;;  %v25_v61 = vld [vmem:[%s15936_s0 + $0x28] sm:$0xff] }
  0x51   :  { %v8042_v2 = vld [vmem:[%s15935_s1 + $0xb80] sm:$0xf]  ;;  %v10266_v3 = vld [vmem:[%s15935_s1 + $0xb8c] sm:$0xf0]  ;;  %v7915_v6 = vor.u32 %v10234_v1, %v7914_v0  ;;  %5038 = vmatpush.bf16.msra.mxu0 %v7659_v4 }
  0x52   :  { %v7642_v7 = vld [vmem:[%s15935_s1 + $0x860] sm:$0xf]  ;;  %v10166_v8 = vld [vmem:[%s15935_s1 + $0x86c] sm:$0xf0]  ;;  %v8043_v10 = vor.u32 %v10266_v3, %v8042_v2 }
  0x53   :  { %v7770_v9 = vld [vmem:[%s15935_s1 + $0x960] sm:$0xf]  ;;  %v10198_v11 = vld [vmem:[%s15935_s1 + $0x96c] sm:$0xf0]  ;;  %v7643_v16 = vor.u32 %v10166_v8, %v7642_v7  ;;  %5051 = vmatpush.bf16.msra.mxu1 %v7787_v5  ;;  %5064 = vmatpush.bf16.msra.mxu2 %v7915_v6 }
  0x54   :  { %v7898_v12 = vld [vmem:[%s15935_s1 + $0xa60] sm:$0xf]  ;;  %v10230_v13 = vld [vmem:[%s15935_s1 + $0xa6c] sm:$0xf0]  ;;  %v7771_v17 = vor.u32 %v10198_v11, %v7770_v9  ;;  %5077 = vmatpush.bf16.msra.mxu3 %v8043_v10  ;;  %v866_v10 = vunpack.c.l.b16 %v25_v61 }
  0x55   :  { %v8026_v14 = vld [vmem:[%s15935_s1 + $0xb60] sm:$0xf]  ;;  %v10262_v15 = vld [vmem:[%s15935_s1 + $0xb6c] sm:$0xf0]  ;;  %v7899_v21 = vor.u32 %v10230_v13, %v7898_v12  ;;  %5039 = vmatpush.bf16.msra.mxu0 %v7643_v16 }
  0x56   :  { %v7626_v23 = vld [vmem:[%s15935_s1 + $0x840] sm:$0xf]  ;;  %v10162_v24 = vld [vmem:[%s15935_s1 + $0x84c] sm:$0xf0]  ;;  %v8027_v26 = vor.u32 %v10262_v15, %v8026_v14  ;;  %v867_v14 = vunpack.c.h.b16 %v25_v61 }
  0x57   :  { %v7754_v25 = vld [vmem:[%s15935_s1 + $0x940] sm:$0xf]  ;;  %v10194_v27 = vld [vmem:[%s15935_s1 + $0x94c] sm:$0xf0]  ;;  %v7627_v32 = vor.u32 %v10162_v24, %v7626_v23  ;;  %5052 = vmatpush.bf16.msra.mxu1 %v7771_v17  ;;  %5065 = vmatpush.bf16.msra.mxu2 %v7899_v21 }
  0x58   :  { %v7882_v28 = vld [vmem:[%s15935_s1 + $0xa40] sm:$0xf]  ;;  %v10226_v29 = vld [vmem:[%s15935_s1 + $0xa4c] sm:$0xf0]  ;;  %v7755_v33 = vor.u32 %v10194_v27, %v7754_v25  ;;  %5078 = vmatpush.bf16.msra.mxu3 %v8027_v26 }
  0x59   :  { %v8010_v30 = vld [vmem:[%s15935_s1 + $0xb40] sm:$0xf]  ;;  %v10258_v31 = vld [vmem:[%s15935_s1 + $0xb4c] sm:$0xf0]  ;;  %v7883_v34 = vor.u32 %v10226_v29, %v7882_v28  ;;  %5040 = vmatpush.bf16.msra.mxu0 %v7627_v32  ;;  %v11424_v29 = vpack.c.b16 %v866_v10, %v866_v10 }
  0x5a   :  { %v7610_v35 = vld [vmem:[%s15935_s1 + $0x820] sm:$0xf]  ;;  %v10158_v36 = vld [vmem:[%s15935_s1 + $0x82c] sm:$0xf0]  ;;  %v8011_v39 = vor.u32 %v10258_v31, %v8010_v30 }
  0x5b   :  { %v7738_v37 = vld [vmem:[%s15935_s1 + $0x920] sm:$0xf]  ;;  %v10190_v40 = vld [vmem:[%s15935_s1 + $0x92c] sm:$0xf0]  ;;  %v7611_v49 = vor.u32 %v10158_v36, %v7610_v35  ;;  %5053 = vmatpush.bf16.msra.mxu1 %v7755_v33  ;;  %5066 = vmatpush.bf16.msra.mxu2 %v7883_v34  ;;  %v11434_v33 = vpack.c.b16 %v867_v14, %v867_v14 }
  0x5c   :  { %v7866_v43 = vld [vmem:[%s15935_s1 + $0xa20] sm:$0xf]  ;;  %v10222_v45 = vld [vmem:[%s15935_s1 + $0xa2c] sm:$0xf0]  ;;  %v7739_v53 = vor.u32 %v10190_v40, %v7738_v37  ;;  %5079 = vmatpush.bf16.msra.mxu3 %v8011_v39 }
  0x5d   :  { %v7994_v46 = vld [vmem:[%s15935_s1 + $0xb20] sm:$0xf]  ;;  %v10254_v47 = vld [vmem:[%s15935_s1 + $0xb2c] sm:$0xf0]  ;;  %v7867_v54 = vor.u32 %v10222_v45, %v7866_v43  ;;  %5041 = vmatpush.bf16.msra.mxu0 %v7611_v49 }
  0x5e   :  { %v7594_v48 = vld [vmem:[%s15935_s1 + $0x800] sm:$0xf]  ;;  %v10154_v50 = vld [vmem:[%s15935_s1 + $0x80c] sm:$0xf0]  ;;  %v7995_v58 = vor.u32 %v10254_v47, %v7994_v46 }
  0x5f   :  { %v7722_v51 = vld [vmem:[%s15935_s1 + $0x900] sm:$0xf]  ;;  %v10186_v52 = vld [vmem:[%s15935_s1 + $0x90c] sm:$0xf0]  ;;  %v7595_v1 = vor.u32 %v10154_v50, %v7594_v48  ;;  %5054 = vmatpush.bf16.msra.mxu1 %v7739_v53  ;;  %5067 = vmatpush.bf16.msra.mxu2 %v7867_v54 }
  0x60   :  { %v7850_v55 = vld [vmem:[%s15935_s1 + $0xa00] sm:$0xf]  ;;  %v10218_v56 = vld [vmem:[%s15935_s1 + $0xa0c] sm:$0xf0]  ;;  %v7723_v6 = vor.u32 %v10186_v52, %v7722_v51  ;;  %5080 = vmatpush.bf16.msra.mxu3 %v7995_v58 }
  0x61   :  { %v24_v57 = vld [vmem:[%s15936_s0 + $0x20] sm:$0xff]  ;;  %v10250_v60 = vld [vmem:[%s15935_s1 + $0xb0c] sm:$0xf0]  ;;  %v7851_v7 = vor.u32 %v10218_v56, %v7850_v55  ;;  %5042 = vmatpush.bf16.msra.mxu0 %v7595_v1 }
  0x62   :  { %v7978_v59 = vld [vmem:[%s15935_s1 + $0xb00] sm:$0xf]  ;;  %v10310_v63 = vld [vmem:[%s15935_s1 + $0xcec] sm:$0xf0]  ;;  %v864_v5 = vunpack.c.l.b16 %v24_v57  ;;  %v865_v11 = vunpack.c.h.b16 %v24_v57 }
  0x63   :  { %v8218_v62 = vld [vmem:[%s15935_s1 + $0xce0] sm:$0xf]  ;;  %v10342_v2 = vld [vmem:[%s15935_s1 + $0xdec] sm:$0xf0]  ;;  %v7979_v12 = vor.u32 %v10250_v60, %v7978_v59  ;;  %5055 = vmatpush.bf16.msra.mxu1 %v7723_v6  ;;  %5068 = vmatpush.bf16.msra.mxu2 %v7851_v7 }
  0x64   :  { %v8346_v0 = vld [vmem:[%s15935_s1 + $0xde0] sm:$0xf]  ;;  %v10374_v4 = vld [vmem:[%s15935_s1 + $0xeec] sm:$0xf0]  ;;  %v8219_v13 = vor.u32 %v10310_v63, %v8218_v62  ;;  %v11413_v25 = vpack.c.b16 %v864_v5, %v864_v5  ;;  %v11426_v30 = vpack.c.b16 %v865_v11, %v865_v11 }
  0x65   :  { %v8474_v3 = vld [vmem:[%s15935_s1 + $0xee0] sm:$0xf]  ;;  %v10406_v9 = vld [vmem:[%s15935_s1 + $0xfec] sm:$0xf0]  ;;  %v8347_v15 = vor.u32 %v10342_v2, %v8346_v0  ;;  %5081 = vmatpush.bf16.msra.mxu3 %v7979_v12 }
  0x66   :  { %v8602_v8 = vld [vmem:[%s15935_s1 + $0xfe0] sm:$0xf]  ;;  %v8475_v16 = vor.u32 %v10374_v4, %v8474_v3  ;;  %v10306_v21 = vld [vmem:[%s15935_s1 + $0xccc] sm:$0xf0]  ;;  %5087 = vmatpush.bf16.msrb.mxu0 %v8219_v13  ;;  %5069 = vmatmul.bf16.vlgmr.msra.gmra.mxu2 %v11424_v29 }
  0x67   :  { %v8202_v17 = vld [vmem:[%s15935_s1 + $0xcc0] sm:$0xf]  ;;  %v8603_v24 = vor.u32 %v10406_v9, %v8602_v8  ;;  %v10338_v26 = vld [vmem:[%s15935_s1 + $0xdcc] sm:$0xf0]  ;;  %5100 = vmatpush.bf16.msrb.mxu1 %v8347_v15  ;;  %5043 = vmatmul.bf16.vlgmr.msra.gmra.mxu0 %v11413_v25 }
  0x68   :  { %v8330_v23 = vld [vmem:[%s15935_s1 + $0xdc0] sm:$0xf]  ;;  %v10370_v28 = vld [vmem:[%s15935_s1 + $0xecc] sm:$0xf0]  ;;  %v8203_v34 = vor.u32 %v10306_v21, %v8202_v17  ;;  %5113 = vmatpush.bf16.msrb.mxu2 %v8475_v16  ;;  %5056 = vmatmul.bf16.vlgmr.msra.gmra.mxu1 %v11426_v30 }
  0x69   :  { %v8458_v27 = vld [vmem:[%s15935_s1 + $0xec0] sm:$0xf]  ;;  %v10402_v32 = vld [vmem:[%s15935_s1 + $0xfcc] sm:$0xf0]  ;;  %v8331_v35 = vor.u32 %v10338_v26, %v8330_v23  ;;  %5126 = vmatpush.bf16.msrb.mxu3 %v8603_v24 }
  0x6a   :  { %v8586_v31 = vld [vmem:[%s15935_s1 + $0xfc0] sm:$0xf]  ;;  %v8459_v36 = vor.u32 %v10370_v28, %v8458_v27  ;;  %v10302_v39 = vld [vmem:[%s15935_s1 + $0xcac] sm:$0xf0]  ;;  %5082 = vmatmul.bf16.vlgmr.msra.gmra.mxu3 %v11434_v33  ;;  %5088 = vmatpush.bf16.msrb.mxu0 %v8203_v34 }
  0x6b   :  { %v8186_v37 = vld [vmem:[%s15935_s1 + $0xca0] sm:$0xf]  ;;  %v8587_v43 = vor.u32 %v10402_v32, %v8586_v31  ;;  %v10334_v45 = vld [vmem:[%s15935_s1 + $0xdac] sm:$0xf0]  ;;  %5101 = vmatpush.bf16.msrb.mxu1 %v8331_v35 }
  0x6c   :  { %v8314_v40 = vld [vmem:[%s15935_s1 + $0xda0] sm:$0xf]  ;;  %v10366_v47 = vld [vmem:[%s15935_s1 + $0xeac] sm:$0xf0]  ;;  %v8187_v50 = vor.u32 %v10302_v39, %v8186_v37  ;;  %5114 = vmatpush.bf16.msrb.mxu2 %v8459_v36 }
  0x6d   :  { %v8442_v46 = vld [vmem:[%s15935_s1 + $0xea0] sm:$0xf]  ;;  %v10398_v49 = vld [vmem:[%s15935_s1 + $0xfac] sm:$0xf0]  ;;  %v8315_v51 = vor.u32 %v10334_v45, %v8314_v40  ;;  %5127 = vmatpush.bf16.msrb.mxu3 %v8587_v43 }
  0x6e   :  { %v8570_v48 = vld [vmem:[%s15935_s1 + $0xfa0] sm:$0xf]  ;;  %v8443_v52 = vor.u32 %v10366_v47, %v8442_v46  ;;  %v10298_v54 = vld [vmem:[%s15935_s1 + $0xc8c] sm:$0xf0]  ;;  %5089 = vmatpush.bf16.msrb.mxu0 %v8187_v50 }
  0x6f   :  { %v8170_v53 = vld [vmem:[%s15935_s1 + $0xc80] sm:$0xf]  ;;  %v8571_v56 = vor.u32 %v10398_v49, %v8570_v48  ;;  %v10330_v57 = vld [vmem:[%s15935_s1 + $0xd8c] sm:$0xf0]  ;;  %5102 = vmatpush.bf16.msrb.mxu1 %v8315_v51 }
  0x70   :  { %v8298_v55 = vld [vmem:[%s15935_s1 + $0xd80] sm:$0xf]  ;;  %v10362_v59 = vld [vmem:[%s15935_s1 + $0xe8c] sm:$0xf0]  ;;  %v8171_v62 = vor.u32 %v10298_v54, %v8170_v53  ;;  %5115 = vmatpush.bf16.msrb.mxu2 %v8443_v52 }
  0x71   :  { %v8426_v58 = vld [vmem:[%s15935_s1 + $0xe80] sm:$0xf]  ;;  %v10394_v61 = vld [vmem:[%s15935_s1 + $0xf8c] sm:$0xf0]  ;;  %v8299_v63 = vor.u32 %v10330_v57, %v8298_v55  ;;  %5128 = vmatpush.bf16.msrb.mxu3 %v8571_v56 }
  0x72   :  { %v8554_v60 = vld [vmem:[%s15935_s1 + $0xf80] sm:$0xf]  ;;  %v8427_v0 = vor.u32 %v10362_v59, %v8426_v58  ;;  %v10294_v2 = vld [vmem:[%s15935_s1 + $0xc6c] sm:$0xf0]  ;;  %5090 = vmatpush.bf16.msrb.mxu0 %v8171_v62  ;;  %v27_v59 = vld [vmem:[%s15936_s0 + $0x38] sm:$0xff] }
  0x73   :  { %v8154_v1 = vld [vmem:[%s15935_s1 + $0xc60] sm:$0xf]  ;;  %v8555_v4 = vor.u32 %v10394_v61, %v8554_v60  ;;  %v10326_v5 = vld [vmem:[%s15935_s1 + $0xd6c] sm:$0xf0]  ;;  %5103 = vmatpush.bf16.msrb.mxu1 %v8299_v63 }
  0x74   :  { %v8282_v3 = vld [vmem:[%s15935_s1 + $0xd60] sm:$0xf]  ;;  %v10358_v7 = vld [vmem:[%s15935_s1 + $0xe6c] sm:$0xf0]  ;;  %v8155_v10 = vor.u32 %v10294_v2, %v8154_v1  ;;  %5116 = vmatpush.bf16.msrb.mxu2 %v8427_v0 }
  0x75   :  { %v8410_v6 = vld [vmem:[%s15935_s1 + $0xe60] sm:$0xf]  ;;  %v10390_v9 = vld [vmem:[%s15935_s1 + $0xf6c] sm:$0xf0]  ;;  %v8283_v11 = vor.u32 %v10326_v5, %v8282_v3  ;;  %5129 = vmatpush.bf16.msrb.mxu3 %v8555_v4 }
  0x76   :  { %v8538_v8 = vld [vmem:[%s15935_s1 + $0xf60] sm:$0xf]  ;;  %v8411_v12 = vor.u32 %v10358_v7, %v8410_v6  ;;  %v10290_v14 = vld [vmem:[%s15935_s1 + $0xc4c] sm:$0xf0]  ;;  %5091 = vmatpush.bf16.msrb.mxu0 %v8155_v10 }
  0x77   :  { %v8138_v13 = vld [vmem:[%s15935_s1 + $0xc40] sm:$0xf]  ;;  %v8539_v16 = vor.u32 %v10390_v9, %v8538_v8  ;;  %v10322_v17 = vld [vmem:[%s15935_s1 + $0xd4c] sm:$0xf0]  ;;  %5104 = vmatpush.bf16.msrb.mxu1 %v8283_v11  ;;  %v870_v8 = vunpack.c.l.b16 %v27_v59 }
  0x78   :  { %v8266_v15 = vld [vmem:[%s15935_s1 + $0xd40] sm:$0xf]  ;;  %v10354_v23 = vld [vmem:[%s15935_s1 + $0xe4c] sm:$0xf0]  ;;  %v8139_v27 = vor.u32 %v10290_v14, %v8138_v13  ;;  %5117 = vmatpush.bf16.msrb.mxu2 %v8411_v12  ;;  %v871_v12 = vunpack.c.h.b16 %v27_v59 }
  0x79   :  { %v8394_v21 = vld [vmem:[%s15935_s1 + $0xe40] sm:$0xf]  ;;  %v10386_v26 = vld [vmem:[%s15935_s1 + $0xf4c] sm:$0xf0]  ;;  %v8267_v28 = vor.u32 %v10322_v17, %v8266_v15  ;;  %5130 = vmatpush.bf16.msrb.mxu3 %v8539_v16 }
  0x7a   :  { %v8522_v24 = vld [vmem:[%s15935_s1 + $0xf40] sm:$0xf]  ;;  %v8395_v31 = vor.u32 %v10354_v23, %v8394_v21  ;;  %v10286_v34 = vld [vmem:[%s15935_s1 + $0xc2c] sm:$0xf0]  ;;  %5092 = vmatpush.bf16.msrb.mxu0 %v8139_v27 }
  0x7b   :  { %v8122_v32 = vld [vmem:[%s15935_s1 + $0xc20] sm:$0xf]  ;;  %v8523_v36 = vor.u32 %v10386_v26, %v8522_v24  ;;  %v10318_v37 = vld [vmem:[%s15935_s1 + $0xd2c] sm:$0xf0]  ;;  %5105 = vmatpush.bf16.msrb.mxu1 %v8267_v28  ;;  %v11634_v28 = vpack.c.b16 %v870_v8, %v870_v8 }
  0x7c   :  { %v8250_v35 = vld [vmem:[%s15935_s1 + $0xd20] sm:$0xf]  ;;  %v10350_v40 = vld [vmem:[%s15935_s1 + $0xe2c] sm:$0xf0]  ;;  %v8123_v47 = vor.u32 %v10286_v34, %v8122_v32  ;;  %5118 = vmatpush.bf16.msrb.mxu2 %v8395_v31 }
  0x7d   :  { %v8378_v39 = vld [vmem:[%s15935_s1 + $0xe20] sm:$0xf]  ;;  %v10382_v45 = vld [vmem:[%s15935_s1 + $0xf2c] sm:$0xf0]  ;;  %v8251_v51 = vor.u32 %v10318_v37, %v8250_v35  ;;  %5131 = vmatpush.bf16.msrb.mxu3 %v8523_v36  ;;  %v11644_v35 = vpack.c.b16 %v871_v12, %v871_v12 }
  0x7e   :  { %v8506_v43 = vld [vmem:[%s15935_s1 + $0xf20] sm:$0xf]  ;;  %v10282_v48 = vld [vmem:[%s15935_s1 + $0xc0c] sm:$0xf0]  ;;  %v8379_v52 = vor.u32 %v10350_v40, %v8378_v39  ;;  %5093 = vmatpush.bf16.msrb.mxu0 %v8123_v47 }
  0x7f   :  { %v8106_v46 = vld [vmem:[%s15935_s1 + $0xc00] sm:$0xf]  ;;  %v10314_v50 = vld [vmem:[%s15935_s1 + $0xd0c] sm:$0xf0]  ;;  %v8507_v56 = vor.u32 %v10382_v45, %v8506_v43  ;;  %5106 = vmatpush.bf16.msrb.mxu1 %v8251_v51 }
  0x80   :  { %v8234_v49 = vld [vmem:[%s15935_s1 + $0xd00] sm:$0xf]  ;;  %v10346_v54 = vld [vmem:[%s15935_s1 + $0xe0c] sm:$0xf0]  ;;  %v8107_v63 = vor.u32 %v10282_v48, %v8106_v46  ;;  %5119 = vmatpush.bf16.msrb.mxu2 %v8379_v52 }
  0x81   :  { %v8362_v53 = vld [vmem:[%s15935_s1 + $0xe00] sm:$0xf]  ;;  %v26_v55 = vld [vmem:[%s15936_s0 + $0x30] sm:$0xff]  ;;  %v8235_v4 = vor.u32 %v10314_v50, %v8234_v49  ;;  %5132 = vmatpush.bf16.msrb.mxu3 %v8507_v56 }
  0x82   :  { %v8490_v57 = vld [vmem:[%s15935_s1 + $0xf00] sm:$0xf]  ;;  %v10378_v58 = vld [vmem:[%s15935_s1 + $0xf0c] sm:$0xf0]  ;;  %v868_v3 = vunpack.c.l.b16 %v26_v55  ;;  %v8363_v5 = vor.u32 %v10346_v54, %v8362_v53  ;;  %v869_v9 = vunpack.c.h.b16 %v26_v55  ;;  %5094 = vmatpush.bf16.msrb.mxu0 %v8107_v63 }
  0x83   :  { %v8730_v60 = vld [vmem:[%s15935_s1 + $0x10e0] sm:$0xf]  ;;  %v10438_v61 = vld [vmem:[%s15935_s1 + $0x10ec] sm:$0xf0]  ;;  %v8491_v10 = vor.u32 %v10378_v58, %v8490_v57  ;;  %5107 = vmatpush.bf16.msrb.mxu1 %v8235_v4 }
  0x84   :  { %v8858_v62 = vld [vmem:[%s15935_s1 + $0x11e0] sm:$0xf]  ;;  %v10470_v0 = vld [vmem:[%s15935_s1 + $0x11ec] sm:$0xf0]  ;;  %v8731_v11 = vor.u32 %v10438_v61, %v8730_v60  ;;  %v11623_v23 = vpack.c.b16 %v868_v3, %v868_v3  ;;  %5120 = vmatpush.bf16.msrb.mxu2 %v8363_v5  ;;  %v11636_v31 = vpack.c.b16 %v869_v9, %v869_v9 }
  0x85   :  { %v8986_v1 = vld [vmem:[%s15935_s1 + $0x12e0] sm:$0xf]  ;;  %v10502_v2 = vld [vmem:[%s15935_s1 + $0x12ec] sm:$0xf0]  ;;  %v8859_v13 = vor.u32 %v10470_v0, %v8858_v62  ;;  %5133 = vmatpush.bf16.msrb.mxu3 %v8491_v10 }
  0x86   :  { %v9114_v6 = vld [vmem:[%s15935_s1 + $0x13e0] sm:$0xf]  ;;  %v10534_v7 = vld [vmem:[%s15935_s1 + $0x13ec] sm:$0xf0]  ;;  %v8987_v14 = vor.u32 %v10502_v2, %v8986_v1  ;;  %5139 = vmatpush.bf16.msra.mxu0 %v8731_v11  ;;  %5108 = vmatmul.bf16.vlgmr.msrb.gmra.mxu1 %v11636_v31 }
  0x87   :  { %v8714_v15 = vld [vmem:[%s15935_s1 + $0x10c0] sm:$0xf]  ;;  %v10434_v16 = vld [vmem:[%s15935_s1 + $0x10cc] sm:$0xf0]  ;;  %v9115_v21 = vor.u32 %v10534_v7, %v9114_v6  ;;  %5152 = vmatpush.bf16.msra.mxu1 %v8859_v13  ;;  %5095 = vmatmul.bf16.vlgmr.msrb.gmra.mxu0 %v11623_v23 }
  0x88   :  { %v8842_v17 = vld [vmem:[%s15935_s1 + $0x11c0] sm:$0xf]  ;;  %v10466_v24 = vld [vmem:[%s15935_s1 + $0x11cc] sm:$0xf0]  ;;  %v8715_v36 = vor.u32 %v10434_v16, %v8714_v15  ;;  %5165 = vmatpush.bf16.msra.mxu2 %v8987_v14  ;;  %5134 = vmatmul.bf16.vlgmr.msrb.gmra.mxu3 %v11644_v35 }
  0x89   :  { %v8970_v26 = vld [vmem:[%s15935_s1 + $0x12c0] sm:$0xf]  ;;  %v10498_v27 = vld [vmem:[%s15935_s1 + $0x12cc] sm:$0xf0]  ;;  %v8843_v37 = vor.u32 %v10466_v24, %v8842_v17  ;;  %5178 = vmatpush.bf16.msra.mxu3 %v9115_v21  ;;  %5121 = vmatmul.bf16.vlgmr.msrb.gmra.mxu2 %v11634_v28 }
  0x8a   :  { %v9098_v32 = vld [vmem:[%s15935_s1 + $0x13c0] sm:$0xf]  ;;  %v10530_v34 = vld [vmem:[%s15935_s1 + $0x13cc] sm:$0xf0]  ;;  %v8971_v39 = vor.u32 %v10498_v27, %v8970_v26  ;;  %5140 = vmatpush.bf16.msra.mxu0 %v8715_v36 }
  0x8b   :  { %v8698_v40 = vld [vmem:[%s15935_s1 + $0x10a0] sm:$0xf]  ;;  %v10430_v43 = vld [vmem:[%s15935_s1 + $0x10ac] sm:$0xf0]  ;;  %v9099_v46 = vor.u32 %v10530_v34, %v9098_v32  ;;  %5153 = vmatpush.bf16.msra.mxu1 %v8843_v37 }
  0x8c   :  { %v8826_v45 = vld [vmem:[%s15935_s1 + $0x11a0] sm:$0xf]  ;;  %v10462_v47 = vld [vmem:[%s15935_s1 + $0x11ac] sm:$0xf0]  ;;  %v8699_v52 = vor.u32 %v10430_v43, %v8698_v40  ;;  %5166 = vmatpush.bf16.msra.mxu2 %v8971_v39 }
  0x8d   :  { %v8954_v48 = vld [vmem:[%s15935_s1 + $0x12a0] sm:$0xf]  ;;  %v10494_v49 = vld [vmem:[%s15935_s1 + $0x12ac] sm:$0xf0]  ;;  %v8827_v53 = vor.u32 %v10462_v47, %v8826_v45  ;;  %5179 = vmatpush.bf16.msra.mxu3 %v9099_v46 }
  0x8e   :  { %v9082_v50 = vld [vmem:[%s15935_s1 + $0x13a0] sm:$0xf]  ;;  %v10526_v51 = vld [vmem:[%s15935_s1 + $0x13ac] sm:$0xf0]  ;;  %v8955_v54 = vor.u32 %v10494_v49, %v8954_v48  ;;  %5141 = vmatpush.bf16.msra.mxu0 %v8699_v52 }
  0x8f   :  { %v8682_v55 = vld [vmem:[%s15935_s1 + $0x1080] sm:$0xf]  ;;  %v10426_v56 = vld [vmem:[%s15935_s1 + $0x108c] sm:$0xf0]  ;;  %v9083_v58 = vor.u32 %v10526_v51, %v9082_v50  ;;  %5154 = vmatpush.bf16.msra.mxu1 %v8827_v53 }
  0x90   :  { %v8810_v57 = vld [vmem:[%s15935_s1 + $0x1180] sm:$0xf]  ;;  %v10458_v59 = vld [vmem:[%s15935_s1 + $0x118c] sm:$0xf0]  ;;  %v8683_v0 = vor.u32 %v10426_v56, %v8682_v55  ;;  %5167 = vmatpush.bf16.msra.mxu2 %v8955_v54 }
  0x91   :  { %v8938_v60 = vld [vmem:[%s15935_s1 + $0x1280] sm:$0xf]  ;;  %v10490_v61 = vld [vmem:[%s15935_s1 + $0x128c] sm:$0xf0]  ;;  %v8811_v1 = vor.u32 %v10458_v59, %v8810_v57  ;;  %5180 = vmatpush.bf16.msra.mxu3 %v9083_v58 }
  0x92   :  { %v9066_v62 = vld [vmem:[%s15935_s1 + $0x1380] sm:$0xf]  ;;  %v10522_v63 = vld [vmem:[%s15935_s1 + $0x138c] sm:$0xf0]  ;;  %v8939_v2 = vor.u32 %v10490_v61, %v8938_v60  ;;  %5142 = vmatpush.bf16.msra.mxu0 %v8683_v0 }
  0x93   :  { %v8666_v3 = vld [vmem:[%s15935_s1 + $0x1060] sm:$0xf]  ;;  %v10422_v4 = vld [vmem:[%s15935_s1 + $0x106c] sm:$0xf0]  ;;  %v9067_v6 = vor.u32 %v10522_v63, %v9066_v62  ;;  %5155 = vmatpush.bf16.msra.mxu1 %v8811_v1  ;;  %v29_v1 = vld [vmem:[%s15936_s0 + $0x48] sm:$0xff] }
  0x94   :  { %v8794_v5 = vld [vmem:[%s15935_s1 + $0x1160] sm:$0xf]  ;;  %v10454_v7 = vld [vmem:[%s15935_s1 + $0x116c] sm:$0xf0]  ;;  %v8667_v12 = vor.u32 %v10422_v4, %v8666_v3  ;;  %5168 = vmatpush.bf16.msra.mxu2 %v8939_v2 }
  0x95   :  { %v8922_v8 = vld [vmem:[%s15935_s1 + $0x1260] sm:$0xf]  ;;  %v10486_v9 = vld [vmem:[%s15935_s1 + $0x126c] sm:$0xf0]  ;;  %v8795_v13 = vor.u32 %v10454_v7, %v8794_v5  ;;  %5181 = vmatpush.bf16.msra.mxu3 %v9067_v6 }
  0x96   :  { %v9050_v10 = vld [vmem:[%s15935_s1 + $0x1360] sm:$0xf]  ;;  %v10518_v11 = vld [vmem:[%s15935_s1 + $0x136c] sm:$0xf0]  ;;  %v8923_v14 = vor.u32 %v10486_v9, %v8922_v8  ;;  %5143 = vmatpush.bf16.msra.mxu0 %v8667_v12 }
  0x97   :  { %v8650_v15 = vld [vmem:[%s15935_s1 + $0x1040] sm:$0xf]  ;;  %v10418_v16 = vld [vmem:[%s15935_s1 + $0x104c] sm:$0xf0]  ;;  %v9051_v21 = vor.u32 %v10518_v11, %v9050_v10  ;;  %5156 = vmatpush.bf16.msra.mxu1 %v8795_v13 }
  0x98   :  { %v8778_v17 = vld [vmem:[%s15935_s1 + $0x1140] sm:$0xf]  ;;  %v10450_v24 = vld [vmem:[%s15935_s1 + $0x114c] sm:$0xf0]  ;;  %v8651_v36 = vor.u32 %v10418_v16, %v8650_v15  ;;  %5169 = vmatpush.bf16.msra.mxu2 %v8923_v14  ;;  %v874_v14 = vunpack.c.l.b16 %v29_v1 }
  0x99   :  { %v8906_v26 = vld [vmem:[%s15935_s1 + $0x1240] sm:$0xf]  ;;  %v10482_v27 = vld [vmem:[%s15935_s1 + $0x124c] sm:$0xf0]  ;;  %v8779_v37 = vor.u32 %v10450_v24, %v8778_v17  ;;  %5182 = vmatpush.bf16.msra.mxu3 %v9051_v21  ;;  %v875_v21 = vunpack.c.h.b16 %v29_v1 }
  0x9a   :  { %v9034_v32 = vld [vmem:[%s15935_s1 + $0x1340] sm:$0xf]  ;;  %v10514_v34 = vld [vmem:[%s15935_s1 + $0x134c] sm:$0xf0]  ;;  %v8907_v39 = vor.u32 %v10482_v27, %v8906_v26  ;;  %5144 = vmatpush.bf16.msra.mxu0 %v8651_v36 }
  0x9b   :  { %v8634_v40 = vld [vmem:[%s15935_s1 + $0x1020] sm:$0xf]  ;;  %v10414_v43 = vld [vmem:[%s15935_s1 + $0x102c] sm:$0xf0]  ;;  %v9035_v46 = vor.u32 %v10514_v34, %v9034_v32  ;;  %5157 = vmatpush.bf16.msra.mxu1 %v8779_v37 }
  0x9c   :  { %v8762_v45 = vld [vmem:[%s15935_s1 + $0x1120] sm:$0xf]  ;;  %v10446_v47 = vld [vmem:[%s15935_s1 + $0x112c] sm:$0xf0]  ;;  %v8635_v53 = vor.u32 %v10414_v43, %v8634_v40  ;;  %5170 = vmatpush.bf16.msra.mxu2 %v8907_v39 }
  0x9d   :  { %v8890_v48 = vld [vmem:[%s15935_s1 + $0x1220] sm:$0xf]  ;;  %v10478_v49 = vld [vmem:[%s15935_s1 + $0x122c] sm:$0xf0]  ;;  %v8763_v57 = vor.u32 %v10446_v47, %v8762_v45  ;;  %5183 = vmatpush.bf16.msra.mxu3 %v9035_v46  ;;  %v11844_v45 = vpack.c.b16 %v874_v14, %v874_v14 }
  0x9e   :  { %v9018_v50 = vld [vmem:[%s15935_s1 + $0x1320] sm:$0xf]  ;;  %v10510_v51 = vld [vmem:[%s15935_s1 + $0x132c] sm:$0xf0]  ;;  %v8891_v58 = vor.u32 %v10478_v49, %v8890_v48  ;;  %5145 = vmatpush.bf16.msra.mxu0 %v8635_v53  ;;  %v11854_v49 = vpack.c.b16 %v875_v21, %v875_v21 }
  0x9f   :  { %v8618_v52 = vld [vmem:[%s15935_s1 + $0x1000] sm:$0xf]  ;;  %v10410_v54 = vld [vmem:[%s15935_s1 + $0x100c] sm:$0xf0]  ;;  %v9019_v62 = vor.u32 %v10510_v51, %v9018_v50  ;;  %5158 = vmatpush.bf16.msra.mxu1 %v8763_v57 }
  0xa0   :  { %v8746_v55 = vld [vmem:[%s15935_s1 + $0x1100] sm:$0xf]  ;;  %v10442_v56 = vld [vmem:[%s15935_s1 + $0x110c] sm:$0xf0]  ;;  %v8619_v5 = vor.u32 %v10410_v54, %v8618_v52  ;;  %5171 = vmatpush.bf16.msra.mxu2 %v8891_v58 }
  0xa1   :  { %v8874_v59 = vld [vmem:[%s15935_s1 + $0x1200] sm:$0xf]  ;;  %v10474_v60 = vld [vmem:[%s15935_s1 + $0x120c] sm:$0xf0]  ;;  %v8747_v10 = vor.u32 %v10442_v56, %v8746_v55  ;;  %5184 = vmatpush.bf16.msra.mxu3 %v9019_v62 }
  0xa2   :  { %v28_v61 = vld [vmem:[%s15936_s0 + $0x40] sm:$0xff]  ;;  %v10506_v0 = vld [vmem:[%s15935_s1 + $0x130c] sm:$0xf0]  ;;  %v8875_v11 = vor.u32 %v10474_v60, %v8874_v59  ;;  %5146 = vmatpush.bf16.msra.mxu0 %v8619_v5 }
  0xa3   :  { %v9002_v63 = vld [vmem:[%s15935_s1 + $0x1300] sm:$0xf]  ;;  %v10566_v3 = vld [vmem:[%s15935_s1 + $0x14ec] sm:$0xf0]  ;;  %v872_v9 = vunpack.c.l.b16 %v28_v61  ;;  %v873_v15 = vunpack.c.h.b16 %v28_v61  ;;  %5159 = vmatpush.bf16.msra.mxu1 %v8747_v10 }
  0xa4   :  { %v9242_v2 = vld [vmem:[%s15935_s1 + $0x14e0] sm:$0xf]  ;;  %v10598_v6 = vld [vmem:[%s15935_s1 + $0x15ec] sm:$0xf0]  ;;  %v9003_v16 = vor.u32 %v10506_v0, %v9002_v63  ;;  %5172 = vmatpush.bf16.msra.mxu2 %v8875_v11 }
  0xa5   :  { %v9370_v4 = vld [vmem:[%s15935_s1 + $0x15e0] sm:$0xf]  ;;  %v10630_v8 = vld [vmem:[%s15935_s1 + $0x16ec] sm:$0xf0]  ;;  %v9243_v17 = vor.u32 %v10566_v3, %v9242_v2  ;;  %v11833_v37 = vpack.c.b16 %v872_v9, %v872_v9  ;;  %v11846_v46 = vpack.c.b16 %v873_v15, %v873_v15 }
  0xa6   :  { %v9498_v7 = vld [vmem:[%s15935_s1 + $0x16e0] sm:$0xf]  ;;  %v10662_v13 = vld [vmem:[%s15935_s1 + $0x17ec] sm:$0xf0]  ;;  %v9371_v24 = vor.u32 %v10598_v6, %v9370_v4  ;;  %5185 = vmatpush.bf16.msra.mxu3 %v9003_v16 }
  0xa7   :  { %v9626_v12 = vld [vmem:[%s15935_s1 + $0x17e0] sm:$0xf]  ;;  %v9499_v26 = vor.u32 %v10630_v8, %v9498_v7  ;;  %v10562_v32 = vld [vmem:[%s15935_s1 + $0x14cc] sm:$0xf0]  ;;  %5191 = vmatpush.bf16.msrb.mxu0 %v9243_v17  ;;  %5173 = vmatmul.bf16.vlgmr.msra.gmra.mxu2 %v11844_v45 }
  0xa8   :  { %v9226_v27 = vld [vmem:[%s15935_s1 + $0x14c0] sm:$0xf]  ;;  %v9627_v36 = vor.u32 %v10662_v13, %v9626_v12  ;;  %v10594_v39 = vld [vmem:[%s15935_s1 + $0x15cc] sm:$0xf0]  ;;  %5204 = vmatpush.bf16.msrb.mxu1 %v9371_v24  ;;  %5147 = vmatmul.bf16.vlgmr.msra.gmra.mxu0 %v11833_v37 }
  0xa9   :  { %v9354_v34 = vld [vmem:[%s15935_s1 + $0x15c0] sm:$0xf]  ;;  %v10626_v43 = vld [vmem:[%s15935_s1 + $0x16cc] sm:$0xf0]  ;;  %v9227_v50 = vor.u32 %v10562_v32, %v9226_v27  ;;  %5217 = vmatpush.bf16.msrb.mxu2 %v9499_v26  ;;  %5160 = vmatmul.bf16.vlgmr.msra.gmra.mxu1 %v11846_v46 }
  0xaa   :  { %v9482_v40 = vld [vmem:[%s15935_s1 + $0x16c0] sm:$0xf]  ;;  %v10658_v48 = vld [vmem:[%s15935_s1 + $0x17cc] sm:$0xf0]  ;;  %v9355_v51 = vor.u32 %v10594_v39, %v9354_v34  ;;  %5230 = vmatpush.bf16.msrb.mxu3 %v9627_v36 }
  0xab   :  { %v9610_v47 = vld [vmem:[%s15935_s1 + $0x17c0] sm:$0xf]  ;;  %v9483_v52 = vor.u32 %v10626_v43, %v9482_v40  ;;  %v10558_v54 = vld [vmem:[%s15935_s1 + $0x14ac] sm:$0xf0]  ;;  %5186 = vmatmul.bf16.vlgmr.msra.gmra.mxu3 %v11854_v49  ;;  %5192 = vmatpush.bf16.msrb.mxu0 %v9227_v50 }
  0xac   :  { %v9210_v53 = vld [vmem:[%s15935_s1 + $0x14a0] sm:$0xf]  ;;  %v9611_v56 = vor.u32 %v10658_v48, %v9610_v47  ;;  %v10590_v57 = vld [vmem:[%s15935_s1 + $0x15ac] sm:$0xf0]  ;;  %5205 = vmatpush.bf16.msrb.mxu1 %v9355_v51 }
  0xad   :  { %v9338_v55 = vld [vmem:[%s15935_s1 + $0x15a0] sm:$0xf]  ;;  %v10622_v59 = vld [vmem:[%s15935_s1 + $0x16ac] sm:$0xf0]  ;;  %v9211_v62 = vor.u32 %v10558_v54, %v9210_v53  ;;  %5218 = vmatpush.bf16.msrb.mxu2 %v9483_v52 }
  0xae   :  { %v9466_v58 = vld [vmem:[%s15935_s1 + $0x16a0] sm:$0xf]  ;;  %v10654_v61 = vld [vmem:[%s15935_s1 + $0x17ac] sm:$0xf0]  ;;  %v9339_v63 = vor.u32 %v10590_v57, %v9338_v55  ;;  %5231 = vmatpush.bf16.msrb.mxu3 %v9611_v56 }
  0xaf   :  { %v9594_v60 = vld [vmem:[%s15935_s1 + $0x17a0] sm:$0xf]  ;;  %v9467_v0 = vor.u32 %v10622_v59, %v9466_v58  ;;  %v10554_v2 = vld [vmem:[%s15935_s1 + $0x148c] sm:$0xf0]  ;;  %5193 = vmatpush.bf16.msrb.mxu0 %v9211_v62  ;;  %v4940_v57 = vpop.f32.mrf.mxu0 }
  0xb0   :  { %v9194_v1 = vld [vmem:[%s15935_s1 + $0x1480] sm:$0xf]  ;;  %v9595_v4 = vor.u32 %v10654_v61, %v9594_v60  ;;  %v10586_v5 = vld [vmem:[%s15935_s1 + $0x158c] sm:$0xf0]  ;;  %5206 = vmatpush.bf16.msrb.mxu1 %v9339_v63 }
  0xb1   :  { %v9322_v3 = vld [vmem:[%s15935_s1 + $0x1580] sm:$0xf]  ;;  %v10618_v7 = vld [vmem:[%s15935_s1 + $0x168c] sm:$0xf0]  ;;  %v9195_v10 = vor.u32 %v10554_v2, %v9194_v1  ;;  %5219 = vmatpush.bf16.msrb.mxu2 %v9467_v0  ;;  %v4953_v0 = vpop.f32.mrf.mxu1 }
  0xb2   :  { %v9450_v6 = vld [vmem:[%s15935_s1 + $0x1680] sm:$0xf]  ;;  %v10650_v9 = vld [vmem:[%s15935_s1 + $0x178c] sm:$0xf0]  ;;  %v9323_v12 = vor.u32 %v10586_v5, %v9322_v3  ;;  %5232 = vmatpush.bf16.msrb.mxu3 %v9595_v4 }
  0xb3   :  { %v9578_v8 = vld [vmem:[%s15935_s1 + $0x1780] sm:$0xf]  ;;  %v9451_v13 = vor.u32 %v10618_v7, %v9450_v6  ;;  %v10550_v14 = vld [vmem:[%s15935_s1 + $0x146c] sm:$0xf0]  ;;  %5194 = vmatpush.bf16.msrb.mxu0 %v9195_v10 }
  0xb4   :  { %v9178_v11 = vld [vmem:[%s15935_s1 + $0x1460] sm:$0xf]  ;;  %v10582_v16 = vld [vmem:[%s15935_s1 + $0x156c] sm:$0xf0]  ;;  %v9579_v17 = vor.u32 %v10650_v9, %v9578_v8  ;;  %5207 = vmatpush.bf16.msrb.mxu1 %v9323_v12 }
  0xb5   :  { %v9306_v15 = vld [vmem:[%s15935_s1 + $0x1560] sm:$0xf]  ;;  %v10614_v24 = vld [vmem:[%s15935_s1 + $0x166c] sm:$0xf0]  ;;  %v9179_v34 = vor.u32 %v10550_v14, %v9178_v11  ;;  %5220 = vmatpush.bf16.msrb.mxu2 %v9451_v13 }
  0xb6   :  { %v9434_v21 = vld [vmem:[%s15935_s1 + $0x1660] sm:$0xf]  ;;  %v10646_v32 = vld [vmem:[%s15935_s1 + $0x176c] sm:$0xf0]  ;;  %v9307_v39 = vor.u32 %v10582_v16, %v9306_v15  ;;  %5233 = vmatpush.bf16.msrb.mxu3 %v9579_v17 }
  0xb7   :  { %v833_v26 = vld [vmem:[%s15937_s2] sm:$0xf]  ;;  %v9435_v40 = vor.u32 %v10614_v24, %v9434_v21  ;;  %v10546_v43 = vld [vmem:[%s15935_s1 + $0x144c] sm:$0xf0]  ;;  %5195 = vmatpush.bf16.msrb.mxu0 %v9179_v34  ;;  %v4966_v21 = vpop.f32.mrf.mxu2 }
  0xb8   :  { %v9562_v27 = vld [vmem:[%s15935_s1 + $0x1760] sm:$0xf]  ;;  %v835_v48 = vperm.slane %v833_v26, 0  ;;  %v10578_v51 = vld [vmem:[%s15935_s1 + $0x154c] sm:$0xf0]  ;;  %5208 = vmatpush.bf16.msrb.mxu1 %v9307_v39 }
  0xb9   :  { %v9162_v36 = vld [vmem:[%s15935_s1 + $0x1440] sm:$0xf]  ;;  %v9563_v50 = vor.u32 %v10646_v32, %v9562_v27  ;;  %v10610_v53 = vld [vmem:[%s15935_s1 + $0x164c] sm:$0xf0]  ;;  %5221 = vmatpush.bf16.msrb.mxu2 %v9435_v40  ;;  %v31_v32 = vld [vmem:[%s15936_s0 + $0x58] sm:$0xff] }
  0xba   :  { %v9290_v47 = vld [vmem:[%s15935_s1 + $0x1540] sm:$0xf]  ;;  %v10642_v55 = vld [vmem:[%s15935_s1 + $0x174c] sm:$0xf0]  ;;  %v9163_v56 = vor.u32 %v10546_v43, %v9162_v36  ;;  %v4941_v63 = vadd.f32 %v4940_v57, %v835_v48  ;;  %v4979_v36 = vpop.f32.mrf.mxu3  ;;  %v9924_v43 = vld [vmem:[%s15935_s1 + $0xe4] sm:$0xf] }
  0xbb   :  { %v9418_v52 = vld [vmem:[%s15935_s1 + $0x1640] sm:$0xf]  ;;  %v9291_v58 = vor.u32 %v10578_v51, %v9290_v47  ;;  %v10542_v61 = vld [vmem:[%s15935_s1 + $0x142c] sm:$0xf0]  ;;  %5234 = vmatpush.bf16.msrb.mxu3 %v9563_v50  ;;  %v6684_v48 = vld [vmem:[%s15935_s1 + $0xf0] sm:$0xf0] }
  0xbc   :  { %v9546_v54 = vld [vmem:[%s15935_s1 + $0x1740] sm:$0xf]  ;;  %v9419_v59 = vor.u32 %v10610_v53, %v9418_v52  ;;  %v10574_v2 = vld [vmem:[%s15935_s1 + $0x152c] sm:$0xf0]  ;;  %v4954_v8 = vadd.f32 %v4953_v0, %v4941_v63  ;;  %5196 = vmatpush.bf16.msrb.mxu0 %v9163_v56  ;;  %v9956_v50 = vld [vmem:[%s15935_s1 + $0x1e4] sm:$0xf]  ;;  %v879_v0 = vunpack.c.h.b16 %v31_v32 }
  0xbd   :  { %v9146_v60 = vld [vmem:[%s15935_s1 + $0x1420] sm:$0xf]  ;;  %v9547_v1 = vor.u32 %v10642_v55, %v9546_v54  ;;  %v10606_v4 = vld [vmem:[%s15935_s1 + $0x162c] sm:$0xf0]  ;;  %5209 = vmatpush.bf16.msrb.mxu1 %v9291_v58  ;;  %v6812_v51 = vld [vmem:[%s15935_s1 + $0x1f0] sm:$0xf0]  ;;  %v4942_v54 = vpop.f32.mrf.mxu0 }
  0xbe   :  { %v9274_v62 = vld [vmem:[%s15935_s1 + $0x1520] sm:$0xf]  ;;  %v10638_v6 = vld [vmem:[%s15935_s1 + $0x172c] sm:$0xf0]  ;;  %v9147_v9 = vor.u32 %v10542_v61, %v9146_v60  ;;  %5222 = vmatpush.bf16.msrb.mxu2 %v9419_v59  ;;  %v4967_v34 = vadd.f32 %v4966_v21, %v4954_v8  ;;  %v9988_v57 = vld [vmem:[%s15935_s1 + $0x2e4] sm:$0xf]  ;;  %v878_v59 = vunpack.c.l.b16 %v31_v32  ;;  %v4955_v61 = vpop.f32.mrf.mxu1 }
  0xbf   :  { %v9402_v3 = vld [vmem:[%s15935_s1 + $0x1620] sm:$0xf]  ;;  %v10538_v10 = vld [vmem:[%s15935_s1 + $0x140c] sm:$0xf0]  ;;  %v9275_v13 = vor.u32 %v10574_v2, %v9274_v62  ;;  %5235 = vmatpush.bf16.msrb.mxu3 %v9547_v1  ;;  %v6940_v58 = vld [vmem:[%s15935_s1 + $0x2f0] sm:$0xf0]  ;;  %v6687_v1 = vor.u32 %v9924_v43, %v6684_v48  ;;  %v6815_v2 = vor.u32 %v9956_v50, %v6812_v51 }
  0xc0   :  { %v9530_v5 = vld [vmem:[%s15935_s1 + $0x1720] sm:$0xf]  ;;  %v10570_v12 = vld [vmem:[%s15935_s1 + $0x150c] sm:$0xf0]  ;;  %v9403_v14 = vor.u32 %v10606_v4, %v9402_v3  ;;  %5197 = vmatpush.bf16.msrb.mxu0 %v9147_v9  ;;  %v12031_v53 = vadd.f32 %v4979_v36, %v4967_v34  ;;  %v6668_v8 = vld [vmem:[%s15935_s1 + $0xd0] sm:$0xf0] }
  0xc1   :  { %v9130_v7 = vld [vmem:[%s15935_s1 + $0x1400] sm:$0xf]  ;;  %v10602_v16 = vld [vmem:[%s15935_s1 + $0x160c] sm:$0xf0]  ;;  %v9531_v24 = vor.u32 %v10638_v6, %v9530_v5  ;;  %5210 = vmatpush.bf16.msrb.mxu1 %v9275_v13  ;;  %v9920_v5 = vld [vmem:[%s15935_s1 + $0xc4] sm:$0xf]  ;;  %v6943_v6 = vor.u32 %v9988_v57, %v6940_v58 }
  0xc2   :  { %v9258_v11 = vld [vmem:[%s15935_s1 + $0x1500] sm:$0xf]  ;;  %v30_v17 = vld [vmem:[%s15936_s0 + $0x50] sm:$0xff]  ;;  %v9131_v47 = vor.u32 %v10538_v10, %v9130_v7  ;;  %5223 = vmatpush.bf16.msrb.mxu2 %v9403_v14  ;;  %v9952_v9 = vld [vmem:[%s15935_s1 + $0x1c4] sm:$0xf]  ;;  %v4981_v21 = vpop.f32.mrf.mxu3 }
  0xc3   :  { %v9386_v15 = vld [vmem:[%s15935_s1 + $0x1600] sm:$0xf]  ;;  %v10634_v27 = vld [vmem:[%s15935_s1 + $0x170c] sm:$0xf0]  ;;  %v876_v52 = vunpack.c.l.b16 %v30_v17  ;;  %v9259_v55 = vor.u32 %v10570_v12, %v9258_v11  ;;  %v877_v60 = vunpack.c.h.b16 %v30_v17  ;;  %5236 = vmatpush.bf16.msrb.mxu3 %v9531_v24  ;;  %v6796_v10 = vld [vmem:[%s15935_s1 + $0x1d0] sm:$0xf0]  ;;  %v12059_v11 = vpack.c.b16 %v878_v59, %v878_v59 }
  0xc4   :  { %v9514_v26 = vld [vmem:[%s15935_s1 + $0x1700] sm:$0xf]  ;;  %v10694_v40 = vld [vmem:[%s15935_s1 + $0x18ec] sm:$0xf0]  ;;  %v9387_v56 = vor.u32 %v10602_v16, %v9386_v15  ;;  %5198 = vmatpush.bf16.msrb.mxu0 %v9131_v47  ;;  %v9984_v13 = vld [vmem:[%s15935_s1 + $0x2c4] sm:$0xf]  ;;  %v4968_v15 = vpop.f32.mrf.mxu2  ;;  %v12069_v16 = vpack.c.b16 %v879_v0, %v879_v0  ;;  %v6671_v24 = vor.u32 %v9920_v5, %v6668_v8 }
  0xc5   :  { %v9754_v39 = vld [vmem:[%s15935_s1 + $0x18e0] sm:$0xf]  ;;  %v9515_v62 = vor.u32 %v10634_v27, %v9514_v26  ;;  %v10690_v4 = vld [vmem:[%s15935_s1 + $0x18cc] sm:$0xf0]  ;;  %v12048_v7 = vpack.c.b16 %v876_v52, %v876_v52  ;;  %5211 = vmatpush.bf16.msrb.mxu1 %v9259_v55  ;;  %v12061_v12 = vpack.c.b16 %v877_v60, %v877_v60  ;;  %v6924_v14 = vld [vmem:[%s15935_s1 + $0x2d0] sm:$0xf0]  ;;  %v6799_v26 = vor.u32 %v9952_v9, %v6796_v10  ;;  %v4992_v0 = vpop.f32.mrf.mxu0 }
  0xc6   :  { %v9755_v63 = vor.u32 %v10694_v40, %v9754_v39  ;;  %v9738_v3 = vld [vmem:[%s15935_s1 + $0x18c0] sm:$0xf]  ;;  %5224 = vmatpush.bf16.msrb.mxu2 %v9387_v56  ;;  %v10686_v32 = vld [vmem:[%s15935_s1 + $0x18ac] sm:$0xf0]  ;;  %v9916_v34 = vld [vmem:[%s15935_s1 + $0xa4] sm:$0xf]  ;;  %v6927_v36 = vor.u32 %v9984_v13, %v6924_v14  ;;  %v5005_v8 = vpop.f32.mrf.mxu1 }
  0xc7   :  { %5237 = vmatpush.bf16.msrb.mxu3 %v9515_v62  ;;  %v9739_v17 = vor.u32 %v10690_v4, %v9738_v3  ;;  %v9722_v27 = vld [vmem:[%s15935_s1 + $0x18a0] sm:$0xf]  ;;  %5199 = vmatmul.bf16.vlgmr.msrb.gmra.mxu0 %v12048_v7  ;;  %v6652_v39 = vld [vmem:[%s15935_s1 + $0xb0] sm:$0xf0]  ;;  %v9948_v40 = vld [vmem:[%s15935_s1 + $0x1a4] sm:$0xf] }
  0xc8   :  { %5243 = vmatpush.bf16.msra.mxu0 %v9755_v63  ;;  %v6780_v43 = vld [vmem:[%s15935_s1 + $0x1b0] sm:$0xf0]  ;;  %5212 = vmatmul.bf16.vlgmr.msrb.gmra.mxu1 %v12061_v12  ;;  %v9980_v47 = vld [vmem:[%s15935_s1 + $0x2a4] sm:$0xf]  ;;  %v9723_v50 = vor.u32 %v10686_v32, %v9722_v27  ;;  %v6655_v51 = vor.u32 %v9916_v34, %v6652_v39  ;;  %v9706_v54 = vld [vmem:[%s15935_s1 + $0x1880] sm:$0xf] }
  0xc9   :  { %5256 = vmatpush.bf16.msra.mxu1 %v6687_v1  ;;  %5225 = vmatmul.bf16.vlgmr.msrb.gmra.mxu2 %v12059_v11  ;;  %v6908_v48 = vld [vmem:[%s15935_s1 + $0x2b0] sm:$0xf0]  ;;  %v6783_v52 = vor.u32 %v9948_v40, %v6780_v43  ;;  %v10682_v55 = vld [vmem:[%s15935_s1 + $0x188c] sm:$0xf0]  ;;  %v9912_v56 = vld [vmem:[%s15935_s1 + $0x84] sm:$0xf] }
  0xca   :  { %5269 = vmatpush.bf16.msra.mxu2 %v6815_v2  ;;  %5238 = vmatmul.bf16.vlgmr.msrb.gmra.mxu3 %v12069_v16  ;;  %v6911_v57 = vor.u32 %v9980_v47, %v6908_v48  ;;  %v6636_v58 = vld [vmem:[%s15935_s1 + $0x90] sm:$0xf0]  ;;  %v9944_v59 = vld [vmem:[%s15935_s1 + $0x184] sm:$0xf]  ;;  %v9707_v63 = vor.u32 %v10682_v55, %v9706_v54  ;;  %v9690_v3 = vld [vmem:[%s15935_s1 + $0x1860] sm:$0xf] }
  0xcb   :  { %5282 = vmatpush.bf16.msra.mxu3 %v6943_v6  ;;  %v6764_v60 = vld [vmem:[%s15935_s1 + $0x190] sm:$0xf0]  ;;  %v9976_v61 = vld [vmem:[%s15935_s1 + $0x284] sm:$0xf]  ;;  %v6639_v1 = vor.u32 %v9912_v56, %v6636_v58  ;;  %v10678_v4 = vld [vmem:[%s15935_s1 + $0x186c] sm:$0xf0]  ;;  %v4993_v6 = vadd.f32 %v4992_v0, %v12031_v53 }
  0xcc   :  { %5244 = vmatpush.bf16.msra.mxu0 %v9739_v17  ;;  %v6892_v62 = vld [vmem:[%s15935_s1 + $0x290] sm:$0xf0]  ;;  %v6767_v2 = vor.u32 %v9944_v59, %v6764_v60  ;;  %v9908_v5 = vld [vmem:[%s15935_s1 + $0x64] sm:$0xf]  ;;  %v9691_v21 = vor.u32 %v10678_v4, %v9690_v3  ;;  %v9674_v27 = vld [vmem:[%s15935_s1 + $0x1840] sm:$0xf] }
  0xcd   :  { %5257 = vmatpush.bf16.msra.mxu1 %v6671_v24  ;;  %v6895_v9 = vor.u32 %v9976_v61, %v6892_v62  ;;  %v6620_v10 = vld [vmem:[%s15935_s1 + $0x70] sm:$0xf0]  ;;  %v9940_v13 = vld [vmem:[%s15935_s1 + $0x164] sm:$0xf]  ;;  %v5006_v17 = vadd.f32 %v5005_v8, %v4993_v6  ;;  %v10674_v32 = vld [vmem:[%s15935_s1 + $0x184c] sm:$0xf0]  ;;  %v4994_v56 = vpop.f32.mrf.mxu0 }
  0xce   :  { %5270 = vmatpush.bf16.msra.mxu2 %v6799_v26  ;;  %v6748_v14 = vld [vmem:[%s15935_s1 + $0x170] sm:$0xf0]  ;;  %v9972_v15 = vld [vmem:[%s15935_s1 + $0x264] sm:$0xf]  ;;  %v6623_v24 = vor.u32 %v9908_v5, %v6620_v10  ;;  %v9675_v54 = vor.u32 %v10674_v32, %v9674_v27  ;;  %v9658_v59 = vld [vmem:[%s15935_s1 + $0x1820] sm:$0xf]  ;;  %v5007_v62 = vpop.f32.mrf.mxu1 }
  0xcf   :  { %5283 = vmatpush.bf16.msra.mxu3 %v6927_v36  ;;  %v6876_v53 = vld [vmem:[%s15935_s1 + $0x270] sm:$0xf0]  ;;  %v6751_v26 = vor.u32 %v9940_v13, %v6748_v14  ;;  %v9904_v34 = vld [vmem:[%s15935_s1 + $0x44] sm:$0xf]  ;;  %v5018_v36 = vpop.f32.mrf.mxu2  ;;  %v10670_v60 = vld [vmem:[%s15935_s1 + $0x182c] sm:$0xf0] }
  0xd0   :  { %5245 = vmatpush.bf16.msra.mxu0 %v9723_v50  ;;  %v6879_v39 = vor.u32 %v9972_v15, %v6876_v53  ;;  %v6604_v40 = vld [vmem:[%s15935_s1 + $0x50] sm:$0xf0]  ;;  %v9936_v43 = vld [vmem:[%s15935_s1 + $0x144] sm:$0xf]  ;;  %v5019_v48 = vadd.f32 %v5018_v36, %v5006_v17  ;;  %v5031_v50 = vpop.f32.mrf.mxu3  ;;  %v9659_v5 = vor.u32 %v10670_v60, %v9658_v59  ;;  %v9642_v6 = vld [vmem:[%s15935_s1 + $0x1800] sm:$0xf] }
  0xd1   :  { %5258 = vmatpush.bf16.msra.mxu1 %v6655_v51  ;;  %v6732_v47 = vld [vmem:[%s15935_s1 + $0x150] sm:$0xf0]  ;;  %v9968_v51 = vld [vmem:[%s15935_s1 + $0x244] sm:$0xf]  ;;  %v10666_v8 = vld [vmem:[%s15935_s1 + $0x180c] sm:$0xf0] }
  0xd2   :  { %5271 = vmatpush.bf16.msra.mxu2 %v6783_v52  ;;  %v6860_v52 = vld [vmem:[%s15935_s1 + $0x250] sm:$0xf0]  ;;  %v12172_v55 = vadd.f32 %v5031_v50, %v5019_v48  ;;  %v6735_v58 = vor.u32 %v9936_v43, %v6732_v47  ;;  %v9900_v61 = vld [vmem:[%s15935_s1 + $0x24] sm:$0xf]  ;;  %v32_v53 = vld [vmem:[%s15936_s0 + $0x60] sm:$0xf] }
  0xd3   :  { %5284 = vmatpush.bf16.msra.mxu3 %v6911_v57  ;;  %v6607_v57 = vor.u32 %v9904_v34, %v6604_v40  ;;  %v6588_v0 = vld [vmem:[%s15935_s1 + $0x30] sm:$0xf0]  ;;  %v9964_v3 = vld [vmem:[%s15935_s1 + $0x224] sm:$0xf]  ;;  %v9643_v40 = vor.u32 %v10666_v8, %v9642_v6  ;;  %v880_v50 = vunpack.c.l.b16 %v32_v53 }
  0xd4   :  { %5246 = vmatpush.bf16.msra.mxu0 %v9707_v63  ;;  %v6863_v63 = vor.u32 %v9968_v51, %v6860_v52  ;;  %v6844_v4 = vld [vmem:[%s15935_s1 + $0x230] sm:$0xf0]  ;;  %v6591_v10 = vor.u32 %v9900_v61, %v6588_v0  ;;  %v9928_v15 = vld [vmem:[%s15935_s1 + $0x104] sm:$0xf] }
  0xd5   :  { %5259 = vmatpush.bf16.msra.mxu1 %v6639_v1  ;;  %v9932_v1 = vld [vmem:[%s15935_s1 + $0x124] sm:$0xf]  ;;  %v6572_v14 = vld [vmem:[%s15935_s1 + $0x10] sm:$0xf0] }
  0xd6   :  { %5272 = vmatpush.bf16.msra.mxu2 %v6767_v2  ;;  %v6716_v2 = vld [vmem:[%s15935_s1 + $0x130] sm:$0xf0]  ;;  %v10020_v34 = vld [vmem:[%s15935_s1 + $0x3e4] sm:$0xf] }
  0xd7   :  { %5285 = vmatpush.bf16.msra.mxu3 %v6895_v9  ;;  %v9896_v9 = vld [vmem:[%s15935_s1 + $0x4] sm:$0xf]  ;;  %v6719_v13 = vor.u32 %v9932_v1, %v6716_v2  ;;  %v5020_v17 = vpop.f32.mrf.mxu2  ;;  %v6828_v27 = vld [vmem:[%s15935_s1 + $0x210] sm:$0xf0]  ;;  %v12258_v1 = vpack.c.b16 %v880_v50, %v880_v50 }
  0xd8   :  { %5247 = vmatpush.bf16.msra.mxu0 %v9691_v21  ;;  %v6847_v21 = vor.u32 %v9964_v3, %v6844_v4  ;;  %v5033_v32 = vpop.f32.mrf.mxu3  ;;  %v7068_v36 = vld [vmem:[%s15935_s1 + $0x3f0] sm:$0xf0]  ;;  %v10084_v47 = vld [vmem:[%s15935_s1 + $0x5e4] sm:$0xf]  ;;  %v6575_v51 = vor.u32 %v9896_v9, %v6572_v14 }
  0xd9   :  { %5260 = vmatpush.bf16.msra.mxu1 %v6623_v24  ;;  %v6700_v24 = vld [vmem:[%s15935_s1 + $0x110] sm:$0xf0]  ;;  %v10016_v61 = vld [vmem:[%s15935_s1 + $0x3c4] sm:$0xf] }
  0xda   :  { %5273 = vmatpush.bf16.msra.mxu2 %v6751_v26  ;;  %v9960_v26 = vld [vmem:[%s15935_s1 + $0x204] sm:$0xf]  ;;  %v7196_v43 = vld [vmem:[%s15935_s1 + $0x4f0] sm:$0xf0]  ;;  %v6703_v52 = vor.u32 %v9928_v15, %v6700_v24 }
  0xdb   :  { %5286 = vmatpush.bf16.msra.mxu3 %v6879_v39  ;;  %v10052_v39 = vld [vmem:[%s15935_s1 + $0x4e4] sm:$0xf]  ;;  %v7324_v48 = vld [vmem:[%s15935_s1 + $0x5f0] sm:$0xf0] }
  0xdc   :  { %5248 = vmatpush.bf16.msra.mxu0 %v9675_v54  ;;  %v10116_v54 = vld [vmem:[%s15935_s1 + $0x6e4] sm:$0xf]  ;;  %v7452_v56 = vld [vmem:[%s15935_s1 + $0x6f0] sm:$0xf0]  ;;  %v7199_v59 = vor.u32 %v10052_v39, %v7196_v43  ;;  %v7327_v60 = vor.u32 %v10084_v47, %v7324_v48 }
  0xdd   :  { %5261 = vmatpush.bf16.msra.mxu1 %v6607_v57  ;;  %v6831_v57 = vor.u32 %v9960_v26, %v6828_v27  ;;  %v7052_v62 = vld [vmem:[%s15935_s1 + $0x3d0] sm:$0xf0]  ;;  %v7455_v0 = vor.u32 %v10116_v54, %v7452_v56  ;;  %v10080_v3 = vld [vmem:[%s15935_s1 + $0x5c4] sm:$0xf] }
  0xde   :  { %5274 = vmatpush.bf16.msra.mxu2 %v6735_v58  ;;  %v7071_v58 = vor.u32 %v10020_v34, %v7068_v36  ;;  %v7180_v2 = vld [vmem:[%s15935_s1 + $0x4d0] sm:$0xf0]  ;;  %v7055_v8 = vor.u32 %v10016_v61, %v7052_v62  ;;  %v10044_v15 = vld [vmem:[%s15935_s1 + $0x4a4] sm:$0xf] }
  0xdf   :  { %5287 = vmatpush.bf16.msra.mxu3 %v6863_v63  ;;  %v10048_v63 = vld [vmem:[%s15935_s1 + $0x4c4] sm:$0xf]  ;;  %v7308_v4 = vld [vmem:[%s15935_s1 + $0x5d0] sm:$0xf0] }
  0xe0   :  { %5249 = vmatpush.bf16.msra.mxu0 %v9659_v5  ;;  %v10112_v5 = vld [vmem:[%s15935_s1 + $0x6c4] sm:$0xf]  ;;  %v7436_v6 = vld [vmem:[%s15935_s1 + $0x6d0] sm:$0xf0]  ;;  %v7183_v9 = vor.u32 %v10048_v63, %v7180_v2 }
  0xe1   :  { %5262 = vmatpush.bf16.msra.mxu1 %v6591_v10  ;;  %v7311_v10 = vor.u32 %v10080_v3, %v7308_v4  ;;  %v7036_v14 = vld [vmem:[%s15935_s1 + $0x3b0] sm:$0xf0]  ;;  %v7439_v53 = vor.u32 %v10112_v5, %v7436_v6  ;;  %v10108_v26 = vld [vmem:[%s15935_s1 + $0x6a4] sm:$0xf] }
  0xe2   :  { %5275 = vmatpush.bf16.msra.mxu2 %v6719_v13  ;;  %v10012_v13 = vld [vmem:[%s15935_s1 + $0x3a4] sm:$0xf]  ;;  %v7164_v17 = vld [vmem:[%s15935_s1 + $0x4b0] sm:$0xf0] }
  0xe3   :  { %5288 = vmatpush.bf16.msra.mxu3 %v6847_v21  ;;  %v10076_v21 = vld [vmem:[%s15935_s1 + $0x5a4] sm:$0xf]  ;;  %v7292_v24 = vld [vmem:[%s15935_s1 + $0x5b0] sm:$0xf0]  ;;  %v7039_v32 = vor.u32 %v10012_v13, %v7036_v14  ;;  %v7167_v34 = vor.u32 %v10044_v15, %v7164_v17 }
  0xe4   :  { %5250 = vmatpush.bf16.msra.mxu0 %v9643_v40  ;;  %v7420_v27 = vld [vmem:[%s15935_s1 + $0x6b0] sm:$0xf0]  ;;  %v7295_v36 = vor.u32 %v10076_v21, %v7292_v24  ;;  %v10008_v39 = vld [vmem:[%s15935_s1 + $0x384] sm:$0xf] }
  0xe5   :  { %5263 = vmatpush.bf16.msra.mxu1 %v6575_v51  ;;  %v7020_v40 = vld [vmem:[%s15935_s1 + $0x390] sm:$0xf0]  ;;  %v10040_v43 = vld [vmem:[%s15935_s1 + $0x484] sm:$0xf]  ;;  %v7423_v47 = vor.u32 %v10108_v26, %v7420_v27 }
  0xe6   :  { %5276 = vmatpush.bf16.msra.mxu2 %v6703_v52  ;;  %v7148_v48 = vld [vmem:[%s15935_s1 + $0x490] sm:$0xf0]  ;;  %v10072_v50 = vld [vmem:[%s15935_s1 + $0x584] sm:$0xf]  ;;  %v5044_v52 = vpop.f32.mrf.mxu0 }
  0xe7   :  { %5289 = vmatpush.bf16.msra.mxu3 %v6831_v57  ;;  %5251 = vmatmul.bf16.vlgmr.msra.gmra.mxu0 %v12258_v1  ;;  %v7276_v51 = vld [vmem:[%s15935_s1 + $0x590] sm:$0xf0]  ;;  %v10104_v54 = vld [vmem:[%s15935_s1 + $0x684] sm:$0xf]  ;;  %v5045_v57 = vadd.f32 %v5044_v52, %v12172_v55 }
  0xe8   :  { %5295 = vmatpush.bf16.msrb.mxu0 %v7071_v58  ;;  %5264 = vmatmul.bf16.vlgmr.msra.gmra.mxu1 %v11058_v19  ;;  %v7404_v56 = vld [vmem:[%s15935_s1 + $0x690] sm:$0xf0]  ;;  %v7023_v58 = vor.u32 %v10008_v39, %v7020_v40  ;;  %v7279_v61 = vor.u32 %v10072_v50, %v7276_v51  ;;  %v10004_v62 = vld [vmem:[%s15935_s1 + $0x364] sm:$0xf] }
  0xe9   :  { %5308 = vmatpush.bf16.msrb.mxu1 %v7199_v59  ;;  %5277 = vmatmul.bf16.vlgmr.msra.gmra.mxu2 %v11062_v22  ;;  %v5057_v59 = vpop.f32.mrf.mxu1  ;;  %v7004_v63 = vld [vmem:[%s15935_s1 + $0x370] sm:$0xf0]  ;;  %v7407_v55 = vor.u32 %v10104_v54, %v7404_v56  ;;  %v10068_v4 = vld [vmem:[%s15935_s1 + $0x564] sm:$0xf]  ;;  %v5070_v21 = vpop.f32.mrf.mxu2 }
  0xea   :  { %5321 = vmatpush.bf16.msrb.mxu2 %v7327_v60  ;;  %5290 = vmatmul.bf16.vlgmr.msra.gmra.mxu3 %v11056_v18  ;;  %v7151_v60 = vor.u32 %v10040_v43, %v7148_v48  ;;  %v5058_v2 = vadd.f32 %v5057_v59, %v5045_v57  ;;  %v7132_v3 = vld [vmem:[%s15935_s1 + $0x470] sm:$0xf0]  ;;  %v10100_v6 = vld [vmem:[%s15935_s1 + $0x664] sm:$0xf] }
  0xeb   :  { %5334 = vmatpush.bf16.msrb.mxu3 %v7455_v0  ;;  %v10036_v0 = vld [vmem:[%s15935_s1 + $0x464] sm:$0xf]  ;;  %v7260_v5 = vld [vmem:[%s15935_s1 + $0x570] sm:$0xf0] }
  0xec   :  { %5296 = vmatpush.bf16.msrb.mxu0 %v7055_v8  ;;  %v7388_v8 = vld [vmem:[%s15935_s1 + $0x670] sm:$0xf0]  ;;  %v7263_v13 = vor.u32 %v10068_v4, %v7260_v5  ;;  %v10000_v14 = vld [vmem:[%s15935_s1 + $0x344] sm:$0xf] }
  0xed   :  { %5309 = vmatpush.bf16.msrb.mxu1 %v7183_v9  ;;  %v7007_v9 = vor.u32 %v10004_v62, %v7004_v63  ;;  %v6988_v15 = vld [vmem:[%s15935_s1 + $0x350] sm:$0xf0]  ;;  %v7391_v17 = vor.u32 %v10100_v6, %v7388_v8  ;;  %v10064_v26 = vld [vmem:[%s15935_s1 + $0x544] sm:$0xf] }
  0xee   :  { %5322 = vmatpush.bf16.msrb.mxu2 %v7311_v10  ;;  %v7135_v10 = vor.u32 %v10036_v0, %v7132_v3  ;;  %v7116_v24 = vld [vmem:[%s15935_s1 + $0x450] sm:$0xf0]  ;;  %v5046_v40 = vpop.f32.mrf.mxu0  ;;  %v6991_v43 = vor.u32 %v10000_v14, %v6988_v15  ;;  %v9996_v52 = vld [vmem:[%s15935_s1 + $0x324] sm:$0xf] }
  0xef   :  { %5335 = vmatpush.bf16.msrb.mxu3 %v7439_v53  ;;  %v10032_v53 = vld [vmem:[%s15935_s1 + $0x444] sm:$0xf]  ;;  %v7244_v27 = vld [vmem:[%s15935_s1 + $0x550] sm:$0xf0] }
  0xf0   :  { %5297 = vmatpush.bf16.msrb.mxu0 %v7039_v32  ;;  %v5071_v32 = vadd.f32 %v5070_v21, %v5058_v2  ;;  %v7372_v39 = vld [vmem:[%s15935_s1 + $0x650] sm:$0xf0]  ;;  %v7119_v50 = vor.u32 %v10032_v53, %v7116_v24  ;;  %v7247_v51 = vor.u32 %v10064_v26, %v7244_v27  ;;  %v10028_v56 = vld [vmem:[%s15935_s1 + $0x424] sm:$0xf] }
  0xf1   :  { %5310 = vmatpush.bf16.msrb.mxu1 %v7167_v34  ;;  %v5083_v34 = vpop.f32.mrf.mxu3  ;;  %v6972_v54 = vld [vmem:[%s15935_s1 + $0x330] sm:$0xf0]  ;;  %v10060_v59 = vld [vmem:[%s15935_s1 + $0x524] sm:$0xf]  ;;  %v5072_v14 = vpop.f32.mrf.mxu2 }
  0xf2   :  { %5323 = vmatpush.bf16.msrb.mxu2 %v7295_v36  ;;  %v10096_v36 = vld [vmem:[%s15935_s1 + $0x644] sm:$0xf]  ;;  %v12376_v48 = vadd.f32 %v5083_v34, %v5071_v32  ;;  %v7356_v62 = vld [vmem:[%s15935_s1 + $0x630] sm:$0xf0]  ;;  %v6975_v63 = vor.u32 %v9996_v52, %v6972_v54 }
  0xf3   :  { %5336 = vmatpush.bf16.msrb.mxu3 %v7423_v47  ;;  %v5059_v47 = vpop.f32.mrf.mxu1  ;;  %v7375_v57 = vor.u32 %v10096_v36, %v7372_v39  ;;  %v9992_v0 = vld [vmem:[%s15935_s1 + $0x304] sm:$0xf]  ;;  %v7084_v5 = vld [vmem:[%s15935_s1 + $0x410] sm:$0xf0] }
  0xf4   :  { %5298 = vmatpush.bf16.msrb.mxu0 %v7023_v58  ;;  %v7100_v58 = vld [vmem:[%s15935_s1 + $0x430] sm:$0xf0]  ;;  %v10024_v4 = vld [vmem:[%s15935_s1 + $0x404] sm:$0xf] }
  0xf5   :  { %5311 = vmatpush.bf16.msrb.mxu1 %v7151_v60  ;;  %v7228_v60 = vld [vmem:[%s15935_s1 + $0x530] sm:$0xf0]  ;;  %v7103_v2 = vor.u32 %v10028_v56, %v7100_v58  ;;  %v10056_v6 = vld [vmem:[%s15935_s1 + $0x504] sm:$0xf]  ;;  %v7087_v34 = vor.u32 %v10024_v4, %v7084_v5 }
  0xf6   :  { %5324 = vmatpush.bf16.msrb.mxu2 %v7279_v61  ;;  %v10092_v61 = vld [vmem:[%s15935_s1 + $0x624] sm:$0xf]  ;;  %v7231_v3 = vor.u32 %v10060_v59, %v7228_v60  ;;  %v7580_v53 = vld [vmem:[%s15935_s1 + $0x7f0] sm:$0xf0] }
  0xf7   :  { %5337 = vmatpush.bf16.msrb.mxu3 %v7407_v55  ;;  %v6956_v55 = vld [vmem:[%s15935_s1 + $0x310] sm:$0xf0]  ;;  %v7359_v8 = vor.u32 %v10092_v61, %v7356_v62  ;;  %v10148_v15 = vld [vmem:[%s15935_s1 + $0x7e4] sm:$0xf] }
  0xf8   :  { %5299 = vmatpush.bf16.msrb.mxu0 %v7007_v9  ;;  %v7212_v9 = vld [vmem:[%s15935_s1 + $0x510] sm:$0xf0]  ;;  %v6959_v24 = vor.u32 %v9992_v0, %v6956_v55  ;;  %v10212_v27 = vld [vmem:[%s15935_s1 + $0x9e4] sm:$0xf]  ;;  %v7583_v47 = vor.u32 %v10148_v15, %v7580_v53 }
  0xf9   :  { %5312 = vmatpush.bf16.msrb.mxu1 %v7135_v10  ;;  %v10088_v10 = vld [vmem:[%s15935_s1 + $0x604] sm:$0xf]  ;;  %v5085_v21 = vpop.f32.mrf.mxu3  ;;  %v7708_v26 = vld [vmem:[%s15935_s1 + $0x8f0] sm:$0xf0]  ;;  %v7215_v36 = vor.u32 %v10056_v6, %v7212_v9 }
  0xfa   :  { %5325 = vmatpush.bf16.msrb.mxu2 %v7263_v13  ;;  %v7340_v13 = vld [vmem:[%s15935_s1 + $0x610] sm:$0xf0]  ;;  %v10244_v39 = vld [vmem:[%s15935_s1 + $0xae4] sm:$0xf] }
  0xfb   :  { %5338 = vmatpush.bf16.msrb.mxu3 %v7391_v17  ;;  %v10180_v17 = vld [vmem:[%s15935_s1 + $0x8e4] sm:$0xf]  ;;  %v7836_v32 = vld [vmem:[%s15935_s1 + $0x9f0] sm:$0xf0] }
  0xfc   :  { %5300 = vmatpush.bf16.msrb.mxu0 %v6991_v43  ;;  %v7964_v40 = vld [vmem:[%s15935_s1 + $0xaf0] sm:$0xf0]  ;;  %v7343_v43 = vor.u32 %v10088_v10, %v7340_v13  ;;  %v10144_v52 = vld [vmem:[%s15935_s1 + $0x7c4] sm:$0xf] }
  0xfd   :  { %5313 = vmatpush.bf16.msrb.mxu1 %v7119_v50  ;;  %v7711_v50 = vor.u32 %v10180_v17, %v7708_v26  ;;  %v7564_v54 = vld [vmem:[%s15935_s1 + $0x7d0] sm:$0xf0]  ;;  %v10176_v56 = vld [vmem:[%s15935_s1 + $0x8c4] sm:$0xf] }
  0xfe   :  { %5326 = vmatpush.bf16.msrb.mxu2 %v7247_v51  ;;  %v7839_v51 = vor.u32 %v10212_v27, %v7836_v32  ;;  %v7692_v58 = vld [vmem:[%s15935_s1 + $0x8d0] sm:$0xf0]  ;;  %v10208_v59 = vld [vmem:[%s15935_s1 + $0x9c4] sm:$0xf] }
  0xff   :  { %5339 = vmatpush.bf16.msrb.mxu3 %v7375_v57  ;;  %v7967_v57 = vor.u32 %v10244_v39, %v7964_v40  ;;  %v7820_v60 = vld [vmem:[%s15935_s1 + $0x9d0] sm:$0xf0]  ;;  %v10240_v61 = vld [vmem:[%s15935_s1 + $0xac4] sm:$0xf]  ;;  %v7695_v0 = vor.u32 %v10176_v56, %v7692_v58 }
 0x100   :  { %5301 = vmatpush.bf16.msrb.mxu0 %v6975_v63  ;;  %v7948_v62 = vld [vmem:[%s15935_s1 + $0xad0] sm:$0xf0]  ;;  %v7567_v63 = vor.u32 %v10144_v52, %v7564_v54  ;;  %v7823_v55 = vor.u32 %v10208_v59, %v7820_v60  ;;  %v10172_v4 = vld [vmem:[%s15935_s1 + $0x8a4] sm:$0xf] }
 0x101   :  { %5314 = vmatpush.bf16.msrb.mxu1 %v7103_v2  ;;  %v10140_v2 = vld [vmem:[%s15935_s1 + $0x7a4] sm:$0xf]  ;;  %v7951_v5 = vor.u32 %v10240_v61, %v7948_v62  ;;  %v7676_v6 = vld [vmem:[%s15935_s1 + $0x8b0] sm:$0xf0] }
 0x102   :  { %5327 = vmatpush.bf16.msrb.mxu2 %v7231_v3  ;;  %v7548_v3 = vld [vmem:[%s15935_s1 + $0x7b0] sm:$0xf0]  ;;  %v10236_v10 = vld [vmem:[%s15935_s1 + $0xaa4] sm:$0xf]  ;;  %v7679_v15 = vor.u32 %v10172_v4, %v7676_v6 }
 0x103   :  { %5340 = vmatpush.bf16.msrb.mxu3 %v7359_v8  ;;  %v10204_v8 = vld [vmem:[%s15935_s1 + $0x9a4] sm:$0xf]  ;;  %v7804_v9 = vld [vmem:[%s15935_s1 + $0x9b0] sm:$0xf0]  ;;  %v7551_v14 = vor.u32 %v10140_v2, %v7548_v3 }
 0x104   :  { %5302 = vmatpush.bf16.msrb.mxu0 %v6959_v24  ;;  %v7932_v13 = vld [vmem:[%s15935_s1 + $0xab0] sm:$0xf0]  ;;  %v7807_v53 = vor.u32 %v10204_v8, %v7804_v9  ;;  %v10136_v17 = vld [vmem:[%s15935_s1 + $0x784] sm:$0xf] }
 0x105   :  { %5315 = vmatpush.bf16.msrb.mxu1 %v7087_v34  ;;  %v7532_v21 = vld [vmem:[%s15935_s1 + $0x790] sm:$0xf0]  ;;  %v10168_v24 = vld [vmem:[%s15935_s1 + $0x884] sm:$0xf]  ;;  %v7935_v26 = vor.u32 %v10236_v10, %v7932_v13 }
 0x106   :  { %5328 = vmatpush.bf16.msrb.mxu2 %v7215_v36  ;;  %v7660_v27 = vld [vmem:[%s15935_s1 + $0x890] sm:$0xf0]  ;;  %v10200_v32 = vld [vmem:[%s15935_s1 + $0x984] sm:$0xf]  ;;  %v5096_v36 = vpop.f32.mrf.mxu0 }
 0x107   :  { %5341 = vmatpush.bf16.msrb.mxu3 %v7343_v43  ;;  %5303 = vmatmul.bf16.vlgmr.msrb.gmra.mxu0 %v11060_v20  ;;  %v7788_v34 = vld [vmem:[%s15935_s1 + $0x990] sm:$0xf0]  ;;  %v10232_v39 = vld [vmem:[%s15935_s1 + $0xa84] sm:$0xf]  ;;  %v5097_v43 = vadd.f32 %v5096_v36, %v12376_v48 }
 0x108   :  { %5347 = vmatpush.bf16.msra.mxu0 %v7583_v47  ;;  %5316 = vmatmul.bf16.vlgmr.msrb.gmra.mxu1 %v11220_v41  ;;  %v7916_v40 = vld [vmem:[%s15935_s1 + $0xa90] sm:$0xf0]  ;;  %v7535_v47 = vor.u32 %v10136_v17, %v7532_v21  ;;  %v7791_v52 = vor.u32 %v10200_v32, %v7788_v34  ;;  %v10132_v54 = vld [vmem:[%s15935_s1 + $0x764] sm:$0xf] }
 0x109   :  { %5360 = vmatpush.bf16.msra.mxu1 %v7711_v50  ;;  %5329 = vmatmul.bf16.vlgmr.msrb.gmra.mxu2 %v11224_v44  ;;  %v5109_v50 = vpop.f32.mrf.mxu1  ;;  %v7516_v56 = vld [vmem:[%s15935_s1 + $0x770] sm:$0xf0]  ;;  %v7919_v48 = vor.u32 %v10232_v39, %v7916_v40  ;;  %v10196_v60 = vld [vmem:[%s15935_s1 + $0x964] sm:$0xf] }
 0x10a   :  { %5373 = vmatpush.bf16.msra.mxu2 %v7839_v51  ;;  %5342 = vmatmul.bf16.vlgmr.msrb.gmra.mxu3 %v11212_v38  ;;  %v7663_v51 = vor.u32 %v10168_v24, %v7660_v27  ;;  %v5110_v58 = vadd.f32 %v5109_v50, %v5097_v43  ;;  %v7644_v59 = vld [vmem:[%s15935_s1 + $0x870] sm:$0xf0]  ;;  %v10228_v62 = vld [vmem:[%s15935_s1 + $0xa64] sm:$0xf] }
 0x10b   :  { %5386 = vmatpush.bf16.msra.mxu3 %v7967_v57  ;;  %v10164_v57 = vld [vmem:[%s15935_s1 + $0x864] sm:$0xf]  ;;  %v7772_v61 = vld [vmem:[%s15935_s1 + $0x970] sm:$0xf0] }
 0x10c   :  { %5348 = vmatpush.bf16.msra.mxu0 %v7567_v63  ;;  %v7900_v63 = vld [vmem:[%s15935_s1 + $0xa70] sm:$0xf0]  ;;  %v7775_v2 = vor.u32 %v10196_v60, %v7772_v61  ;;  %v10128_v3 = vld [vmem:[%s15935_s1 + $0x744] sm:$0xf]  ;;  %v5122_v8 = vpop.f32.mrf.mxu2 }
 0x10d   :  { %5361 = vmatpush.bf16.msra.mxu1 %v7695_v0  ;;  %v7519_v0 = vor.u32 %v10132_v54, %v7516_v56  ;;  %v7500_v4 = vld [vmem:[%s15935_s1 + $0x750] sm:$0xf0]  ;;  %v7903_v6 = vor.u32 %v10228_v62, %v7900_v63  ;;  %v10192_v10 = vld [vmem:[%s15935_s1 + $0x944] sm:$0xf] }
 0x10e   :  { %5374 = vmatpush.bf16.msra.mxu2 %v7823_v55  ;;  %v7647_v55 = vor.u32 %v10164_v57, %v7644_v59  ;;  %v7628_v9 = vld [vmem:[%s15935_s1 + $0x850] sm:$0xf0]  ;;  %v5098_v21 = vpop.f32.mrf.mxu0  ;;  %v7503_v24 = vor.u32 %v10128_v3, %v7500_v4  ;;  %v10124_v36 = vld [vmem:[%s15935_s1 + $0x724] sm:$0xf] }
 0x10f   :  { %5387 = vmatpush.bf16.msra.mxu3 %v7951_v5  ;;  %v10160_v5 = vld [vmem:[%s15935_s1 + $0x844] sm:$0xf]  ;;  %v7756_v13 = vld [vmem:[%s15935_s1 + $0x950] sm:$0xf0] }
 0x110   :  { %5349 = vmatpush.bf16.msra.mxu0 %v7551_v14  ;;  %v5123_v14 = vadd.f32 %v5122_v8, %v5110_v58  ;;  %v7884_v17 = vld [vmem:[%s15935_s1 + $0xa50] sm:$0xf0]  ;;  %v7631_v32 = vor.u32 %v10160_v5, %v7628_v9  ;;  %v7759_v34 = vor.u32 %v10192_v10, %v7756_v13  ;;  %v10156_v40 = vld [vmem:[%s15935_s1 + $0x824] sm:$0xf] }
 0x111   :  { %5362 = vmatpush.bf16.msra.mxu1 %v7679_v15  ;;  %v5135_v15 = vpop.f32.mrf.mxu3  ;;  %v7484_v39 = vld [vmem:[%s15935_s1 + $0x730] sm:$0xf0]  ;;  %v10188_v50 = vld [vmem:[%s15935_s1 + $0x924] sm:$0xf] }
 0x112   :  { %5375 = vmatpush.bf16.msra.mxu2 %v7807_v53  ;;  %v10224_v53 = vld [vmem:[%s15935_s1 + $0xa44] sm:$0xf]  ;;  %v12575_v27 = vadd.f32 %v5135_v15, %v5123_v14  ;;  %v7868_v54 = vld [vmem:[%s15935_s1 + $0xa30] sm:$0xf0]  ;;  %v7487_v56 = vor.u32 %v10124_v36, %v7484_v39 }
 0x113   :  { %5388 = vmatpush.bf16.msra.mxu3 %v7935_v26  ;;  %v5111_v26 = vpop.f32.mrf.mxu1  ;;  %v7887_v43 = vor.u32 %v10224_v53, %v7884_v17  ;;  %v10120_v57 = vld [vmem:[%s15935_s1 + $0x704] sm:$0xf]  ;;  %v7596_v61 = vld [vmem:[%s15935_s1 + $0x810] sm:$0xf0] }
 0x114   :  { %5350 = vmatpush.bf16.msra.mxu0 %v7535_v47  ;;  %v7612_v47 = vld [vmem:[%s15935_s1 + $0x830] sm:$0xf0]  ;;  %v10152_v60 = vld [vmem:[%s15935_s1 + $0x804] sm:$0xf]  ;;  %v5124_v3 = vpop.f32.mrf.mxu2 }
 0x115   :  { %5363 = vmatpush.bf16.msra.mxu1 %v7663_v51  ;;  %v7740_v51 = vld [vmem:[%s15935_s1 + $0x930] sm:$0xf0]  ;;  %v7615_v58 = vor.u32 %v10156_v40, %v7612_v47  ;;  %v10184_v62 = vld [vmem:[%s15935_s1 + $0x904] sm:$0xf]  ;;  %v7599_v15 = vor.u32 %v10152_v60, %v7596_v61 }
 0x116   :  { %5376 = vmatpush.bf16.msra.mxu2 %v7791_v52  ;;  %v10220_v52 = vld [vmem:[%s15935_s1 + $0xa24] sm:$0xf]  ;;  %v7743_v59 = vor.u32 %v10188_v50, %v7740_v51  ;;  %v8092_v5 = vld [vmem:[%s15935_s1 + $0xbf0] sm:$0xf0] }
 0x117   :  { %5389 = vmatpush.bf16.msra.mxu3 %v7919_v48  ;;  %v7468_v48 = vld [vmem:[%s15935_s1 + $0x710] sm:$0xf0]  ;;  %v7871_v63 = vor.u32 %v10220_v52, %v7868_v54  ;;  %v10276_v4 = vld [vmem:[%s15935_s1 + $0xbe4] sm:$0xf] }
 0x118   :  { %5351 = vmatpush.bf16.msra.mxu0 %v7519_v0  ;;  %v7724_v0 = vld [vmem:[%s15935_s1 + $0x910] sm:$0xf0]  ;;  %v7471_v9 = vor.u32 %v10120_v57, %v7468_v48  ;;  %v10340_v13 = vld [vmem:[%s15935_s1 + $0xde4] sm:$0xf]  ;;  %v8095_v26 = vor.u32 %v10276_v4, %v8092_v5 }
 0x119   :  { %5364 = vmatpush.bf16.msra.mxu1 %v7647_v55  ;;  %v10216_v55 = vld [vmem:[%s15935_s1 + $0xa04] sm:$0xf]  ;;  %v5137_v8 = vpop.f32.mrf.mxu3  ;;  %v8220_v10 = vld [vmem:[%s15935_s1 + $0xcf0] sm:$0xf0]  ;;  %v7727_v53 = vor.u32 %v10184_v62, %v7724_v0 }
 0x11a   :  { %5377 = vmatpush.bf16.msra.mxu2 %v7775_v2  ;;  %v7852_v2 = vld [vmem:[%s15935_s1 + $0xa10] sm:$0xf0]  ;;  %v10372_v17 = vld [vmem:[%s15935_s1 + $0xee4] sm:$0xf] }
 0x11b   :  { %5390 = vmatpush.bf16.msra.mxu3 %v7903_v6  ;;  %v10308_v6 = vld [vmem:[%s15935_s1 + $0xce4] sm:$0xf]  ;;  %v8348_v14 = vld [vmem:[%s15935_s1 + $0xdf0] sm:$0xf0] }
 0x11c   :  { %5352 = vmatpush.bf16.msra.mxu0 %v7503_v24  ;;  %v8476_v21 = vld [vmem:[%s15935_s1 + $0xef0] sm:$0xf0]  ;;  %v7855_v24 = vor.u32 %v10216_v55, %v7852_v2  ;;  %v10272_v36 = vld [vmem:[%s15935_s1 + $0xbc4] sm:$0xf] }
 0x11d   :  { %5365 = vmatpush.bf16.msra.mxu1 %v7631_v32  ;;  %v8223_v32 = vor.u32 %v10308_v6, %v8220_v10  ;;  %v8076_v39 = vld [vmem:[%s15935_s1 + $0xbd0] sm:$0xf0]  ;;  %v10304_v40 = vld [vmem:[%s15935_s1 + $0xcc4] sm:$0xf] }
 0x11e   :  { %5378 = vmatpush.bf16.msra.mxu2 %v7759_v34  ;;  %v8351_v34 = vor.u32 %v10340_v13, %v8348_v14  ;;  %v8204_v47 = vld [vmem:[%s15935_s1 + $0xcd0] sm:$0xf0]  ;;  %v10336_v50 = vld [vmem:[%s15935_s1 + $0xdc4] sm:$0xf] }
 0x11f   :  { %5391 = vmatpush.bf16.msra.mxu3 %v7887_v43  ;;  %v8479_v43 = vor.u32 %v10372_v17, %v8476_v21  ;;  %v8332_v51 = vld [vmem:[%s15935_s1 + $0xdd0] sm:$0xf0]  ;;  %v10368_v52 = vld [vmem:[%s15935_s1 + $0xec4] sm:$0xf]  ;;  %v8207_v57 = vor.u32 %v10304_v40, %v8204_v47 }
 0x120   :  { %5353 = vmatpush.bf16.msra.mxu0 %v7487_v56  ;;  %v8460_v54 = vld [vmem:[%s15935_s1 + $0xed0] sm:$0xf0]  ;;  %v8079_v56 = vor.u32 %v10272_v36, %v8076_v39  ;;  %v8335_v48 = vor.u32 %v10336_v50, %v8332_v51  ;;  %v10300_v60 = vld [vmem:[%s15935_s1 + $0xca4] sm:$0xf] }
 0x121   :  { %5366 = vmatpush.bf16.msra.mxu1 %v7615_v58  ;;  %v10268_v58 = vld [vmem:[%s15935_s1 + $0xba4] sm:$0xf]  ;;  %v8463_v61 = vor.u32 %v10368_v52, %v8460_v54  ;;  %v8188_v62 = vld [vmem:[%s15935_s1 + $0xcb0] sm:$0xf0] }
 0x122   :  { %5379 = vmatpush.bf16.msra.mxu2 %v7743_v59  ;;  %v8060_v59 = vld [vmem:[%s15935_s1 + $0xbb0] sm:$0xf0]  ;;  %v10364_v55 = vld [vmem:[%s15935_s1 + $0xea4] sm:$0xf]  ;;  %v8191_v4 = vor.u32 %v10300_v60, %v8188_v62 }
 0x123   :  { %5392 = vmatpush.bf16.msra.mxu3 %v7871_v63  ;;  %v10332_v63 = vld [vmem:[%s15935_s1 + $0xda4] sm:$0xf]  ;;  %v8316_v0 = vld [vmem:[%s15935_s1 + $0xdb0] sm:$0xf0]  ;;  %v8063_v3 = vor.u32 %v10268_v58, %v8060_v59 }
 0x124   :  { %5354 = vmatpush.bf16.msra.mxu0 %v7471_v9  ;;  %v8444_v2 = vld [vmem:[%s15935_s1 + $0xeb0] sm:$0xf0]  ;;  %v8319_v5 = vor.u32 %v10332_v63, %v8316_v0  ;;  %v10264_v6 = vld [vmem:[%s15935_s1 + $0xb84] sm:$0xf] }
 0x125   :  { %5367 = vmatpush.bf16.msra.mxu1 %v7599_v15  ;;  %v8044_v8 = vld [vmem:[%s15935_s1 + $0xb90] sm:$0xf0]  ;;  %v10296_v9 = vld [vmem:[%s15935_s1 + $0xc84] sm:$0xf]  ;;  %v8447_v10 = vor.u32 %v10364_v55, %v8444_v2 }
 0x126   :  { %5380 = vmatpush.bf16.msra.mxu2 %v7727_v53  ;;  %v8172_v13 = vld [vmem:[%s15935_s1 + $0xc90] sm:$0xf0]  ;;  %v10328_v14 = vld [vmem:[%s15935_s1 + $0xd84] sm:$0xf]  ;;  %v5148_v53 = vpop.f32.mrf.mxu0 }
 0x127   :  { %5393 = vmatpush.bf16.msra.mxu3 %v7855_v24  ;;  %5355 = vmatmul.bf16.vlgmr.msra.gmra.mxu0 %v11222_v42  ;;  %v8300_v15 = vld [vmem:[%s15935_s1 + $0xd90] sm:$0xf0]  ;;  %v10360_v17 = vld [vmem:[%s15935_s1 + $0xe84] sm:$0xf]  ;;  %v5149_v24 = vadd.f32 %v5148_v53, %v12575_v27 }
 0x128   :  { %5399 = vmatpush.bf16.msrb.mxu0 %v8095_v26  ;;  %5368 = vmatmul.bf16.vlgmr.msra.gmra.mxu1 %v11413_v25  ;;  %v8428_v21 = vld [vmem:[%s15935_s1 + $0xe90] sm:$0xf0]  ;;  %v8047_v26 = vor.u32 %v10264_v6, %v8044_v8  ;;  %v8303_v36 = vor.u32 %v10328_v14, %v8300_v15  ;;  %v10260_v39 = vld [vmem:[%s15935_s1 + $0xb64] sm:$0xf] }
 0x129   :  { %5412 = vmatpush.bf16.msrb.mxu1 %v8223_v32  ;;  %5381 = vmatmul.bf16.vlgmr.msra.gmra.mxu2 %v11426_v30  ;;  %v5161_v32 = vpop.f32.mrf.mxu1  ;;  %v8028_v40 = vld [vmem:[%s15935_s1 + $0xb70] sm:$0xf0]  ;;  %v8431_v27 = vor.u32 %v10360_v17, %v8428_v21  ;;  %v10324_v51 = vld [vmem:[%s15935_s1 + $0xd64] sm:$0xf] }
 0x12a   :  { %5425 = vmatpush.bf16.msrb.mxu2 %v8351_v34  ;;  %5394 = vmatmul.bf16.vlgmr.msra.gmra.mxu3 %v11424_v29  ;;  %v8175_v34 = vor.u32 %v10296_v9, %v8172_v13  ;;  %v5162_v47 = vadd.f32 %v5161_v32, %v5149_v24  ;;  %v8156_v50 = vld [vmem:[%s15935_s1 + $0xc70] sm:$0xf0]  ;;  %v10356_v54 = vld [vmem:[%s15935_s1 + $0xe64] sm:$0xf]  ;;  %v5174_v63 = vpop.f32.mrf.mxu2 }
 0x12b   :  { %5438 = vmatpush.bf16.msrb.mxu3 %v8479_v43  ;;  %v10292_v43 = vld [vmem:[%s15935_s1 + $0xc64] sm:$0xf]  ;;  %v8284_v52 = vld [vmem:[%s15935_s1 + $0xd70] sm:$0xf0] }
 0x12c   :  { %5400 = vmatpush.bf16.msrb.mxu0 %v8079_v56  ;;  %v8412_v56 = vld [vmem:[%s15935_s1 + $0xe70] sm:$0xf0]  ;;  %v8287_v58 = vor.u32 %v10324_v51, %v8284_v52  ;;  %v10256_v59 = vld [vmem:[%s15935_s1 + $0xb44] sm:$0xf] }
 0x12d   :  { %5413 = vmatpush.bf16.msrb.mxu1 %v8207_v57  ;;  %v8031_v57 = vor.u32 %v10260_v39, %v8028_v40  ;;  %v8012_v60 = vld [vmem:[%s15935_s1 + $0xb50] sm:$0xf0]  ;;  %v8415_v62 = vor.u32 %v10356_v54, %v8412_v56  ;;  %v10320_v55 = vld [vmem:[%s15935_s1 + $0xd44] sm:$0xf] }
 0x12e   :  { %5426 = vmatpush.bf16.msrb.mxu2 %v8335_v48  ;;  %v8159_v48 = vor.u32 %v10292_v43, %v8156_v50  ;;  %v8140_v0 = vld [vmem:[%s15935_s1 + $0xc50] sm:$0xf0]  ;;  %v5150_v8 = vpop.f32.mrf.mxu0  ;;  %v8015_v9 = vor.u32 %v10256_v59, %v8012_v60  ;;  %v10252_v53 = vld [vmem:[%s15935_s1 + $0xb24] sm:$0xf] }
 0x12f   :  { %5439 = vmatpush.bf16.msrb.mxu3 %v8463_v61  ;;  %v10288_v61 = vld [vmem:[%s15935_s1 + $0xc44] sm:$0xf]  ;;  %v8268_v2 = vld [vmem:[%s15935_s1 + $0xd50] sm:$0xf0] }
 0x130   :  { %5401 = vmatpush.bf16.msrb.mxu0 %v8063_v3  ;;  %v5175_v3 = vadd.f32 %v5174_v63, %v5162_v47  ;;  %v8396_v6 = vld [vmem:[%s15935_s1 + $0xe50] sm:$0xf0]  ;;  %v8143_v14 = vor.u32 %v10288_v61, %v8140_v0  ;;  %v8271_v15 = vor.u32 %v10320_v55, %v8268_v2  ;;  %v10284_v21 = vld [vmem:[%s15935_s1 + $0xc24] sm:$0xf] }
 0x131   :  { %5414 = vmatpush.bf16.msrb.mxu1 %v8191_v4  ;;  %v5187_v4 = vpop.f32.mrf.mxu3  ;;  %v7996_v17 = vld [vmem:[%s15935_s1 + $0xb30] sm:$0xf0]  ;;  %v10316_v32 = vld [vmem:[%s15935_s1 + $0xd24] sm:$0xf] }
 0x132   :  { %5427 = vmatpush.bf16.msrb.mxu2 %v8319_v5  ;;  %v10352_v5 = vld [vmem:[%s15935_s1 + $0xe44] sm:$0xf]  ;;  %v12774_v13 = vadd.f32 %v5187_v4, %v5175_v3  ;;  %v8380_v39 = vld [vmem:[%s15935_s1 + $0xe30] sm:$0xf0]  ;;  %v7999_v40 = vor.u32 %v10252_v53, %v7996_v17  ;;  %v5176_v59 = vpop.f32.mrf.mxu2 }
 0x133   :  { %5440 = vmatpush.bf16.msrb.mxu3 %v8447_v10  ;;  %v5163_v10 = vpop.f32.mrf.mxu1  ;;  %v8399_v24 = vor.u32 %v10352_v5, %v8396_v6  ;;  %v10248_v43 = vld [vmem:[%s15935_s1 + $0xb04] sm:$0xf]  ;;  %v8108_v52 = vld [vmem:[%s15935_s1 + $0xc10] sm:$0xf0] }
 0x134   :  { %5402 = vmatpush.bf16.msrb.mxu0 %v8047_v26  ;;  %v8124_v26 = vld [vmem:[%s15935_s1 + $0xc30] sm:$0xf0]  ;;  %v10280_v51 = vld [vmem:[%s15935_s1 + $0xc04] sm:$0xf] }
 0x135   :  { %5415 = vmatpush.bf16.msrb.mxu1 %v8175_v34  ;;  %v8252_v34 = vld [vmem:[%s15935_s1 + $0xd30] sm:$0xf0]  ;;  %v8127_v47 = vor.u32 %v10284_v21, %v8124_v26  ;;  %v10312_v54 = vld [vmem:[%s15935_s1 + $0xd04] sm:$0xf]  ;;  %v8111_v4 = vor.u32 %v10280_v51, %v8108_v52 }
 0x136   :  { %5428 = vmatpush.bf16.msrb.mxu2 %v8303_v36  ;;  %v10348_v36 = vld [vmem:[%s15935_s1 + $0xe24] sm:$0xf]  ;;  %v8255_v50 = vor.u32 %v10316_v32, %v8252_v34  ;;  %v8604_v61 = vld [vmem:[%s15935_s1 + $0xff0] sm:$0xf0] }
 0x137   :  { %5441 = vmatpush.bf16.msrb.mxu3 %v8431_v27  ;;  %v7980_v27 = vld [vmem:[%s15935_s1 + $0xb10] sm:$0xf0]  ;;  %v8383_v56 = vor.u32 %v10348_v36, %v8380_v39  ;;  %v10404_v60 = vld [vmem:[%s15935_s1 + $0xfe4] sm:$0xf] }
 0x138   :  { %5403 = vmatpush.bf16.msrb.mxu0 %v8031_v57  ;;  %v8236_v57 = vld [vmem:[%s15935_s1 + $0xd10] sm:$0xf0]  ;;  %v7983_v0 = vor.u32 %v10248_v43, %v7980_v27  ;;  %v10468_v2 = vld [vmem:[%s15935_s1 + $0x11e4] sm:$0xf]  ;;  %v8607_v10 = vor.u32 %v10404_v60, %v8604_v61 }
 0x139   :  { %5416 = vmatpush.bf16.msrb.mxu1 %v8159_v48  ;;  %v10344_v48 = vld [vmem:[%s15935_s1 + $0xe04] sm:$0xf]  ;;  %v5189_v63 = vpop.f32.mrf.mxu3  ;;  %v8732_v55 = vld [vmem:[%s15935_s1 + $0x10f0] sm:$0xf0]  ;;  %v8239_v5 = vor.u32 %v10312_v54, %v8236_v57 }
 0x13a   :  { %5429 = vmatpush.bf16.msrb.mxu2 %v8287_v58  ;;  %v8364_v58 = vld [vmem:[%s15935_s1 + $0xe10] sm:$0xf0]  ;;  %v10500_v6 = vld [vmem:[%s15935_s1 + $0x12e4] sm:$0xf] }
 0x13b   :  { %5442 = vmatpush.bf16.msrb.mxu3 %v8415_v62  ;;  %v10436_v62 = vld [vmem:[%s15935_s1 + $0x10e4] sm:$0xf]  ;;  %v8860_v3 = vld [vmem:[%s15935_s1 + $0x11f0] sm:$0xf0] }
 0x13c   :  { %5404 = vmatpush.bf16.msrb.mxu0 %v8015_v9  ;;  %v8988_v8 = vld [vmem:[%s15935_s1 + $0x12f0] sm:$0xf0]  ;;  %v8367_v9 = vor.u32 %v10344_v48, %v8364_v58  ;;  %v10400_v53 = vld [vmem:[%s15935_s1 + $0xfc4] sm:$0xf] }
 0x13d   :  { %5417 = vmatpush.bf16.msrb.mxu1 %v8143_v14  ;;  %v8735_v14 = vor.u32 %v10436_v62, %v8732_v55  ;;  %v8588_v17 = vld [vmem:[%s15935_s1 + $0xfd0] sm:$0xf0]  ;;  %v10432_v21 = vld [vmem:[%s15935_s1 + $0x10c4] sm:$0xf] }
 0x13e   :  { %5430 = vmatpush.bf16.msrb.mxu2 %v8271_v15  ;;  %v8863_v15 = vor.u32 %v10468_v2, %v8860_v3  ;;  %v8716_v26 = vld [vmem:[%s15935_s1 + $0x10d0] sm:$0xf0]  ;;  %v10464_v32 = vld [vmem:[%s15935_s1 + $0x11c4] sm:$0xf] }
 0x13f   :  { %5443 = vmatpush.bf16.msrb.mxu3 %v8399_v24  ;;  %v8991_v24 = vor.u32 %v10500_v6, %v8988_v8  ;;  %v8844_v34 = vld [vmem:[%s15935_s1 + $0x11d0] sm:$0xf0]  ;;  %v10496_v36 = vld [vmem:[%s15935_s1 + $0x12c4] sm:$0xf]  ;;  %v8719_v43 = vor.u32 %v10432_v21, %v8716_v26 }
 0x140   :  { %5405 = vmatpush.bf16.msrb.mxu0 %v7999_v40  ;;  %v8972_v39 = vld [vmem:[%s15935_s1 + $0x12d0] sm:$0xf0]  ;;  %v8591_v40 = vor.u32 %v10400_v53, %v8588_v17  ;;  %v8847_v27 = vor.u32 %v10464_v32, %v8844_v34  ;;  %v10428_v51 = vld [vmem:[%s15935_s1 + $0x10a4] sm:$0xf] }
 0x141   :  { %5418 = vmatpush.bf16.msrb.mxu1 %v8127_v47  ;;  %v10396_v47 = vld [vmem:[%s15935_s1 + $0xfa4] sm:$0xf]  ;;  %v8975_v52 = vor.u32 %v10496_v36, %v8972_v39  ;;  %v8700_v54 = vld [vmem:[%s15935_s1 + $0x10b0] sm:$0xf0] }
 0x142   :  { %5431 = vmatpush.bf16.msrb.mxu2 %v8255_v50  ;;  %v8572_v50 = vld [vmem:[%s15935_s1 + $0xfb0] sm:$0xf0]  ;;  %v10492_v48 = vld [vmem:[%s15935_s1 + $0x12a4] sm:$0xf]  ;;  %v8703_v60 = vor.u32 %v10428_v51, %v8700_v54 }
 0x143   :  { %5444 = vmatpush.bf16.msrb.mxu3 %v8383_v56  ;;  %v10460_v56 = vld [vmem:[%s15935_s1 + $0x11a4] sm:$0xf]  ;;  %v8828_v57 = vld [vmem:[%s15935_s1 + $0x11b0] sm:$0xf0]  ;;  %v8575_v59 = vor.u32 %v10396_v47, %v8572_v50 }
 0x144   :  { %5406 = vmatpush.bf16.msrb.mxu0 %v7983_v0  ;;  %v8956_v58 = vld [vmem:[%s15935_s1 + $0x12b0] sm:$0xf0]  ;;  %v8831_v61 = vor.u32 %v10460_v56, %v8828_v57  ;;  %v10392_v62 = vld [vmem:[%s15935_s1 + $0xf84] sm:$0xf] }
 0x145   :  { %5419 = vmatpush.bf16.msrb.mxu1 %v8111_v4  ;;  %v8556_v63 = vld [vmem:[%s15935_s1 + $0xf90] sm:$0xf0]  ;;  %v10424_v0 = vld [vmem:[%s15935_s1 + $0x1084] sm:$0xf]  ;;  %v8959_v55 = vor.u32 %v10492_v48, %v8956_v58 }
 0x146   :  { %5432 = vmatpush.bf16.msrb.mxu2 %v8239_v5  ;;  %v8684_v2 = vld [vmem:[%s15935_s1 + $0x1090] sm:$0xf0]  ;;  %v10456_v3 = vld [vmem:[%s15935_s1 + $0x1184] sm:$0xf]  ;;  %v5200_v5 = vpop.f32.mrf.mxu0 }
 0x147   :  { %5445 = vmatpush.bf16.msrb.mxu3 %v8367_v9  ;;  %5407 = vmatmul.bf16.vlgmr.msrb.gmra.mxu0 %v11434_v33  ;;  %v8812_v4 = vld [vmem:[%s15935_s1 + $0x1190] sm:$0xf0]  ;;  %v10488_v6 = vld [vmem:[%s15935_s1 + $0x1284] sm:$0xf]  ;;  %v5201_v9 = vadd.f32 %v5200_v5, %v12774_v13 }
 0x148   :  { %5451 = vmatpush.bf16.msra.mxu0 %v8607_v10  ;;  %5420 = vmatmul.bf16.vlgmr.msrb.gmra.mxu1 %v11623_v23  ;;  %v8940_v8 = vld [vmem:[%s15935_s1 + $0x1290] sm:$0xf0]  ;;  %v8559_v10 = vor.u32 %v10392_v62, %v8556_v63  ;;  %v8815_v53 = vor.u32 %v10456_v3, %v8812_v4  ;;  %v10388_v17 = vld [vmem:[%s15935_s1 + $0xf64] sm:$0xf] }
 0x149   :  { %5464 = vmatpush.bf16.msra.mxu1 %v8735_v14  ;;  %5433 = vmatmul.bf16.vlgmr.msrb.gmra.mxu2 %v11636_v31  ;;  %v5213_v14 = vpop.f32.mrf.mxu1  ;;  %v8540_v21 = vld [vmem:[%s15935_s1 + $0xf70] sm:$0xf0]  ;;  %v8943_v13 = vor.u32 %v10488_v6, %v8940_v8  ;;  %v10452_v34 = vld [vmem:[%s15935_s1 + $0x1164] sm:$0xf] }
 0x14a   :  { %5477 = vmatpush.bf16.msra.mxu2 %v8863_v15  ;;  %5446 = vmatmul.bf16.vlgmr.msrb.gmra.mxu3 %v11634_v28  ;;  %v8687_v15 = vor.u32 %v10424_v0, %v8684_v2  ;;  %v5214_v26 = vadd.f32 %v5213_v14, %v5201_v9  ;;  %v8668_v32 = vld [vmem:[%s15935_s1 + $0x1070] sm:$0xf0]  ;;  %v10484_v39 = vld [vmem:[%s15935_s1 + $0x1264] sm:$0xf] }
 0x14b   :  { %5490 = vmatpush.bf16.msra.mxu3 %v8991_v24  ;;  %v10420_v24 = vld [vmem:[%s15935_s1 + $0x1064] sm:$0xf]  ;;  %v8796_v36 = vld [vmem:[%s15935_s1 + $0x1170] sm:$0xf0] }
 0x14c   :  { %5452 = vmatpush.bf16.msra.mxu0 %v8591_v40  ;;  %v8924_v40 = vld [vmem:[%s15935_s1 + $0x1270] sm:$0xf0]  ;;  %v8799_v47 = vor.u32 %v10452_v34, %v8796_v36  ;;  %v10384_v50 = vld [vmem:[%s15935_s1 + $0xf44] sm:$0xf]  ;;  %v5226_v56 = vpop.f32.mrf.mxu2 }
 0x14d   :  { %5465 = vmatpush.bf16.msra.mxu1 %v8719_v43  ;;  %v8543_v43 = vor.u32 %v10388_v17, %v8540_v21  ;;  %v8524_v51 = vld [vmem:[%s15935_s1 + $0xf50] sm:$0xf0]  ;;  %v8927_v54 = vor.u32 %v10484_v39, %v8924_v40  ;;  %v10448_v48 = vld [vmem:[%s15935_s1 + $0x1144] sm:$0xf] }
 0x14e   :  { %5478 = vmatpush.bf16.msra.mxu2 %v8847_v27  ;;  %v8671_v27 = vor.u32 %v10420_v24, %v8668_v32  ;;  %v8652_v57 = vld [vmem:[%s15935_s1 + $0x1050] sm:$0xf0]  ;;  %v5202_v63 = vpop.f32.mrf.mxu0  ;;  %v8527_v0 = vor.u32 %v10384_v50, %v8524_v51  ;;  %v10380_v5 = vld [vmem:[%s15935_s1 + $0xf24] sm:$0xf] }
 0x14f   :  { %5491 = vmatpush.bf16.msra.mxu3 %v8975_v52  ;;  %v10416_v52 = vld [vmem:[%s15935_s1 + $0x1044] sm:$0xf]  ;;  %v8780_v58 = vld [vmem:[%s15935_s1 + $0x1150] sm:$0xf0] }
 0x150   :  { %5453 = vmatpush.bf16.msra.mxu0 %v8575_v59  ;;  %v5227_v59 = vadd.f32 %v5226_v56, %v5214_v26  ;;  %v8908_v62 = vld [vmem:[%s15935_s1 + $0x1250] sm:$0xf0]  ;;  %v8655_v3 = vor.u32 %v10416_v52, %v8652_v57  ;;  %v8783_v4 = vor.u32 %v10448_v48, %v8780_v58  ;;  %v10412_v8 = vld [vmem:[%s15935_s1 + $0x1024] sm:$0xf] }
 0x151   :  { %5466 = vmatpush.bf16.msra.mxu1 %v8703_v60  ;;  %v5239_v60 = vpop.f32.mrf.mxu3  ;;  %v8508_v6 = vld [vmem:[%s15935_s1 + $0xf30] sm:$0xf0]  ;;  %v10444_v14 = vld [vmem:[%s15935_s1 + $0x1124] sm:$0xf] }
 0x152   :  { %5479 = vmatpush.bf16.msra.mxu2 %v8831_v61  ;;  %v10480_v61 = vld [vmem:[%s15935_s1 + $0x1244] sm:$0xf]  ;;  %v12973_v2 = vadd.f32 %v5239_v60, %v5227_v59  ;;  %v8892_v17 = vld [vmem:[%s15935_s1 + $0x1230] sm:$0xf0]  ;;  %v8511_v21 = vor.u32 %v10380_v5, %v8508_v6 }
 0x153   :  { %5492 = vmatpush.bf16.msra.mxu3 %v8959_v55  ;;  %v5215_v55 = vpop.f32.mrf.mxu1  ;;  %v8911_v9 = vor.u32 %v10480_v61, %v8908_v62  ;;  %v10376_v24 = vld [vmem:[%s15935_s1 + $0xf04] sm:$0xf]  ;;  %v8620_v36 = vld [vmem:[%s15935_s1 + $0x1010] sm:$0xf0] }
 0x154   :  { %5454 = vmatpush.bf16.msra.mxu0 %v8559_v10  ;;  %v8636_v10 = vld [vmem:[%s15935_s1 + $0x1030] sm:$0xf0]  ;;  %v10408_v34 = vld [vmem:[%s15935_s1 + $0x1004] sm:$0xf]  ;;  %v5228_v50 = vpop.f32.mrf.mxu2 }
 0x155   :  { %5467 = vmatpush.bf16.msra.mxu1 %v8687_v15  ;;  %v8764_v15 = vld [vmem:[%s15935_s1 + $0x1130] sm:$0xf0]  ;;  %v8639_v26 = vor.u32 %v10412_v8, %v8636_v10  ;;  %v10440_v39 = vld [vmem:[%s15935_s1 + $0x1104] sm:$0xf]  ;;  %v8623_v60 = vor.u32 %v10408_v34, %v8620_v36 }
 0x156   :  { %5480 = vmatpush.bf16.msra.mxu2 %v8815_v53  ;;  %v10476_v53 = vld [vmem:[%s15935_s1 + $0x1224] sm:$0xf]  ;;  %v8767_v32 = vor.u32 %v10444_v14, %v8764_v15  ;;  %v9116_v52 = vld [vmem:[%s15935_s1 + $0x13f0] sm:$0xf0] }
 0x157   :  { %5493 = vmatpush.bf16.msra.mxu3 %v8943_v13  ;;  %v8492_v13 = vld [vmem:[%s15935_s1 + $0xf10] sm:$0xf0]  ;;  %v8895_v40 = vor.u32 %v10476_v53, %v8892_v17  ;;  %v10532_v51 = vld [vmem:[%s15935_s1 + $0x13e4] sm:$0xf] }
 0x158   :  { %5455 = vmatpush.bf16.msra.mxu0 %v8543_v43  ;;  %v8748_v43 = vld [vmem:[%s15935_s1 + $0x1110] sm:$0xf0]  ;;  %v8495_v57 = vor.u32 %v10376_v24, %v8492_v13  ;;  %v10596_v58 = vld [vmem:[%s15935_s1 + $0x15e4] sm:$0xf]  ;;  %v9119_v55 = vor.u32 %v10532_v51, %v9116_v52 }
 0x159   :  { %5468 = vmatpush.bf16.msra.mxu1 %v8671_v27  ;;  %v10472_v27 = vld [vmem:[%s15935_s1 + $0x1204] sm:$0xf]  ;;  %v5241_v56 = vpop.f32.mrf.mxu3  ;;  %v9244_v48 = vld [vmem:[%s15935_s1 + $0x14f0] sm:$0xf0]  ;;  %v8751_v61 = vor.u32 %v10440_v39, %v8748_v43 }
 0x15a   :  { %5481 = vmatpush.bf16.msra.mxu2 %v8799_v47  ;;  %v8876_v47 = vld [vmem:[%s15935_s1 + $0x1210] sm:$0xf0]  ;;  %v10628_v62 = vld [vmem:[%s15935_s1 + $0x16e4] sm:$0xf] }
 0x15b   :  { %5494 = vmatpush.bf16.msra.mxu3 %v8927_v54  ;;  %v10564_v54 = vld [vmem:[%s15935_s1 + $0x14e4] sm:$0xf]  ;;  %v9372_v59 = vld [vmem:[%s15935_s1 + $0x15f0] sm:$0xf0] }
 0x15c   :  { %5456 = vmatpush.bf16.msra.mxu0 %v8527_v0  ;;  %v9500_v63 = vld [vmem:[%s15935_s1 + $0x16f0] sm:$0xf0]  ;;  %v8879_v0 = vor.u32 %v10472_v27, %v8876_v47  ;;  %v10528_v5 = vld [vmem:[%s15935_s1 + $0x13c4] sm:$0xf] }
 0x15d   :  { %5469 = vmatpush.bf16.msra.mxu1 %v8655_v3  ;;  %v9247_v3 = vor.u32 %v10564_v54, %v9244_v48  ;;  %v9100_v6 = vld [vmem:[%s15935_s1 + $0x13d0] sm:$0xf0]  ;;  %v10560_v8 = vld [vmem:[%s15935_s1 + $0x14c4] sm:$0xf] }
 0x15e   :  { %5482 = vmatpush.bf16.msra.mxu2 %v8783_v4  ;;  %v9375_v4 = vor.u32 %v10596_v58, %v9372_v59  ;;  %v9228_v10 = vld [vmem:[%s15935_s1 + $0x14d0] sm:$0xf0]  ;;  %v10592_v14 = vld [vmem:[%s15935_s1 + $0x15c4] sm:$0xf] }
 0x15f   :  { %5495 = vmatpush.bf16.msra.mxu3 %v8911_v9  ;;  %v9503_v9 = vor.u32 %v10628_v62, %v9500_v63  ;;  %v9356_v15 = vld [vmem:[%s15935_s1 + $0x15d0] sm:$0xf0]  ;;  %v10624_v53 = vld [vmem:[%s15935_s1 + $0x16c4] sm:$0xf]  ;;  %v9231_v24 = vor.u32 %v10560_v8, %v9228_v10 }
 0x160   :  { %5457 = vmatpush.bf16.msra.mxu0 %v8511_v21  ;;  %v9484_v17 = vld [vmem:[%s15935_s1 + $0x16d0] sm:$0xf0]  ;;  %v9103_v21 = vor.u32 %v10528_v5, %v9100_v6  ;;  %v9359_v13 = vor.u32 %v10592_v14, %v9356_v15  ;;  %v10556_v34 = vld [vmem:[%s15935_s1 + $0x14a4] sm:$0xf] }
 0x161   :  { %5470 = vmatpush.bf16.msra.mxu1 %v8639_v26  ;;  %v10524_v26 = vld [vmem:[%s15935_s1 + $0x13a4] sm:$0xf]  ;;  %v9487_v36 = vor.u32 %v10624_v53, %v9484_v17  ;;  %v9212_v39 = vld [vmem:[%s15935_s1 + $0x14b0] sm:$0xf0] }
 0x162   :  { %5483 = vmatpush.bf16.msra.mxu2 %v8767_v32  ;;  %v9084_v32 = vld [vmem:[%s15935_s1 + $0x13b0] sm:$0xf0]  ;;  %v10620_v27 = vld [vmem:[%s15935_s1 + $0x16a4] sm:$0xf]  ;;  %v9215_v51 = vor.u32 %v10556_v34, %v9212_v39 }
 0x163   :  { %5496 = vmatpush.bf16.msra.mxu3 %v8895_v40  ;;  %v10588_v40 = vld [vmem:[%s15935_s1 + $0x15a4] sm:$0xf]  ;;  %v9340_v43 = vld [vmem:[%s15935_s1 + $0x15b0] sm:$0xf0]  ;;  %v9087_v50 = vor.u32 %v10524_v26, %v9084_v32 }
 0x164   :  { %5458 = vmatpush.bf16.msra.mxu0 %v8495_v57  ;;  %v9468_v47 = vld [vmem:[%s15935_s1 + $0x16b0] sm:$0xf0]  ;;  %v9343_v52 = vor.u32 %v10588_v40, %v9340_v43  ;;  %v10520_v54 = vld [vmem:[%s15935_s1 + $0x1384] sm:$0xf] }
 0x165   :  { %5471 = vmatpush.bf16.msra.mxu1 %v8623_v60  ;;  %v9068_v56 = vld [vmem:[%s15935_s1 + $0x1390] sm:$0xf0]  ;;  %v10552_v57 = vld [vmem:[%s15935_s1 + $0x1484] sm:$0xf]  ;;  %v9471_v48 = vor.u32 %v10620_v27, %v9468_v47  ;;  %v5265_v14 = vpop.f32.mrf.mxu1 }
 0x166   :  { %5484 = vmatpush.bf16.msra.mxu2 %v8751_v61  ;;  %v9196_v58 = vld [vmem:[%s15935_s1 + $0x1490] sm:$0xf0]  ;;  %v10584_v59 = vld [vmem:[%s15935_s1 + $0x1584] sm:$0xf]  ;;  %v5252_v61 = vpop.f32.mrf.mxu0 }
 0x167   :  { %5497 = vmatpush.bf16.msra.mxu3 %v8879_v0  ;;  %5459 = vmatmul.bf16.vlgmr.msra.gmra.mxu0 %v11644_v35  ;;  %v9324_v60 = vld [vmem:[%s15935_s1 + $0x1590] sm:$0xf0]  ;;  %v10616_v62 = vld [vmem:[%s15935_s1 + $0x1684] sm:$0xf]  ;;  %v10729_v0 = vld [vmem:[%s15937_s2] sm:$0xf]  ;;  %v9199_v5 = vor.u32 %v10552_v57, %v9196_v58 }
 0x168   :  { %5503 = vmatpush.bf16.msrb.mxu0 %v9119_v55  ;;  %5472 = vmatmul.bf16.vlgmr.msra.gmra.mxu1 %v11833_v37  ;;  %v9452_v63 = vld [vmem:[%s15935_s1 + $0x1690] sm:$0xf0]  ;;  %v836_v55 = vperm.slane %v10729_v0, 1  ;;  %v9327_v6 = vor.u32 %v10584_v59, %v9324_v60  ;;  %v10516_v8 = vld [vmem:[%s15935_s1 + $0x1364] sm:$0xf] }
 0x169   :  { %5516 = vmatpush.bf16.msrb.mxu1 %v9247_v3  ;;  %5485 = vmatmul.bf16.vlgmr.msra.gmra.mxu2 %v11846_v46  ;;  %v13127_v3 = vadd.f32 %v5252_v61, %v12973_v2  ;;  %v10548_v10 = vld [vmem:[%s15935_s1 + $0x1464] sm:$0xf]  ;;  %v9455_v2 = vor.u32 %v10616_v62, %v9452_v63  ;;  %v9180_v15 = vld [vmem:[%s15935_s1 + $0x1470] sm:$0xf0] }
 0x16a   :  { %5529 = vmatpush.bf16.msrb.mxu2 %v9375_v4  ;;  %5498 = vmatmul.bf16.vlgmr.msra.gmra.mxu3 %v11844_v45  ;;  %v9071_v4 = vor.u32 %v10520_v54, %v9068_v56  ;;  %v10580_v53 = vld [vmem:[%s15935_s1 + $0x1564] sm:$0xf]  ;;  %v9308_v17 = vld [vmem:[%s15935_s1 + $0x1570] sm:$0xf0]  ;;  %v9183_v32 = vor.u32 %v10548_v10, %v9180_v15 }
 0x16b   :  { %5542 = vmatpush.bf16.msrb.mxu3 %v9503_v9  ;;  %v9052_v9 = vld [vmem:[%s15935_s1 + $0x1370] sm:$0xf0]  ;;  %v9311_v34 = vor.u32 %v10580_v53, %v9308_v17  ;;  %v10544_v40 = vld [vmem:[%s15935_s1 + $0x1444] sm:$0xf] }
 0x16c   :  { %5504 = vmatpush.bf16.msrb.mxu0 %v9103_v21  ;;  %v10612_v21 = vld [vmem:[%s15935_s1 + $0x1664] sm:$0xf]  ;;  %v9055_v26 = vor.u32 %v10516_v8, %v9052_v9  ;;  %v9036_v39 = vld [vmem:[%s15935_s1 + $0x1350] sm:$0xf0] }
 0x16d   :  { %5517 = vmatpush.bf16.msrb.mxu1 %v9231_v24  ;;  %v9436_v24 = vld [vmem:[%s15935_s1 + $0x1670] sm:$0xf0]  ;;  %v10576_v47 = vld [vmem:[%s15935_s1 + $0x1544] sm:$0xf] }
 0x16e   :  { %5530 = vmatpush.bf16.msrb.mxu2 %v9359_v13  ;;  %v5266_v13 = vadd.f32 %v5265_v14, %v836_v55  ;;  %v9439_v43 = vor.u32 %v10612_v21, %v9436_v24  ;;  %v9164_v27 = vld [vmem:[%s15935_s1 + $0x1450] sm:$0xf0]  ;;  %v10608_v54 = vld [vmem:[%s15935_s1 + $0x1644] sm:$0xf]  ;;  %v5267_v55 = vpop.f32.mrf.mxu1 }
 0x16f   :  { %5543 = vmatpush.bf16.msrb.mxu3 %v9487_v36  ;;  %v10512_v36 = vld [vmem:[%s15935_s1 + $0x1344] sm:$0xf]  ;;  %v9420_v56 = vld [vmem:[%s15935_s1 + $0x1650] sm:$0xf0]  ;;  %v9167_v59 = vor.u32 %v10544_v40, %v9164_v27 }
 0x170   :  { %5505 = vmatpush.bf16.msrb.mxu0 %v9087_v50  ;;  %v9292_v50 = vld [vmem:[%s15935_s1 + $0x1550] sm:$0xf0]  ;;  %v9039_v58 = vor.u32 %v10512_v36, %v9036_v39  ;;  %v10508_v61 = vld [vmem:[%s15935_s1 + $0x1324] sm:$0xf] }
 0x171   :  { %5518 = vmatpush.bf16.msrb.mxu1 %v9215_v51  ;;  %v5278_v51 = vpop.f32.mrf.mxu2  ;;  %v9295_v60 = vor.u32 %v10576_v47, %v9292_v50  ;;  %v9020_v62 = vld [vmem:[%s15935_s1 + $0x1330] sm:$0xf0]  ;;  %v10540_v63 = vld [vmem:[%s15935_s1 + $0x1424] sm:$0xf] }
 0x172   :  { %5531 = vmatpush.bf16.msrb.mxu2 %v9343_v52  ;;  %v5291_v52 = vpop.f32.mrf.mxu3  ;;  %v5279_v57 = vadd.f32 %v5278_v51, %v5266_v13  ;;  %v9276_v8 = vld [vmem:[%s15935_s1 + $0x1530] sm:$0xf0]  ;;  %v10604_v9 = vld [vmem:[%s15935_s1 + $0x1624] sm:$0xf]  ;;  %v9023_v14 = vor.u32 %v10508_v61, %v9020_v62 }
 0x173   :  { %5544 = vmatpush.bf16.msrb.mxu3 %v9471_v48  ;;  %v5254_v48 = vpop.f32.mrf.mxu0  ;;  %v9404_v10 = vld [vmem:[%s15935_s1 + $0x1630] sm:$0xf0]  ;;  %v10536_v21 = vld [vmem:[%s15935_s1 + $0x1404] sm:$0xf] }
 0x174   :  { %5506 = vmatpush.bf16.msrb.mxu0 %v9071_v4  ;;  %v13186_v0 = vadd.f32 %v5291_v52, %v5279_v57  ;;  %v9423_v4 = vor.u32 %v10608_v54, %v9420_v56  ;;  %v9004_v15 = vld [vmem:[%s15935_s1 + $0x1310] sm:$0xf0]  ;;  %v10568_v13 = vld [vmem:[%s15935_s1 + $0x1504] sm:$0xf]  ;;  %v6690_v52 = vld [vmem:[%s15935_s1 + $0xe8] sm:$0xf] }
 0x175   :  { %5519 = vmatpush.bf16.msrb.mxu1 %v9199_v5  ;;  %v9148_v5 = vld [vmem:[%s15935_s1 + $0x1430] sm:$0xf0]  ;;  %v10692_v47 = vld [vmem:[%s15935_s1 + $0x18e4] sm:$0xf]  ;;  %v9927_v54 = vld [vmem:[%s15935_s1 + $0xf4] sm:$0xf0] }
 0x176   :  { %5532 = vmatpush.bf16.msrb.mxu2 %v9327_v6  ;;  %v10572_v6 = vld [vmem:[%s15935_s1 + $0x1524] sm:$0xf]  ;;  %v9151_v53 = vor.u32 %v10540_v63, %v9148_v5  ;;  %v9132_v24 = vld [vmem:[%s15935_s1 + $0x1410] sm:$0xf0]  ;;  %v6818_v48 = vld [vmem:[%s15935_s1 + $0x1e8] sm:$0xf]  ;;  %v6691_v62 = vor.u32 %v9927_v54, %v6690_v52 }
 0x177   :  { %5545 = vmatpush.bf16.msrb.mxu3 %v9455_v2  ;;  %v10504_v2 = vld [vmem:[%s15935_s1 + $0x1304] sm:$0xf]  ;;  %v9279_v17 = vor.u32 %v10572_v6, %v9276_v8  ;;  %v9388_v36 = vld [vmem:[%s15935_s1 + $0x1610] sm:$0xf0]  ;;  %v9135_v56 = vor.u32 %v10536_v21, %v9132_v24  ;;  %v6674_v8 = vld [vmem:[%s15935_s1 + $0xc8] sm:$0xf] }
 0x178   :  { %5507 = vmatpush.bf16.msrb.mxu0 %v9055_v26  ;;  %v9407_v26 = vor.u32 %v10604_v9, %v9404_v10  ;;  %v9628_v27 = vld [vmem:[%s15935_s1 + $0x17f0] sm:$0xf0]  ;;  %v9007_v50 = vor.u32 %v10504_v2, %v9004_v15  ;;  %v10656_v63 = vld [vmem:[%s15935_s1 + $0x17c4] sm:$0xf]  ;;  %v9923_v9 = vld [vmem:[%s15935_s1 + $0xd4] sm:$0xf0] }
 0x179   :  { %5520 = vmatpush.bf16.msrb.mxu1 %v9183_v32  ;;  %v9260_v32 = vld [vmem:[%s15935_s1 + $0x1510] sm:$0xf0]  ;;  %v5280_v39 = vpop.f32.mrf.mxu2  ;;  %v6802_v10 = vld [vmem:[%s15935_s1 + $0x1c8] sm:$0xf]  ;;  %v10684_v24 = vld [vmem:[%s15935_s1 + $0x18a4] sm:$0xf] }
 0x17a   :  { %5533 = vmatpush.bf16.msrb.mxu2 %v9311_v34  ;;  %v10600_v34 = vld [vmem:[%s15935_s1 + $0x1604] sm:$0xf]  ;;  %v5293_v40 = vpop.f32.mrf.mxu3  ;;  %v9756_v51 = vld [vmem:[%s15935_s1 + $0x18f0] sm:$0xf0]  ;;  %v9263_v57 = vor.u32 %v10568_v13, %v9260_v32  ;;  %v6658_v32 = vld [vmem:[%s15935_s1 + $0xa8] sm:$0xf] }
 0x17b   :  { %5546 = vmatpush.bf16.msrb.mxu3 %v9439_v43  ;;  %v10660_v43 = vld [vmem:[%s15935_s1 + $0x17e4] sm:$0xf]  ;;  %v9759_v61 = vor.u32 %v10692_v47, %v9756_v51  ;;  %v9612_v55 = vld [vmem:[%s15935_s1 + $0x17d0] sm:$0xf0]  ;;  %v9951_v39 = vld [vmem:[%s15935_s1 + $0x1b4] sm:$0xf0] }
 0x17c   :  { %5508 = vmatpush.bf16.msrb.mxu0 %v9039_v58  ;;  %v9959_v58 = vld [vmem:[%s15935_s1 + $0x1f4] sm:$0xf0]  ;;  %v9740_v6 = vld [vmem:[%s15935_s1 + $0x18d0] sm:$0xf0]  ;;  %v9615_v2 = vor.u32 %v10656_v63, %v9612_v55  ;;  %v10648_v47 = vld [vmem:[%s15935_s1 + $0x1784] sm:$0xf] }
 0x17d   :  { %5521 = vmatpush.bf16.msrb.mxu1 %v9167_v59  ;;  %v9391_v59 = vor.u32 %v10600_v34, %v9388_v36  ;;  %v6819_v5 = vor.u32 %v9959_v58, %v6818_v48  ;;  %v9596_v21 = vld [vmem:[%s15935_s1 + $0x17b0] sm:$0xf0]  ;;  %v9919_v34 = vld [vmem:[%s15935_s1 + $0xb4] sm:$0xf0]  ;;  %v6786_v36 = vld [vmem:[%s15935_s1 + $0x1a8] sm:$0xf] }
 0x17e   :  { %5534 = vmatpush.bf16.msrb.mxu2 %v9295_v60  ;;  %v9631_v60 = vor.u32 %v10660_v43, %v9628_v27  ;;  %v6659_v27 = vor.u32 %v9919_v34, %v6658_v32  ;;  %v10680_v51 = vld [vmem:[%s15935_s1 + $0x1884] sm:$0xf]  ;;  %v6787_v52 = vor.u32 %v9951_v39, %v6786_v36  ;;  %v9708_v54 = vld [vmem:[%s15935_s1 + $0x1890] sm:$0xf0]  ;;  %v6770_v48 = vld [vmem:[%s15935_s1 + $0x188] sm:$0xf] }
 0x17f   :  { %5547 = vmatpush.bf16.msrb.mxu3 %v9423_v4  ;;  %v10688_v4 = vld [vmem:[%s15935_s1 + $0x18c4] sm:$0xf]  ;;  %v9947_v58 = vld [vmem:[%s15935_s1 + $0x194] sm:$0xf0]  ;;  %v9564_v55 = vld [vmem:[%s15935_s1 + $0x1770] sm:$0xf0] }
 0x180   :  { %5509 = vmatpush.bf16.msrb.mxu0 %v9023_v14  ;;  %v9955_v14 = vld [vmem:[%s15935_s1 + $0x1d4] sm:$0xf0]  ;;  %v9743_v15 = vor.u32 %v10688_v4, %v9740_v6  ;;  %v10644_v63 = vld [vmem:[%s15935_s1 + $0x1764] sm:$0xf]  ;;  %v9676_v36 = vld [vmem:[%s15935_s1 + $0x1850] sm:$0xf0] }
 0x181   :  { %5522 = vmatpush.bf16.msrb.mxu1 %v9151_v53  ;;  %v6675_v53 = vor.u32 %v9923_v9, %v6674_v8  ;;  %v6803_v13 = vor.u32 %v9955_v14, %v6802_v10  ;;  %v10676_v4 = vld [vmem:[%s15935_s1 + $0x1864] sm:$0xf]  ;;  %v6771_v8 = vor.u32 %v9947_v58, %v6770_v48  ;;  %v9692_v9 = vld [vmem:[%s15935_s1 + $0x1870] sm:$0xf0]  ;;  %v6626_v10 = vld [vmem:[%s15935_s1 + $0x68] sm:$0xf] }
 0x182   :  { %5535 = vmatpush.bf16.msrb.mxu2 %v9279_v17  ;;  %v10652_v17 = vld [vmem:[%s15935_s1 + $0x17a4] sm:$0xf]  ;;  %v9911_v14 = vld [vmem:[%s15935_s1 + $0x74] sm:$0xf0]  ;;  %v6610_v39 = vld [vmem:[%s15935_s1 + $0x48] sm:$0xf] }
 0x183   :  { %5548 = vmatpush.bf16.msrb.mxu3 %v9407_v26  ;;  %v9724_v26 = vld [vmem:[%s15935_s1 + $0x18b0] sm:$0xf0]  ;;  %v9599_v40 = vor.u32 %v10652_v17, %v9596_v21  ;;  %v9695_v17 = vor.u32 %v10676_v4, %v9692_v9  ;;  %v6627_v21 = vor.u32 %v9911_v14, %v6626_v10  ;;  %v10636_v48 = vld [vmem:[%s15935_s1 + $0x1724] sm:$0xf]  ;;  %v6722_v4 = vld [vmem:[%s15935_s1 + $0x128] sm:$0xf] }
 0x184   :  { %5510 = vmatpush.bf16.msrb.mxu0 %v9007_v50  ;;  %v9727_v43 = vor.u32 %v10684_v24, %v9724_v26  ;;  %v9580_v50 = vld [vmem:[%s15935_s1 + $0x1790] sm:$0xf0]  ;;  %v10640_v24 = vld [vmem:[%s15935_s1 + $0x1744] sm:$0xf] }
 0x185   :  { %5523 = vmatpush.bf16.msrb.mxu1 %v9135_v56  ;;  %v6642_v56 = vld [vmem:[%s15935_s1 + $0x88] sm:$0xf]  ;;  %v5317_v6 = vpop.f32.mrf.mxu1  ;;  %v10672_v26 = vld [vmem:[%s15935_s1 + $0x1844] sm:$0xf]  ;;  %v9532_v58 = vld [vmem:[%s15935_s1 + $0x1730] sm:$0xf0] }
 0x186   :  { %5536 = vmatpush.bf16.msrb.mxu2 %v9263_v57  ;;  %v9915_v57 = vld [vmem:[%s15935_s1 + $0x94] sm:$0xf0]  ;;  %v9516_v9 = vld [vmem:[%s15935_s1 + $0x1710] sm:$0xf0] }
 0x187   :  { %5549 = vmatpush.bf16.msrb.mxu3 %v9391_v59  ;;  %5511 = vmatmul.bf16.vlgmr.msrb.gmra.mxu0 %v11854_v49  ;;  %v9583_v59 = vor.u32 %v10648_v47, %v9580_v50  ;;  %v6738_v47 = vld [vmem:[%s15935_s1 + $0x148] sm:$0xf]  ;;  %v9939_v50 = vld [vmem:[%s15935_s1 + $0x154] sm:$0xf0] }
 0x188   :  { %5555 = vmatpush.bf16.msra.mxu0 %v9631_v60  ;;  %5524 = vmatmul.bf16.vlgmr.msrb.gmra.mxu1 %v12048_v7  ;;  %v5304_v60 = vpop.f32.mrf.mxu0 }
 0x189   :  { %5568 = vmatpush.bf16.msra.mxu1 %v9759_v61  ;;  %5537 = vmatmul.bf16.vlgmr.msrb.gmra.mxu2 %v12061_v12  ;;  %v9711_v61 = vor.u32 %v10680_v51, %v9708_v54 }
 0x18a   :  { %5581 = vmatpush.bf16.msra.mxu2 %v6691_v62  ;;  %5550 = vmatmul.bf16.vlgmr.msrb.gmra.mxu3 %v12059_v11  ;;  %v6643_v62 = vor.u32 %v9915_v57, %v6642_v56  ;;  %v9679_v56 = vor.u32 %v10672_v26, %v9676_v36  ;;  %v7074_v36 = vld [vmem:[%s15935_s1 + $0x3e8] sm:$0xf] }
 0x18b   :  { %5594 = vmatpush.bf16.msra.mxu3 %v6819_v5  ;;  %v5305_v5 = vadd.f32 %v5304_v60, %v13186_v0  ;;  %v9943_v0 = vld [vmem:[%s15935_s1 + $0x174] sm:$0xf0] }
 0x18c   :  { %5556 = vmatpush.bf16.msra.mxu0 %v9615_v2  ;;  %v6754_v2 = vld [vmem:[%s15935_s1 + $0x168] sm:$0xf]  ;;  %v5330_v32 = vpop.f32.mrf.mxu2 }
 0x18d   :  { %5569 = vmatpush.bf16.msra.mxu1 %v9743_v15  ;;  %v5318_v15 = vadd.f32 %v5317_v6, %v5305_v5  ;;  %v6755_v34 = vor.u32 %v9943_v0, %v6754_v2  ;;  %v5319_v60 = vpop.f32.mrf.mxu1  ;;  %v9935_v5 = vld [vmem:[%s15935_s1 + $0x134] sm:$0xf0]  ;;  %v9535_v6 = vor.u32 %v10636_v48, %v9532_v58  ;;  %v10664_v2 = vld [vmem:[%s15935_s1 + $0x1804] sm:$0xf]  ;;  %v9644_v0 = vld [vmem:[%s15935_s1 + $0x1810] sm:$0xf0] }
 0x18e   :  { %5582 = vmatpush.bf16.msra.mxu2 %v6675_v53  ;;  %v9567_v53 = vor.u32 %v10644_v63, %v9564_v55  ;;  %v6594_v63 = vld [vmem:[%s15935_s1 + $0x28] sm:$0xf]  ;;  %v9903_v55 = vld [vmem:[%s15935_s1 + $0x34] sm:$0xf0] }
 0x18f   :  { %5595 = vmatpush.bf16.msra.mxu3 %v6803_v13  ;;  %v9548_v13 = vld [vmem:[%s15935_s1 + $0x1750] sm:$0xf0]  ;;  %v6595_v14 = vor.u32 %v9903_v55, %v6594_v63  ;;  %v9987_v60 = vld [vmem:[%s15935_s1 + $0x2d4] sm:$0xf0]  ;;  %v7186_v55 = vld [vmem:[%s15935_s1 + $0x4c8] sm:$0xf] }
 0x190   :  { %5557 = vmatpush.bf16.msra.mxu0 %v9599_v40  ;;  %v9907_v40 = vld [vmem:[%s15935_s1 + $0x54] sm:$0xf0]  ;;  %v9551_v51 = vor.u32 %v10640_v24, %v9548_v13  ;;  %v5306_v54 = vpop.f32.mrf.mxu0  ;;  %v6706_v24 = vld [vmem:[%s15935_s1 + $0x108] sm:$0xf] }
 0x191   :  { %5570 = vmatpush.bf16.msra.mxu1 %v9727_v43  ;;  %v5331_v43 = vadd.f32 %v5330_v32, %v5318_v15  ;;  %v6611_v57 = vor.u32 %v9907_v40, %v6610_v39  ;;  %v6578_v15 = vld [vmem:[%s15935_s1 + $0x8] sm:$0xf]  ;;  %v9931_v13 = vld [vmem:[%s15935_s1 + $0x114] sm:$0xf0] }
 0x192   :  { %5583 = vmatpush.bf16.msra.mxu2 %v6659_v27  ;;  %v5343_v27 = vpop.f32.mrf.mxu3  ;;  %v6946_v32 = vld [vmem:[%s15935_s1 + $0x2e8] sm:$0xf]  ;;  %v10023_v40 = vld [vmem:[%s15935_s1 + $0x3f4] sm:$0xf0] }
 0x193   :  { %5596 = vmatpush.bf16.msra.mxu3 %v6787_v52  ;;  %v13376_v52 = vadd.f32 %v5343_v27, %v5331_v43  ;;  %v7202_v43 = vld [vmem:[%s15935_s1 + $0x4e8] sm:$0xf]  ;;  %v10055_v27 = vld [vmem:[%s15935_s1 + $0x4f4] sm:$0xf0]  ;;  %v7075_v48 = vor.u32 %v10023_v40, %v7074_v36 }
 0x194   :  { %5558 = vmatpush.bf16.msra.mxu0 %v9583_v59  ;;  %v10668_v59 = vld [vmem:[%s15935_s1 + $0x1824] sm:$0xf]  ;;  %v10087_v54 = vld [vmem:[%s15935_s1 + $0x5f4] sm:$0xf0]  ;;  %v7203_v58 = vor.u32 %v10055_v27, %v7202_v43  ;;  %v6898_v36 = vld [vmem:[%s15935_s1 + $0x288] sm:$0xf] }
 0x195   :  { %5571 = vmatpush.bf16.msra.mxu1 %v9711_v61  ;;  %v6739_v61 = vor.u32 %v9939_v50, %v6738_v47  ;;  %v9647_v47 = vor.u32 %v10664_v2, %v9644_v0  ;;  %v10019_v63 = vld [vmem:[%s15935_s1 + $0x3d4] sm:$0xf0]  ;;  %v7042_v0 = vld [vmem:[%s15935_s1 + $0x3a8] sm:$0xf] }
 0x196   :  { %5584 = vmatpush.bf16.msra.mxu2 %v6643_v62  ;;  %v9660_v62 = vld [vmem:[%s15935_s1 + $0x1830] sm:$0xf0]  ;;  %v9983_v2 = vld [vmem:[%s15935_s1 + $0x2b4] sm:$0xf0]  ;;  %v7026_v40 = vld [vmem:[%s15935_s1 + $0x388] sm:$0xf] }
 0x197   :  { %5597 = vmatpush.bf16.msra.mxu3 %v6771_v8  ;;  %v10632_v8 = vld [vmem:[%s15935_s1 + $0x1704] sm:$0xf]  ;;  %v9663_v10 = vor.u32 %v10668_v59, %v9660_v62  ;;  %v6930_v59 = vld [vmem:[%s15935_s1 + $0x2c8] sm:$0xf]  ;;  %v10011_v27 = vld [vmem:[%s15935_s1 + $0x394] sm:$0xf0] }
 0x198   :  { %5559 = vmatpush.bf16.msra.mxu0 %v9567_v53  ;;  %v5332_v53 = vpop.f32.mrf.mxu2  ;;  %v9519_v39 = vor.u32 %v10632_v8, %v9516_v9  ;;  %v6931_v8 = vor.u32 %v9987_v60, %v6930_v59  ;;  %v7027_v59 = vor.u32 %v10011_v27, %v7026_v40 }
 0x199   :  { %5572 = vmatpush.bf16.msra.mxu1 %v9695_v17  ;;  %v6723_v17 = vor.u32 %v9935_v5, %v6722_v4  ;;  %v10051_v4 = vld [vmem:[%s15935_s1 + $0x4d4] sm:$0xf0]  ;;  %v7314_v5 = vld [vmem:[%s15935_s1 + $0x5c8] sm:$0xf] }
 0x19a   :  { %5585 = vmatpush.bf16.msra.mxu2 %v6627_v21  ;;  %v9899_v21 = vld [vmem:[%s15935_s1 + $0x14] sm:$0xf0]  ;;  %v5345_v26 = vpop.f32.mrf.mxu3 }
 0x19b   :  { %5598 = vmatpush.bf16.msra.mxu3 %v6755_v34  ;;  %v9991_v34 = vld [vmem:[%s15935_s1 + $0x2f4] sm:$0xf0]  ;;  %v6579_v50 = vor.u32 %v9899_v21, %v6578_v15 }
 0x19c   :  { %5560 = vmatpush.bf16.msra.mxu0 %v9551_v51  ;;  %v7330_v51 = vld [vmem:[%s15935_s1 + $0x5e8] sm:$0xf]  ;;  %v10015_v53 = vld [vmem:[%s15935_s1 + $0x3b4] sm:$0xf0] }
 0x19d   :  { %5573 = vmatpush.bf16.msra.mxu1 %v9679_v56  ;;  %v6707_v56 = vor.u32 %v9931_v13, %v6706_v24  ;;  %v7331_v62 = vor.u32 %v10087_v54, %v7330_v51  ;;  %v10047_v21 = vld [vmem:[%s15935_s1 + $0x4b4] sm:$0xf0]  ;;  %v7298_v24 = vld [vmem:[%s15935_s1 + $0x5a8] sm:$0xf] }
 0x19e   :  { %5586 = vmatpush.bf16.msra.mxu2 %v6611_v57  ;;  %v6947_v57 = vor.u32 %v9991_v34, %v6946_v32  ;;  %v10079_v13 = vld [vmem:[%s15935_s1 + $0x5b4] sm:$0xf0]  ;;  %v7043_v32 = vor.u32 %v10015_v53, %v7042_v0  ;;  %v7282_v54 = vld [vmem:[%s15935_s1 + $0x588] sm:$0xf] }
 0x19f   :  { %5599 = vmatpush.bf16.msra.mxu3 %v6739_v61  ;;  %v7058_v61 = vld [vmem:[%s15935_s1 + $0x3c8] sm:$0xf]  ;;  %v7299_v43 = vor.u32 %v10079_v13, %v7298_v24  ;;  %v10003_v24 = vld [vmem:[%s15935_s1 + $0x354] sm:$0xf0] }
 0x1a0   :  { %5561 = vmatpush.bf16.msra.mxu0 %v9535_v6  ;;  %v10083_v6 = vld [vmem:[%s15935_s1 + $0x5d4] sm:$0xf0]  ;;  %v7059_v9 = vor.u32 %v10019_v63, %v7058_v61  ;;  %v6882_v61 = vld [vmem:[%s15935_s1 + $0x268] sm:$0xf] }
 0x1a1   :  { %5574 = vmatpush.bf16.msra.mxu1 %v9663_v10  ;;  %v7187_v10 = vor.u32 %v10051_v4, %v7186_v55  ;;  %v7315_v15 = vor.u32 %v10083_v6, %v7314_v5  ;;  %v7010_v63 = vld [vmem:[%s15935_s1 + $0x368] sm:$0xf]  ;;  %v10007_v4 = vld [vmem:[%s15935_s1 + $0x374] sm:$0xf0] }
 0x1a2   :  { %5587 = vmatpush.bf16.msra.mxu2 %v6595_v14  ;;  %v6914_v14 = vld [vmem:[%s15935_s1 + $0x2a8] sm:$0xf]  ;;  %v10039_v6 = vld [vmem:[%s15935_s1 + $0x474] sm:$0xf0] }
 0x1a3   :  { %5600 = vmatpush.bf16.msra.mxu3 %v6723_v17  ;;  %v7170_v17 = vld [vmem:[%s15935_s1 + $0x4a8] sm:$0xf]  ;;  %v6915_v26 = vor.u32 %v9983_v2, %v6914_v14  ;;  %v7011_v14 = vor.u32 %v10007_v4, %v7010_v63 }
 0x1a4   :  { %5562 = vmatpush.bf16.msra.mxu0 %v9519_v39  ;;  %v7171_v34 = vor.u32 %v10047_v21, %v7170_v17  ;;  %v9979_v39 = vld [vmem:[%s15935_s1 + $0x294] sm:$0xf0]  ;;  %v5356_v51 = vpop.f32.mrf.mxu0  ;;  %v7138_v5 = vld [vmem:[%s15935_s1 + $0x468] sm:$0xf] }
 0x1a5   :  { %5575 = vmatpush.bf16.msra.mxu1 %v9647_v47  ;;  %v7154_v47 = vld [vmem:[%s15935_s1 + $0x488] sm:$0xf]  ;;  %v7139_v2 = vor.u32 %v10039_v6, %v7138_v5 }
 0x1a6   :  { %5588 = vmatpush.bf16.msra.mxu2 %v6579_v50  ;;  %v10043_v50 = vld [vmem:[%s15935_s1 + $0x494] sm:$0xf0]  ;;  %v6866_v0 = vld [vmem:[%s15935_s1 + $0x248] sm:$0xf] }
 0x1a7   :  { %5601 = vmatpush.bf16.msra.mxu3 %v6707_v56  ;;  %5563 = vmatmul.bf16.vlgmr.msra.gmra.mxu0 %v12069_v16  ;;  %v10075_v56 = vld [vmem:[%s15935_s1 + $0x594] sm:$0xf0]  ;;  %v7155_v60 = vor.u32 %v10043_v50, %v7154_v47  ;;  %v6994_v53 = vld [vmem:[%s15935_s1 + $0x348] sm:$0xf] }
 0x1a8   :  { %5607 = vmatpush.bf16.msrb.mxu0 %v6947_v57  ;;  %5576 = vmatmul.bf16.vlgmr.msra.gmra.mxu1 %v12258_v1  ;;  %v5357_v57 = vadd.f32 %v5356_v51, %v13376_v52  ;;  %v7283_v52 = vor.u32 %v10075_v56, %v7282_v54  ;;  %v7122_v13 = vld [vmem:[%s15935_s1 + $0x448] sm:$0xf]  ;;  %v6995_v50 = vor.u32 %v10003_v24, %v6994_v53  ;;  %v9967_v56 = vld [vmem:[%s15935_s1 + $0x234] sm:$0xf0] }
 0x1a9   :  { %5620 = vmatpush.bf16.msrb.mxu1 %v7075_v48  ;;  %5589 = vmatmul.bf16.vlgmr.msra.gmra.mxu2 %v11058_v19  ;;  %v6899_v48 = vor.u32 %v9979_v39, %v6898_v36  ;;  %v7250_v36 = vld [vmem:[%s15935_s1 + $0x548] sm:$0xf]  ;;  %v10067_v39 = vld [vmem:[%s15935_s1 + $0x554] sm:$0xf0] }
 0x1aa   :  { %5633 = vmatpush.bf16.msrb.mxu2 %v7203_v58  ;;  %5602 = vmatmul.bf16.vlgmr.msra.gmra.mxu3 %v11062_v22  ;;  %v5369_v58 = vpop.f32.mrf.mxu1  ;;  %v6850_v54 = vld [vmem:[%s15935_s1 + $0x228] sm:$0xf] }
 0x1ab   :  { %5646 = vmatpush.bf16.msrb.mxu3 %v7331_v62  ;;  %v9975_v62 = vld [vmem:[%s15935_s1 + $0x274] sm:$0xf0]  ;;  %v5370_v55 = vadd.f32 %v5369_v58, %v5357_v57  ;;  %v6978_v57 = vld [vmem:[%s15935_s1 + $0x328] sm:$0xf]  ;;  %v6851_v63 = vor.u32 %v9967_v56, %v6850_v54 }
 0x1ac   :  { %5608 = vmatpush.bf16.msrb.mxu0 %v6931_v8  ;;  %v7266_v8 = vld [vmem:[%s15935_s1 + $0x568] sm:$0xf]  ;;  %v5382_v21 = vpop.f32.mrf.mxu2  ;;  %v5358_v40 = vpop.f32.mrf.mxu0  ;;  %v9999_v58 = vld [vmem:[%s15935_s1 + $0x334] sm:$0xf0] }
 0x1ad   :  { %5621 = vmatpush.bf16.msrb.mxu1 %v7059_v9  ;;  %v10071_v9 = vld [vmem:[%s15935_s1 + $0x574] sm:$0xf0]  ;;  %v6979_v4 = vor.u32 %v9999_v58, %v6978_v57  ;;  %v6962_v6 = vld [vmem:[%s15935_s1 + $0x308] sm:$0xf] }
 0x1ae   :  { %5634 = vmatpush.bf16.msrb.mxu2 %v7187_v10  ;;  %v6883_v10 = vor.u32 %v9975_v62, %v6882_v61  ;;  %v7267_v17 = vor.u32 %v10071_v9, %v7266_v8  ;;  %v7234_v61 = vld [vmem:[%s15935_s1 + $0x528] sm:$0xf]  ;;  %v10063_v62 = vld [vmem:[%s15935_s1 + $0x534] sm:$0xf0] }
 0x1af   :  { %5647 = vmatpush.bf16.msrb.mxu3 %v7315_v15  ;;  %v9971_v15 = vld [vmem:[%s15935_s1 + $0x254] sm:$0xf0]  ;;  %v7090_v9 = vld [vmem:[%s15935_s1 + $0x408] sm:$0xf] }
 0x1b0   :  { %5609 = vmatpush.bf16.msrb.mxu0 %v6915_v26  ;;  %v10035_v26 = vld [vmem:[%s15935_s1 + $0x454] sm:$0xf0]  ;;  %v7458_v53 = vld [vmem:[%s15935_s1 + $0x6e8] sm:$0xf] }
 0x1b1   :  { %5622 = vmatpush.bf16.msrb.mxu1 %v7043_v32  ;;  %v5383_v32 = vadd.f32 %v5382_v21, %v5370_v55  ;;  %v7123_v51 = vor.u32 %v10035_v26, %v7122_v13  ;;  %v9963_v55 = vld [vmem:[%s15935_s1 + $0x214] sm:$0xf0]  ;;  %v7586_v21 = vld [vmem:[%s15935_s1 + $0x7e8] sm:$0xf] }
 0x1b2   :  { %5635 = vmatpush.bf16.msrb.mxu2 %v7171_v34  ;;  %v5395_v34 = vpop.f32.mrf.mxu3  ;;  %v5371_v27 = vpop.f32.mrf.mxu1  ;;  %v9995_v8 = vld [vmem:[%s15935_s1 + $0x314] sm:$0xf0]  ;;  %v7842_v40 = vld [vmem:[%s15935_s1 + $0x9e8] sm:$0xf] }
 0x1b3   :  { %5648 = vmatpush.bf16.msrb.mxu3 %v7299_v43  ;;  %v6867_v43 = vor.u32 %v9971_v15, %v6866_v0  ;;  %v13575_v47 = vadd.f32 %v5395_v34, %v5383_v32  ;;  %v10059_v0 = vld [vmem:[%s15935_s1 + $0x514] sm:$0xf0]  ;;  %v7714_v32 = vld [vmem:[%s15935_s1 + $0x8e8] sm:$0xf] }
 0x1b4   :  { %5610 = vmatpush.bf16.msrb.mxu0 %v6899_v48  ;;  %v7251_v48 = vor.u32 %v10067_v39, %v7250_v36  ;;  %v5384_v15 = vpop.f32.mrf.mxu2  ;;  %v10151_v26 = vld [vmem:[%s15935_s1 + $0x7f4] sm:$0xf0]  ;;  %v6963_v36 = vor.u32 %v9995_v8, %v6962_v6  ;;  %v7442_v56 = vld [vmem:[%s15935_s1 + $0x6c8] sm:$0xf] }
 0x1b5   :  { %5623 = vmatpush.bf16.msrb.mxu1 %v7027_v59  ;;  %v7106_v59 = vld [vmem:[%s15935_s1 + $0x428] sm:$0xf]  ;;  %v10183_v34 = vld [vmem:[%s15935_s1 + $0x8f4] sm:$0xf0] }
 0x1b6   :  { %5636 = vmatpush.bf16.msrb.mxu2 %v7155_v60  ;;  %v10031_v60 = vld [vmem:[%s15935_s1 + $0x434] sm:$0xf0]  ;;  %v7715_v54 = vor.u32 %v10183_v34, %v7714_v32  ;;  %v7554_v8 = vld [vmem:[%s15935_s1 + $0x7a8] sm:$0xf] }
 0x1b7   :  { %5649 = vmatpush.bf16.msrb.mxu3 %v7283_v52  ;;  %v6834_v52 = vld [vmem:[%s15935_s1 + $0x208] sm:$0xf]  ;;  %v7107_v5 = vor.u32 %v10031_v60, %v7106_v59  ;;  %v10115_v57 = vld [vmem:[%s15935_s1 + $0x6d4] sm:$0xf0] }
 0x1b8   :  { %5611 = vmatpush.bf16.msrb.mxu0 %v6883_v10  ;;  %v7235_v10 = vor.u32 %v10063_v62, %v7234_v61  ;;  %v6835_v13 = vor.u32 %v9963_v55, %v6834_v52  ;;  %v10147_v59 = vld [vmem:[%s15935_s1 + $0x7d4] sm:$0xf0]  ;;  %v7698_v60 = vld [vmem:[%s15935_s1 + $0x8c8] sm:$0xf]  ;;  %v7443_v52 = vor.u32 %v10115_v57, %v7442_v56 }
 0x1b9   :  { %5624 = vmatpush.bf16.msrb.mxu1 %v7011_v14  ;;  %v10027_v14 = vld [vmem:[%s15935_s1 + $0x414] sm:$0xf0]  ;;  %v7826_v62 = vld [vmem:[%s15935_s1 + $0x9c8] sm:$0xf] }
 0x1ba   :  { %5637 = vmatpush.bf16.msrb.mxu2 %v7139_v2  ;;  %v7218_v2 = vld [vmem:[%s15935_s1 + $0x508] sm:$0xf]  ;;  %v5397_v24 = vpop.f32.mrf.mxu3  ;;  %v7091_v39 = vor.u32 %v10027_v14, %v7090_v9  ;;  %v10179_v61 = vld [vmem:[%s15935_s1 + $0x8d4] sm:$0xf0] }
 0x1bb   :  { %5650 = vmatpush.bf16.msrb.mxu3 %v7267_v17  ;;  %v10119_v17 = vld [vmem:[%s15935_s1 + $0x6f4] sm:$0xf0]  ;;  %v7219_v27 = vor.u32 %v10059_v0, %v7218_v2  ;;  %v7682_v14 = vld [vmem:[%s15935_s1 + $0x8a8] sm:$0xf] }
 0x1bc   :  { %5612 = vmatpush.bf16.msrb.mxu0 %v6867_v43  ;;  %v10215_v43 = vld [vmem:[%s15935_s1 + $0x9f4] sm:$0xf0]  ;;  %v7810_v0 = vld [vmem:[%s15935_s1 + $0x9a8] sm:$0xf] }
 0x1bd   :  { %5625 = vmatpush.bf16.msrb.mxu1 %v6995_v50  ;;  %v7459_v50 = vor.u32 %v10119_v17, %v7458_v53  ;;  %v7843_v58 = vor.u32 %v10215_v43, %v7842_v40  ;;  %v10111_v6 = vld [vmem:[%s15935_s1 + $0x6b4] sm:$0xf0]  ;;  %v7410_v24 = vld [vmem:[%s15935_s1 + $0x688] sm:$0xf] }
 0x1be   :  { %5638 = vmatpush.bf16.msrb.mxu2 %v7123_v51  ;;  %v7587_v51 = vor.u32 %v10151_v26, %v7586_v21  ;;  %v10175_v2 = vld [vmem:[%s15935_s1 + $0x8b4] sm:$0xf0]  ;;  %v7538_v26 = vld [vmem:[%s15935_s1 + $0x788] sm:$0xf] }
 0x1bf   :  { %5651 = vmatpush.bf16.msrb.mxu3 %v7251_v48  ;;  %v7570_v48 = vld [vmem:[%s15935_s1 + $0x7c8] sm:$0xf]  ;;  %v10207_v15 = vld [vmem:[%s15935_s1 + $0x9b4] sm:$0xf0]  ;;  %v7683_v21 = vor.u32 %v10175_v2, %v7682_v14 }
 0x1c0   :  { %5613 = vmatpush.bf16.msrb.mxu0 %v6851_v63  ;;  %v10211_v63 = vld [vmem:[%s15935_s1 + $0x9d4] sm:$0xf0]  ;;  %v7571_v55 = vor.u32 %v10147_v59, %v7570_v48  ;;  %v7811_v32 = vor.u32 %v10207_v15, %v7810_v0  ;;  %v7794_v43 = vld [vmem:[%s15935_s1 + $0x988] sm:$0xf] }
 0x1c1   :  { %5626 = vmatpush.bf16.msrb.mxu1 %v6979_v4  ;;  %v7699_v4 = vor.u32 %v10179_v61, %v7698_v60  ;;  %v7827_v9 = vor.u32 %v10211_v63, %v7826_v62  ;;  %v10139_v34 = vld [vmem:[%s15935_s1 + $0x794] sm:$0xf0]  ;;  %v7394_v48 = vld [vmem:[%s15935_s1 + $0x668] sm:$0xf] }
 0x1c2   :  { %5639 = vmatpush.bf16.msrb.mxu2 %v7107_v5  ;;  %v7426_v5 = vld [vmem:[%s15935_s1 + $0x6a8] sm:$0xf]  ;;  %v7539_v56 = vor.u32 %v10139_v34, %v7538_v26  ;;  %v10135_v61 = vld [vmem:[%s15935_s1 + $0x774] sm:$0xf0] }
 0x1c3   :  { %5652 = vmatpush.bf16.msrb.mxu3 %v7235_v10  ;;  %v10143_v10 = vld [vmem:[%s15935_s1 + $0x7b4] sm:$0xf0]  ;;  %v7427_v53 = vor.u32 %v10111_v6, %v7426_v5  ;;  %v7522_v59 = vld [vmem:[%s15935_s1 + $0x768] sm:$0xf] }
 0x1c4   :  { %5614 = vmatpush.bf16.msrb.mxu0 %v6835_v13  ;;  %v7555_v17 = vor.u32 %v10143_v10, %v7554_v8  ;;  %v10107_v13 = vld [vmem:[%s15935_s1 + $0x694] sm:$0xf0]  ;;  %v5408_v40 = vpop.f32.mrf.mxu0  ;;  %v7650_v62 = vld [vmem:[%s15935_s1 + $0x868] sm:$0xf]  ;;  %v7523_v5 = vor.u32 %v10135_v61, %v7522_v59 }
 0x1c5   :  { %5627 = vmatpush.bf16.msrb.mxu1 %v6963_v36  ;;  %v7666_v36 = vld [vmem:[%s15935_s1 + $0x888] sm:$0xf]  ;;  %v10167_v63 = vld [vmem:[%s15935_s1 + $0x874] sm:$0xf0] }
 0x1c6   :  { %5640 = vmatpush.bf16.msrb.mxu2 %v7091_v39  ;;  %v10171_v39 = vld [vmem:[%s15935_s1 + $0x894] sm:$0xf0]  ;;  %v7651_v6 = vor.u32 %v10167_v63, %v7650_v62  ;;  %v7378_v8 = vld [vmem:[%s15935_s1 + $0x648] sm:$0xf] }
 0x1c7   :  { %5653 = vmatpush.bf16.msrb.mxu3 %v7219_v27  ;;  %5615 = vmatmul.bf16.vlgmr.msrb.gmra.mxu0 %v11056_v18  ;;  %v10203_v27 = vld [vmem:[%s15935_s1 + $0x994] sm:$0xf0]  ;;  %v7667_v57 = vor.u32 %v10171_v39, %v7666_v36  ;;  %v7506_v10 = vld [vmem:[%s15935_s1 + $0x748] sm:$0xf] }
 0x1c8   :  { %5659 = vmatpush.bf16.msra.mxu0 %v7459_v50  ;;  %5628 = vmatmul.bf16.vlgmr.msrb.gmra.mxu1 %v11060_v20  ;;  %v5409_v50 = vadd.f32 %v5408_v40, %v13575_v47  ;;  %v7795_v47 = vor.u32 %v10203_v27, %v7794_v43  ;;  %v10131_v0 = vld [vmem:[%s15935_s1 + $0x754] sm:$0xf0]  ;;  %v7634_v15 = vld [vmem:[%s15935_s1 + $0x848] sm:$0xf] }
 0x1c9   :  { %5672 = vmatpush.bf16.msra.mxu1 %v7587_v51  ;;  %5641 = vmatmul.bf16.vlgmr.msrb.gmra.mxu2 %v11220_v41  ;;  %v7411_v51 = vor.u32 %v10107_v13, %v7410_v24  ;;  %v7762_v24 = vld [vmem:[%s15935_s1 + $0x948] sm:$0xf]  ;;  %v10195_v13 = vld [vmem:[%s15935_s1 + $0x954] sm:$0xf0]  ;;  %v7507_v39 = vor.u32 %v10131_v0, %v7506_v10 }
 0x1ca   :  { %5685 = vmatpush.bf16.msra.mxu2 %v7715_v54  ;;  %5654 = vmatmul.bf16.vlgmr.msrb.gmra.mxu3 %v11224_v44  ;;  %v5421_v54 = vpop.f32.mrf.mxu1  ;;  %v7362_v43 = vld [vmem:[%s15935_s1 + $0x628] sm:$0xf]  ;;  %v10095_v27 = vld [vmem:[%s15935_s1 + $0x634] sm:$0xf0] }
 0x1cb   :  { %5698 = vmatpush.bf16.msra.mxu3 %v7843_v58  ;;  %v10103_v58 = vld [vmem:[%s15935_s1 + $0x674] sm:$0xf0]  ;;  %v5422_v60 = vadd.f32 %v5421_v54, %v5409_v50  ;;  %v7490_v50 = vld [vmem:[%s15935_s1 + $0x728] sm:$0xf]  ;;  %v7363_v59 = vor.u32 %v10095_v27, %v7362_v43 }
 0x1cc   :  { %5660 = vmatpush.bf16.msra.mxu0 %v7443_v52  ;;  %v7778_v52 = vld [vmem:[%s15935_s1 + $0x968] sm:$0xf]  ;;  %v5434_v2 = vpop.f32.mrf.mxu2  ;;  %v5410_v26 = vpop.f32.mrf.mxu0  ;;  %v10127_v54 = vld [vmem:[%s15935_s1 + $0x734] sm:$0xf0] }
 0x1cd   :  { %5673 = vmatpush.bf16.msra.mxu1 %v7571_v55  ;;  %v10199_v55 = vld [vmem:[%s15935_s1 + $0x974] sm:$0xf0]  ;;  %v7491_v61 = vor.u32 %v10127_v54, %v7490_v50  ;;  %v7474_v63 = vld [vmem:[%s15935_s1 + $0x708] sm:$0xf] }
 0x1ce   :  { %5686 = vmatpush.bf16.msra.mxu2 %v7699_v4  ;;  %v7395_v4 = vor.u32 %v10103_v58, %v7394_v48  ;;  %v7779_v14 = vor.u32 %v10199_v55, %v7778_v52  ;;  %v7746_v48 = vld [vmem:[%s15935_s1 + $0x928] sm:$0xf]  ;;  %v10191_v58 = vld [vmem:[%s15935_s1 + $0x934] sm:$0xf0] }
 0x1cf   :  { %5699 = vmatpush.bf16.msra.mxu3 %v7827_v9  ;;  %v10099_v9 = vld [vmem:[%s15935_s1 + $0x654] sm:$0xf0]  ;;  %v7602_v55 = vld [vmem:[%s15935_s1 + $0x808] sm:$0xf] }
 0x1d0   :  { %5661 = vmatpush.bf16.msra.mxu0 %v7427_v53  ;;  %v10163_v53 = vld [vmem:[%s15935_s1 + $0x854] sm:$0xf0]  ;;  %v7970_v10 = vld [vmem:[%s15935_s1 + $0xae8] sm:$0xf] }
 0x1d1   :  { %5674 = vmatpush.bf16.msra.mxu1 %v7555_v17  ;;  %v5435_v17 = vadd.f32 %v5434_v2, %v5422_v60  ;;  %v7635_v40 = vor.u32 %v10163_v53, %v7634_v15  ;;  %v10091_v60 = vld [vmem:[%s15935_s1 + $0x614] sm:$0xf0]  ;;  %v8098_v2 = vld [vmem:[%s15935_s1 + $0xbe8] sm:$0xf] }
 0x1d2   :  { %5687 = vmatpush.bf16.msra.mxu2 %v7683_v21  ;;  %v5447_v21 = vpop.f32.mrf.mxu3  ;;  %v5423_v34 = vpop.f32.mrf.mxu1  ;;  %v10123_v52 = vld [vmem:[%s15935_s1 + $0x714] sm:$0xf0]  ;;  %v8354_v26 = vld [vmem:[%s15935_s1 + $0xde8] sm:$0xf] }
 0x1d3   :  { %5700 = vmatpush.bf16.msra.mxu3 %v7811_v32  ;;  %v7379_v32 = vor.u32 %v10099_v9, %v7378_v8  ;;  %v13774_v36 = vadd.f32 %v5447_v21, %v5435_v17  ;;  %v10187_v8 = vld [vmem:[%s15935_s1 + $0x914] sm:$0xf0]  ;;  %v8226_v17 = vld [vmem:[%s15935_s1 + $0xce8] sm:$0xf] }
 0x1d4   :  { %5662 = vmatpush.bf16.msra.mxu0 %v7411_v51  ;;  %v7763_v51 = vor.u32 %v10195_v13, %v7762_v24  ;;  %v5436_v9 = vpop.f32.mrf.mxu2  ;;  %v10279_v53 = vld [vmem:[%s15935_s1 + $0xbf4] sm:$0xf0]  ;;  %v7475_v24 = vor.u32 %v10123_v52, %v7474_v63  ;;  %v7954_v27 = vld [vmem:[%s15935_s1 + $0xac8] sm:$0xf] }
 0x1d5   :  { %5675 = vmatpush.bf16.msra.mxu1 %v7539_v56  ;;  %v7618_v56 = vld [vmem:[%s15935_s1 + $0x828] sm:$0xf]  ;;  %v10311_v21 = vld [vmem:[%s15935_s1 + $0xcf4] sm:$0xf0] }
 0x1d6   :  { %5688 = vmatpush.bf16.msra.mxu2 %v7667_v57  ;;  %v10159_v57 = vld [vmem:[%s15935_s1 + $0x834] sm:$0xf0]  ;;  %v8227_v43 = vor.u32 %v10311_v21, %v8226_v17  ;;  %v8066_v52 = vld [vmem:[%s15935_s1 + $0xba8] sm:$0xf] }
 0x1d7   :  { %5701 = vmatpush.bf16.msra.mxu3 %v7795_v47  ;;  %v7346_v47 = vld [vmem:[%s15935_s1 + $0x608] sm:$0xf]  ;;  %v7619_v62 = vor.u32 %v10159_v57, %v7618_v56  ;;  %v10243_v50 = vld [vmem:[%s15935_s1 + $0xad4] sm:$0xf0] }
 0x1d8   :  { %5663 = vmatpush.bf16.msra.mxu0 %v7395_v4  ;;  %v7747_v4 = vor.u32 %v10191_v58, %v7746_v48  ;;  %v7347_v15 = vor.u32 %v10091_v60, %v7346_v47  ;;  %v10275_v56 = vld [vmem:[%s15935_s1 + $0xbd4] sm:$0xf0]  ;;  %v8210_v57 = vld [vmem:[%s15935_s1 + $0xcc8] sm:$0xf]  ;;  %v7955_v47 = vor.u32 %v10243_v50, %v7954_v27 }
 0x1d9   :  { %5676 = vmatpush.bf16.msra.mxu1 %v7523_v5  ;;  %v10155_v5 = vld [vmem:[%s15935_s1 + $0x814] sm:$0xf0]  ;;  %v8338_v58 = vld [vmem:[%s15935_s1 + $0xdc8] sm:$0xf] }
 0x1da   :  { %5689 = vmatpush.bf16.msra.mxu2 %v7651_v6  ;;  %v7730_v6 = vld [vmem:[%s15935_s1 + $0x908] sm:$0xf]  ;;  %v5449_v0 = vpop.f32.mrf.mxu3  ;;  %v7603_v13 = vor.u32 %v10155_v5, %v7602_v55  ;;  %v10307_v48 = vld [vmem:[%s15935_s1 + $0xcd4] sm:$0xf0] }
 0x1db   :  { %5702 = vmatpush.bf16.msra.mxu3 %v7779_v14  ;;  %v10247_v14 = vld [vmem:[%s15935_s1 + $0xaf4] sm:$0xf0]  ;;  %v7731_v34 = vor.u32 %v10187_v8, %v7730_v6  ;;  %v8194_v5 = vld [vmem:[%s15935_s1 + $0xca8] sm:$0xf] }
 0x1dc   :  { %5664 = vmatpush.bf16.msra.mxu0 %v7379_v32  ;;  %v10343_v32 = vld [vmem:[%s15935_s1 + $0xdf4] sm:$0xf0]  ;;  %v8322_v8 = vld [vmem:[%s15935_s1 + $0xda8] sm:$0xf] }
 0x1dd   :  { %5677 = vmatpush.bf16.msra.mxu1 %v7507_v39  ;;  %v7971_v39 = vor.u32 %v10247_v14, %v7970_v10  ;;  %v8355_v54 = vor.u32 %v10343_v32, %v8354_v26  ;;  %v10239_v63 = vld [vmem:[%s15935_s1 + $0xab4] sm:$0xf0]  ;;  %v7922_v0 = vld [vmem:[%s15935_s1 + $0xa88] sm:$0xf] }
 0x1de   :  { %5690 = vmatpush.bf16.msra.mxu2 %v7635_v40  ;;  %v8099_v40 = vor.u32 %v10279_v53, %v8098_v2  ;;  %v10303_v6 = vld [vmem:[%s15935_s1 + $0xcb4] sm:$0xf0]  ;;  %v8050_v53 = vld [vmem:[%s15935_s1 + $0xb88] sm:$0xf] }
 0x1df   :  { %5703 = vmatpush.bf16.msra.mxu3 %v7763_v51  ;;  %v8082_v51 = vld [vmem:[%s15935_s1 + $0xbc8] sm:$0xf]  ;;  %v10335_v9 = vld [vmem:[%s15935_s1 + $0xdb4] sm:$0xf0]  ;;  %v8195_v2 = vor.u32 %v10303_v6, %v8194_v5 }
 0x1e0   :  { %5665 = vmatpush.bf16.msra.mxu0 %v7363_v59  ;;  %v10339_v59 = vld [vmem:[%s15935_s1 + $0xdd4] sm:$0xf0]  ;;  %v8083_v60 = vor.u32 %v10275_v56, %v8082_v51  ;;  %v8323_v17 = vor.u32 %v10335_v9, %v8322_v8  ;;  %v8306_v32 = vld [vmem:[%s15935_s1 + $0xd88] sm:$0xf] }
 0x1e1   :  { %5678 = vmatpush.bf16.msra.mxu1 %v7491_v61  ;;  %v8211_v61 = vor.u32 %v10307_v48, %v8210_v57  ;;  %v8339_v55 = vor.u32 %v10339_v59, %v8338_v58  ;;  %v10267_v21 = vld [vmem:[%s15935_s1 + $0xb94] sm:$0xf0]  ;;  %v7906_v51 = vld [vmem:[%s15935_s1 + $0xa68] sm:$0xf] }
 0x1e2   :  { %5691 = vmatpush.bf16.msra.mxu2 %v7619_v62  ;;  %v7938_v62 = vld [vmem:[%s15935_s1 + $0xaa8] sm:$0xf]  ;;  %v8051_v27 = vor.u32 %v10267_v21, %v8050_v53  ;;  %v10263_v48 = vld [vmem:[%s15935_s1 + $0xb74] sm:$0xf0] }
 0x1e3   :  { %5704 = vmatpush.bf16.msra.mxu3 %v7747_v4  ;;  %v10271_v4 = vld [vmem:[%s15935_s1 + $0xbb4] sm:$0xf0]  ;;  %v7939_v10 = vor.u32 %v10239_v63, %v7938_v62  ;;  %v8034_v56 = vld [vmem:[%s15935_s1 + $0xb68] sm:$0xf] }
 0x1e4   :  { %5666 = vmatpush.bf16.msra.mxu0 %v7347_v15  ;;  %v8067_v14 = vor.u32 %v10271_v4, %v8066_v52  ;;  %v10235_v15 = vld [vmem:[%s15935_s1 + $0xa94] sm:$0xf0]  ;;  %v5460_v26 = vpop.f32.mrf.mxu0  ;;  %v8162_v58 = vld [vmem:[%s15935_s1 + $0xc68] sm:$0xf]  ;;  %v8035_v62 = vor.u32 %v10263_v48, %v8034_v56 }
 0x1e5   :  { %5679 = vmatpush.bf16.msra.mxu1 %v7475_v24  ;;  %v8178_v24 = vld [vmem:[%s15935_s1 + $0xc88] sm:$0xf]  ;;  %v10295_v59 = vld [vmem:[%s15935_s1 + $0xc74] sm:$0xf0] }
 0x1e6   :  { %5692 = vmatpush.bf16.msra.mxu2 %v7603_v13  ;;  %v10299_v13 = vld [vmem:[%s15935_s1 + $0xc94] sm:$0xf0]  ;;  %v8163_v63 = vor.u32 %v10295_v59, %v8162_v58  ;;  %v7890_v52 = vld [vmem:[%s15935_s1 + $0xa48] sm:$0xf] }
 0x1e7   :  { %5705 = vmatpush.bf16.msra.mxu3 %v7731_v34  ;;  %5667 = vmatmul.bf16.vlgmr.msra.gmra.mxu0 %v11212_v38  ;;  %v10331_v34 = vld [vmem:[%s15935_s1 + $0xd94] sm:$0xf0]  ;;  %v8179_v50 = vor.u32 %v10299_v13, %v8178_v24  ;;  %v8018_v4 = vld [vmem:[%s15935_s1 + $0xb48] sm:$0xf] }
 0x1e8   :  { %5711 = vmatpush.bf16.msrb.mxu0 %v7971_v39  ;;  %5680 = vmatmul.bf16.vlgmr.msra.gmra.mxu1 %v11222_v42  ;;  %v5461_v39 = vadd.f32 %v5460_v26, %v13774_v36  ;;  %v8307_v36 = vor.u32 %v10331_v34, %v8306_v32  ;;  %v10259_v8 = vld [vmem:[%s15935_s1 + $0xb54] sm:$0xf0]  ;;  %v8146_v9 = vld [vmem:[%s15935_s1 + $0xc48] sm:$0xf] }
 0x1e9   :  { %5724 = vmatpush.bf16.msrb.mxu1 %v8099_v40  ;;  %5693 = vmatmul.bf16.vlgmr.msra.gmra.mxu2 %v11413_v25  ;;  %v7923_v40 = vor.u32 %v10235_v15, %v7922_v0  ;;  %v8274_v0 = vld [vmem:[%s15935_s1 + $0xd48] sm:$0xf]  ;;  %v10323_v15 = vld [vmem:[%s15935_s1 + $0xd54] sm:$0xf0]  ;;  %v8019_v13 = vor.u32 %v10259_v8, %v8018_v4 }
 0x1ea   :  { %5737 = vmatpush.bf16.msrb.mxu2 %v8227_v43  ;;  %5706 = vmatmul.bf16.vlgmr.msra.gmra.mxu3 %v11426_v30  ;;  %v5473_v43 = vpop.f32.mrf.mxu1  ;;  %v7874_v32 = vld [vmem:[%s15935_s1 + $0xa28] sm:$0xf]  ;;  %v10223_v34 = vld [vmem:[%s15935_s1 + $0xa34] sm:$0xf0] }
 0x1eb   :  { %5750 = vmatpush.bf16.msrb.mxu3 %v8355_v54  ;;  %v10231_v54 = vld [vmem:[%s15935_s1 + $0xa74] sm:$0xf0]  ;;  %v5474_v57 = vadd.f32 %v5473_v43, %v5461_v39  ;;  %v8002_v39 = vld [vmem:[%s15935_s1 + $0xb28] sm:$0xf]  ;;  %v7875_v56 = vor.u32 %v10223_v34, %v7874_v32 }
 0x1ec   :  { %5712 = vmatpush.bf16.msrb.mxu0 %v7955_v47  ;;  %v8290_v47 = vld [vmem:[%s15935_s1 + $0xd68] sm:$0xf]  ;;  %v5486_v6 = vpop.f32.mrf.mxu2  ;;  %v5462_v53 = vpop.f32.mrf.mxu0  ;;  %v10255_v43 = vld [vmem:[%s15935_s1 + $0xb34] sm:$0xf0] }
 0x1ed   :  { %5725 = vmatpush.bf16.msrb.mxu1 %v8083_v60  ;;  %v10327_v60 = vld [vmem:[%s15935_s1 + $0xd74] sm:$0xf0]  ;;  %v8003_v48 = vor.u32 %v10255_v43, %v8002_v39  ;;  %v7986_v59 = vld [vmem:[%s15935_s1 + $0xb08] sm:$0xf] }
 0x1ee   :  { %5738 = vmatpush.bf16.msrb.mxu2 %v8211_v61  ;;  %v7907_v61 = vor.u32 %v10231_v54, %v7906_v51  ;;  %v8291_v5 = vor.u32 %v10327_v60, %v8290_v47  ;;  %v8258_v51 = vld [vmem:[%s15935_s1 + $0xd28] sm:$0xf]  ;;  %v10319_v54 = vld [vmem:[%s15935_s1 + $0xd34] sm:$0xf0] }
 0x1ef   :  { %5751 = vmatpush.bf16.msrb.mxu3 %v8339_v55  ;;  %v10227_v55 = vld [vmem:[%s15935_s1 + $0xa54] sm:$0xf0]  ;;  %v8114_v60 = vld [vmem:[%s15935_s1 + $0xc08] sm:$0xf] }
 0x1f0   :  { %5713 = vmatpush.bf16.msrb.mxu0 %v7939_v10  ;;  %v10291_v10 = vld [vmem:[%s15935_s1 + $0xc54] sm:$0xf0]  ;;  %v8482_v4 = vld [vmem:[%s15935_s1 + $0xee8] sm:$0xf] }
 0x1f1   :  { %5726 = vmatpush.bf16.msrb.mxu1 %v8067_v14  ;;  %v5487_v14 = vadd.f32 %v5486_v6, %v5474_v57  ;;  %v8147_v26 = vor.u32 %v10291_v10, %v8146_v9  ;;  %v10219_v57 = vld [vmem:[%s15935_s1 + $0xa14] sm:$0xf0]  ;;  %v8610_v6 = vld [vmem:[%s15935_s1 + $0xfe8] sm:$0xf] }
 0x1f2   :  { %5739 = vmatpush.bf16.msrb.mxu2 %v8195_v2  ;;  %v5499_v2 = vpop.f32.mrf.mxu3  ;;  %v5475_v21 = vpop.f32.mrf.mxu1  ;;  %v10251_v47 = vld [vmem:[%s15935_s1 + $0xb14] sm:$0xf0]  ;;  %v8866_v53 = vld [vmem:[%s15935_s1 + $0x11e8] sm:$0xf] }
 0x1f3   :  { %5752 = vmatpush.bf16.msrb.mxu3 %v8323_v17  ;;  %v7891_v17 = vor.u32 %v10227_v55, %v7890_v52  ;;  %v13973_v24 = vadd.f32 %v5499_v2, %v5487_v14  ;;  %v10315_v52 = vld [vmem:[%s15935_s1 + $0xd14] sm:$0xf0]  ;;  %v8738_v14 = vld [vmem:[%s15935_s1 + $0x10e8] sm:$0xf] }
 0x1f4   :  { %5714 = vmatpush.bf16.msrb.mxu0 %v7923_v40  ;;  %v8275_v40 = vor.u32 %v10323_v15, %v8274_v0  ;;  %v5488_v55 = vpop.f32.mrf.mxu2  ;;  %v10407_v10 = vld [vmem:[%s15935_s1 + $0xff4] sm:$0xf0]  ;;  %v7987_v0 = vor.u32 %v10251_v47, %v7986_v59  ;;  %v8466_v34 = vld [vmem:[%s15935_s1 + $0xec8] sm:$0xf] }
 0x1f5   :  { %5727 = vmatpush.bf16.msrb.mxu1 %v8051_v27  ;;  %v8130_v27 = vld [vmem:[%s15935_s1 + $0xc28] sm:$0xf]  ;;  %v10439_v2 = vld [vmem:[%s15935_s1 + $0x10f4] sm:$0xf0] }
 0x1f6   :  { %5740 = vmatpush.bf16.msrb.mxu2 %v8179_v50  ;;  %v10287_v50 = vld [vmem:[%s15935_s1 + $0xc34] sm:$0xf0]  ;;  %v8739_v32 = vor.u32 %v10439_v2, %v8738_v14  ;;  %v8578_v47 = vld [vmem:[%s15935_s1 + $0xfa8] sm:$0xf] }
 0x1f7   :  { %5753 = vmatpush.bf16.msrb.mxu3 %v8307_v36  ;;  %v7858_v36 = vld [vmem:[%s15935_s1 + $0xa08] sm:$0xf]  ;;  %v8131_v58 = vor.u32 %v10287_v50, %v8130_v27  ;;  %v10371_v39 = vld [vmem:[%s15935_s1 + $0xed4] sm:$0xf0] }
 0x1f8   :  { %5715 = vmatpush.bf16.msrb.mxu0 %v7907_v61  ;;  %v8259_v61 = vor.u32 %v10319_v54, %v8258_v51  ;;  %v7859_v9 = vor.u32 %v10219_v57, %v7858_v36  ;;  %v10403_v27 = vld [vmem:[%s15935_s1 + $0xfd4] sm:$0xf0]  ;;  %v8722_v50 = vld [vmem:[%s15935_s1 + $0x10c8] sm:$0xf]  ;;  %v8467_v36 = vor.u32 %v10371_v39, %v8466_v34 }
 0x1f9   :  { %5728 = vmatpush.bf16.msrb.mxu1 %v8035_v62  ;;  %v10283_v62 = vld [vmem:[%s15935_s1 + $0xc14] sm:$0xf0]  ;;  %v8850_v54 = vld [vmem:[%s15935_s1 + $0x11c8] sm:$0xf] }
 0x1fa   :  { %5741 = vmatpush.bf16.msrb.mxu2 %v8163_v63  ;;  %v8242_v63 = vld [vmem:[%s15935_s1 + $0xd08] sm:$0xf]  ;;  %v5501_v8 = vpop.f32.mrf.mxu3  ;;  %v8115_v15 = vor.u32 %v10283_v62, %v8114_v60  ;;  %v10435_v51 = vld [vmem:[%s15935_s1 + $0x10d4] sm:$0xf0] }
 0x1fb   :  { %5754 = vmatpush.bf16.msrb.mxu3 %v8291_v5  ;;  %v10375_v5 = vld [vmem:[%s15935_s1 + $0xef4] sm:$0xf0]  ;;  %v8243_v21 = vor.u32 %v10315_v52, %v8242_v63  ;;  %v8706_v62 = vld [vmem:[%s15935_s1 + $0x10a8] sm:$0xf] }
 0x1fc   :  { %5716 = vmatpush.bf16.msrb.mxu0 %v7891_v17  ;;  %v10471_v17 = vld [vmem:[%s15935_s1 + $0x11f4] sm:$0xf0]  ;;  %v8834_v52 = vld [vmem:[%s15935_s1 + $0x11a8] sm:$0xf] }
 0x1fd   :  { %5729 = vmatpush.bf16.msrb.mxu1 %v8019_v13  ;;  %v8483_v13 = vor.u32 %v10375_v5, %v8482_v4  ;;  %v8867_v43 = vor.u32 %v10471_v17, %v8866_v53  ;;  %v10367_v59 = vld [vmem:[%s15935_s1 + $0xeb4] sm:$0xf0]  ;;  %v8434_v8 = vld [vmem:[%s15935_s1 + $0xe88] sm:$0xf] }
 0x1fe   :  { %5742 = vmatpush.bf16.msrb.mxu2 %v8147_v26  ;;  %v8611_v26 = vor.u32 %v10407_v10, %v8610_v6  ;;  %v10431_v63 = vld [vmem:[%s15935_s1 + $0x10b4] sm:$0xf0]  ;;  %v8562_v10 = vld [vmem:[%s15935_s1 + $0xf88] sm:$0xf] }
 0x1ff   :  { %5755 = vmatpush.bf16.msrb.mxu3 %v8275_v40  ;;  %v8594_v40 = vld [vmem:[%s15935_s1 + $0xfc8] sm:$0xf]  ;;  %v10463_v55 = vld [vmem:[%s15935_s1 + $0x11b4] sm:$0xf0]  ;;  %v8707_v6 = vor.u32 %v10431_v63, %v8706_v62 }
 0x200   :  { %5717 = vmatpush.bf16.msrb.mxu0 %v7875_v56  ;;  %v10467_v56 = vld [vmem:[%s15935_s1 + $0x11d4] sm:$0xf0]  ;;  %v8595_v57 = vor.u32 %v10403_v27, %v8594_v40  ;;  %v8835_v14 = vor.u32 %v10463_v55, %v8834_v52  ;;  %v8818_v17 = vld [vmem:[%s15935_s1 + $0x1188] sm:$0xf] }
 0x201   :  { %5730 = vmatpush.bf16.msrb.mxu1 %v8003_v48  ;;  %v8723_v48 = vor.u32 %v10435_v51, %v8722_v50  ;;  %v8851_v60 = vor.u32 %v10467_v56, %v8850_v54  ;;  %v10395_v2 = vld [vmem:[%s15935_s1 + $0xf94] sm:$0xf0]  ;;  %v8418_v40 = vld [vmem:[%s15935_s1 + $0xe68] sm:$0xf] }
 0x202   :  { %5743 = vmatpush.bf16.msrb.mxu2 %v8131_v58  ;;  %v8450_v58 = vld [vmem:[%s15935_s1 + $0xea8] sm:$0xf]  ;;  %v8563_v34 = vor.u32 %v10395_v2, %v8562_v10  ;;  %v10391_v51 = vld [vmem:[%s15935_s1 + $0xf74] sm:$0xf0] }
 0x203   :  { %5756 = vmatpush.bf16.msrb.mxu3 %v8259_v61  ;;  %v10399_v61 = vld [vmem:[%s15935_s1 + $0xfb4] sm:$0xf0]  ;;  %v8451_v4 = vor.u32 %v10367_v59, %v8450_v58  ;;  %v8546_v27 = vld [vmem:[%s15935_s1 + $0xf68] sm:$0xf] }
 0x204   :  { %5718 = vmatpush.bf16.msrb.mxu0 %v7859_v9  ;;  %v8579_v5 = vor.u32 %v10399_v61, %v8578_v47  ;;  %v10363_v9 = vld [vmem:[%s15935_s1 + $0xe94] sm:$0xf0]  ;;  %v5512_v53 = vpop.f32.mrf.mxu0  ;;  %v8674_v54 = vld [vmem:[%s15935_s1 + $0x1068] sm:$0xf]  ;;  %v8547_v58 = vor.u32 %v10391_v51, %v8546_v27 }
 0x205   :  { %5731 = vmatpush.bf16.msrb.mxu1 %v7987_v0  ;;  %v8690_v0 = vld [vmem:[%s15935_s1 + $0x1088] sm:$0xf]  ;;  %v10423_v56 = vld [vmem:[%s15935_s1 + $0x1074] sm:$0xf0] }
 0x206   :  { %5744 = vmatpush.bf16.msrb.mxu2 %v8115_v15  ;;  %v10427_v15 = vld [vmem:[%s15935_s1 + $0x1094] sm:$0xf0]  ;;  %v8675_v59 = vor.u32 %v10423_v56, %v8674_v54  ;;  %v8402_v47 = vld [vmem:[%s15935_s1 + $0xe48] sm:$0xf] }
 0x207   :  { %5757 = vmatpush.bf16.msrb.mxu3 %v8243_v21  ;;  %5719 = vmatmul.bf16.vlgmr.msrb.gmra.mxu0 %v11424_v29  ;;  %v10459_v21 = vld [vmem:[%s15935_s1 + $0x1194] sm:$0xf0]  ;;  %v8691_v39 = vor.u32 %v10427_v15, %v8690_v0  ;;  %v8530_v61 = vld [vmem:[%s15935_s1 + $0xf48] sm:$0xf] }
 0x208   :  { %5763 = vmatpush.bf16.msra.mxu0 %v8483_v13  ;;  %5732 = vmatmul.bf16.vlgmr.msrb.gmra.mxu1 %v11434_v33  ;;  %v5513_v13 = vadd.f32 %v5512_v53, %v13973_v24  ;;  %v8819_v24 = vor.u32 %v10459_v21, %v8818_v17  ;;  %v10387_v52 = vld [vmem:[%s15935_s1 + $0xf54] sm:$0xf0]  ;;  %v8658_v55 = vld [vmem:[%s15935_s1 + $0x1048] sm:$0xf] }
 0x209   :  { %5776 = vmatpush.bf16.msra.mxu1 %v8611_v26  ;;  %5745 = vmatmul.bf16.vlgmr.msrb.gmra.mxu2 %v11623_v23  ;;  %v8435_v26 = vor.u32 %v10363_v9, %v8434_v8  ;;  %v8786_v8 = vld [vmem:[%s15935_s1 + $0x1148] sm:$0xf]  ;;  %v10451_v9 = vld [vmem:[%s15935_s1 + $0x1154] sm:$0xf0]  ;;  %v8531_v15 = vor.u32 %v10387_v52, %v8530_v61 }
 0x20a   :  { %5789 = vmatpush.bf16.msra.mxu2 %v8739_v32  ;;  %5758 = vmatmul.bf16.vlgmr.msrb.gmra.mxu3 %v11636_v31  ;;  %v5525_v32 = vpop.f32.mrf.mxu1  ;;  %v8386_v17 = vld [vmem:[%s15935_s1 + $0xe28] sm:$0xf]  ;;  %v10351_v21 = vld [vmem:[%s15935_s1 + $0xe34] sm:$0xf0] }
 0x20b   :  { %5802 = vmatpush.bf16.msra.mxu3 %v8867_v43  ;;  %v10359_v43 = vld [vmem:[%s15935_s1 + $0xe74] sm:$0xf0]  ;;  %v5526_v50 = vadd.f32 %v5525_v32, %v5513_v13  ;;  %v8514_v13 = vld [vmem:[%s15935_s1 + $0xf28] sm:$0xf]  ;;  %v8387_v27 = vor.u32 %v10351_v21, %v8386_v17 }
 0x20c   :  { %5764 = vmatpush.bf16.msra.mxu0 %v8467_v36  ;;  %v8802_v36 = vld [vmem:[%s15935_s1 + $0x1168] sm:$0xf]  ;;  %v5538_v63 = vpop.f32.mrf.mxu2  ;;  %v5514_v10 = vpop.f32.mrf.mxu0  ;;  %v10383_v32 = vld [vmem:[%s15935_s1 + $0xf34] sm:$0xf0] }
 0x20d   :  { %5777 = vmatpush.bf16.msra.mxu1 %v8595_v57  ;;  %v10455_v57 = vld [vmem:[%s15935_s1 + $0x1174] sm:$0xf0]  ;;  %v8515_v51 = vor.u32 %v10383_v32, %v8514_v13  ;;  %v8498_v56 = vld [vmem:[%s15935_s1 + $0xf08] sm:$0xf] }
 0x20e   :  { %5790 = vmatpush.bf16.msra.mxu2 %v8723_v48  ;;  %v8419_v48 = vor.u32 %v10359_v43, %v8418_v40  ;;  %v8803_v62 = vor.u32 %v10455_v57, %v8802_v36  ;;  %v8770_v40 = vld [vmem:[%s15935_s1 + $0x1128] sm:$0xf]  ;;  %v10447_v43 = vld [vmem:[%s15935_s1 + $0x1134] sm:$0xf0] }
 0x20f   :  { %5803 = vmatpush.bf16.msra.mxu3 %v8851_v60  ;;  %v10355_v60 = vld [vmem:[%s15935_s1 + $0xe54] sm:$0xf0]  ;;  %v8626_v57 = vld [vmem:[%s15935_s1 + $0x1008] sm:$0xf] }
 0x210   :  { %5765 = vmatpush.bf16.msra.mxu0 %v8451_v4  ;;  %v10419_v4 = vld [vmem:[%s15935_s1 + $0x1054] sm:$0xf0]  ;;  %v8994_v61 = vld [vmem:[%s15935_s1 + $0x12e8] sm:$0xf] }
 0x211   :  { %5778 = vmatpush.bf16.msra.mxu1 %v8579_v5  ;;  %v5539_v5 = vadd.f32 %v5538_v63, %v5526_v50  ;;  %v8659_v53 = vor.u32 %v10419_v4, %v8658_v55  ;;  %v10347_v50 = vld [vmem:[%s15935_s1 + $0xe14] sm:$0xf0]  ;;  %v9122_v63 = vld [vmem:[%s15935_s1 + $0x13e8] sm:$0xf] }
 0x212   :  { %5791 = vmatpush.bf16.msra.mxu2 %v8707_v6  ;;  %v5551_v6 = vpop.f32.mrf.mxu3  ;;  %v5527_v2 = vpop.f32.mrf.mxu1  ;;  %v10379_v36 = vld [vmem:[%s15935_s1 + $0xf14] sm:$0xf0]  ;;  %v9378_v10 = vld [vmem:[%s15935_s1 + $0x15e8] sm:$0xf] }
 0x213   :  { %5804 = vmatpush.bf16.msra.mxu3 %v8835_v14  ;;  %v8403_v14 = vor.u32 %v10355_v60, %v8402_v47  ;;  %v14172_v0 = vadd.f32 %v5551_v6, %v5539_v5  ;;  %v10443_v47 = vld [vmem:[%s15935_s1 + $0x1114] sm:$0xf0]  ;;  %v9250_v5 = vld [vmem:[%s15935_s1 + $0x14e8] sm:$0xf] }
 0x214   :  { %5766 = vmatpush.bf16.msra.mxu0 %v8435_v26  ;;  %v8787_v26 = vor.u32 %v10451_v9, %v8786_v8  ;;  %v5540_v60 = vpop.f32.mrf.mxu2  ;;  %v10535_v4 = vld [vmem:[%s15935_s1 + $0x13f4] sm:$0xf0]  ;;  %v8499_v8 = vor.u32 %v10379_v36, %v8498_v56  ;;  %v8978_v21 = vld [vmem:[%s15935_s1 + $0x12c8] sm:$0xf] }
 0x215   :  { %5779 = vmatpush.bf16.msra.mxu1 %v8563_v34  ;;  %v8642_v34 = vld [vmem:[%s15935_s1 + $0x1028] sm:$0xf]  ;;  %v10567_v6 = vld [vmem:[%s15935_s1 + $0x14f4] sm:$0xf0] }
 0x216   :  { %5792 = vmatpush.bf16.msra.mxu2 %v8691_v39  ;;  %v10415_v39 = vld [vmem:[%s15935_s1 + $0x1034] sm:$0xf0]  ;;  %v9251_v17 = vor.u32 %v10567_v6, %v9250_v5  ;;  %v9090_v36 = vld [vmem:[%s15935_s1 + $0x13a8] sm:$0xf] }
 0x217   :  { %5805 = vmatpush.bf16.msra.mxu3 %v8819_v24  ;;  %v8370_v24 = vld [vmem:[%s15935_s1 + $0xe08] sm:$0xf]  ;;  %v8643_v54 = vor.u32 %v10415_v39, %v8642_v34  ;;  %v10499_v13 = vld [vmem:[%s15935_s1 + $0x12d4] sm:$0xf0] }
 0x218   :  { %5767 = vmatpush.bf16.msra.mxu0 %v8419_v48  ;;  %v8771_v48 = vor.u32 %v10447_v43, %v8770_v40  ;;  %v8371_v55 = vor.u32 %v10347_v50, %v8370_v24  ;;  %v10531_v34 = vld [vmem:[%s15935_s1 + $0x13d4] sm:$0xf0]  ;;  %v9234_v39 = vld [vmem:[%s15935_s1 + $0x14c8] sm:$0xf]  ;;  %v8979_v24 = vor.u32 %v10499_v13, %v8978_v21 }
 0x219   :  { %5780 = vmatpush.bf16.msra.mxu1 %v8547_v58  ;;  %v10411_v58 = vld [vmem:[%s15935_s1 + $0x1014] sm:$0xf0]  ;;  %v9362_v43 = vld [vmem:[%s15935_s1 + $0x15c8] sm:$0xf] }
 0x21a   :  { %5793 = vmatpush.bf16.msra.mxu2 %v8675_v59  ;;  %v8754_v59 = vld [vmem:[%s15935_s1 + $0x1108] sm:$0xf]  ;;  %v5553_v52 = vpop.f32.mrf.mxu3  ;;  %v8627_v9 = vor.u32 %v10411_v58, %v8626_v57  ;;  %v10563_v40 = vld [vmem:[%s15935_s1 + $0x14d4] sm:$0xf0] }
 0x21b   :  { %5806 = vmatpush.bf16.msra.mxu3 %v8803_v62  ;;  %v10503_v62 = vld [vmem:[%s15935_s1 + $0x12f4] sm:$0xf0]  ;;  %v8755_v2 = vor.u32 %v10443_v47, %v8754_v59  ;;  %v9218_v58 = vld [vmem:[%s15935_s1 + $0x14a8] sm:$0xf] }
 0x21c   :  { %5768 = vmatpush.bf16.msra.mxu0 %v8403_v14  ;;  %v10599_v14 = vld [vmem:[%s15935_s1 + $0x15f4] sm:$0xf0]  ;;  %v9346_v47 = vld [vmem:[%s15935_s1 + $0x15a8] sm:$0xf] }
 0x21d   :  { %5781 = vmatpush.bf16.msra.mxu1 %v8531_v15  ;;  %v8995_v15 = vor.u32 %v10503_v62, %v8994_v61  ;;  %v9379_v32 = vor.u32 %v10599_v14, %v9378_v10  ;;  %v10495_v56 = vld [vmem:[%s15935_s1 + $0x12b4] sm:$0xf0]  ;;  %v8946_v52 = vld [vmem:[%s15935_s1 + $0x1288] sm:$0xf] }
 0x21e   :  { %5794 = vmatpush.bf16.msra.mxu2 %v8659_v53  ;;  %v9123_v53 = vor.u32 %v10535_v4, %v9122_v63  ;;  %v10559_v59 = vld [vmem:[%s15935_s1 + $0x14b4] sm:$0xf0]  ;;  %v9074_v4 = vld [vmem:[%s15935_s1 + $0x1388] sm:$0xf] }
 0x21f   :  { %5807 = vmatpush.bf16.msra.mxu3 %v8787_v26  ;;  %v9106_v26 = vld [vmem:[%s15935_s1 + $0x13c8] sm:$0xf]  ;;  %v10591_v60 = vld [vmem:[%s15935_s1 + $0x15b4] sm:$0xf0]  ;;  %v9219_v63 = vor.u32 %v10559_v59, %v9218_v58 }
 0x220   :  { %5769 = vmatpush.bf16.msra.mxu0 %v8387_v27  ;;  %v10595_v27 = vld [vmem:[%s15935_s1 + $0x15d4] sm:$0xf0]  ;;  %v9107_v50 = vor.u32 %v10531_v34, %v9106_v26  ;;  %v9347_v5 = vor.u32 %v10591_v60, %v9346_v47  ;;  %v9330_v14 = vld [vmem:[%s15935_s1 + $0x1588] sm:$0xf] }
 0x221   :  { %5782 = vmatpush.bf16.msra.mxu1 %v8515_v51  ;;  %v9235_v51 = vor.u32 %v10563_v40, %v9234_v39  ;;  %v9363_v57 = vor.u32 %v10595_v27, %v9362_v43  ;;  %v10523_v6 = vld [vmem:[%s15935_s1 + $0x1394] sm:$0xf0]  ;;  %v8930_v26 = vld [vmem:[%s15935_s1 + $0x1268] sm:$0xf] }
 0x222   :  { %5795 = vmatpush.bf16.msra.mxu2 %v8643_v54  ;;  %v8962_v54 = vld [vmem:[%s15935_s1 + $0x12a8] sm:$0xf]  ;;  %v9075_v21 = vor.u32 %v10523_v6, %v9074_v4  ;;  %v10519_v40 = vld [vmem:[%s15935_s1 + $0x1374] sm:$0xf0] }
 0x223   :  { %5808 = vmatpush.bf16.msra.mxu3 %v8771_v48  ;;  %v10527_v48 = vld [vmem:[%s15935_s1 + $0x13b4] sm:$0xf0]  ;;  %v8963_v61 = vor.u32 %v10495_v56, %v8962_v54  ;;  %v9058_v34 = vld [vmem:[%s15935_s1 + $0x1368] sm:$0xf] }
 0x224   :  { %5770 = vmatpush.bf16.msra.mxu0 %v8371_v55  ;;  %v9091_v62 = vor.u32 %v10527_v48, %v9090_v36  ;;  %v10491_v55 = vld [vmem:[%s15935_s1 + $0x1294] sm:$0xf0]  ;;  %v5564_v10 = vpop.f32.mrf.mxu0  ;;  %v9186_v43 = vld [vmem:[%s15935_s1 + $0x1468] sm:$0xf] }
 0x225   :  { %5783 = vmatpush.bf16.msra.mxu1 %v8499_v8  ;;  %v9202_v8 = vld [vmem:[%s15935_s1 + $0x1488] sm:$0xf]  ;;  %v10551_v27 = vld [vmem:[%s15935_s1 + $0x1474] sm:$0xf0] }
 0x226   :  { %5796 = vmatpush.bf16.msra.mxu2 %v8627_v9  ;;  %v10555_v9 = vld [vmem:[%s15935_s1 + $0x1494] sm:$0xf0]  ;;  %v9187_v48 = vor.u32 %v10551_v27, %v9186_v43  ;;  %v8914_v58 = vld [vmem:[%s15935_s1 + $0x1248] sm:$0xf] }
 0x227   :  { %5809 = vmatpush.bf16.msra.mxu3 %v8755_v2  ;;  %5771 = vmatmul.bf16.vlgmr.msra.gmra.mxu0 %v11634_v28  ;;  %v10587_v2 = vld [vmem:[%s15935_s1 + $0x1594] sm:$0xf0]  ;;  %v9203_v13 = vor.u32 %v10555_v9, %v9202_v8  ;;  %v9042_v47 = vld [vmem:[%s15935_s1 + $0x1348] sm:$0xf] }
 0x228   :  { %5815 = vmatpush.bf16.msrb.mxu0 %v8995_v15  ;;  %5784 = vmatmul.bf16.vlgmr.msra.gmra.mxu1 %v11644_v35  ;;  %v5565_v15 = vadd.f32 %v5564_v10, %v14172_v0  ;;  %v9331_v0 = vor.u32 %v10587_v2, %v9330_v14  ;;  %v10483_v59 = vld [vmem:[%s15935_s1 + $0x1254] sm:$0xf0]  ;;  %v8898_v2 = vld [vmem:[%s15935_s1 + $0x1228] sm:$0xf] }
 0x229   :  { %5828 = vmatpush.bf16.msrb.mxu1 %v9123_v53  ;;  %5797 = vmatmul.bf16.vlgmr.msra.gmra.mxu2 %v11833_v37  ;;  %v8947_v53 = vor.u32 %v10491_v55, %v8946_v52  ;;  %v10515_v60 = vld [vmem:[%s15935_s1 + $0x1354] sm:$0xf0]  ;;  %v9298_v52 = vld [vmem:[%s15935_s1 + $0x1548] sm:$0xf]  ;;  %v8915_v8 = vor.u32 %v10483_v59, %v8914_v58 }
 0x22a   :  { %5841 = vmatpush.bf16.msrb.mxu2 %v9251_v17  ;;  %5810 = vmatmul.bf16.vlgmr.msra.gmra.mxu3 %v11846_v46  ;;  %v5577_v17 = vpop.f32.mrf.mxu1  ;;  %v10579_v55 = vld [vmem:[%s15935_s1 + $0x1554] sm:$0xf0]  ;;  %v9043_v10 = vor.u32 %v10515_v60, %v9042_v47  ;;  %v9506_v47 = vld [vmem:[%s15935_s1 + $0x16e8] sm:$0xf] }
 0x22b   :  { %5854 = vmatpush.bf16.msrb.mxu3 %v9379_v32  ;;  %v10487_v32 = vld [vmem:[%s15935_s1 + $0x1274] sm:$0xf0]  ;;  %v5578_v39 = vadd.f32 %v5577_v17, %v5565_v15  ;;  %v9634_v60 = vld [vmem:[%s15935_s1 + $0x17e8] sm:$0xf] }
 0x22c   :  { %5816 = vmatpush.bf16.msrb.mxu0 %v8979_v24  ;;  %v9314_v24 = vld [vmem:[%s15935_s1 + $0x1568] sm:$0xf]  ;;  %v8931_v36 = vor.u32 %v10487_v32, %v8930_v26  ;;  %v5566_v6 = vpop.f32.mrf.mxu0  ;;  %v10479_v15 = vld [vmem:[%s15935_s1 + $0x1234] sm:$0xf0] }
 0x22d   :  { %5829 = vmatpush.bf16.msrb.mxu1 %v9107_v50  ;;  %v10583_v50 = vld [vmem:[%s15935_s1 + $0x1574] sm:$0xf0]  ;;  %v14351_v56 = vpack.c.bf16 %v5578_v39, %v13127_v3  ;;  %v9154_v26 = vld [vmem:[%s15935_s1 + $0x1428] sm:$0xf]  ;;  %v8899_v39 = vor.u32 %v10479_v15, %v8898_v2  ;;  %v9925_v6 = vld [vmem:[%s15935_s1 + $0xec] sm:$0xf] }
 0x22e   :  { %5842 = vmatpush.bf16.msrb.mxu2 %v9235_v51  ;;  %v10730_v51 = vld [vmem:[%s15937_s2] sm:$0xf]  ;;  %v9315_v3 = vor.u32 %v10583_v50, %v9314_v24  ;;  %v10543_v32 = vld [vmem:[%s15935_s1 + $0x1434] sm:$0xf0]  ;;  %v9010_v50 = vld [vmem:[%s15935_s1 + $0x1308] sm:$0xf] }
 0x22f   :  { %5855 = vmatpush.bf16.msrb.mxu3 %v9363_v57  ;;  %v837_v54 = vperm.slane %v10730_v51, 2  ;;  %v9059_v57 = vor.u32 %v10519_v40, %v9058_v34  ;;  %v9282_v34 = vld [vmem:[%s15935_s1 + $0x1528] sm:$0xf]  ;;  %v10475_v43 = vld [vmem:[%s15935_s1 + $0x1214] sm:$0xf0]  ;;  %v9155_v24 = vor.u32 %v10543_v32, %v9154_v26 }
 0x230   :  { %5817 = vmatpush.bf16.msrb.mxu0 %v8963_v61  ;;  %v9170_v61 = vld [vmem:[%s15935_s1 + $0x1448] sm:$0xf]  ;;  %v10507_v51 = vld [vmem:[%s15935_s1 + $0x1314] sm:$0xf0] }
 0x231   :  { %5830 = vmatpush.bf16.msrb.mxu1 %v9091_v62  ;;  %v10547_v62 = vld [vmem:[%s15935_s1 + $0x1454] sm:$0xf0]  ;;  %v8882_v40 = vld [vmem:[%s15935_s1 + $0x1208] sm:$0xf] }
 0x232   :  { %5843 = vmatpush.bf16.msrb.mxu2 %v9219_v63  ;;  %v5590_v63 = vpop.f32.mrf.mxu2  ;;  %v5579_v9 = vpop.f32.mrf.mxu1  ;;  %v9171_v14 = vor.u32 %v10547_v62, %v9170_v61  ;;  %v10571_v58 = vld [vmem:[%s15935_s1 + $0x1514] sm:$0xf0]  ;;  %v8883_v62 = vor.u32 %v10475_v43, %v8882_v40  ;;  %v9490_v15 = vld [vmem:[%s15935_s1 + $0x16c8] sm:$0xf] }
 0x233   :  { %5856 = vmatpush.bf16.msrb.mxu3 %v9347_v5  ;;  %v5591_v4 = vadd.f32 %v5590_v63, %v837_v54  ;;  %v5603_v5 = vpop.f32.mrf.mxu3  ;;  %v9138_v54 = vld [vmem:[%s15935_s1 + $0x1408] sm:$0xf]  ;;  %v10663_v63 = vld [vmem:[%s15935_s1 + $0x17f4] sm:$0xf0] }
 0x234   :  { %5818 = vmatpush.bf16.msrb.mxu0 %v8947_v53  ;;  %v9026_v53 = vld [vmem:[%s15935_s1 + $0x1328] sm:$0xf]  ;;  %v10659_v26 = vld [vmem:[%s15935_s1 + $0x17d4] sm:$0xf0] }
 0x235   :  { %5831 = vmatpush.bf16.msrb.mxu1 %v9075_v21  ;;  %v14386_v17 = vadd.f32 %v5603_v5, %v5591_v4  ;;  %v9299_v21 = vor.u32 %v10579_v55, %v9298_v52  ;;  %v9762_v52 = vld [vmem:[%s15935_s1 + $0x18e8] sm:$0xf]  ;;  %v10695_v55 = vld [vmem:[%s15935_s1 + $0x18f4] sm:$0xf0]  ;;  %v9011_v4 = vor.u32 %v10507_v51, %v9010_v50 }
 0x236   :  { %5844 = vmatpush.bf16.msrb.mxu2 %v9203_v13  ;;  %v10511_v13 = vld [vmem:[%s15935_s1 + $0x1334] sm:$0xf0]  ;;  %v9763_v2 = vor.u32 %v10695_v55, %v9762_v52  ;;  %v9746_v32 = vld [vmem:[%s15935_s1 + $0x18c8] sm:$0xf] }
 0x237   :  { %5857 = vmatpush.bf16.msrb.mxu3 %v9331_v0  ;;  %v10575_v0 = vld [vmem:[%s15935_s1 + $0x1534] sm:$0xf0]  ;;  %v9027_v27 = vor.u32 %v10511_v13, %v9026_v53  ;;  %v9602_v51 = vld [vmem:[%s15935_s1 + $0x17a8] sm:$0xf] }
 0x238   :  { %5819 = vmatpush.bf16.msrb.mxu0 %v8931_v36  ;;  %v9283_v36 = vor.u32 %v10575_v0, %v9282_v34  ;;  %v10627_v53 = vld [vmem:[%s15935_s1 + $0x16d4] sm:$0xf0]  ;;  %v9921_v0 = vld [vmem:[%s15935_s1 + $0xcc] sm:$0xf] }
 0x239   :  { %5832 = vmatpush.bf16.msrb.mxu1 %v9059_v57  ;;  %v10539_v57 = vld [vmem:[%s15935_s1 + $0x1414] sm:$0xf0]  ;;  %v9491_v40 = vor.u32 %v10627_v53, %v9490_v15  ;;  %v9442_v15 = vld [vmem:[%s15935_s1 + $0x1668] sm:$0xf] }
 0x23a   :  { %5845 = vmatpush.bf16.msrb.mxu2 %v9187_v48  ;;  %v9266_v48 = vld [vmem:[%s15935_s1 + $0x1508] sm:$0xf]  ;;  %v5592_v59 = vpop.f32.mrf.mxu2  ;;  %v9139_v5 = vor.u32 %v10539_v57, %v9138_v54  ;;  %v10691_v34 = vld [vmem:[%s15935_s1 + $0x18d4] sm:$0xf0] }
 0x23b   :  { %5858 = vmatpush.bf16.msrb.mxu3 %v9315_v3  ;;  %v10631_v3 = vld [vmem:[%s15935_s1 + $0x16f4] sm:$0xf0]  ;;  %v5605_v61 = vpop.f32.mrf.mxu3  ;;  %v9267_v9 = vor.u32 %v10571_v58, %v9266_v48  ;;  %v9730_v57 = vld [vmem:[%s15935_s1 + $0x18a8] sm:$0xf]  ;;  %v9917_v58 = vld [vmem:[%s15935_s1 + $0xac] sm:$0xf] }
 0x23c   :  { %5820 = vmatpush.bf16.msrb.mxu0 %v8915_v8  ;;  %v6692_v8 = vld [vmem:[%s15935_s1 + $0xf8] sm:$0xf0]  ;;  %v10623_v50 = vld [vmem:[%s15935_s1 + $0x16b4] sm:$0xf0]  ;;  %v9458_v61 = vld [vmem:[%s15935_s1 + $0x1688] sm:$0xf] }
 0x23d   :  { %5833 = vmatpush.bf16.msrb.mxu1 %v9043_v10  ;;  %v9507_v10 = vor.u32 %v10631_v3, %v9506_v47  ;;  %v6695_v13 = vor.u32 %v9925_v6, %v6692_v8  ;;  %v10687_v48 = vld [vmem:[%s15935_s1 + $0x18b4] sm:$0xf0]  ;;  %v6660_v59 = vld [vmem:[%s15935_s1 + $0xb8] sm:$0xf0]  ;;  %v9913_v6 = vld [vmem:[%s15935_s1 + $0x8c] sm:$0xf] }
 0x23e   :  { %5846 = vmatpush.bf16.msrb.mxu2 %v9171_v14  ;;  %v9635_v14 = vor.u32 %v10663_v63, %v9634_v60  ;;  %v9731_v60 = vor.u32 %v10687_v48, %v9730_v57  ;;  %v9586_v63 = vld [vmem:[%s15935_s1 + $0x1788] sm:$0xf]  ;;  %v6663_v52 = vor.u32 %v9917_v58, %v6660_v59  ;;  %v10651_v55 = vld [vmem:[%s15935_s1 + $0x1794] sm:$0xf0]  ;;  %v6644_v8 = vld [vmem:[%s15935_s1 + $0x98] sm:$0xf0] }
 0x23f   :  { %5859 = vmatpush.bf16.msrb.mxu3 %v9299_v21  ;;  %v9618_v21 = vld [vmem:[%s15935_s1 + $0x17c8] sm:$0xf]  ;;  %v10615_v53 = vld [vmem:[%s15935_s1 + $0x1674] sm:$0xf0] }
 0x240   :  { %5821 = vmatpush.bf16.msrb.mxu0 %v8899_v39  ;;  %v6676_v39 = vld [vmem:[%s15935_s1 + $0xd8] sm:$0xf0]  ;;  %v9619_v43 = vor.u32 %v10659_v26, %v9618_v21  ;;  %v9570_v21 = vld [vmem:[%s15935_s1 + $0x1768] sm:$0xf]  ;;  %v10643_v58 = vld [vmem:[%s15935_s1 + $0x1754] sm:$0xf0] }
 0x241   :  { %5834 = vmatpush.bf16.msrb.mxu1 %v9027_v27  ;;  %v9747_v27 = vor.u32 %v10691_v34, %v9746_v32  ;;  %v6679_v54 = vor.u32 %v9921_v0, %v6676_v39  ;;  %v6647_v32 = vor.u32 %v9913_v6, %v6644_v8  ;;  %v10647_v34 = vld [vmem:[%s15935_s1 + $0x1774] sm:$0xf0]  ;;  %v9698_v0 = vld [vmem:[%s15935_s1 + $0x1868] sm:$0xf] }
 0x242   :  { %5847 = vmatpush.bf16.msrb.mxu2 %v9155_v24  ;;  %v9474_v24 = vld [vmem:[%s15935_s1 + $0x16a8] sm:$0xf]  ;;  %v10679_v39 = vld [vmem:[%s15935_s1 + $0x1874] sm:$0xf0] }
 0x243   :  { %5860 = vmatpush.bf16.msrb.mxu3 %v9283_v36  ;;  %v10655_v36 = vld [vmem:[%s15935_s1 + $0x17b4] sm:$0xf0]  ;;  %v9475_v47 = vor.u32 %v10623_v50, %v9474_v24  ;;  %v9571_v24 = vor.u32 %v10647_v34, %v9570_v21  ;;  %v9699_v50 = vor.u32 %v10679_v39, %v9698_v0  ;;  %v9682_v59 = vld [vmem:[%s15935_s1 + $0x1848] sm:$0xf]  ;;  %v9901_v21 = vld [vmem:[%s15935_s1 + $0x2c] sm:$0xf] }
 0x244   :  { %5822 = vmatpush.bf16.msrb.mxu0 %v8883_v62  ;;  %v9603_v3 = vor.u32 %v10655_v36, %v9602_v51  ;;  %v10619_v62 = vld [vmem:[%s15935_s1 + $0x1694] sm:$0xf0]  ;;  %v9426_v51 = vld [vmem:[%s15935_s1 + $0x1648] sm:$0xf] }
 0x245   :  { %5835 = vmatpush.bf16.msrb.mxu1 %v9011_v4  ;;  %v9714_v4 = vld [vmem:[%s15935_s1 + $0x1888] sm:$0xf]  ;;  %v5629_v26 = vpop.f32.mrf.mxu1  ;;  %v10607_v8 = vld [vmem:[%s15935_s1 + $0x1634] sm:$0xf0] }
 0x246   :  { %5848 = vmatpush.bf16.msrb.mxu2 %v9139_v5  ;;  %v10683_v5 = vld [vmem:[%s15935_s1 + $0x1894] sm:$0xf0]  ;;  %v9554_v36 = vld [vmem:[%s15935_s1 + $0x1748] sm:$0xf] }
 0x247   :  { %5861 = vmatpush.bf16.msrb.mxu3 %v9267_v9  ;;  %5823 = vmatmul.bf16.vlgmr.msrb.gmra.mxu0 %v11844_v45  ;;  %v9459_v9 = vor.u32 %v10619_v62, %v9458_v61  ;;  %v9905_v61 = vld [vmem:[%s15935_s1 + $0x4c] sm:$0xf]  ;;  %v6612_v62 = vld [vmem:[%s15935_s1 + $0x58] sm:$0xf0]  ;;  %v9410_v6 = vld [vmem:[%s15935_s1 + $0x1628] sm:$0xf] }
 0x248   :  { %5867 = vmatpush.bf16.msra.mxu0 %v9507_v10  ;;  %5836 = vmatmul.bf16.vlgmr.msrb.gmra.mxu1 %v11854_v49  ;;  %v5616_v10 = vpop.f32.mrf.mxu0  ;;  %v10603_v34 = vld [vmem:[%s15935_s1 + $0x1614] sm:$0xf0] }
 0x249   :  { %5880 = vmatpush.bf16.msra.mxu1 %v9635_v14  ;;  %5849 = vmatmul.bf16.vlgmr.msrb.gmra.mxu2 %v12048_v7  ;;  %v9587_v14 = vor.u32 %v10651_v55, %v9586_v63 }
 0x24a   :  { %5893 = vmatpush.bf16.msra.mxu2 %v9763_v2  ;;  %5862 = vmatmul.bf16.vlgmr.msrb.gmra.mxu3 %v12061_v12  ;;  %v9715_v2 = vor.u32 %v10683_v5, %v9714_v4  ;;  %v9555_v4 = vor.u32 %v10643_v58, %v9554_v36  ;;  %v9989_v58 = vld [vmem:[%s15935_s1 + $0x2ec] sm:$0xf] }
 0x24b   :  { %5906 = vmatpush.bf16.msra.mxu3 %v6695_v13  ;;  %v5617_v13 = vadd.f32 %v5616_v10, %v14386_v17  ;;  %v6628_v17 = vld [vmem:[%s15935_s1 + $0x78] sm:$0xf0] }
 0x24c   :  { %5868 = vmatpush.bf16.msra.mxu0 %v9491_v40  ;;  %v9909_v40 = vld [vmem:[%s15935_s1 + $0x6c] sm:$0xf]  ;;  %v5642_v57 = vpop.f32.mrf.mxu2 }
 0x24d   :  { %5881 = vmatpush.bf16.msra.mxu1 %v9619_v43  ;;  %v5630_v43 = vadd.f32 %v5629_v26, %v5617_v13  ;;  %v6631_v48 = vor.u32 %v9909_v40, %v6628_v17  ;;  %v5631_v10 = vpop.f32.mrf.mxu1  ;;  %v6596_v13 = vld [vmem:[%s15935_s1 + $0x38] sm:$0xf0]  ;;  %v9411_v26 = vor.u32 %v10607_v8, %v9410_v6  ;;  %v9522_v40 = vld [vmem:[%s15935_s1 + $0x1708] sm:$0xf]  ;;  %v10635_v17 = vld [vmem:[%s15935_s1 + $0x1714] sm:$0xf0] }
 0x24e   :  { %5894 = vmatpush.bf16.msra.mxu2 %v9747_v27  ;;  %v9443_v27 = vor.u32 %v10615_v53, %v9442_v15  ;;  %v9666_v15 = vld [vmem:[%s15935_s1 + $0x1828] sm:$0xf]  ;;  %v10671_v53 = vld [vmem:[%s15935_s1 + $0x1834] sm:$0xf0]  ;;  %v6804_v10 = vld [vmem:[%s15935_s1 + $0x1d8] sm:$0xf0] }
 0x24f   :  { %5907 = vmatpush.bf16.msra.mxu3 %v6679_v54  ;;  %v10611_v54 = vld [vmem:[%s15935_s1 + $0x1654] sm:$0xf0]  ;;  %v9667_v39 = vor.u32 %v10671_v53, %v9666_v15  ;;  %v6932_v15 = vld [vmem:[%s15935_s1 + $0x2d8] sm:$0xf0]  ;;  %v10017_v53 = vld [vmem:[%s15935_s1 + $0x3cc] sm:$0xf] }
 0x250   :  { %5869 = vmatpush.bf16.msra.mxu0 %v9475_v47  ;;  %v10675_v47 = vld [vmem:[%s15935_s1 + $0x1854] sm:$0xf0]  ;;  %v9427_v63 = vor.u32 %v10611_v54, %v9426_v51  ;;  %v5618_v55 = vpop.f32.mrf.mxu0  ;;  %v9897_v51 = vld [vmem:[%s15935_s1 + $0xc] sm:$0xf]  ;;  %v6580_v54 = vld [vmem:[%s15935_s1 + $0x18] sm:$0xf0] }
 0x251   :  { %5882 = vmatpush.bf16.msra.mxu1 %v9603_v3  ;;  %v5643_v3 = vadd.f32 %v5642_v57, %v5630_v43  ;;  %v9683_v5 = vor.u32 %v10675_v47, %v9682_v59  ;;  %v9650_v43 = vld [vmem:[%s15935_s1 + $0x1808] sm:$0xf]  ;;  %v9957_v57 = vld [vmem:[%s15935_s1 + $0x1ec] sm:$0xf]  ;;  %v6948_v47 = vld [vmem:[%s15935_s1 + $0x2f8] sm:$0xf0] }
 0x252   :  { %5895 = vmatpush.bf16.msra.mxu2 %v9731_v60  ;;  %v5655_v60 = vpop.f32.mrf.mxu3  ;;  %v7204_v55 = vld [vmem:[%s15935_s1 + $0x4f8] sm:$0xf0]  ;;  %v6951_v6 = vor.u32 %v9989_v58, %v6948_v47  ;;  %v9945_v58 = vld [vmem:[%s15935_s1 + $0x18c] sm:$0xf] }
 0x253   :  { %5908 = vmatpush.bf16.msra.mxu3 %v6663_v52  ;;  %v14576_v52 = vadd.f32 %v5655_v60, %v5643_v3  ;;  %v10021_v3 = vld [vmem:[%s15935_s1 + $0x3ec] sm:$0xf]  ;;  %v7076_v60 = vld [vmem:[%s15935_s1 + $0x3f8] sm:$0xf0] }
 0x254   :  { %5870 = vmatpush.bf16.msra.mxu0 %v9459_v9  ;;  %v9538_v9 = vld [vmem:[%s15935_s1 + $0x1728] sm:$0xf]  ;;  %v7079_v8 = vor.u32 %v10021_v3, %v7076_v60  ;;  %v9977_v47 = vld [vmem:[%s15935_s1 + $0x28c] sm:$0xf] }
 0x255   :  { %5883 = vmatpush.bf16.msra.mxu1 %v9587_v14  ;;  %v6615_v14 = vor.u32 %v9905_v61, %v6612_v62  ;;  %v9523_v61 = vor.u32 %v10635_v17, %v9522_v40  ;;  %v6788_v40 = vld [vmem:[%s15935_s1 + $0x1b8] sm:$0xf0]  ;;  %v9981_v17 = vld [vmem:[%s15935_s1 + $0x2ac] sm:$0xf] }
 0x256   :  { %5896 = vmatpush.bf16.msra.mxu2 %v9715_v2  ;;  %v10639_v2 = vld [vmem:[%s15935_s1 + $0x1734] sm:$0xf0]  ;;  %v10009_v60 = vld [vmem:[%s15935_s1 + $0x38c] sm:$0xf] }
 0x257   :  { %5909 = vmatpush.bf16.msra.mxu3 %v6647_v32  ;;  %v9394_v32 = vld [vmem:[%s15935_s1 + $0x1608] sm:$0xf]  ;;  %v9539_v0 = vor.u32 %v10639_v2, %v9538_v9  ;;  %v9953_v9 = vld [vmem:[%s15935_s1 + $0x1cc] sm:$0xf] }
 0x258   :  { %5871 = vmatpush.bf16.msra.mxu0 %v9443_v27  ;;  %v5644_v27 = vpop.f32.mrf.mxu2  ;;  %v9395_v59 = vor.u32 %v10603_v34, %v9394_v32  ;;  %v6807_v32 = vor.u32 %v9953_v9, %v6804_v10  ;;  %v9941_v10 = vld [vmem:[%s15935_s1 + $0x16c] sm:$0xf] }
 0x259   :  { %5884 = vmatpush.bf16.msra.mxu1 %v9571_v24  ;;  %v6599_v24 = vor.u32 %v9901_v21, %v6596_v13  ;;  %v7060_v21 = vld [vmem:[%s15935_s1 + $0x3d8] sm:$0xf0]  ;;  %v10049_v13 = vld [vmem:[%s15935_s1 + $0x4cc] sm:$0xf] }
 0x25a   :  { %5897 = vmatpush.bf16.msra.mxu2 %v9699_v50  ;;  %v10667_v50 = vld [vmem:[%s15935_s1 + $0x1814] sm:$0xf0]  ;;  %v5657_v36 = vpop.f32.mrf.mxu3  ;;  %v6916_v27 = vld [vmem:[%s15935_s1 + $0x2b8] sm:$0xf0] }
 0x25b   :  { %5910 = vmatpush.bf16.msra.mxu3 %v6631_v48  ;;  %v6820_v48 = vld [vmem:[%s15935_s1 + $0x1f8] sm:$0xf0]  ;;  %v9651_v62 = vor.u32 %v10667_v50, %v9650_v43 }
 0x25c   :  { %5872 = vmatpush.bf16.msra.mxu0 %v9427_v63  ;;  %v10053_v63 = vld [vmem:[%s15935_s1 + $0x4ec] sm:$0xf]  ;;  %v7044_v50 = vld [vmem:[%s15935_s1 + $0x3b8] sm:$0xf0] }
 0x25d   :  { %5885 = vmatpush.bf16.msra.mxu1 %v9555_v4  ;;  %v6583_v4 = vor.u32 %v9897_v51, %v6580_v54  ;;  %v7207_v2 = vor.u32 %v10053_v63, %v7204_v55  ;;  %v10045_v51 = vld [vmem:[%s15935_s1 + $0x4ac] sm:$0xf]  ;;  %v7172_v54 = vld [vmem:[%s15935_s1 + $0x4b8] sm:$0xf0] }
 0x25e   :  { %5898 = vmatpush.bf16.msra.mxu2 %v9683_v5  ;;  %v6823_v5 = vor.u32 %v9957_v57, %v6820_v48  ;;  %v6919_v57 = vor.u32 %v9981_v17, %v6916_v27  ;;  %v7175_v3 = vor.u32 %v10045_v51, %v7172_v54  ;;  %v10041_v63 = vld [vmem:[%s15935_s1 + $0x48c] sm:$0xf]  ;;  %v7156_v55 = vld [vmem:[%s15935_s1 + $0x498] sm:$0xf0] }
 0x25f   :  { %5911 = vmatpush.bf16.msra.mxu3 %v6615_v14  ;;  %v9985_v14 = vld [vmem:[%s15935_s1 + $0x2cc] sm:$0xf]  ;;  %v6740_v17 = vld [vmem:[%s15935_s1 + $0x158] sm:$0xf0] }
 0x260   :  { %5873 = vmatpush.bf16.msra.mxu0 %v9411_v26  ;;  %v7188_v26 = vld [vmem:[%s15935_s1 + $0x4d8] sm:$0xf0]  ;;  %v6935_v34 = vor.u32 %v9985_v14, %v6932_v15  ;;  %v10001_v51 = vld [vmem:[%s15935_s1 + $0x34c] sm:$0xf] }
 0x261   :  { %5886 = vmatpush.bf16.msra.mxu1 %v9539_v0  ;;  %v7063_v0 = vor.u32 %v10017_v53, %v7060_v21  ;;  %v7191_v43 = vor.u32 %v10049_v13, %v7188_v26  ;;  %v6756_v14 = vld [vmem:[%s15935_s1 + $0x178] sm:$0xf0]  ;;  %v10005_v21 = vld [vmem:[%s15935_s1 + $0x36c] sm:$0xf] }
 0x262   :  { %5899 = vmatpush.bf16.msra.mxu2 %v9667_v39  ;;  %v9949_v39 = vld [vmem:[%s15935_s1 + $0x1ac] sm:$0xf]  ;;  %v6884_v53 = vld [vmem:[%s15935_s1 + $0x278] sm:$0xf0] }
 0x263   :  { %5912 = vmatpush.bf16.msra.mxu3 %v6599_v24  ;;  %v10013_v24 = vld [vmem:[%s15935_s1 + $0x3ac] sm:$0xf]  ;;  %v6791_v36 = vor.u32 %v9949_v39, %v6788_v40  ;;  %v7012_v13 = vld [vmem:[%s15935_s1 + $0x378] sm:$0xf0] }
 0x264   :  { %5874 = vmatpush.bf16.msra.mxu0 %v9395_v59  ;;  %v7047_v48 = vor.u32 %v10013_v24, %v7044_v50  ;;  %v6772_v59 = vld [vmem:[%s15935_s1 + $0x198] sm:$0xf0]  ;;  %v10037_v26 = vld [vmem:[%s15935_s1 + $0x46c] sm:$0xf]  ;;  %v7015_v39 = vor.u32 %v10005_v21, %v7012_v13 }
 0x265   :  { %5887 = vmatpush.bf16.msra.mxu1 %v9523_v61  ;;  %v7028_v61 = vld [vmem:[%s15935_s1 + $0x398] sm:$0xf0]  ;;  %v9937_v40 = vld [vmem:[%s15935_s1 + $0x14c] sm:$0xf] }
 0x266   :  { %5900 = vmatpush.bf16.msra.mxu2 %v9651_v62  ;;  %v5668_v62 = vpop.f32.mrf.mxu0  ;;  %v7031_v9 = vor.u32 %v10009_v60, %v7028_v61  ;;  %v6868_v50 = vld [vmem:[%s15935_s1 + $0x258] sm:$0xf0]  ;;  %v9961_v21 = vld [vmem:[%s15935_s1 + $0x20c] sm:$0xf] }
 0x267   :  { %5913 = vmatpush.bf16.msra.mxu3 %v6583_v4  ;;  %5875 = vmatmul.bf16.vlgmr.msra.gmra.mxu0 %v12059_v11  ;;  %v5669_v4 = vadd.f32 %v5668_v62, %v14576_v52  ;;  %v7159_v52 = vor.u32 %v10041_v63, %v7156_v55  ;;  %v6996_v54 = vld [vmem:[%s15935_s1 + $0x358] sm:$0xf0]  ;;  %v9933_v62 = vld [vmem:[%s15935_s1 + $0x12c] sm:$0xf] }
 0x268   :  { %5919 = vmatpush.bf16.msrb.mxu0 %v6823_v5  ;;  %5888 = vmatmul.bf16.vlgmr.msra.gmra.mxu1 %v12069_v16  ;;  %v6775_v5 = vor.u32 %v9945_v58, %v6772_v59  ;;  %v7124_v58 = vld [vmem:[%s15935_s1 + $0x458] sm:$0xf0]  ;;  %v6999_v61 = vor.u32 %v10001_v51, %v6996_v54  ;;  %v9965_v55 = vld [vmem:[%s15935_s1 + $0x22c] sm:$0xf] }
 0x269   :  { %5932 = vmatpush.bf16.msrb.mxu1 %v6951_v6  ;;  %5901 = vmatmul.bf16.vlgmr.msra.gmra.mxu2 %v12258_v1  ;;  %v5681_v6 = vpop.f32.mrf.mxu1  ;;  %v6724_v63 = vld [vmem:[%s15935_s1 + $0x138] sm:$0xf0]  ;;  %v10149_v54 = vld [vmem:[%s15935_s1 + $0x7ec] sm:$0xf] }
 0x26a   :  { %5945 = vmatpush.bf16.msrb.mxu2 %v7079_v8  ;;  %5914 = vmatmul.bf16.vlgmr.msra.gmra.mxu3 %v11058_v19  ;;  %v6900_v19 = vld [vmem:[%s15935_s1 + $0x298] sm:$0xf0]  ;;  %v5682_v15 = vadd.f32 %v5681_v6, %v5669_v4  ;;  %v9997_v6 = vld [vmem:[%s15935_s1 + $0x32c] sm:$0xf] }
 0x26b   :  { %5958 = vmatpush.bf16.msrb.mxu3 %v7207_v2  ;;  %v6903_v8 = vor.u32 %v9977_v47, %v6900_v19  ;;  %v9973_v2 = vld [vmem:[%s15935_s1 + $0x26c] sm:$0xf]  ;;  %v6743_v47 = vor.u32 %v9937_v40, %v6740_v17  ;;  %v6836_v13 = vld [vmem:[%s15935_s1 + $0x218] sm:$0xf0] }
 0x26c   :  { %5920 = vmatpush.bf16.msrb.mxu0 %v6807_v32  ;;  %v7140_v32 = vld [vmem:[%s15935_s1 + $0x478] sm:$0xf0]  ;;  %v5694_v24 = vpop.f32.mrf.mxu2  ;;  %v10085_v17 = vld [vmem:[%s15935_s1 + $0x5ec] sm:$0xf] }
 0x26d   :  { %5933 = vmatpush.bf16.msrb.mxu1 %v6935_v34  ;;  %v6759_v34 = vor.u32 %v9941_v10, %v6756_v14  ;;  %v7143_v27 = vor.u32 %v10037_v26, %v7140_v32  ;;  %v7108_v10 = vld [vmem:[%s15935_s1 + $0x438] sm:$0xf0]  ;;  %v6727_v14 = vor.u32 %v9933_v62, %v6724_v63  ;;  %v9993_v26 = vld [vmem:[%s15935_s1 + $0x30c] sm:$0xf] }
 0x26e   :  { %5946 = vmatpush.bf16.msrb.mxu2 %v7063_v0  ;;  %v6887_v0 = vor.u32 %v9973_v2, %v6884_v53  ;;  %v5670_v59 = vpop.f32.mrf.mxu0  ;;  %v9929_v2 = vld [vmem:[%s15935_s1 + $0x10c] sm:$0xf]  ;;  %v7460_v51 = vld [vmem:[%s15935_s1 + $0x6f8] sm:$0xf0] }
 0x26f   :  { %5959 = vmatpush.bf16.msrb.mxu3 %v7191_v43  ;;  %v9969_v43 = vld [vmem:[%s15935_s1 + $0x24c] sm:$0xf]  ;;  %v7716_v59 = vld [vmem:[%s15935_s1 + $0x8f8] sm:$0xf0] }
 0x270   :  { %5921 = vmatpush.bf16.msrb.mxu0 %v6791_v36  ;;  %v5695_v36 = vadd.f32 %v5694_v24, %v5682_v15  ;;  %v6871_v60 = vor.u32 %v9969_v43, %v6868_v50  ;;  %v7332_v43 = vld [vmem:[%s15935_s1 + $0x5f8] sm:$0xf0]  ;;  %v10081_v62 = vld [vmem:[%s15935_s1 + $0x5cc] sm:$0xf] }
 0x271   :  { %5934 = vmatpush.bf16.msrb.mxu1 %v6919_v57  ;;  %v5707_v57 = vpop.f32.mrf.mxu3  ;;  %v7316_v63 = vld [vmem:[%s15935_s1 + $0x5d8] sm:$0xf0] }
 0x272   :  { %5947 = vmatpush.bf16.msrb.mxu2 %v7047_v48  ;;  %v10033_v48 = vld [vmem:[%s15935_s1 + $0x44c] sm:$0xf]  ;;  %v14775_v19 = vadd.f32 %v5707_v57, %v5695_v36  ;;  %v7588_v36 = vld [vmem:[%s15935_s1 + $0x7f8] sm:$0xf0]  ;;  %v6839_v57 = vor.u32 %v9961_v21, %v6836_v13 }
 0x273   :  { %5960 = vmatpush.bf16.msrb.mxu3 %v7175_v3  ;;  %v5683_v3 = vpop.f32.mrf.mxu1  ;;  %v7127_v4 = vor.u32 %v10033_v48, %v7124_v58  ;;  %v10181_v58 = vld [vmem:[%s15935_s1 + $0x8ec] sm:$0xf] }
 0x274   :  { %5922 = vmatpush.bf16.msrb.mxu0 %v6775_v5  ;;  %v6852_v5 = vld [vmem:[%s15935_s1 + $0x238] sm:$0xf0]  ;;  %v5696_v40 = vpop.f32.mrf.mxu2  ;;  %v7335_v3 = vor.u32 %v10085_v17, %v7332_v43  ;;  %v10109_v21 = vld [vmem:[%s15935_s1 + $0x6ac] sm:$0xf] }
 0x275   :  { %5935 = vmatpush.bf16.msrb.mxu1 %v6903_v8  ;;  %v6980_v8 = vld [vmem:[%s15935_s1 + $0x338] sm:$0xf0]  ;;  %v6855_v15 = vor.u32 %v9965_v55, %v6852_v5  ;;  %v10113_v55 = vld [vmem:[%s15935_s1 + $0x6cc] sm:$0xf] }
 0x276   :  { %5948 = vmatpush.bf16.msrb.mxu2 %v7031_v9  ;;  %v10029_v9 = vld [vmem:[%s15935_s1 + $0x42c] sm:$0xf]  ;;  %v6983_v53 = vor.u32 %v9997_v6, %v6980_v8  ;;  %v7444_v5 = vld [vmem:[%s15935_s1 + $0x6d8] sm:$0xf0] }
 0x277   :  { %5961 = vmatpush.bf16.msrb.mxu3 %v7159_v52  ;;  %v6708_v52 = vld [vmem:[%s15935_s1 + $0x118] sm:$0xf0]  ;;  %v7111_v32 = vor.u32 %v10029_v9, %v7108_v10  ;;  %v10145_v6 = vld [vmem:[%s15935_s1 + $0x7cc] sm:$0xf] }
 0x278   :  { %5923 = vmatpush.bf16.msrb.mxu0 %v6759_v34  ;;  %v6964_v34 = vld [vmem:[%s15935_s1 + $0x318] sm:$0xf0]  ;;  %v6711_v50 = vor.u32 %v9929_v2, %v6708_v52  ;;  %v10177_v9 = vld [vmem:[%s15935_s1 + $0x8cc] sm:$0xf]  ;;  %v7447_v2 = vor.u32 %v10113_v55, %v7444_v5 }
 0x279   :  { %5936 = vmatpush.bf16.msrb.mxu1 %v6887_v0  ;;  %v10025_v0 = vld [vmem:[%s15935_s1 + $0x40c] sm:$0xf]  ;;  %v5709_v24 = vpop.f32.mrf.mxu3  ;;  %v6967_v48 = vor.u32 %v9993_v26, %v6964_v34  ;;  %v7572_v8 = vld [vmem:[%s15935_s1 + $0x7d8] sm:$0xf0] }
 0x27a   :  { %5949 = vmatpush.bf16.msrb.mxu2 %v7015_v39  ;;  %v7092_v39 = vld [vmem:[%s15935_s1 + $0x418] sm:$0xf0]  ;;  %v7575_v52 = vor.u32 %v10145_v6, %v7572_v8  ;;  %v10073_v43 = vld [vmem:[%s15935_s1 + $0x58c] sm:$0xf] }
 0x27b   :  { %5962 = vmatpush.bf16.msrb.mxu3 %v7143_v27  ;;  %v10117_v27 = vld [vmem:[%s15935_s1 + $0x6ec] sm:$0xf]  ;;  %v7700_v10 = vld [vmem:[%s15935_s1 + $0x8d8] sm:$0xf0] }
 0x27c   :  { %5924 = vmatpush.bf16.msrb.mxu0 %v6743_v47  ;;  %v7095_v47 = vor.u32 %v10025_v0, %v7092_v39  ;;  %v7703_v13 = vor.u32 %v10177_v9, %v7700_v10  ;;  %v7428_v26 = vld [vmem:[%s15935_s1 + $0x6b8] sm:$0xf0]  ;;  %v10173_v0 = vld [vmem:[%s15935_s1 + $0x8ac] sm:$0xf] }
 0x27d   :  { %5937 = vmatpush.bf16.msrb.mxu1 %v6871_v60  ;;  %v7463_v60 = vor.u32 %v10117_v27, %v7460_v51  ;;  %v7556_v34 = vld [vmem:[%s15935_s1 + $0x7b8] sm:$0xf0]  ;;  %v7431_v40 = vor.u32 %v10109_v21, %v7428_v26  ;;  %v10137_v24 = vld [vmem:[%s15935_s1 + $0x78c] sm:$0xf] }
 0x27e   :  { %5950 = vmatpush.bf16.msrb.mxu2 %v6999_v61  ;;  %v7591_v61 = vor.u32 %v10149_v54, %v7588_v36  ;;  %v7284_v27 = vld [vmem:[%s15935_s1 + $0x598] sm:$0xf0]  ;;  %v10169_v54 = vld [vmem:[%s15935_s1 + $0x88c] sm:$0xf] }
 0x27f   :  { %5963 = vmatpush.bf16.msrb.mxu3 %v7127_v4  ;;  %v7719_v4 = vor.u32 %v10181_v58, %v7716_v59  ;;  %v7668_v36 = vld [vmem:[%s15935_s1 + $0x898] sm:$0xf0]  ;;  %v10133_v55 = vld [vmem:[%s15935_s1 + $0x76c] sm:$0xf] }
 0x280   :  { %5925 = vmatpush.bf16.msrb.mxu0 %v6727_v14  ;;  %v7319_v14 = vor.u32 %v10081_v62, %v7316_v63  ;;  %v7396_v63 = vld [vmem:[%s15935_s1 + $0x678] sm:$0xf0]  ;;  %v10165_v5 = vld [vmem:[%s15935_s1 + $0x86c] sm:$0xf] }
 0x281   :  { %5938 = vmatpush.bf16.msrb.mxu1 %v6855_v15  ;;  %v10077_v15 = vld [vmem:[%s15935_s1 + $0x5ac] sm:$0xf]  ;;  %v7652_v6 = vld [vmem:[%s15935_s1 + $0x878] sm:$0xf0] }
 0x282   :  { %5951 = vmatpush.bf16.msrb.mxu2 %v6983_v53  ;;  %v7300_v53 = vld [vmem:[%s15935_s1 + $0x5b8] sm:$0xf0] }
 0x283   :  { %5964 = vmatpush.bf16.msrb.mxu3 %v7111_v32  ;;  %v10141_v32 = vld [vmem:[%s15935_s1 + $0x7ac] sm:$0xf]  ;;  %v7303_v39 = vor.u32 %v10077_v15, %v7300_v53  ;;  %v7655_v15 = vor.u32 %v10165_v5, %v7652_v6  ;;  %v7380_v21 = vld [vmem:[%s15935_s1 + $0x658] sm:$0xf0] }
 0x284   :  { %5926 = vmatpush.bf16.msrb.mxu0 %v6711_v50  ;;  %v7559_v17 = vor.u32 %v10141_v32, %v7556_v34  ;;  %v7540_v50 = vld [vmem:[%s15935_s1 + $0x798] sm:$0xf0]  ;;  %v5720_v51 = vpop.f32.mrf.mxu0 }
 0x285   :  { %5939 = vmatpush.bf16.msrb.mxu1 %v6839_v57  ;;  %v5721_v57 = vadd.f32 %v5720_v51, %v14775_v19  ;;  %v5733_v58 = vpop.f32.mrf.mxu1  ;;  %v7671_v19 = vor.u32 %v10169_v54, %v7668_v36  ;;  %v7508_v26 = vld [vmem:[%s15935_s1 + $0x758] sm:$0xf0]  ;;  %v10125_v54 = vld [vmem:[%s15935_s1 + $0x72c] sm:$0xf] }
 0x286   :  { %5952 = vmatpush.bf16.msrb.mxu2 %v6967_v48  ;;  %v7287_v48 = vor.u32 %v10073_v43, %v7284_v27  ;;  %v7364_v51 = vld [vmem:[%s15935_s1 + $0x638] sm:$0xf0] }
 0x287   :  { %5965 = vmatpush.bf16.msrb.mxu3 %v7095_v47  ;;  %5927 = vmatmul.bf16.vlgmr.msrb.gmra.mxu0 %v11062_v22  ;;  %v10105_v22 = vld [vmem:[%s15935_s1 + $0x68c] sm:$0xf]  ;;  %v7543_v47 = vor.u32 %v10137_v24, %v7540_v50  ;;  %v5734_v62 = vadd.f32 %v5733_v58, %v5721_v57  ;;  %v7492_v36 = vld [vmem:[%s15935_s1 + $0x738] sm:$0xf0] }
 0x288   :  { %5971 = vmatpush.bf16.msra.mxu0 %v7335_v3  ;;  %5940 = vmatmul.bf16.vlgmr.msrb.gmra.mxu1 %v11056_v18  ;;  %v7412_v18 = vld [vmem:[%s15935_s1 + $0x698] sm:$0xf0]  ;;  %v10069_v3 = vld [vmem:[%s15935_s1 + $0x56c] sm:$0xf] }
 0x289   :  { %5984 = vmatpush.bf16.msra.mxu1 %v7463_v60  ;;  %5953 = vmatmul.bf16.vlgmr.msrb.gmra.mxu2 %v11060_v20  ;;  %v7684_v20 = vld [vmem:[%s15935_s1 + $0x8b8] sm:$0xf0]  ;;  %v7415_v59 = vor.u32 %v10105_v22, %v7412_v18  ;;  %v10093_v24 = vld [vmem:[%s15935_s1 + $0x62c] sm:$0xf] }
 0x28a   :  { %5997 = vmatpush.bf16.msra.mxu2 %v7591_v61  ;;  %5966 = vmatmul.bf16.vlgmr.msrb.gmra.mxu3 %v11220_v41  ;;  %v7687_v41 = vor.u32 %v10173_v0, %v7684_v20  ;;  %v7268_v60 = vld [vmem:[%s15935_s1 + $0x578] sm:$0xf0]  ;;  %v10101_v61 = vld [vmem:[%s15935_s1 + $0x66c] sm:$0xf] }
 0x28b   :  { %6010 = vmatpush.bf16.msra.mxu3 %v7719_v4  ;;  %v7524_v4 = vld [vmem:[%s15935_s1 + $0x778] sm:$0xf0]  ;;  %v7271_v8 = vor.u32 %v10069_v3, %v7268_v60  ;;  %v7399_v9 = vor.u32 %v10101_v61, %v7396_v63  ;;  %v10161_v0 = vld [vmem:[%s15935_s1 + $0x84c] sm:$0xf]  ;;  %v7367_v3 = vor.u32 %v10093_v24, %v7364_v51  ;;  %v7495_v60 = vor.u32 %v10125_v54, %v7492_v36 }
 0x28c   :  { %5972 = vmatpush.bf16.msra.mxu0 %v7319_v14  ;;  %v7527_v10 = vor.u32 %v10133_v55, %v7524_v4  ;;  %v10065_v14 = vld [vmem:[%s15935_s1 + $0x54c] sm:$0xf]  ;;  %v5746_v53 = vpop.f32.mrf.mxu2  ;;  %v7636_v20 = vld [vmem:[%s15935_s1 + $0x858] sm:$0xf0] }
 0x28d   :  { %5985 = vmatpush.bf16.msra.mxu1 %v7447_v2  ;;  %v7252_v2 = vld [vmem:[%s15935_s1 + $0x558] sm:$0xf0]  ;;  %v5747_v32 = vadd.f32 %v5746_v53, %v5734_v62  ;;  %v5759_v34 = vpop.f32.mrf.mxu3  ;;  %v7639_v50 = vor.u32 %v10161_v0, %v7636_v20  ;;  %v10157_v57 = vld [vmem:[%s15935_s1 + $0x82c] sm:$0xf] }
 0x28e   :  { %5998 = vmatpush.bf16.msra.mxu2 %v7575_v52  ;;  %v10097_v52 = vld [vmem:[%s15935_s1 + $0x64c] sm:$0xf]  ;;  %v7236_v18 = vld [vmem:[%s15935_s1 + $0x538] sm:$0xf0] }
 0x28f   :  { %6011 = vmatpush.bf16.msra.mxu3 %v7703_v13  ;;  %v10129_v13 = vld [vmem:[%s15935_s1 + $0x74c] sm:$0xf]  ;;  %v14974_v43 = vadd.f32 %v5759_v34, %v5747_v32  ;;  %v7383_v27 = vor.u32 %v10097_v52, %v7380_v21  ;;  %v7476_v55 = vld [vmem:[%s15935_s1 + $0x718] sm:$0xf0] }
 0x290   :  { %5973 = vmatpush.bf16.msra.mxu0 %v7303_v39  ;;  %v5722_v39 = vpop.f32.mrf.mxu0  ;;  %v7511_v22 = vor.u32 %v10129_v13, %v7508_v26  ;;  %v10089_v61 = vld [vmem:[%s15935_s1 + $0x60c] sm:$0xf]  ;;  %v7604_v5 = vld [vmem:[%s15935_s1 + $0x818] sm:$0xf0] }
 0x291   :  { %5986 = vmatpush.bf16.msra.mxu1 %v7431_v40  ;;  %v7255_v40 = vor.u32 %v10065_v14, %v7252_v2  ;;  %v10121_v62 = vld [vmem:[%s15935_s1 + $0x70c] sm:$0xf]  ;;  %v7972_v52 = vld [vmem:[%s15935_s1 + $0xaf8] sm:$0xf0] }
 0x292   :  { %5999 = vmatpush.bf16.msra.mxu2 %v7559_v17  ;;  %v5735_v17 = vpop.f32.mrf.mxu1  ;;  %v10153_v4 = vld [vmem:[%s15935_s1 + $0x80c] sm:$0xf]  ;;  %v8100_v53 = vld [vmem:[%s15935_s1 + $0xbf8] sm:$0xf0]  ;;  %v7479_v13 = vor.u32 %v10121_v62, %v7476_v55 }
 0x293   :  { %6012 = vmatpush.bf16.msra.mxu3 %v7687_v41  ;;  %v10061_v41 = vld [vmem:[%s15935_s1 + $0x52c] sm:$0xf]  ;;  %v8228_v32 = vld [vmem:[%s15935_s1 + $0xcf8] sm:$0xf0]  ;;  %v7607_v34 = vor.u32 %v10153_v4, %v7604_v5 }
 0x294   :  { %5974 = vmatpush.bf16.msra.mxu0 %v7287_v48  ;;  %v7620_v48 = vld [vmem:[%s15935_s1 + $0x838] sm:$0xf0]  ;;  %v7239_v58 = vor.u32 %v10061_v41, %v7236_v18  ;;  %v5748_v6 = vpop.f32.mrf.mxu2  ;;  %v10309_v26 = vld [vmem:[%s15935_s1 + $0xcec] sm:$0xf] }
 0x295   :  { %5987 = vmatpush.bf16.msra.mxu1 %v7415_v59  ;;  %v10057_v59 = vld [vmem:[%s15935_s1 + $0x50c] sm:$0xf]  ;;  %v7623_v63 = vor.u32 %v10157_v57, %v7620_v48  ;;  %v5761_v14 = vpop.f32.mrf.mxu3  ;;  %v7828_v17 = vld [vmem:[%s15935_s1 + $0x9d8] sm:$0xf0] }
 0x296   :  { %6000 = vmatpush.bf16.msra.mxu2 %v7543_v47  ;;  %v7220_v47 = vld [vmem:[%s15935_s1 + $0x518] sm:$0xf0]  ;;  %v10273_v18 = vld [vmem:[%s15935_s1 + $0xbcc] sm:$0xf] }
 0x297   :  { %6013 = vmatpush.bf16.msra.mxu3 %v7671_v19  ;;  %v7348_v19 = vld [vmem:[%s15935_s1 + $0x618] sm:$0xf0]  ;;  %v7223_v2 = vor.u32 %v10057_v59, %v7220_v47  ;;  %v10205_v48 = vld [vmem:[%s15935_s1 + $0x9ac] sm:$0xf] }
 0x298   :  { %5975 = vmatpush.bf16.msra.mxu0 %v7271_v8  ;;  %v10213_v8 = vld [vmem:[%s15935_s1 + $0x9ec] sm:$0xf]  ;;  %v7351_v21 = vor.u32 %v10089_v61, %v7348_v19  ;;  %v7956_v41 = vld [vmem:[%s15935_s1 + $0xad8] sm:$0xf0] }
 0x299   :  { %5988 = vmatpush.bf16.msra.mxu1 %v7399_v9  ;;  %v7844_v9 = vld [vmem:[%s15935_s1 + $0x9f8] sm:$0xf0]  ;;  %v10237_v59 = vld [vmem:[%s15935_s1 + $0xaac] sm:$0xf] }
 0x29a   :  { %6001 = vmatpush.bf16.msra.mxu2 %v7527_v10  ;;  %v10245_v10 = vld [vmem:[%s15935_s1 + $0xaec] sm:$0xf]  ;;  %v7847_v0 = vor.u32 %v10213_v8, %v7844_v9  ;;  %v8084_v24 = vld [vmem:[%s15935_s1 + $0xbd8] sm:$0xf0] }
 0x29b   :  { %6014 = vmatpush.bf16.msra.mxu3 %v7655_v15  ;;  %v10277_v15 = vld [vmem:[%s15935_s1 + $0xbec] sm:$0xf]  ;;  %v7975_v20 = vor.u32 %v10245_v10, %v7972_v52  ;;  %v8212_v51 = vld [vmem:[%s15935_s1 + $0xcd8] sm:$0xf0]  ;;  %v8087_v57 = vor.u32 %v10273_v18, %v8084_v24 }
 0x29c   :  { %5976 = vmatpush.bf16.msra.mxu0 %v7255_v40  ;;  %v8103_v39 = vor.u32 %v10277_v15, %v8100_v53  ;;  %v10209_v40 = vld [vmem:[%s15935_s1 + $0x9cc] sm:$0xf]  ;;  %v8068_v61 = vld [vmem:[%s15935_s1 + $0xbb8] sm:$0xf0] }
 0x29d   :  { %5989 = vmatpush.bf16.msra.mxu1 %v7383_v27  ;;  %v10241_v27 = vld [vmem:[%s15935_s1 + $0xacc] sm:$0xf]  ;;  %v7831_v54 = vor.u32 %v10209_v40, %v7828_v17  ;;  %v8196_v19 = vld [vmem:[%s15935_s1 + $0xcb8] sm:$0xf0] }
 0x29e   :  { %6002 = vmatpush.bf16.msra.mxu2 %v7511_v22  ;;  %v8231_v22 = vor.u32 %v10309_v26, %v8228_v32  ;;  %v7959_v36 = vor.u32 %v10241_v27, %v7956_v41  ;;  %v10233_v4 = vld [vmem:[%s15935_s1 + $0xa8c] sm:$0xf]  ;;  %v7924_v5 = vld [vmem:[%s15935_s1 + $0xa98] sm:$0xf0] }
 0x29f   :  { %6015 = vmatpush.bf16.msra.mxu3 %v7639_v50  ;;  %v10305_v50 = vld [vmem:[%s15935_s1 + $0xccc] sm:$0xf]  ;;  %v8052_v8 = vld [vmem:[%s15935_s1 + $0xb98] sm:$0xf0]  ;;  %v7927_v53 = vor.u32 %v10233_v4, %v7924_v5 }
 0x2a0   :  { %5977 = vmatpush.bf16.msra.mxu0 %v7239_v58  ;;  %v7812_v58 = vld [vmem:[%s15935_s1 + $0x9b8] sm:$0xf0]  ;;  %v8215_v47 = vor.u32 %v10305_v50, %v8212_v51  ;;  %v10265_v6 = vld [vmem:[%s15935_s1 + $0xb8c] sm:$0xf] }
 0x2a1   :  { %5990 = vmatpush.bf16.msra.mxu1 %v7367_v3  ;;  %v7940_v3 = vld [vmem:[%s15935_s1 + $0xab8] sm:$0xf0]  ;;  %v7815_v62 = vor.u32 %v10205_v48, %v7812_v58  ;;  %v10297_v10 = vld [vmem:[%s15935_s1 + $0xc8c] sm:$0xf] }
 0x2a2   :  { %6003 = vmatpush.bf16.msra.mxu2 %v7495_v60  ;;  %v10269_v60 = vld [vmem:[%s15935_s1 + $0xbac] sm:$0xf]  ;;  %v8180_v14 = vld [vmem:[%s15935_s1 + $0xc98] sm:$0xf0] }
 0x2a3   :  { %6016 = vmatpush.bf16.msra.mxu3 %v7623_v63  ;;  %v7943_v63 = vor.u32 %v10237_v59, %v7940_v3  ;;  %v8071_v55 = vor.u32 %v10269_v60, %v8068_v61  ;;  %v7780_v26 = vld [vmem:[%s15935_s1 + $0x978] sm:$0xf0]  ;;  %v10229_v32 = vld [vmem:[%s15935_s1 + $0xa6c] sm:$0xf] }
 0x2a4   :  { %5978 = vmatpush.bf16.msra.mxu0 %v7223_v2  ;;  %v5772_v9 = vpop.f32.mrf.mxu0  ;;  %v10293_v40 = vld [vmem:[%s15935_s1 + $0xc6c] sm:$0xf]  ;;  %v8164_v17 = vld [vmem:[%s15935_s1 + $0xc78] sm:$0xf0] }
 0x2a5   :  { %5991 = vmatpush.bf16.msra.mxu1 %v7351_v21  ;;  %v5773_v2 = vadd.f32 %v5772_v9, %v14974_v43  ;;  %v5785_v15 = vpop.f32.mrf.mxu1  ;;  %v8055_v21 = vor.u32 %v10265_v6, %v8052_v8  ;;  %v8183_v43 = vor.u32 %v10297_v10, %v8180_v14  ;;  %v10193_v18 = vld [vmem:[%s15935_s1 + $0x94c] sm:$0xf]  ;;  %v7764_v24 = vld [vmem:[%s15935_s1 + $0x958] sm:$0xf0]  ;;  %v8167_v51 = vor.u32 %v10293_v40, %v8164_v17 }
 0x2a6   :  { %6004 = vmatpush.bf16.msra.mxu2 %v7479_v13  ;;  %v10197_v13 = vld [vmem:[%s15935_s1 + $0x96c] sm:$0xf]  ;;  %v8020_v48 = vld [vmem:[%s15935_s1 + $0xb58] sm:$0xf0]  ;;  %v7767_v61 = vor.u32 %v10193_v18, %v7764_v24 }
 0x2a7   :  { %6017 = vmatpush.bf16.msra.mxu3 %v7607_v34  ;;  %5979 = vmatmul.bf16.vlgmr.msra.gmra.mxu0 %v11224_v44  ;;  %v10301_v44 = vld [vmem:[%s15935_s1 + $0xcac] sm:$0xf]  ;;  %v5786_v34 = vadd.f32 %v5785_v15, %v5773_v2  ;;  %v7783_v27 = vor.u32 %v10197_v13, %v7780_v26  ;;  %v8148_v3 = vld [vmem:[%s15935_s1 + $0xc58] sm:$0xf0] }
 0x2a8   :  { %6023 = vmatpush.bf16.msrb.mxu0 %v7847_v0  ;;  %5992 = vmatmul.bf16.vlgmr.msra.gmra.mxu1 %v11212_v38  ;;  %v10201_v38 = vld [vmem:[%s15935_s1 + $0x98c] sm:$0xf]  ;;  %v7908_v0 = vld [vmem:[%s15935_s1 + $0xa78] sm:$0xf0] }
 0x2a9   :  { %6036 = vmatpush.bf16.msrb.mxu1 %v7975_v20  ;;  %6005 = vmatmul.bf16.vlgmr.msra.gmra.mxu2 %v11222_v42  ;;  %v7796_v42 = vld [vmem:[%s15935_s1 + $0x998] sm:$0xf0]  ;;  %v10261_v20 = vld [vmem:[%s15935_s1 + $0xb6c] sm:$0xf] }
 0x2aa   :  { %6049 = vmatpush.bf16.msrb.mxu2 %v8103_v39  ;;  %6018 = vmatmul.bf16.vlgmr.msra.gmra.mxu3 %v11413_v25  ;;  %v8199_v25 = vor.u32 %v10301_v44, %v8196_v19  ;;  %v7799_v52 = vor.u32 %v10201_v38, %v7796_v42  ;;  %v8036_v39 = vld [vmem:[%s15935_s1 + $0xb78] sm:$0xf0]  ;;  %v10225_v50 = vld [vmem:[%s15935_s1 + $0xa4c] sm:$0xf] }
 0x2ab   :  { %6062 = vmatpush.bf16.msrb.mxu3 %v8231_v22  ;;  %v7911_v22 = vor.u32 %v10229_v32, %v7908_v0  ;;  %v8039_v41 = vor.u32 %v10261_v20, %v8036_v39  ;;  %v7748_v38 = vld [vmem:[%s15935_s1 + $0x938] sm:$0xf0]  ;;  %v10221_v42 = vld [vmem:[%s15935_s1 + $0xa2c] sm:$0xf] }
 0x2ac   :  { %6024 = vmatpush.bf16.msrb.mxu0 %v7831_v54  ;;  %v5798_v54 = vpop.f32.mrf.mxu2  ;;  %v5774_v60 = vpop.f32.mrf.mxu0  ;;  %v10253_v5 = vld [vmem:[%s15935_s1 + $0xb2c] sm:$0xf]  ;;  %v8004_v6 = vld [vmem:[%s15935_s1 + $0xb38] sm:$0xf0] }
 0x2ad   :  { %6037 = vmatpush.bf16.msrb.mxu1 %v7959_v36  ;;  %v7892_v36 = vld [vmem:[%s15935_s1 + $0xa58] sm:$0xf0]  ;;  %v5799_v58 = vadd.f32 %v5798_v54, %v5786_v34  ;;  %v5811_v59 = vpop.f32.mrf.mxu3  ;;  %v5787_v44 = vpop.f32.mrf.mxu1  ;;  %v10285_v8 = vld [vmem:[%s15935_s1 + $0xc2c] sm:$0xf]  ;;  %v8007_v15 = vor.u32 %v10253_v5, %v8004_v6 }
 0x2ae   :  { %6050 = vmatpush.bf16.msrb.mxu2 %v8087_v57  ;;  %v10257_v57 = vld [vmem:[%s15935_s1 + $0xb4c] sm:$0xf]  ;;  %v8132_v9 = vld [vmem:[%s15935_s1 + $0xc38] sm:$0xf0] }
 0x2af   :  { %6063 = vmatpush.bf16.msrb.mxu3 %v8215_v47  ;;  %v10289_v47 = vld [vmem:[%s15935_s1 + $0xc4c] sm:$0xf]  ;;  %v15173_v19 = vadd.f32 %v5811_v59, %v5799_v58  ;;  %v7732_v2 = vld [vmem:[%s15935_s1 + $0x918] sm:$0xf0]  ;;  %v8135_v26 = vor.u32 %v10285_v8, %v8132_v9 }
 0x2b0   :  { %6025 = vmatpush.bf16.msrb.mxu0 %v7815_v62  ;;  %v7895_v62 = vor.u32 %v10225_v50, %v7892_v36  ;;  %v8151_v4 = vor.u32 %v10289_v47, %v8148_v3  ;;  %v10185_v14 = vld [vmem:[%s15935_s1 + $0x90c] sm:$0xf]  ;;  %v7988_v32 = vld [vmem:[%s15935_s1 + $0xb18] sm:$0xf0] }
 0x2b1   :  { %6038 = vmatpush.bf16.msrb.mxu1 %v7943_v63  ;;  %v8023_v63 = vor.u32 %v10257_v57, %v8020_v48  ;;  %v10249_v13 = vld [vmem:[%s15935_s1 + $0xb0c] sm:$0xf]  ;;  %v8116_v34 = vld [vmem:[%s15935_s1 + $0xc18] sm:$0xf0] }
 0x2b2   :  { %6051 = vmatpush.bf16.msrb.mxu2 %v8071_v55  ;;  %v10189_v55 = vld [vmem:[%s15935_s1 + $0x92c] sm:$0xf]  ;;  %v8356_v39 = vld [vmem:[%s15935_s1 + $0xdf8] sm:$0xf0]  ;;  %v7991_v50 = vor.u32 %v10249_v13, %v7988_v32 }
 0x2b3   :  { %6064 = vmatpush.bf16.msrb.mxu3 %v8199_v25  ;;  %v7876_v25 = vld [vmem:[%s15935_s1 + $0xa38] sm:$0xf0]  ;;  %v7751_v10 = vor.u32 %v10189_v55, %v7748_v38  ;;  %v10341_v20 = vld [vmem:[%s15935_s1 + $0xdec] sm:$0xf] }
 0x2b4   :  { %6026 = vmatpush.bf16.msrb.mxu0 %v7799_v52  ;;  %v7879_v52 = vor.u32 %v10221_v42, %v7876_v25  ;;  %v5800_v0 = vpop.f32.mrf.mxu2  ;;  %v10373_v40 = vld [vmem:[%s15935_s1 + $0xeec] sm:$0xf]  ;;  %v8612_v18 = vld [vmem:[%s15935_s1 + $0xff8] sm:$0xf0]  ;;  %v8359_v57 = vor.u32 %v10341_v20, %v8356_v39 }
 0x2b5   :  { %6039 = vmatpush.bf16.msrb.mxu1 %v7927_v53  ;;  %v10217_v53 = vld [vmem:[%s15935_s1 + $0xa0c] sm:$0xf]  ;;  %v5813_v17 = vpop.f32.mrf.mxu3  ;;  %v8740_v54 = vld [vmem:[%s15935_s1 + $0x10f8] sm:$0xf0] }
 0x2b6   :  { %6052 = vmatpush.bf16.msrb.mxu2 %v8055_v21  ;;  %v7860_v21 = vld [vmem:[%s15935_s1 + $0xa18] sm:$0xf0]  ;;  %v10337_v59 = vld [vmem:[%s15935_s1 + $0xdcc] sm:$0xf] }
 0x2b7   :  { %6065 = vmatpush.bf16.msrb.mxu3 %v8183_v43  ;;  %v10281_v43 = vld [vmem:[%s15935_s1 + $0xc0c] sm:$0xf]  ;;  %v7863_v24 = vor.u32 %v10217_v53, %v7860_v21  ;;  %v8340_v47 = vld [vmem:[%s15935_s1 + $0xdd8] sm:$0xf0] }
 0x2b8   :  { %6027 = vmatpush.bf16.msrb.mxu0 %v7783_v27  ;;  %v7735_v27 = vor.u32 %v10185_v14, %v7732_v2  ;;  %v8119_v36 = vor.u32 %v10281_v43, %v8116_v34  ;;  %v10369_v3 = vld [vmem:[%s15935_s1 + $0xecc] sm:$0xf]  ;;  %v8724_v55 = vld [vmem:[%s15935_s1 + $0x10d8] sm:$0xf0]  ;;  %v8343_v38 = vor.u32 %v10337_v59, %v8340_v47 }
 0x2b9   :  { %6040 = vmatpush.bf16.msrb.mxu1 %v7911_v22  ;;  %v8484_v22 = vld [vmem:[%s15935_s1 + $0xef8] sm:$0xf0]  ;;  %v10401_v44 = vld [vmem:[%s15935_s1 + $0xfcc] sm:$0xf] }
 0x2ba   :  { %6053 = vmatpush.bf16.msrb.mxu2 %v8039_v41  ;;  %v10405_v41 = vld [vmem:[%s15935_s1 + $0xfec] sm:$0xf]  ;;  %v8487_v48 = vor.u32 %v10373_v40, %v8484_v22  ;;  %v8324_v5 = vld [vmem:[%s15935_s1 + $0xdb8] sm:$0xf0] }
 0x2bb   :  { %6066 = vmatpush.bf16.msrb.mxu3 %v8167_v51  ;;  %v10437_v51 = vld [vmem:[%s15935_s1 + $0x10ec] sm:$0xf]  ;;  %v8615_v58 = vor.u32 %v10405_v41, %v8612_v18  ;;  %v8452_v9 = vld [vmem:[%s15935_s1 + $0xeb8] sm:$0xf0] }
 0x2bc   :  { %6028 = vmatpush.bf16.msrb.mxu0 %v7767_v61  ;;  %v8743_v60 = vor.u32 %v10437_v51, %v8740_v54  ;;  %v8468_v61 = vld [vmem:[%s15935_s1 + $0xed8] sm:$0xf0]  ;;  %v10333_v25 = vld [vmem:[%s15935_s1 + $0xdac] sm:$0xf] }
 0x2bd   :  { %6041 = vmatpush.bf16.msrb.mxu1 %v7895_v62  ;;  %v8596_v62 = vld [vmem:[%s15935_s1 + $0xfd8] sm:$0xf0]  ;;  %v8471_v42 = vor.u32 %v10369_v3, %v8468_v61  ;;  %v10365_v6 = vld [vmem:[%s15935_s1 + $0xeac] sm:$0xf] }
 0x2be   :  { %6054 = vmatpush.bf16.msrb.mxu2 %v8023_v63  ;;  %v10433_v63 = vld [vmem:[%s15935_s1 + $0x10cc] sm:$0xf]  ;;  %v8580_v14 = vld [vmem:[%s15935_s1 + $0xfb8] sm:$0xf0] }
 0x2bf   :  { %6067 = vmatpush.bf16.msrb.mxu3 %v8151_v4  ;;  %v8599_v4 = vor.u32 %v10401_v44, %v8596_v62  ;;  %v8727_v8 = vor.u32 %v10433_v63, %v8724_v55  ;;  %v8708_v2 = vld [vmem:[%s15935_s1 + $0x10b8] sm:$0xf0]  ;;  %v10361_v21 = vld [vmem:[%s15935_s1 + $0xe8c] sm:$0xf] }
 0x2c0   :  { %6029 = vmatpush.bf16.msrb.mxu0 %v7751_v10  ;;  %v10397_v10 = vld [vmem:[%s15935_s1 + $0xfac] sm:$0xf]  ;;  %v8436_v13 = vld [vmem:[%s15935_s1 + $0xe98] sm:$0xf0] }
 0x2c1   :  { %6042 = vmatpush.bf16.msrb.mxu1 %v7879_v52  ;;  %v8327_v52 = vor.u32 %v10333_v25, %v8324_v5  ;;  %v8583_v53 = vor.u32 %v10397_v10, %v8580_v14  ;;  %v8564_v32 = vld [vmem:[%s15935_s1 + $0xf98] sm:$0xf0]  ;;  %v10425_v34 = vld [vmem:[%s15935_s1 + $0x108c] sm:$0xf]  ;;  %v8439_v17 = vor.u32 %v10361_v21, %v8436_v13 }
 0x2c2   :  { %6055 = vmatpush.bf16.msrb.mxu2 %v8007_v15  ;;  %v8455_v15 = vor.u32 %v10365_v6, %v8452_v9  ;;  %v8692_v0 = vld [vmem:[%s15935_s1 + $0x1098] sm:$0xf0]  ;;  %v10325_v22 = vld [vmem:[%s15935_s1 + $0xd6c] sm:$0xf] }
 0x2c3   :  { %6068 = vmatpush.bf16.msrb.mxu3 %v8135_v26  ;;  %v10393_v26 = vld [vmem:[%s15935_s1 + $0xf8c] sm:$0xf]  ;;  %v8292_v41 = vld [vmem:[%s15935_s1 + $0xd78] sm:$0xf0] }
 0x2c4   :  { %6030 = vmatpush.bf16.msrb.mxu0 %v7735_v27  ;;  %v5824_v43 = vpop.f32.mrf.mxu0  ;;  %v8567_v27 = vor.u32 %v10393_v26, %v8564_v32  ;;  %v10357_v18 = vld [vmem:[%s15935_s1 + $0xe6c] sm:$0xf]  ;;  %v8548_v54 = vld [vmem:[%s15935_s1 + $0xf78] sm:$0xf0] }
 0x2c5   :  { %6043 = vmatpush.bf16.msrb.mxu1 %v7863_v24  ;;  %v5825_v20 = vadd.f32 %v5824_v43, %v15173_v19  ;;  %v5837_v40 = vpop.f32.mrf.mxu1  ;;  %v8695_v19 = vor.u32 %v10425_v34, %v8692_v0  ;;  %v10389_v51 = vld [vmem:[%s15935_s1 + $0xf6c] sm:$0xf]  ;;  %v8276_v3 = vld [vmem:[%s15935_s1 + $0xd58] sm:$0xf0] }
 0x2c6   :  { %6056 = vmatpush.bf16.msrb.mxu2 %v7991_v50  ;;  %v8420_v50 = vld [vmem:[%s15935_s1 + $0xe78] sm:$0xf0]  ;;  %v8551_v59 = vor.u32 %v10389_v51, %v8548_v54  ;;  %v10321_v47 = vld [vmem:[%s15935_s1 + $0xd4c] sm:$0xf] }
 0x2c7   :  { %6069 = vmatpush.bf16.msrb.mxu3 %v8119_v36  ;;  %6031 = vmatmul.bf16.vlgmr.msrb.gmra.mxu0 %v11426_v30  ;;  %v10429_v30 = vld [vmem:[%s15935_s1 + $0x10ac] sm:$0xf]  ;;  %v5838_v24 = vadd.f32 %v5837_v40, %v5825_v20  ;;  %v8404_v62 = vld [vmem:[%s15935_s1 + $0xe58] sm:$0xf0]  ;;  %v8279_v6 = vor.u32 %v10321_v47, %v8276_v3 }
 0x2c8   :  { %6075 = vmatpush.bf16.msra.mxu0 %v8359_v57  ;;  %6044 = vmatmul.bf16.vlgmr.msrb.gmra.mxu1 %v11424_v29  ;;  %v10329_v29 = vld [vmem:[%s15935_s1 + $0xd8c] sm:$0xf]  ;;  %v8676_v57 = vld [vmem:[%s15935_s1 + $0x1078] sm:$0xf0] }
 0x2c9   :  { %6088 = vmatpush.bf16.msra.mxu1 %v8487_v48  ;;  %6057 = vmatmul.bf16.vlgmr.msrb.gmra.mxu2 %v11434_v33  ;;  %v8308_v33 = vld [vmem:[%s15935_s1 + $0xd98] sm:$0xf0]  ;;  %v10421_v36 = vld [vmem:[%s15935_s1 + $0x106c] sm:$0xf]  ;;  %v8295_v48 = vor.u32 %v10325_v22, %v8292_v41 }
 0x2ca   :  { %6101 = vmatpush.bf16.msra.mxu2 %v8615_v58  ;;  %6070 = vmatmul.bf16.vlgmr.msrb.gmra.mxu3 %v11623_v23  ;;  %v8711_v23 = vor.u32 %v10429_v30, %v8708_v2  ;;  %v8311_v39 = vor.u32 %v10329_v29, %v8308_v33  ;;  %v8423_v58 = vor.u32 %v10357_v18, %v8420_v50  ;;  %v10385_v63 = vld [vmem:[%s15935_s1 + $0xf4c] sm:$0xf]  ;;  %v8532_v55 = vld [vmem:[%s15935_s1 + $0xf58] sm:$0xf0] }
 0x2cb   :  { %6114 = vmatpush.bf16.msra.mxu3 %v8743_v60  ;;  %v10353_v60 = vld [vmem:[%s15935_s1 + $0xe4c] sm:$0xf]  ;;  %v8679_v61 = vor.u32 %v10421_v36, %v8676_v57  ;;  %v8660_v25 = vld [vmem:[%s15935_s1 + $0x1058] sm:$0xf0]  ;;  %v8535_v14 = vor.u32 %v10385_v63, %v8532_v55 }
 0x2cc   :  { %6076 = vmatpush.bf16.msra.mxu0 %v8343_v38  ;;  %v5850_v44 = vpop.f32.mrf.mxu2  ;;  %v5826_v5 = vpop.f32.mrf.mxu0  ;;  %v8407_v10 = vor.u32 %v10353_v60, %v8404_v62  ;;  %v10317_v30 = vld [vmem:[%s15935_s1 + $0xd2c] sm:$0xf]  ;;  %v8260_v2 = vld [vmem:[%s15935_s1 + $0xd38] sm:$0xf0] }
 0x2cd   :  { %6089 = vmatpush.bf16.msra.mxu1 %v8471_v42  ;;  %v5851_v38 = vadd.f32 %v5850_v44, %v5838_v24  ;;  %v5863_v42 = vpop.f32.mrf.mxu3  ;;  %v10381_v29 = vld [vmem:[%s15935_s1 + $0xf2c] sm:$0xf]  ;;  %v8516_v33 = vld [vmem:[%s15935_s1 + $0xf38] sm:$0xf0]  ;;  %v8263_v13 = vor.u32 %v10317_v30, %v8260_v2 }
 0x2ce   :  { %6102 = vmatpush.bf16.msra.mxu2 %v8599_v4  ;;  %v10417_v4 = vld [vmem:[%s15935_s1 + $0x104c] sm:$0xf]  ;;  %v8244_v32 = vld [vmem:[%s15935_s1 + $0xd18] sm:$0xf0]  ;;  %v8519_v34 = vor.u32 %v10381_v29, %v8516_v33 }
 0x2cf   :  { %6115 = vmatpush.bf16.msra.mxu3 %v8727_v8  ;;  %v5839_v8 = vpop.f32.mrf.mxu1  ;;  %v15372_v9 = vadd.f32 %v5863_v42, %v5851_v38  ;;  %v10413_v21 = vld [vmem:[%s15935_s1 + $0x102c] sm:$0xf]  ;;  %v8372_v20 = vld [vmem:[%s15935_s1 + $0xe18] sm:$0xf0] }
 0x2d0   :  { %6077 = vmatpush.bf16.msra.mxu0 %v8327_v52  ;;  %v10349_v52 = vld [vmem:[%s15935_s1 + $0xe2c] sm:$0xf]  ;;  %v8628_v22 = vld [vmem:[%s15935_s1 + $0x1018] sm:$0xf0] }
 0x2d1   :  { %6090 = vmatpush.bf16.msra.mxu1 %v8455_v15  ;;  %v8663_v15 = vor.u32 %v10417_v4, %v8660_v25  ;;  %v10313_v26 = vld [vmem:[%s15935_s1 + $0xd0c] sm:$0xf]  ;;  %v8996_v54 = vld [vmem:[%s15935_s1 + $0x12f8] sm:$0xf0] }
 0x2d2   :  { %6103 = vmatpush.bf16.msra.mxu2 %v8583_v53  ;;  %v8388_v53 = vld [vmem:[%s15935_s1 + $0xe38] sm:$0xf0]  ;;  %v10345_v0 = vld [vmem:[%s15935_s1 + $0xe0c] sm:$0xf]  ;;  %v8247_v51 = vor.u32 %v10313_v26, %v8244_v32 }
 0x2d3   :  { %6116 = vmatpush.bf16.msra.mxu3 %v8711_v23  ;;  %v8644_v23 = vld [vmem:[%s15935_s1 + $0x1038] sm:$0xf0]  ;;  %v8391_v43 = vor.u32 %v10349_v52, %v8388_v53  ;;  %v10469_v18 = vld [vmem:[%s15935_s1 + $0x11ec] sm:$0xf] }
 0x2d4   :  { %6078 = vmatpush.bf16.msra.mxu0 %v8311_v39  ;;  %v10377_v39 = vld [vmem:[%s15935_s1 + $0xf0c] sm:$0xf]  ;;  %v8647_v40 = vor.u32 %v10413_v21, %v8644_v23  ;;  %v5852_v41 = vpop.f32.mrf.mxu2  ;;  %v9124_v57 = vld [vmem:[%s15935_s1 + $0x13f8] sm:$0xf0] }
 0x2d5   :  { %6091 = vmatpush.bf16.msra.mxu1 %v8439_v17  ;;  %v8500_v17 = vld [vmem:[%s15935_s1 + $0xf18] sm:$0xf0]  ;;  %v10501_v24 = vld [vmem:[%s15935_s1 + $0x12ec] sm:$0xf]  ;;  %v5865_v50 = vpop.f32.mrf.mxu3 }
 0x2d6   :  { %6104 = vmatpush.bf16.msra.mxu2 %v8567_v27  ;;  %v10409_v27 = vld [vmem:[%s15935_s1 + $0x100c] sm:$0xf]  ;;  %v9252_v47 = vld [vmem:[%s15935_s1 + $0x14f8] sm:$0xf0] }
 0x2d7   :  { %6117 = vmatpush.bf16.msra.mxu3 %v8695_v19  ;;  %v8868_v19 = vld [vmem:[%s15935_s1 + $0x11f8] sm:$0xf0]  ;;  %v10533_v36 = vld [vmem:[%s15935_s1 + $0x13ec] sm:$0xf]  ;;  %v8631_v3 = vor.u32 %v10409_v27, %v8628_v22 }
 0x2d8   :  { %6079 = vmatpush.bf16.msra.mxu0 %v8295_v48  ;;  %v8375_v48 = vor.u32 %v10345_v0, %v8372_v20  ;;  %v8871_v60 = vor.u32 %v10469_v18, %v8868_v19  ;;  %v9127_v44 = vor.u32 %v10533_v36, %v9124_v57  ;;  %v10465_v62 = vld [vmem:[%s15935_s1 + $0x11cc] sm:$0xf]  ;;  %v8852_v63 = vld [vmem:[%s15935_s1 + $0x11d8] sm:$0xf0] }
 0x2d9   :  { %6092 = vmatpush.bf16.msra.mxu1 %v8423_v58  ;;  %v8503_v58 = vor.u32 %v10377_v39, %v8500_v17  ;;  %v10497_v55 = vld [vmem:[%s15935_s1 + $0x12cc] sm:$0xf]  ;;  %v8980_v42 = vld [vmem:[%s15935_s1 + $0x12d8] sm:$0xf0]  ;;  %v8855_v8 = vor.u32 %v10465_v62, %v8852_v63 }
 0x2da   :  { %6105 = vmatpush.bf16.msra.mxu2 %v8551_v59  ;;  %v10565_v59 = vld [vmem:[%s15935_s1 + $0x14ec] sm:$0xf]  ;;  %v9108_v25 = vld [vmem:[%s15935_s1 + $0x13d8] sm:$0xf0] }
 0x2db   :  { %6118 = vmatpush.bf16.msra.mxu3 %v8679_v61  ;;  %v8999_v61 = vor.u32 %v10501_v24, %v8996_v54  ;;  %v9255_v38 = vor.u32 %v10565_v59, %v9252_v47  ;;  %v10529_v4 = vld [vmem:[%s15935_s1 + $0x13cc] sm:$0xf]  ;;  %v8836_v2 = vld [vmem:[%s15935_s1 + $0x11b8] sm:$0xf0] }
 0x2dc   :  { %6080 = vmatpush.bf16.msra.mxu0 %v8279_v6  ;;  %v10561_v5 = vld [vmem:[%s15935_s1 + $0x14cc] sm:$0xf]  ;;  %v9236_v6 = vld [vmem:[%s15935_s1 + $0x14d8] sm:$0xf0] }
 0x2dd   :  { %6093 = vmatpush.bf16.msra.mxu1 %v8407_v10  ;;  %v8983_v10 = vor.u32 %v10497_v55, %v8980_v42  ;;  %v10461_v30 = vld [vmem:[%s15935_s1 + $0x11ac] sm:$0xf]  ;;  %v8964_v53 = vld [vmem:[%s15935_s1 + $0x12b8] sm:$0xf0] }
 0x2de   :  { %6106 = vmatpush.bf16.msra.mxu2 %v8535_v14  ;;  %v9111_v14 = vor.u32 %v10529_v4, %v9108_v25  ;;  %v10493_v52 = vld [vmem:[%s15935_s1 + $0x12ac] sm:$0xf]  ;;  %v9092_v33 = vld [vmem:[%s15935_s1 + $0x13b8] sm:$0xf0]  ;;  %v8839_v23 = vor.u32 %v10461_v30, %v8836_v2 }
 0x2df   :  { %6119 = vmatpush.bf16.msra.mxu3 %v8663_v15  ;;  %v9239_v15 = vor.u32 %v10561_v5, %v9236_v6  ;;  %v10525_v29 = vld [vmem:[%s15935_s1 + $0x13ac] sm:$0xf]  ;;  %v9220_v21 = vld [vmem:[%s15935_s1 + $0x14b8] sm:$0xf0] }
 0x2e0   :  { %6081 = vmatpush.bf16.msra.mxu0 %v8263_v13  ;;  %v8967_v13 = vor.u32 %v10493_v52, %v8964_v53  ;;  %v9095_v26 = vor.u32 %v10525_v29, %v9092_v33  ;;  %v10489_v32 = vld [vmem:[%s15935_s1 + $0x128c] sm:$0xf]  ;;  %v9076_v0 = vld [vmem:[%s15935_s1 + $0x1398] sm:$0xf0] }
 0x2e1   :  { %6094 = vmatpush.bf16.msra.mxu1 %v8391_v43  ;;  %v8948_v43 = vld [vmem:[%s15935_s1 + $0x1298] sm:$0xf0]  ;;  %v10553_v39 = vld [vmem:[%s15935_s1 + $0x148c] sm:$0xf] }
 0x2e2   :  { %6107 = vmatpush.bf16.msra.mxu2 %v8519_v34  ;;  %v10521_v34 = vld [vmem:[%s15935_s1 + $0x138c] sm:$0xf]  ;;  %v8951_v41 = vor.u32 %v10489_v32, %v8948_v43  ;;  %v8804_v24 = vld [vmem:[%s15935_s1 + $0x1178] sm:$0xf0] }
 0x2e3   :  { %6120 = vmatpush.bf16.msra.mxu3 %v8647_v40  ;;  %v9204_v40 = vld [vmem:[%s15935_s1 + $0x1498] sm:$0xf0]  ;;  %v9079_v18 = vor.u32 %v10521_v34, %v9076_v0  ;;  %v10453_v19 = vld [vmem:[%s15935_s1 + $0x116c] sm:$0xf] }
 0x2e4   :  { %6082 = vmatpush.bf16.msra.mxu0 %v8247_v51  ;;  %v5876_v20 = vpop.f32.mrf.mxu0  ;;  %v10485_v50 = vld [vmem:[%s15935_s1 + $0x126c] sm:$0xf]  ;;  %v8932_v54 = vld [vmem:[%s15935_s1 + $0x1278] sm:$0xf0]  ;;  %v8807_v59 = vor.u32 %v10453_v19, %v8804_v24 }
 0x2e5   :  { %6095 = vmatpush.bf16.msra.mxu1 %v8375_v48  ;;  %v5877_v17 = vadd.f32 %v5876_v20, %v15372_v9  ;;  %v5889_v22 = vpop.f32.mrf.mxu1  ;;  %v9207_v9 = vor.u32 %v10553_v39, %v9204_v40  ;;  %v10517_v36 = vld [vmem:[%s15935_s1 + $0x136c] sm:$0xf]  ;;  %v9060_v57 = vld [vmem:[%s15935_s1 + $0x1378] sm:$0xf0]  ;;  %v8935_v47 = vor.u32 %v10485_v50, %v8932_v54 }
 0x2e6   :  { %6108 = vmatpush.bf16.msra.mxu2 %v8503_v58  ;;  %v10549_v48 = vld [vmem:[%s15935_s1 + $0x146c] sm:$0xf]  ;;  %v9188_v58 = vld [vmem:[%s15935_s1 + $0x1478] sm:$0xf0] }
 0x2e7   :  { %6121 = vmatpush.bf16.msra.mxu3 %v8631_v3  ;;  %6083 = vmatmul.bf16.vlgmr.msra.gmra.mxu0 %v11636_v31  ;;  %v10557_v31 = vld [vmem:[%s15935_s1 + $0x14ac] sm:$0xf]  ;;  %v5890_v51 = vadd.f32 %v5889_v22, %v5877_v17  ;;  %v9063_v3 = vor.u32 %v10517_v36, %v9060_v57  ;;  %v9191_v62 = vor.u32 %v10549_v48, %v9188_v58  ;;  %v8916_v55 = vld [vmem:[%s15935_s1 + $0x1258] sm:$0xf0] }
 0x2e8   :  { %6127 = vmatpush.bf16.msrb.mxu0 %v8871_v60  ;;  %6096 = vmatmul.bf16.vlgmr.msra.gmra.mxu1 %v11634_v28  ;;  %v10457_v28 = vld [vmem:[%s15935_s1 + $0x118c] sm:$0xf]  ;;  %v9044_v42 = vld [vmem:[%s15935_s1 + $0x1358] sm:$0xf0] }
 0x2e9   :  { %6140 = vmatpush.bf16.msrb.mxu1 %v8999_v61  ;;  %6109 = vmatmul.bf16.vlgmr.msra.gmra.mxu2 %v11644_v35  ;;  %v8820_v35 = vld [vmem:[%s15935_s1 + $0x1198] sm:$0xf0]  ;;  %v10449_v60 = vld [vmem:[%s15935_s1 + $0x114c] sm:$0xf] }
 0x2ea   :  { %6153 = vmatpush.bf16.msrb.mxu2 %v9127_v44  ;;  %6122 = vmatmul.bf16.vlgmr.msra.gmra.mxu3 %v11833_v37  ;;  %v9223_v37 = vor.u32 %v10557_v31, %v9220_v21  ;;  %v8823_v27 = vor.u32 %v10457_v28, %v8820_v35  ;;  %v8788_v61 = vld [vmem:[%s15935_s1 + $0x1158] sm:$0xf0]  ;;  %v10481_v44 = vld [vmem:[%s15935_s1 + $0x124c] sm:$0xf] }
 0x2eb   :  { %6166 = vmatpush.bf16.msrb.mxu3 %v9255_v38  ;;  %v10513_v38 = vld [vmem:[%s15935_s1 + $0x134c] sm:$0xf]  ;;  %v9172_v5 = vld [vmem:[%s15935_s1 + $0x1458] sm:$0xf0]  ;;  %v8919_v30 = vor.u32 %v10481_v44, %v8916_v55 }
 0x2ec   :  { %6128 = vmatpush.bf16.msrb.mxu0 %v8855_v8  ;;  %v5902_v63 = vpop.f32.mrf.mxu2  ;;  %v10545_v25 = vld [vmem:[%s15935_s1 + $0x144c] sm:$0xf]  ;;  %v5878_v8 = vpop.f32.mrf.mxu0  ;;  %v9047_v2 = vor.u32 %v10513_v38, %v9044_v42  ;;  %v8900_v33 = vld [vmem:[%s15935_s1 + $0x1238] sm:$0xf0] }
 0x2ed   :  { %6141 = vmatpush.bf16.msrb.mxu1 %v8983_v10  ;;  %v15565_v4 = vadd.f32 %v5902_v63, %v5890_v51  ;;  %v15573_v6 = vpop.f32.mrf.mxu3  ;;  %v8791_v10 = vor.u32 %v10449_v60, %v8788_v61  ;;  %v10445_v52 = vld [vmem:[%s15935_s1 + $0x112c] sm:$0xf]  ;;  %v9175_v29 = vor.u32 %v10545_v25, %v9172_v5  ;;  %v9028_v21 = vld [vmem:[%s15935_s1 + $0x1338] sm:$0xf0] }
 0x2ee   :  { %6154 = vmatpush.bf16.msrb.mxu2 %v9111_v14  ;;  %v5891_v14 = vpop.f32.mrf.mxu1  ;;  %v10477_v53 = vld [vmem:[%s15935_s1 + $0x122c] sm:$0xf]  ;;  %v8756_v35 = vld [vmem:[%s15935_s1 + $0x1118] sm:$0xf0] }
 0x2ef   :  { %6167 = vmatpush.bf16.msrb.mxu3 %v9239_v15  ;;  %v8772_v15 = vld [vmem:[%s15935_s1 + $0x1138] sm:$0xf0]  ;;  %v10509_v31 = vld [vmem:[%s15935_s1 + $0x132c] sm:$0xf]  ;;  %v8903_v32 = vor.u32 %v10477_v53, %v8900_v33 }
 0x2f0   :  { %6129 = vmatpush.bf16.msrb.mxu0 %v8839_v23  ;;  %v10541_v23 = vld [vmem:[%s15935_s1 + $0x142c] sm:$0xf]  ;;  %v8884_v34 = vld [vmem:[%s15935_s1 + $0x1218] sm:$0xf0] }
 0x2f1   :  { %6142 = vmatpush.bf16.msrb.mxu1 %v8967_v13  ;;  %v9156_v13 = vld [vmem:[%s15935_s1 + $0x1438] sm:$0xf0]  ;;  %v10441_v28 = vld [vmem:[%s15935_s1 + $0x110c] sm:$0xf] }
 0x2f2   :  { %6155 = vmatpush.bf16.msrb.mxu2 %v9095_v26  ;;  %v8775_v26 = vor.u32 %v10445_v52, %v8772_v15  ;;  %v10473_v43 = vld [vmem:[%s15935_s1 + $0x120c] sm:$0xf]  ;;  %v9159_v20 = vor.u32 %v10541_v23, %v9156_v13  ;;  %v9012_v39 = vld [vmem:[%s15935_s1 + $0x1318] sm:$0xf0]  ;;  %v8759_v24 = vor.u32 %v10441_v28, %v8756_v35  ;;  %v10731_v52 = vld [vmem:[%s15937_s2] sm:$0xf] }
 0x2f3   :  { %6168 = vmatpush.bf16.msrb.mxu3 %v9223_v37  ;;  %v9031_v37 = vor.u32 %v10509_v31, %v9028_v21  ;;  %v10505_v0 = vld [vmem:[%s15935_s1 + $0x130c] sm:$0xf]  ;;  %v9140_v17 = vld [vmem:[%s15935_s1 + $0x1418] sm:$0xf0]  ;;  %v8887_v54 = vor.u32 %v10473_v43, %v8884_v34  ;;  %v838_v15 = vperm.slane %v10731_v52, 3 }
 0x2f4   :  { %6130 = vmatpush.bf16.msrb.mxu0 %v8823_v27  ;;  %v10537_v40 = vld [vmem:[%s15935_s1 + $0x140c] sm:$0xf]  ;;  %v5904_v27 = vpop.f32.mrf.mxu2  ;;  %v9508_v50 = vld [vmem:[%s15935_s1 + $0x16f8] sm:$0xf0]  ;;  %v9015_v36 = vor.u32 %v10505_v0, %v9012_v39 }
 0x2f5   :  { %6143 = vmatpush.bf16.msrb.mxu1 %v8951_v41  ;;  %v10597_v22 = vld [vmem:[%s15935_s1 + $0x15ec] sm:$0xf]  ;;  %v9380_v41 = vld [vmem:[%s15935_s1 + $0x15f8] sm:$0xf0]  ;;  %v5917_v19 = vpop.f32.mrf.mxu3  ;;  %v9143_v58 = vor.u32 %v10537_v40, %v9140_v17 }
 0x2f6   :  { %6156 = vmatpush.bf16.msrb.mxu2 %v9079_v18  ;;  %v10629_v18 = vld [vmem:[%s15935_s1 + $0x16ec] sm:$0xf]  ;;  %v9636_v51 = vld [vmem:[%s15935_s1 + $0x17f8] sm:$0xf0] }
 0x2f7   :  { %6169 = vmatpush.bf16.msrb.mxu3 %v9207_v9  ;;  %v10661_v9 = vld [vmem:[%s15935_s1 + $0x17ec] sm:$0xf]  ;;  %v9764_v48 = vld [vmem:[%s15935_s1 + $0x18f8] sm:$0xf0] }
 0x2f8   :  { %6131 = vmatpush.bf16.msrb.mxu0 %v8807_v59  ;;  %v10693_v57 = vld [vmem:[%s15935_s1 + $0x18ec] sm:$0xf]  ;;  %v9383_v59 = vor.u32 %v10597_v22, %v9380_v41  ;;  %v9364_v61 = vld [vmem:[%s15935_s1 + $0x15d8] sm:$0xf0] }
 0x2f9   :  { %6144 = vmatpush.bf16.msrb.mxu1 %v8935_v47  ;;  %v9511_v47 = vor.u32 %v10629_v18, %v9508_v50  ;;  %v10593_v60 = vld [vmem:[%s15935_s1 + $0x15cc] sm:$0xf]  ;;  %v9492_v63 = vld [vmem:[%s15935_s1 + $0x16d8] sm:$0xf0] }
 0x2fa   :  { %6157 = vmatpush.bf16.msrb.mxu2 %v9063_v3  ;;  %v9639_v3 = vor.u32 %v10661_v9, %v9636_v51  ;;  %v10625_v44 = vld [vmem:[%s15935_s1 + $0x16cc] sm:$0xf]  ;;  %v9620_v38 = vld [vmem:[%s15935_s1 + $0x17d8] sm:$0xf0]  ;;  %v9367_v5 = vor.u32 %v10593_v60, %v9364_v61 }
 0x2fb   :  { %6170 = vmatpush.bf16.msrb.mxu3 %v9191_v62  ;;  %v9767_v62 = vor.u32 %v10693_v57, %v9764_v48  ;;  %v10657_v55 = vld [vmem:[%s15935_s1 + $0x17cc] sm:$0xf]  ;;  %v9748_v25 = vld [vmem:[%s15935_s1 + $0x18d8] sm:$0xf0] }
 0x2fc   :  { %6132 = vmatpush.bf16.msrb.mxu0 %v8791_v10  ;;  %v10689_v42 = vld [vmem:[%s15935_s1 + $0x18cc] sm:$0xf]  ;;  %v9495_v10 = vor.u32 %v10625_v44, %v9492_v63  ;;  %v9623_v14 = vor.u32 %v10657_v55, %v9620_v38  ;;  %v9604_v31 = vld [vmem:[%s15935_s1 + $0x17b8] sm:$0xf0] }
 0x2fd   :  { %6145 = vmatpush.bf16.msrb.mxu1 %v8919_v30  ;;  %v10589_v8 = vld [vmem:[%s15935_s1 + $0x15ac] sm:$0xf]  ;;  %v9348_v30 = vld [vmem:[%s15935_s1 + $0x15b8] sm:$0xf0]  ;;  %v9751_v53 = vor.u32 %v10689_v42, %v9748_v25 }
 0x2fe   :  { %6158 = vmatpush.bf16.msrb.mxu2 %v9047_v2  ;;  %v10621_v2 = vld [vmem:[%s15935_s1 + $0x16ac] sm:$0xf]  ;;  %v9732_v21 = vld [vmem:[%s15935_s1 + $0x18b8] sm:$0xf0]  ;;  %v9351_v23 = vor.u32 %v10589_v8, %v9348_v30 }
 0x2ff   :  { %6171 = vmatpush.bf16.msrb.mxu3 %v9175_v29  ;;  %v9476_v29 = vld [vmem:[%s15935_s1 + $0x16b8] sm:$0xf0]  ;;  %v10653_v33 = vld [vmem:[%s15935_s1 + $0x17ac] sm:$0xf] }
 0x300   :  { %6133 = vmatpush.bf16.msrb.mxu0 %v8775_v26  ;;  %v9479_v13 = vor.u32 %v10621_v2, %v9476_v29  ;;  %v9607_v26 = vor.u32 %v10653_v33, %v9604_v31  ;;  %v9332_v28 = vld [vmem:[%s15935_s1 + $0x1598] sm:$0xf0]  ;;  %v10681_v43 = vld [vmem:[%s15935_s1 + $0x188c] sm:$0xf] }
 0x301   :  { %6146 = vmatpush.bf16.msrb.mxu1 %v8903_v32  ;;  %v9460_v32 = vld [vmem:[%s15935_s1 + $0x1698] sm:$0xf0]  ;;  %v10581_v17 = vld [vmem:[%s15935_s1 + $0x156c] sm:$0xf] }
 0x302   :  { %6159 = vmatpush.bf16.msrb.mxu2 %v9031_v37  ;;  %v9588_v37 = vld [vmem:[%s15935_s1 + $0x1798] sm:$0xf0]  ;;  %v10613_v22 = vld [vmem:[%s15935_s1 + $0x166c] sm:$0xf] }
 0x303   :  { %6172 = vmatpush.bf16.msrb.mxu3 %v9159_v20  ;;  %v9716_v34 = vld [vmem:[%s15935_s1 + $0x1898] sm:$0xf0]  ;;  %v10645_v50 = vld [vmem:[%s15935_s1 + $0x176c] sm:$0xf] }
 0x304   :  { %6134 = vmatpush.bf16.msrb.mxu0 %v8759_v24  ;;  %v5928_v20 = vpop.f32.mrf.mxu0  ;;  %v9316_v27 = vld [vmem:[%s15935_s1 + $0x1578] sm:$0xf0]  ;;  %v9719_v19 = vor.u32 %v10681_v43, %v9716_v34  ;;  %v10677_v51 = vld [vmem:[%s15935_s1 + $0x186c] sm:$0xf] }
 0x305   :  { %6147 = vmatpush.bf16.msrb.mxu1 %v8887_v54  ;;  %v5941_v18 = vpop.f32.mrf.mxu1  ;;  %v9444_v24 = vld [vmem:[%s15935_s1 + $0x1678] sm:$0xf0]  ;;  %v9319_v57 = vor.u32 %v10581_v17, %v9316_v27  ;;  %v10673_v42 = vld [vmem:[%s15935_s1 + $0x184c] sm:$0xf] }
 0x306   :  { %6160 = vmatpush.bf16.msrb.mxu2 %v9015_v36  ;;  %v9572_v9 = vld [vmem:[%s15935_s1 + $0x1778] sm:$0xf0]  ;;  %v9447_v48 = vor.u32 %v10613_v22, %v9444_v24  ;;  %v10573_v2 = vld [vmem:[%s15935_s1 + $0x152c] sm:$0xf] }
 0x307   :  { %6173 = vmatpush.bf16.msrb.mxu3 %v9143_v58  ;;  %6135 = vmatmul.bf16.vlgmr.msrb.gmra.mxu0 %v11846_v46  ;;  %v10685_v46 = vld [vmem:[%s15935_s1 + $0x18ac] sm:$0xf]  ;;  %v9700_v54 = vld [vmem:[%s15935_s1 + $0x1878] sm:$0xf0]  ;;  %v9575_v58 = vor.u32 %v10645_v50, %v9572_v9 }
 0x308   :  { %6179 = vmatpush.bf16.msra.mxu0 %v9383_v59  ;;  %6148 = vmatmul.bf16.vlgmr.msrb.gmra.mxu1 %v11844_v45  ;;  %v10585_v45 = vld [vmem:[%s15935_s1 + $0x158c] sm:$0xf]  ;;  %v9735_v35 = vor.u32 %v10685_v46, %v9732_v21  ;;  %v9703_v61 = vor.u32 %v10677_v51, %v9700_v54  ;;  %v9428_v44 = vld [vmem:[%s15935_s1 + $0x1658] sm:$0xf0] }
 0x309   :  { %6192 = vmatpush.bf16.msra.mxu1 %v9511_v47  ;;  %6161 = vmatmul.bf16.vlgmr.msrb.gmra.mxu2 %v11854_v49  ;;  %v5916_v49 = vadd.f32 %v15573_v6, %v838_v15  ;;  %v10649_v6 = vld [vmem:[%s15935_s1 + $0x178c] sm:$0xf]  ;;  %v9335_v0 = vor.u32 %v10585_v45, %v9332_v28  ;;  %v9300_v47 = vld [vmem:[%s15935_s1 + $0x1558] sm:$0xf0] }
 0x30a   :  { %6205 = vmatpush.bf16.msra.mxu2 %v9639_v3  ;;  %6174 = vmatmul.bf16.vlgmr.msrb.gmra.mxu3 %v12048_v7  ;;  %v10617_v7 = vld [vmem:[%s15935_s1 + $0x168c] sm:$0xf]  ;;  %v9591_v40 = vor.u32 %v10649_v6, %v9588_v37  ;;  %v9556_v63 = vld [vmem:[%s15935_s1 + $0x1758] sm:$0xf0] }
 0x30b   :  { %6218 = vmatpush.bf16.msra.mxu3 %v9767_v62  ;;  %v9463_v39 = vor.u32 %v10617_v7, %v9460_v32  ;;  %v5929_v41 = vadd.f32 %v5928_v20, %v5916_v49  ;;  %v10577_v59 = vld [vmem:[%s15935_s1 + $0x154c] sm:$0xf]  ;;  %v9684_v25 = vld [vmem:[%s15935_s1 + $0x1858] sm:$0xf0] }
 0x30c   :  { %6180 = vmatpush.bf16.msra.mxu0 %v9367_v5  ;;  %v10609_v3 = vld [vmem:[%s15935_s1 + $0x164c] sm:$0xf]  ;;  %v5954_v60 = vpop.f32.mrf.mxu2  ;;  %v9303_v5 = vor.u32 %v10577_v59, %v9300_v47  ;;  %v9284_v52 = vld [vmem:[%s15935_s1 + $0x1538] sm:$0xf0]  ;;  %v9687_v29 = vor.u32 %v10673_v42, %v9684_v25  ;;  %v10698_v47 = vld [vmem:[%s15938_s3 + $0x10] sm:$0xff]  ;;  %v6307_v42 = vunpack.c.l.b16 %v14351_v56 }
 0x30d   :  { %6193 = vmatpush.bf16.msra.mxu1 %v9495_v10  ;;  %v5942_v36 = vadd.f32 %v5941_v18, %v5929_v41  ;;  %v10641_v62 = vld [vmem:[%s15935_s1 + $0x174c] sm:$0xf]  ;;  %v5967_v38 = vpop.f32.mrf.mxu3  ;;  %v5930_v10 = vpop.f32.mrf.mxu0  ;;  %v9412_v33 = vld [vmem:[%s15935_s1 + $0x1638] sm:$0xf0]  ;;  %v10702_v18 = vld [vmem:[%s15938_s3 + $0x30] sm:$0xff] }
 0x30e   :  { %6206 = vmatpush.bf16.msra.mxu2 %v9623_v14  ;;  %v9431_v14 = vor.u32 %v10609_v3, %v9428_v44  ;;  %v9559_v30 = vor.u32 %v10641_v62, %v9556_v63  ;;  %v10605_v15 = vld [vmem:[%s15935_s1 + $0x162c] sm:$0xf]  ;;  %v9540_v46 = vld [vmem:[%s15935_s1 + $0x1738] sm:$0xf0]  ;;  %v10704_v25 = vld [vmem:[%s15938_s3 + $0x40] sm:$0xff] }
 0x30f   :  { %6219 = vmatpush.bf16.msra.mxu3 %v9751_v53  ;;  %v5955_v55 = vadd.f32 %v5954_v60, %v5942_v36  ;;  %v5943_v53 = vpop.f32.mrf.mxu1  ;;  %v10637_v31 = vld [vmem:[%s15935_s1 + $0x172c] sm:$0xf]  ;;  %v9268_v28 = vld [vmem:[%s15935_s1 + $0x1518] sm:$0xf0] }
 0x310   :  { %6181 = vmatpush.bf16.msra.mxu0 %v9351_v23  ;;  %v10669_v21 = vld [vmem:[%s15935_s1 + $0x182c] sm:$0xf]  ;;  %v9668_v23 = vld [vmem:[%s15935_s1 + $0x1838] sm:$0xf0]  ;;  %v9543_v49 = vor.u32 %v10637_v31, %v9540_v46 }
 0x311   :  { %6194 = vmatpush.bf16.msra.mxu1 %v9479_v13  ;;  %v15775_v8 = vadd.f32 %v5967_v38, %v5955_v55  ;;  %v9287_v13 = vor.u32 %v10573_v2, %v9284_v52  ;;  %v10569_v45 = vld [vmem:[%s15935_s1 + $0x150c] sm:$0xf]  ;;  %v9671_v32 = vor.u32 %v10669_v21, %v9668_v23  ;;  %v9396_v6 = vld [vmem:[%s15935_s1 + $0x1618] sm:$0xf0]  ;;  %v10696_v38 = vld [vmem:[%s15938_s3] sm:$0xff] }
 0x312   :  { %6207 = vmatpush.bf16.msra.mxu2 %v9607_v26  ;;  %v9415_v26 = vor.u32 %v10605_v15, %v9412_v33  ;;  %v10601_v7 = vld [vmem:[%s15935_s1 + $0x160c] sm:$0xf]  ;;  %v9524_v43 = vld [vmem:[%s15935_s1 + $0x1718] sm:$0xf0] }
 0x313   :  { %6220 = vmatpush.bf16.msra.mxu3 %v9735_v35  ;;  %v10633_v37 = vld [vmem:[%s15935_s1 + $0x170c] sm:$0xf]  ;;  %v9652_v20 = vld [vmem:[%s15935_s1 + $0x1818] sm:$0xf0] }
 0x314   :  { %6182 = vmatpush.bf16.msra.mxu0 %v9335_v0  ;;  %v5956_v35 = vpop.f32.mrf.mxu2  ;;  %v10665_v0 = vld [vmem:[%s15935_s1 + $0x180c] sm:$0xf]  ;;  %v9527_v17 = vor.u32 %v10633_v37, %v9524_v43  ;;  %v10703_v22 = vld [vmem:[%s15938_s3 + $0x38] sm:$0xff] }
 0x315   :  { %6195 = vmatpush.bf16.msra.mxu1 %v9463_v39  ;;  %v5969_v34 = vpop.f32.mrf.mxu3  ;;  %v9271_v39 = vor.u32 %v10569_v45, %v9268_v28  ;;  %v9655_v27 = vor.u32 %v10665_v0, %v9652_v20  ;;  %v10711_v41 = vld [vmem:[%s15938_s3 + $0x78] sm:$0xff]  ;;  %v10701_v24 = vld [vmem:[%s15938_s3 + $0x28] sm:$0xff]  ;;  %v10716_v20 = vld [vmem:[%s15938_s3 + $0xa0] sm:$0xff] }
 0x316   :  { %6208 = vmatpush.bf16.msra.mxu2 %v9591_v40  ;;  %v9399_v40 = vor.u32 %v10601_v7, %v9396_v6  ;;  %v10699_v54 = vld [vmem:[%s15938_s3 + $0x18] sm:$0xff]  ;;  %v10697_v44 = vld [vmem:[%s15938_s3 + $0x8] sm:$0xff]  ;;  %v10726_v6 = vld [vmem:[%s15938_s3 + $0xf0] sm:$0xff] }
 0x317   :  { %6221 = vmatpush.bf16.msra.mxu3 %v9719_v19  ;;  %v10710_v19 = vld [vmem:[%s15938_s3 + $0x70] sm:$0xff]  ;;  %v10707_v36 = vld [vmem:[%s15938_s3 + $0x58] sm:$0xff]  ;;  %v10705_v62 = vld [vmem:[%s15938_s3 + $0x48] sm:$0xff] }
 0x318   :  { %6183 = vmatpush.bf16.msra.mxu0 %v9319_v57  ;;  %v10719_v28 = vld [vmem:[%s15938_s3 + $0xb8] sm:$0xff]  ;;  %v10717_v43 = vld [vmem:[%s15938_s3 + $0xa8] sm:$0xff] }
 0x319   :  { %6196 = vmatpush.bf16.msra.mxu1 %v9447_v48  ;;  %v10727_v7 = vld [vmem:[%s15938_s3 + $0xf8] sm:$0xff]  ;;  %v10725_v34 = vld [vmem:[%s15938_s3 + $0xe8] sm:$0xff] }
 0x31a   :  { %6209 = vmatpush.bf16.msra.mxu2 %v9575_v58 }
 0x31b   :  { %6222 = vmatpush.bf16.msra.mxu3 %v9703_v61  ;;  %v10706_v61 = vld [vmem:[%s15938_s3 + $0x50] sm:$0xff] }
 0x31c   :  { %6184 = vmatpush.bf16.msra.mxu0 %v9303_v5  ;;  %v6308_v5 = vunpack.c.h.b16 %v14351_v56 }
 0x31d   :  { %6197 = vmatpush.bf16.msra.mxu1 %v9431_v14 }
 0x31e   :  { %6210 = vmatpush.bf16.msra.mxu2 %v9559_v30  ;;  %v6312_v10 = vpack.c.b16 %v6308_v5, %v6308_v5 }
 0x31f   :  { %6223 = vmatpush.bf16.msra.mxu3 %v9687_v29 }
 0x320   :  { %6185 = vmatpush.bf16.msra.mxu0 %v9287_v13 }
 0x321   :  { %6198 = vmatpush.bf16.msra.mxu1 %v9415_v26 }
 0x322   :  { %6211 = vmatpush.bf16.msra.mxu2 %v9543_v49 }
 0x323   :  { %6224 = vmatpush.bf16.msra.mxu3 %v9671_v32  ;;  %v10718_v32 = vld [vmem:[%s15938_s3 + $0xb0] sm:$0xff] }
 0x324   :  { %6186 = vmatpush.bf16.msra.mxu0 %v9271_v39  ;;  %v5980_v50 = vpop.f32.mrf.mxu0  ;;  %v10724_v39 = vld [vmem:[%s15938_s3 + $0xe0] sm:$0xff] }
 0x325   :  { %6199 = vmatpush.bf16.msra.mxu1 %v9399_v40  ;;  %v5981_v9 = vadd.f32 %v5980_v50, %v15775_v8  ;;  %v6311_v8 = vpack.c.b16 %v6307_v42, %v6307_v42  ;;  %v10715_v40 = vld [vmem:[%s15938_s3 + $0x98] sm:$0xff]  ;;  %v10721_v50 = vld [vmem:[%s15938_s3 + $0xc8] sm:$0xff] }
 0x326   :  { %6212 = vmatpush.bf16.msra.mxu2 %v9527_v17  ;;  %v10723_v17 = vld [vmem:[%s15938_s3 + $0xd8] sm:$0xff] }
 0x327   :  { %6225 = vmatpush.bf16.msra.mxu3 %v9655_v27  ;;  %6187 = vmatmul.bf16.vlgmr.msra.gmra.mxu0 %v12061_v12  ;;  %v10709_v12 = vld [vmem:[%s15938_s3 + $0x68] sm:$0xff] }
 0x328   :  { %6511 = vmatpush.bf16.msrb.mxu0 %v10703_v22  ;;  %6200 = vmatmul.bf16.vlgmr.msra.gmra.mxu1 %v12059_v11  ;;  %v10700_v11 = vld [vmem:[%s15938_s3 + $0x20] sm:$0xff] }
 0x329   :  { %6524 = vmatpush.bf16.msrb.mxu1 %v10711_v41  ;;  %6213 = vmatmul.bf16.vlgmr.msra.gmra.mxu2 %v12069_v16  ;;  %v5993_v16 = vpop.f32.mrf.mxu1  ;;  %v10714_v41 = vld [vmem:[%s15938_s3 + $0x90] sm:$0xff] }
 0x32a   :  { %6226 = vmatmul.bf16.vlgmr.msra.gmra.mxu3 %v12258_v1  ;;  %v10708_v1 = vld [vmem:[%s15938_s3 + $0x60] sm:$0xff]  ;;  %v5994_v51 = vadd.f32 %v5993_v16, %v5981_v9  ;;  %6537 = vmatpush.bf16.msrb.mxu2 %v10719_v28 }
 0x32b   :  { %6550 = vmatpush.bf16.msrb.mxu3 %v10727_v7 }
 0x32c   :  { %6512 = vmatpush.bf16.msrb.mxu0 %v10702_v18  ;;  %v6006_v57 = vpop.f32.mrf.mxu2  ;;  %v5982_v59 = vpop.f32.mrf.mxu0  ;;  %v10722_v18 = vld [vmem:[%s15938_s3 + $0xd0] sm:$0xff] }
 0x32d   :  { %6525 = vmatpush.bf16.msrb.mxu1 %v10710_v19  ;;  %v6007_v48 = vadd.f32 %v6006_v57, %v5994_v51  ;;  %v6019_v58 = vpop.f32.mrf.mxu3  ;;  %v10712_v51 = vld [vmem:[%s15938_s3 + $0x80] sm:$0xff] }
 0x32e   :  { %6538 = vmatpush.bf16.msrb.mxu2 %v10718_v32 }
 0x32f   :  { %v6020_v60 = vadd.f32 %v6019_v58, %v6007_v48  ;;  %6551 = vmatpush.bf16.msrb.mxu3 %v10726_v6 }
 0x330   :  { %6513 = vmatpush.bf16.msrb.mxu0 %v10701_v24 }
 0x331   :  { %6526 = vmatpush.bf16.msrb.mxu1 %v10709_v12  ;;  %v5995_v3 = vpop.f32.mrf.mxu1  ;;  %v10713_v12 = vld [vmem:[%s15938_s3 + $0x88] sm:$0xff] }
 0x332   :  { %6539 = vmatpush.bf16.msrb.mxu2 %v10717_v43 }
 0x333   :  { %6552 = vmatpush.bf16.msrb.mxu3 %v10725_v34 }
 0x334   :  { %6514 = vmatpush.bf16.msrb.mxu0 %v10700_v11  ;;  %v6008_v63 = vpop.f32.mrf.mxu2 }
 0x335   :  { %6527 = vmatpush.bf16.msrb.mxu1 %v10708_v1  ;;  %v6021_v55 = vpop.f32.mrf.mxu3 }
 0x336   :  { %6540 = vmatpush.bf16.msrb.mxu2 %v10716_v20 }
 0x337   :  { %6553 = vmatpush.bf16.msrb.mxu3 %v10724_v39 }
 0x338   :  { %6515 = vmatpush.bf16.msrb.mxu0 %v10699_v54  ;;  %v10720_v54 = vld [vmem:[%s15938_s3 + $0xc0] sm:$0xff] }
 0x339   :  { %6528 = vmatpush.bf16.msrb.mxu1 %v10707_v36 }
 0x33a   :  { %6541 = vmatpush.bf16.msrb.mxu2 %v10715_v40 }
 0x33b   :  { %6554 = vmatpush.bf16.msrb.mxu3 %v10723_v17 }
 0x33c   :  { %6516 = vmatpush.bf16.msrb.mxu0 %v10698_v47 }
 0x33d   :  { %6529 = vmatpush.bf16.msrb.mxu1 %v10706_v61 }
 0x33e   :  { %6542 = vmatpush.bf16.msrb.mxu2 %v10714_v41 }
 0x33f   :  { %6555 = vmatpush.bf16.msrb.mxu3 %v10722_v18 }
 0x340   :  { %6517 = vmatpush.bf16.msrb.mxu0 %v10697_v44 }
 0x341   :  { %6530 = vmatpush.bf16.msrb.mxu1 %v10705_v62 }
 0x342   :  { %6543 = vmatpush.bf16.msrb.mxu2 %v10713_v12 }
 0x343   :  { %6556 = vmatpush.bf16.msrb.mxu3 %v10721_v50 }
 0x344   :  { %6518 = vmatpush.bf16.msrb.mxu0 %v10696_v38  ;;  %v6032_v14 = vpop.f32.mrf.mxu0 }
 0x345   :  { %6531 = vmatpush.bf16.msrb.mxu1 %v10704_v25  ;;  %v6033_v30 = vadd.f32 %v6032_v14, %v6020_v60  ;;  %v6045_v2 = vpop.f32.mrf.mxu1 }
 0x346   :  { %6544 = vmatpush.bf16.msrb.mxu2 %v10712_v51 }
 0x347   :  { %6519 = vmatmul.bf16.vlgmr.msrb.gmra.mxu0 %v6311_v8  ;;  %v6046_v52 = vadd.f32 %v6045_v2, %v6033_v30  ;;  %6557 = vmatpush.bf16.msrb.mxu3 %v10720_v54 }
 0x348   :  { %6532 = vmatmul.bf16.vlgmr.msrb.gmra.mxu1 %v6312_v10 }
 0x34c   :  { %v6058_v15 = vpop.f32.mrf.mxu2  ;;  %v6034_v33 = vpop.f32.mrf.mxu0 }
 0x34d   :  { %v6059_v53 = vadd.f32 %v6058_v15, %v6046_v52  ;;  %v6071_v29 = vpop.f32.mrf.mxu3  ;;  %v6047_v31 = vpop.f32.mrf.mxu1 }
 0x34f   :  { %v6072_v46 = vadd.f32 %v6071_v29, %v6059_v53  ;;  %v10728_v29 = vld [vmem:[%s15939_s4] ss:$0 sm:$0xff] }
 0x354   :  { %v6060_v21 = vpop.f32.mrf.mxu2 }
 0x355   :  { %v6073_v23 = vpop.f32.mrf.mxu3 }
 0x364   :  { %v6084_v13 = vpop.f32.mrf.mxu0 }
 0x365   :  { %v6097_v56 = vpop.f32.mrf.mxu1  ;;  %v6085_v19 = vadd.f32 %v6084_v13, %v6072_v46 }
 0x367   :  { %v6098_v1 = vadd.f32 %v6097_v56, %v6085_v19 }
 0x36c   :  { %v6110_v26 = vpop.f32.mrf.mxu2  ;;  %v6086_v45 = vpop.f32.mrf.mxu0 }
 0x36d   :  { %v6123_v49 = vpop.f32.mrf.mxu3  ;;  %v6099_v35 = vpop.f32.mrf.mxu1  ;;  %v6111_v36 = vadd.f32 %v6110_v26, %v6098_v1 }
 0x36f   :  { %v6124_v58 = vadd.f32 %v6123_v49, %v6111_v36 }
 0x374   :  { %v6112_v37 = vpop.f32.mrf.mxu2 }
 0x375   :  { %v6125_v0 = vpop.f32.mrf.mxu3 }
 0x384   :  { %v6136_v27 = vpop.f32.mrf.mxu0 }
 0x385   :  { %v6149_v22 = vpop.f32.mrf.mxu1  ;;  %v6137_v59 = vadd.f32 %v6136_v27, %v6124_v58 }
 0x387   :  { %v6150_v47 = vadd.f32 %v6149_v22, %v6137_v59 }
 0x38c   :  { %v6162_v24 = vpop.f32.mrf.mxu2  ;;  %v6138_v11 = vpop.f32.mrf.mxu0 }
 0x38d   :  { %v6175_v9 = vpop.f32.mrf.mxu3  ;;  %v6151_v16 = vpop.f32.mrf.mxu1  ;;  %v6163_v3 = vadd.f32 %v6162_v24, %v6150_v47 }
 0x38f   :  { %v6176_v60 = vadd.f32 %v6175_v9, %v6163_v3 }
 0x394   :  { %v6164_v57 = vpop.f32.mrf.mxu2 }
 0x395   :  { %v6177_v48 = vpop.f32.mrf.mxu3 }
 0x3a4   :  { %v6188_v61 = vpop.f32.mrf.mxu0 }
 0x3a5   :  { %v6201_v44 = vpop.f32.mrf.mxu1  ;;  %v6189_v62 = vadd.f32 %v6188_v61, %v6176_v60 }
 0x3a7   :  { %v6202_v63 = vadd.f32 %v6201_v44, %v6189_v62 }
 0x3ac   :  { %v6214_v55 = vpop.f32.mrf.mxu2  ;;  %v6190_v25 = vpop.f32.mrf.mxu0 }
 0x3ad   :  { %v6215_v38 = vadd.f32 %v6214_v55, %v6202_v63  ;;  %v6227_v42 = vpop.f32.mrf.mxu3  ;;  %v6203_v5 = vpop.f32.mrf.mxu1 }
 0x3af   :  { %v6228_v8 = vadd.f32 %v6227_v42, %v6215_v38 }
 0x3b1   :  { %v6232_v10 = vpack.c.bf16 %v6228_v8, %v15565_v4 }
 0x3b3   :  { %v6309_v14 = vunpack.c.l.b16 %v6232_v10  ;;  %v6310_v30 = vunpack.c.h.b16 %v6232_v10 }
 0x3b4   :  { %v6216_v2 = vpop.f32.mrf.mxu2 }
 0x3b5   :  { %v6313_v52 = vpack.c.b16 %v6309_v14, %v6309_v14  ;;  %v6314_v15 = vpack.c.b16 %v6310_v30, %v6310_v30  ;;  %v6229_v53 = vpop.f32.mrf.mxu3 }
 0x3b7   :  { %6545 = vmatmul.bf16.vlgmr.msrb.gmra.mxu2 %v6313_v52  ;;  %6558 = vmatmul.bf16.vlgmr.msrb.gmra.mxu3 %v6314_v15 }
 0x3c4   :  { %v6520_v33 = vpop.f32.mrf.mxu0 }
 0x3c5   :  { %v6521_v31 = vadd.f32 %v10728_v29, %v6520_v33  ;;  %v6533_v46 = vpop.f32.mrf.mxu1 }
 0x3c7   :  { %v6534_v21 = vadd.f32 %v6533_v46, %v6521_v31 }
 0x3cc   :  { %v6522_v23 = vpop.f32.mrf.mxu0 }
 0x3cd   :  { %v6535_v13 = vpop.f32.mrf.mxu1 }
 0x43a   :  { %v6546_v56 = vpop.f32.mrf.mxu2  ;;  %v6559_v4 = vpop.f32.mrf.mxu3 }
 0x43b   :  { %v6547_v26 = vadd.f32 %v6546_v56, %v6534_v21 }
 0x43d   :  { %v6560_v49 = vadd.f32 %v6559_v4, %v6547_v26 }
 0x43f   :  { %6563 = vst [vmem:[%s15940_s5] sm:$0xff] %v6560_v49 }
 0x442   :  { %v6548_v45 = vpop.f32.mrf.mxu2  ;;  %v6561_v28 = vpop.f32.mrf.mxu3 }

</bundles_post_ra>
